<compile_context>
chip_gen: v7x
topology: tpu7x:2x2x1
jax: 0.10.0
libtpu: 0.0.40
codegen_flags: <defaults>
</compile_context>

<pallas_src>
import functools
import numpy as np

import jax
import jax.numpy as jnp
from jax import lax
from jax.experimental import pallas as pl
from jax.experimental.pallas import tpu as pltpu


def _leaky(v):
    # LeakyReLU(0.2)
    return jnp.where(v >= 0, v, 0.2 * v)


def _upsample_matrix(n_in, factor):
    """1-D bilinear interpolation matrix matching torch Upsample(align_corners=False)."""
    n_out = n_in * factor
    m = np.zeros((n_out, n_in), np.float32)
    for o in range(n_out):
        src = max((o + 0.5) / factor - 0.5, 0.0)
        i0 = min(int(np.floor(src)), n_in - 1)
        lam = src - i0
        i1 = min(i0 + 1, n_in - 1)
        m[o, i0] += 1.0 - lam
        m[o, i1] += lam
    return m


def _ublock_kernel(x_ref, sc_ref, sh_ref, up_ref,
                   w1_ref, b1_ref, w2_ref, b2_ref, w3_ref, b3_ref,
                   w4_ref, b4_ref, w5_ref, b5_ref,
                   o_ref, pad_ref, id_ref,
                   *, H, W, Cin, Cout, Bt, factor, dilations, pad_lanes):
    Ho, Wo = H * factor, W * factor
    N = Ho * Wo
    P = pad_lanes                        # 128-aligned halo width (>= dmax*Wo + dmax)
    Ri, Ro = Bt * Cin, Bt * Cout         # batch-tiled channel row counts

    # --- batched bilinear upsample of [leaky(x); x] for the whole tile: 1 matmul
    x = x_ref[0]                                                  # (Bt*Cin, H*W)
    xs = jnp.concatenate([_leaky(x), x], axis=0)                  # (2*Bt*Cin, H*W)
    u = jnp.dot(xs, up_ref[...], preferred_element_type=jnp.float32)   # (2*Ri, N)

    # block2 (upsample(x) -> 1x1 conv) right away: w3 is zero-padded so it picks
    # the raw-x half of u; result parked in VMEM so it occupies no vregs during
    # the conv bodies, and u's live range ends at the first conv's interior write.
    id_ref[...] = (jnp.dot(w3_ref[...], u, preferred_element_type=jnp.float32)
                   + b3_ref[...])

    # flattened-spatial column index, computed once, reused by every conv mask
    ix = lax.broadcasted_iota(jnp.int32, (1, N), 1) % Wo

    # zero only the halo lanes once per grid step; the interior [P, P+N) is
    # fully rewritten by every conv, so no full-buffer re-zeroing.
    R = pad_ref.shape[0]
    pad_ref[:, 0:P] = jnp.zeros((R, P), jnp.float32)
    pad_ref[:, P + N:] = jnp.zeros((R, pad_ref.shape[1] - P - N), jnp.float32)

    # FiLM affine params stay as (Bt*Cout, 1) columns (implicit lane broadcast).
    sc = sc_ref[0]
    sh = sh_ref[0]

    def conv3x3(img, rows, w_ref, b_ref, d):
        # img: (rows, N), flattened (Ho, Wo) spatial axis on lanes.
        # 9 shifted lane-slices of the zero-haloed flat image, each column-wrap
        # masked and contracted on the fly into a vreg accumulator
        # (no materialized im2col matrix, no big-K staging stores).
        pad_ref[0:rows, P:P + N] = img                  # lane-aligned interior
        m_l = ix >= d                                   # hoisted: dx = -d taps
        m_r = ix < Wo - d                               # hoisted: dx = +d taps
        acc = None
        for k in range(9):
            ky, kx = divmod(k, 3)
            dy, dx = (ky - 1) * d, (kx - 1) * d
            s = dy * Wo + dx
            r = pad_ref[0:rows, P + s:P + s + N]
            # y-out-of-range taps read zeros from the halo; only the column
            # wrap across rows needs masking.
            if dx > 0:
                r = jnp.where(m_r, r, 0.0)
            elif dx < 0:
                r = jnp.where(m_l, r, 0.0)
            t = jnp.dot(w_ref[k], r, preferred_element_type=jnp.float32)
            acc = t if acc is None else acc + t
        return acc + b_ref[...]                          # (Bt*Cout, N)

    d0, d1, d2, d3 = dilations

    # block1[0]: LeakyReLU -> bilinear upsample -> conv3x3 (dilation d0)
    y = conv3x3(u[0:Ri], Ri, w1_ref, b1_ref, d0)
    # block1[1] (FiLM): affine -> LeakyReLU -> conv3x3 (dilation d1)
    y = conv3x3(_leaky(y * sc + sh), Ro, w2_ref, b2_ref, d1)
    # add the 1x1 skip branch, stash identity in VMEM (keeps conv bodies
    # under the 64-vreg budget even with Bt > 1).
    y = y + id_ref[...]
    id_ref[...] = y
    # block3[0], block3[1]: FiLM -> LeakyReLU -> conv3x3 (dilations d2, d3)
    y = conv3x3(_leaky(y * sc + sh), Ro, w4_ref, b4_ref, d2)
    y = conv3x3(_leaky(y * sc + sh), Ro, w5_ref, b5_ref, d3)
    o_ref[0] = (y + id_ref[...]).astype(o_ref.dtype)


def ublock_forward(x, scale, shift, params, *, factor, dilations, batch_tile=2):
    """x: (B, Cin, H, W) NCHW; scale/shift: (B, Cout, 1, 1).  Returns NCHW output."""
    B, Cin, H, W = x.shape
    Cout = params["w1"].shape[0]
    Ho, Wo = H * factor, W * factor
    N = Ho * Wo
    dmax = max(dilations)
    Bt = batch_tile if (batch_tile >= 1 and B % batch_tile == 0) else 1
    G = B // Bt
    Cmax = max(Cin, Cout)
    # halo width in flattened lanes, rounded up to a 128-lane boundary so the
    # interior write is fully aligned
    P = ((dmax * Wo + dmax + 127) // 128) * 128

    # separable 2-D bilinear operator (align_corners=False), transposed so the
    # kernel does (C, H*W) @ (H*W, Ho*Wo); independent of channel/batch counts.
    uh = _upsample_matrix(H, factor)                               # (Ho, H)
    uw = _upsample_matrix(W, factor)                               # (Wo, W)
    up_t = jnp.asarray(np.kron(uh, uw).T)                          # (H*W, N)
    # TODO(synk): at production resolutions replace the fused kron operator with
    # two separable per-axis interpolation matmuls + H tiling (dmax halo) sized
    # for v7x's 64 MiB VMEM.

    eye = jnp.eye(Bt, dtype=jnp.float32)

    def tap_w(w):
        # torch OIHW (Cout, Ci, 3, 3) -> (9, Bt*Cout, Bt*Ci) per-tap weights,
        # block-diagonal over the batch tile, tap order k = ky*3 + kx.
        co, ci = w.shape[0], w.shape[1]
        wt = jnp.transpose(w, (2, 3, 0, 1)).reshape(9, co, ci)
        return jnp.einsum('bB,koc->kboBc', eye, wt).reshape(9, Bt * co, Bt * ci)

    w1 = tap_w(params["w1"])                                       # (9, Bt*Cout, Bt*Cin)
    w2 = tap_w(params["w2"])                                       # (9, Bt*Cout, Bt*Cout)
    w4 = tap_w(params["w4"])
    w5 = tap_w(params["w5"])
    w3 = params["w3"][:, :, 0, 0]                                  # (Cout, Cin)
    w3bd = jnp.einsum('bB,oc->boBc', eye, w3).reshape(Bt * Cout, Bt * Cin)
    # left zero-pad so the 1x1 weight selects the raw-x half of u directly
    w3p = jnp.concatenate([jnp.zeros_like(w3bd), w3bd], axis=1)    # (Bt*Cout, 2*Bt*Cin)

    def tile_b(b):
        return jnp.tile(b.reshape(Cout, 1), (Bt, 1))               # (Bt*Cout, 1)

    b1, b2, b3, b4, b5 = (tile_b(params[k]) for k in ("b1", "b2", "b3", "b4", "b5"))

    x_flat = x.reshape(G, Bt * Cin, H * W)      # batch tile on the channel axis
    sc = scale.reshape(G, Bt * Cout, 1)
    sh = shift.reshape(G, Bt * Cout, 1)

    def full(shp):
        return pl.BlockSpec(shp, lambda b, _r=len(shp): (0,) * _r)

    kernel = functools.partial(_ublock_kernel, H=H, W=W, Cin=Cin, Cout=Cout,
                               Bt=Bt, factor=factor, dilations=tuple(dilations),
                               pad_lanes=P)

    out = pl.pallas_call(
        kernel,
        out_shape=jax.ShapeDtypeStruct((G, Bt * Cout, N), jnp.float32),
        grid_spec=pltpu.PrefetchScalarGridSpec(
            num_scalar_prefetch=0,
            grid=(G,),
            in_specs=[
                pl.BlockSpec((1, Bt * Cin, H * W), lambda b: (b, 0, 0)),
                pl.BlockSpec((1, Bt * Cout, 1), lambda b: (b, 0, 0)),
                pl.BlockSpec((1, Bt * Cout, 1), lambda b: (b, 0, 0)),
                full((H * W, N)),
                full((9, Bt * Cout, Bt * Cin)), full((Bt * Cout, 1)),
                full((9, Bt * Cout, Bt * Cout)), full((Bt * Cout, 1)),
                full((Bt * Cout, 2 * Bt * Cin)), full((Bt * Cout, 1)),
                full((9, Bt * Cout, Bt * Cout)), full((Bt * Cout, 1)),
                full((9, Bt * Cout, Bt * Cout)), full((Bt * Cout, 1)),
            ],
            out_specs=pl.BlockSpec((1, Bt * Cout, N), lambda b: (b, 0, 0)),
            scratch_shapes=[
                pltpu.VMEM((Bt * Cmax, P + N + P), jnp.float32),   # zero-haloed flat image
                pltpu.VMEM((Bt * Cout, N), jnp.float32),           # skip / identity stash
            ],
        ),
        compiler_params=pltpu.CompilerParams(
            dimension_semantics=("parallel",),          # batch tiles independent
            vmem_limit_bytes=16 * 1024 * 1024,          # actual footprint ~3 MiB
        ),
    )(x_flat, sc, sh, up_t, w1, b1, w2, b2, w3p, b3, w4, b4, w5, b5)

    return out.reshape(B, Cout, Ho, Wo)


def ublock_reference(x, scale, shift, params, *, factor, dilations):
    """Pure-JAX reference (lax conv + same interpolation matrices), NCHW."""
    B, Cin, H, W = x.shape
    uh = jnp.asarray(_upsample_matrix(H, factor))
    uw = jnp.asarray(_upsample_matrix(W, factor))

    def upsample(img):  # (B, C, H, W)
        t = jnp.einsum('oh,bchw->bcow', uh, img)
        return jnp.einsum('pw,bcow->bcop', uw, t)

    def conv3(img, w, b, d):
        y = lax.conv_general_dilated(img, w, (1, 1), [(d, d), (d, d)],
                                     rhs_dilation=(d, d),
                                     dimension_numbers=('NCHW', 'OIHW', 'NCHW'))
        return y + b[None, :, None, None]

    def conv1(img, w, b):
        y = lax.conv_general_dilated(img, w, (1, 1), [(0, 0), (0, 0)],
                                     dimension_numbers=('NCHW', 'OIHW', 'NCHW'))
        return y + b[None, :, None, None]

    d0, d1, d2, d3 = dilations
    y = conv3(upsample(_leaky(x)), params["w1"], params["b1"], d0)
    y = conv3(_leaky(y * scale + shift), params["w2"], params["b2"], d1)
    y = y + conv1(upsample(x), params["w3"], params["b3"])
    identity = y
    y = conv3(_leaky(y * scale + shift), params["w4"], params["b4"], d2)
    y = conv3(_leaky(y * scale + shift), params["w5"], params["b5"], d3)
    return y + identity


if __name__ == "__main__":
    B, Cin, Cout, H, W = 4, 4, 8, 16, 16
    factor = 2
    dilations = (1, 2, 4, 8)

    key = jax.random.PRNGKey(0)
    ks = jax.random.split(key, 16)

    def nrm(k, shp, s=0.1):
        return s * jax.random.normal(k, shp, jnp.float32)

    params = {
        "w1": nrm(ks[0], (Cout, Cin, 3, 3)),  "b1": nrm(ks[1], (Cout,)),
        "w2": nrm(ks[2], (Cout, Cout, 3, 3)), "b2": nrm(ks[3], (Cout,)),
        "w3": nrm(ks[4], (Cout, Cin, 1, 1)),  "b3": nrm(ks[5], (Cout,)),
        "w4": nrm(ks[6], (Cout, Cout, 3, 3)), "b4": nrm(ks[7], (Cout,)),
        "w5": nrm(ks[8], (Cout, Cout, 3, 3)), "b5": nrm(ks[9], (Cout,)),
    }
    x = jax.random.normal(ks[10], (B, Cin, H, W), jnp.float32)
    scale = jax.random.normal(ks[11], (B, Cout, 1, 1), jnp.float32)
    shift = jax.random.normal(ks[12], (B, Cout, 1, 1), jnp.float32)

    out = ublock_forward(x, scale, shift, params, factor=factor,
                         dilations=dilations, batch_tile=2)
    out = jax.block_until_ready(out)

    ref = ublock_reference(x, scale, shift, params, factor=factor, dilations=dilations)
    ref = jax.block_until_ready(ref)

    assert out.shape == (B, Cout, H * factor, W * factor)
    if not np.allclose(np.asarray(out), np.asarray(ref), atol=1e-3, rtol=1e-3):
        max_err = float(np.max(np.abs(np.asarray(out) - np.asarray(ref))))
        raise AssertionError(f"Pallas output mismatch vs reference, max abs err={max_err}")

    print("KERNEL_OK")
</pallas_src>

<mosaic_0001>
module attributes {stable_mosaic.version = 11 : i64} {
  func.func @_ublock_kernel(%arg0: i32, %arg1: memref<1x8x256xf32, #tpu.memory_space<vmem>>, %arg2: memref<1x16x1xf32, #tpu.memory_space<vmem>>, %arg3: memref<1x16x1xf32, #tpu.memory_space<vmem>>, %arg4: memref<256x1024xf32, #tpu.memory_space<vmem>>, %arg5: memref<9x16x8xf32, #tpu.memory_space<vmem>>, %arg6: memref<16x1xf32, #tpu.memory_space<vmem>>, %arg7: memref<9x16x16xf32, #tpu.memory_space<vmem>>, %arg8: memref<16x1xf32, #tpu.memory_space<vmem>>, %arg9: memref<16x16xf32, #tpu.memory_space<vmem>>, %arg10: memref<16x1xf32, #tpu.memory_space<vmem>>, %arg11: memref<9x16x16xf32, #tpu.memory_space<vmem>>, %arg12: memref<16x1xf32, #tpu.memory_space<vmem>>, %arg13: memref<9x16x16xf32, #tpu.memory_space<vmem>>, %arg14: memref<16x1xf32, #tpu.memory_space<vmem>>, %arg15: memref<1x16x1024xf32, #tpu.memory_space<vmem>>, %arg16: memref<16x1792xf32, #tpu.memory_space<vmem>>, %arg17: memref<16x1024xf32, #tpu.memory_space<vmem>>) attributes {dimension_semantics = [#tpu.dimension_semantics<parallel>], iteration_bounds = array<i64: 2>, scalar_prefetch = 0 : i64, scratch_operands = 2 : i64, tpu.core_type = #tpu.core_type<tc>, window_params = [{transform_indices = @transform_0, window_bounds = array<i64: 1, 8, 256>}, {transform_indices = @transform_1, window_bounds = array<i64: 1, 16, 1>}, {transform_indices = @transform_2, window_bounds = array<i64: 1, 16, 1>}, {pipeline_mode = #tpu.pipeline_mode<synchronous>, transform_indices = @transform_3, window_bounds = array<i64: 256, 1024>}, {pipeline_mode = #tpu.pipeline_mode<synchronous>, transform_indices = @transform_4, window_bounds = array<i64: 9, 16, 8>}, {pipeline_mode = #tpu.pipeline_mode<synchronous>, transform_indices = @transform_5, window_bounds = array<i64: 16, 1>}, {pipeline_mode = #tpu.pipeline_mode<synchronous>, transform_indices = @transform_6, window_bounds = array<i64: 9, 16, 16>}, {pipeline_mode = #tpu.pipeline_mode<synchronous>, transform_indices = @transform_7, window_bounds = array<i64: 16, 1>}, {pipeline_mode = #tpu.pipeline_mode<synchronous>, transform_indices = @transform_8, window_bounds = array<i64: 16, 16>}, {pipeline_mode = #tpu.pipeline_mode<synchronous>, transform_indices = @transform_9, window_bounds = array<i64: 16, 1>}, {pipeline_mode = #tpu.pipeline_mode<synchronous>, transform_indices = @transform_10, window_bounds = array<i64: 9, 16, 16>}, {pipeline_mode = #tpu.pipeline_mode<synchronous>, transform_indices = @transform_11, window_bounds = array<i64: 16, 1>}, {pipeline_mode = #tpu.pipeline_mode<synchronous>, transform_indices = @transform_12, window_bounds = array<i64: 9, 16, 16>}, {pipeline_mode = #tpu.pipeline_mode<synchronous>, transform_indices = @transform_13, window_bounds = array<i64: 16, 1>}, {transform_indices = @transform_14, window_bounds = array<i64: 1, 16, 1024>}]} {
    %c0 = arith.constant 0 : index
    %c0_0 = arith.constant 0 : index
    %c0_1 = arith.constant 0 : index
    %0 = vector.load %arg1[%c0, %c0_0, %c0_1] : memref<1x8x256xf32, #tpu.memory_space<vmem>>, vector<1x8x256xf32>
    %1 = vector.shape_cast %0 : vector<1x8x256xf32> to vector<8x256xf32>
    %cst = arith.constant 0.000000e+00 : f32
    %2 = vector.broadcast %cst : f32 to vector<8x256xf32>
    %3 = arith.cmpf oge, %1, %2 : vector<8x256xf32>
    %cst_2 = arith.constant 2.000000e-01 : f32
    %4 = vector.broadcast %cst_2 : f32 to vector<8x256xf32>
    %5 = arith.mulf %4, %1 : vector<8x256xf32>
    %6 = arith.select %3, %1, %5 : vector<8x256xi1>, vector<8x256xf32>
    %7 = tpu.concatenate %6, %1 in 0 : vector<8x256xf32>, vector<8x256xf32> -> vector<16x256xf32>
    %c0_3 = arith.constant 0 : index
    %c0_4 = arith.constant 0 : index
    %8 = vector.load %arg4[%c0_3, %c0_4] : memref<256x1024xf32, #tpu.memory_space<vmem>>, vector<256x1024xf32>
    %cst_5 = arith.constant dense<0.000000e+00> : vector<16x1024xf32>
    %9 = tpu.matmul %7, %8, %cst_5 {dimension_numbers = #tpu.dot_dimension_numbers<[1], [0], [0], [1], [0, 0, 1, 1], [], []>} : vector<16x256xf32>, vector<256x1024xf32>, vector<16x1024xf32> -> vector<16x1024xf32>
    %c0_6 = arith.constant 0 : index
    %c0_7 = arith.constant 0 : index
    %10 = vector.load %arg9[%c0_6, %c0_7] : memref<16x16xf32, #tpu.memory_space<vmem>>, vector<16x16xf32>
    %cst_8 = arith.constant dense<0.000000e+00> : vector<16x1024xf32>
    %11 = tpu.matmul %10, %9, %cst_8 {dimension_numbers = #tpu.dot_dimension_numbers<[1], [0], [0], [1], [0, 0, 1, 1], [], []>} : vector<16x16xf32>, vector<16x1024xf32>, vector<16x1024xf32> -> vector<16x1024xf32>
    %c0_9 = arith.constant 0 : index
    %c0_10 = arith.constant 0 : index
    %12 = vector.load %arg10[%c0_9, %c0_10] : memref<16x1xf32, #tpu.memory_space<vmem>>, vector<16x1xf32>
    %13 = vector.broadcast %12 : vector<16x1xf32> to vector<16x1024xf32>
    %14 = arith.addf %11, %13 : vector<16x1024xf32>
    %c0_11 = arith.constant 0 : index
    %c0_12 = arith.constant 0 : index
    %15 = vector.load %arg17[%c0_11, %c0_12] : memref<16x1024xf32, #tpu.memory_space<vmem>>, vector<16x1024xf32>
    tpu.vector_store %arg17[%c0_11, %c0_12], %14 {strides = array<i32>} : memref<16x1024xf32, #tpu.memory_space<vmem>>, vector<16x1024xf32>,
    %16 = tpu.iota {dimensions = array<i32: 1>} : vector<1x1024xi32>
    %c32_i32 = arith.constant 32 : i32
    %c0_i32 = arith.constant 0 : i32
    %17 = arith.cmpi eq, %c32_i32, %c0_i32 : i32
    %c1_i32 = arith.constant 1 : i32
    %18 = arith.select %17, %c1_i32, %c32_i32 : i32
    %19 = vector.broadcast %18 : i32 to vector<1x1024xi32>
    %20 = arith.remsi %16, %19 : vector<1x1024xi32>
    %c0_i32_13 = arith.constant 0 : i32
    %21 = vector.broadcast %c0_i32_13 : i32 to vector<1x1024xi32>
    %22 = arith.cmpi ne, %20, %21 : vector<1x1024xi32>
    %c0_i32_14 = arith.constant 0 : i32
    %23 = vector.broadcast %c0_i32_14 : i32 to vector<1x1024xi32>
    %24 = arith.cmpi slt, %20, %23 : vector<1x1024xi32>
    %c0_i32_15 = arith.constant 0 : i32
    %25 = arith.cmpi slt, %18, %c0_i32_15 : i32
    %26 = vector.broadcast %25 : i1 to vector<1x1024xi1>
    %27 = vector.broadcast %26 : vector<1x1024xi1> to vector<1x1024xi1>
    %28 = arith.xori %24, %27 : vector<1x1024xi1>
    %29 = arith.andi %28, %22 : vector<1x1024xi1>
    %30 = vector.broadcast %18 : i32 to vector<1x1024xi32>
    %31 = arith.addi %20, %30 : vector<1x1024xi32>
    %32 = arith.select %29, %31, %20 : vector<1x1024xi1>, vector<1x1024xi32>
    %cst_16 = arith.constant 0.000000e+00 : f32
    %33 = vector.broadcast %cst_16 : f32 to vector<16x384xf32>
    %c0_17 = arith.constant 0 : index
    %c0_18 = arith.constant 0 : index
    %34 = vector.load %arg16[%c0_17, %c0_18] : memref<16x1792xf32, #tpu.memory_space<vmem>>, vector<16x384xf32>
    tpu.vector_store %arg16[%c0_17, %c0_18], %33 {strides = array<i32>} : memref<16x1792xf32, #tpu.memory_space<vmem>>, vector<16x384xf32>,
    %cst_19 = arith.constant 0.000000e+00 : f32
    %35 = vector.broadcast %cst_19 : f32 to vector<16x384xf32>
    %c0_20 = arith.constant 0 : index
    %c1408 = arith.constant 1408 : index
    %36 = vector.load %arg16[%c0_20, %c1408] : memref<16x1792xf32, #tpu.memory_space<vmem>>, vector<16x384xf32>
    tpu.vector_store %arg16[%c0_20, %c1408], %35 {strides = array<i32>} : memref<16x1792xf32, #tpu.memory_space<vmem>>, vector<16x384xf32>,
    %c0_21 = arith.constant 0 : index
    %c0_22 = arith.constant 0 : index
    %c0_23 = arith.constant 0 : index
    %37 = vector.load %arg2[%c0_21, %c0_22, %c0_23] : memref<1x16x1xf32, #tpu.memory_space<vmem>>, vector<1x16x1xf32>
    %38 = vector.shape_cast %37 : vector<1x16x1xf32> to vector<16x1xf32>
    %c0_24 = arith.constant 0 : index
    %c0_25 = arith.constant 0 : index
    %c0_26 = arith.constant 0 : index
    %39 = vector.load %arg3[%c0_24, %c0_25, %c0_26] : memref<1x16x1xf32, #tpu.memory_space<vmem>>, vector<1x16x1xf32>
    %40 = vector.shape_cast %39 : vector<1x16x1xf32> to vector<16x1xf32>
    %41 = vector.extract_strided_slice %9 {offsets = [0, 0], sizes = [8, 1024], strides = [1, 1]} : vector<16x1024xf32> to vector<8x1024xf32>
    %c0_27 = arith.constant 0 : index
    %c384 = arith.constant 384 : index
    %42 = vector.load %arg16[%c0_27, %c384] : memref<16x1792xf32, #tpu.memory_space<vmem>>, vector<8x1024xf32>
    tpu.vector_store %arg16[%c0_27, %c384], %41 {strides = array<i32>} : memref<16x1792xf32, #tpu.memory_space<vmem>>, vector<8x1024xf32>,
    %c1_i32_28 = arith.constant 1 : i32
    %43 = vector.broadcast %c1_i32_28 : i32 to vector<1x1024xi32>
    %44 = arith.cmpi sge, %32, %43 : vector<1x1024xi32>
    %c31_i32 = arith.constant 31 : i32
    %45 = vector.broadcast %c31_i32 : i32 to vector<1x1024xi32>
    %46 = arith.cmpi slt, %32, %45 : vector<1x1024xi32>
    %c0_29 = arith.constant 0 : index
    %c351 = arith.constant 351 : index
    %47 = vector.load %arg16[%c0_29, %c351] : memref<16x1792xf32, #tpu.memory_space<vmem>>, vector<8x1024xf32>
    %cst_30 = arith.constant 0.000000e+00 : f32
    %48 = vector.shape_cast %44 : vector<1x1024xi1> to vector<1x1024xi1>
    %49 = vector.broadcast %48 : vector<1x1024xi1> to vector<8x1024xi1>
    %50 = vector.broadcast %cst_30 : f32 to vector<8x1024xf32>
    %51 = arith.select %49, %47, %50 : vector<8x1024xi1>, vector<8x1024xf32>
    %c0_31 = arith.constant 0 : index
    %c0_32 = arith.constant 0 : index
    %c0_33 = arith.constant 0 : index
    %52 = vector.load %arg5[%c0_31, %c0_32, %c0_33] : memref<9x16x8xf32, #tpu.memory_space<vmem>>, vector<1x16x8xf32>
    %53 = vector.shape_cast %52 : vector<1x16x8xf32> to vector<16x8xf32>
    %cst_34 = arith.constant dense<0.000000e+00> : vector<16x1024xf32>
    %54 = tpu.matmul %53, %51, %cst_34 {dimension_numbers = #tpu.dot_dimension_numbers<[1], [0], [0], [1], [0, 0, 1, 1], [], []>} : vector<16x8xf32>, vector<8x1024xf32>, vector<16x1024xf32> -> vector<16x1024xf32>
    %c0_35 = arith.constant 0 : index
    %c352 = arith.constant 352 : index
    %55 = vector.load %arg16[%c0_35, %c352] : memref<16x1792xf32, #tpu.memory_space<vmem>>, vector<8x1024xf32>
    %c1 = arith.constant 1 : index
    %c0_36 = arith.constant 0 : index
    %c0_37 = arith.constant 0 : index
    %56 = vector.load %arg5[%c1, %c0_36, %c0_37] : memref<9x16x8xf32, #tpu.memory_space<vmem>>, vector<1x16x8xf32>
    %57 = vector.shape_cast %56 : vector<1x16x8xf32> to vector<16x8xf32>
    %cst_38 = arith.constant dense<0.000000e+00> : vector<16x1024xf32>
    %58 = tpu.matmul %57, %55, %cst_38 {dimension_numbers = #tpu.dot_dimension_numbers<[1], [0], [0], [1], [0, 0, 1, 1], [], []>} : vector<16x8xf32>, vector<8x1024xf32>, vector<16x1024xf32> -> vector<16x1024xf32>
    %59 = arith.addf %54, %58 : vector<16x1024xf32>
    %c0_39 = arith.constant 0 : index
    %c353 = arith.constant 353 : index
    %60 = vector.load %arg16[%c0_39, %c353] : memref<16x1792xf32, #tpu.memory_space<vmem>>, vector<8x1024xf32>
    %cst_40 = arith.constant 0.000000e+00 : f32
    %61 = vector.shape_cast %46 : vector<1x1024xi1> to vector<1x1024xi1>
    %62 = vector.broadcast %61 : vector<1x1024xi1> to vector<8x1024xi1>
    %63 = vector.broadcast %cst_40 : f32 to vector<8x1024xf32>
    %64 = arith.select %62, %60, %63 : vector<8x1024xi1>, vector<8x1024xf32>
    %c2 = arith.constant 2 : index
    %c0_41 = arith.constant 0 : index
    %c0_42 = arith.constant 0 : index
    %65 = vector.load %arg5[%c2, %c0_41, %c0_42] : memref<9x16x8xf32, #tpu.memory_space<vmem>>, vector<1x16x8xf32>
    %66 = vector.shape_cast %65 : vector<1x16x8xf32> to vector<16x8xf32>
    %cst_43 = arith.constant dense<0.000000e+00> : vector<16x1024xf32>
    %67 = tpu.matmul %66, %64, %cst_43 {dimension_numbers = #tpu.dot_dimension_numbers<[1], [0], [0], [1], [0, 0, 1, 1], [], []>} : vector<16x8xf32>, vector<8x1024xf32>, vector<16x1024xf32> -> vector<16x1024xf32>
    %68 = arith.addf %59, %67 : vector<16x1024xf32>
    %c0_44 = arith.constant 0 : index
    %c383 = arith.constant 383 : index
    %69 = vector.load %arg16[%c0_44, %c383] : memref<16x1792xf32, #tpu.memory_space<vmem>>, vector<8x1024xf32>
    %cst_45 = arith.constant 0.000000e+00 : f32
    %70 = vector.shape_cast %44 : vector<1x1024xi1> to vector<1x1024xi1>
    %71 = vector.broadcast %70 : vector<1x1024xi1> to vector<8x1024xi1>
    %72 = vector.broadcast %cst_45 : f32 to vector<8x1024xf32>
    %73 = arith.select %71, %69, %72 : vector<8x1024xi1>, vector<8x1024xf32>
    %c3 = arith.constant 3 : index
    %c0_46 = arith.constant 0 : index
    %c0_47 = arith.constant 0 : index
    %74 = vector.load %arg5[%c3, %c0_46, %c0_47] : memref<9x16x8xf32, #tpu.memory_space<vmem>>, vector<1x16x8xf32>
    %75 = vector.shape_cast %74 : vector<1x16x8xf32> to vector<16x8xf32>
    %cst_48 = arith.constant dense<0.000000e+00> : vector<16x1024xf32>
    %76 = tpu.matmul %75, %73, %cst_48 {dimension_numbers = #tpu.dot_dimension_numbers<[1], [0], [0], [1], [0, 0, 1, 1], [], []>} : vector<16x8xf32>, vector<8x1024xf32>, vector<16x1024xf32> -> vector<16x1024xf32>
    %77 = arith.addf %68, %76 : vector<16x1024xf32>
    %c0_49 = arith.constant 0 : index
    %c384_50 = arith.constant 384 : index
    %78 = vector.load %arg16[%c0_49, %c384_50] : memref<16x1792xf32, #tpu.memory_space<vmem>>, vector<8x1024xf32>
    %c4 = arith.constant 4 : index
    %c0_51 = arith.constant 0 : index
    %c0_52 = arith.constant 0 : index
    %79 = vector.load %arg5[%c4, %c0_51, %c0_52] : memref<9x16x8xf32, #tpu.memory_space<vmem>>, vector<1x16x8xf32>
    %80 = vector.shape_cast %79 : vector<1x16x8xf32> to vector<16x8xf32>
    %cst_53 = arith.constant dense<0.000000e+00> : vector<16x1024xf32>
    %81 = tpu.matmul %80, %78, %cst_53 {dimension_numbers = #tpu.dot_dimension_numbers<[1], [0], [0], [1], [0, 0, 1, 1], [], []>} : vector<16x8xf32>, vector<8x1024xf32>, vector<16x1024xf32> -> vector<16x1024xf32>
    %82 = arith.addf %77, %81 : vector<16x1024xf32>
    %c0_54 = arith.constant 0 : index
    %c385 = arith.constant 385 : index
    %83 = vector.load %arg16[%c0_54, %c385] : memref<16x1792xf32, #tpu.memory_space<vmem>>, vector<8x1024xf32>
    %cst_55 = arith.constant 0.000000e+00 : f32
    %84 = vector.shape_cast %46 : vector<1x1024xi1> to vector<1x1024xi1>
    %85 = vector.broadcast %84 : vector<1x1024xi1> to vector<8x1024xi1>
    %86 = vector.broadcast %cst_55 : f32 to vector<8x1024xf32>
    %87 = arith.select %85, %83, %86 : vector<8x1024xi1>, vector<8x1024xf32>
    %c5 = arith.constant 5 : index
    %c0_56 = arith.constant 0 : index
    %c0_57 = arith.constant 0 : index
    %88 = vector.load %arg5[%c5, %c0_56, %c0_57] : memref<9x16x8xf32, #tpu.memory_space<vmem>>, vector<1x16x8xf32>
    %89 = vector.shape_cast %88 : vector<1x16x8xf32> to vector<16x8xf32>
    %cst_58 = arith.constant dense<0.000000e+00> : vector<16x1024xf32>
    %90 = tpu.matmul %89, %87, %cst_58 {dimension_numbers = #tpu.dot_dimension_numbers<[1], [0], [0], [1], [0, 0, 1, 1], [], []>} : vector<16x8xf32>, vector<8x1024xf32>, vector<16x1024xf32> -> vector<16x1024xf32>
    %91 = arith.addf %82, %90 : vector<16x1024xf32>
    %c0_59 = arith.constant 0 : index
    %c415 = arith.constant 415 : index
    %92 = vector.load %arg16[%c0_59, %c415] : memref<16x1792xf32, #tpu.memory_space<vmem>>, vector<8x1024xf32>
    %cst_60 = arith.constant 0.000000e+00 : f32
    %93 = vector.shape_cast %44 : vector<1x1024xi1> to vector<1x1024xi1>
    %94 = vector.broadcast %93 : vector<1x1024xi1> to vector<8x1024xi1>
    %95 = vector.broadcast %cst_60 : f32 to vector<8x1024xf32>
    %96 = arith.select %94, %92, %95 : vector<8x1024xi1>, vector<8x1024xf32>
    %c6 = arith.constant 6 : index
    %c0_61 = arith.constant 0 : index
    %c0_62 = arith.constant 0 : index
    %97 = vector.load %arg5[%c6, %c0_61, %c0_62] : memref<9x16x8xf32, #tpu.memory_space<vmem>>, vector<1x16x8xf32>
    %98 = vector.shape_cast %97 : vector<1x16x8xf32> to vector<16x8xf32>
    %cst_63 = arith.constant dense<0.000000e+00> : vector<16x1024xf32>
    %99 = tpu.matmul %98, %96, %cst_63 {dimension_numbers = #tpu.dot_dimension_numbers<[1], [0], [0], [1], [0, 0, 1, 1], [], []>} : vector<16x8xf32>, vector<8x1024xf32>, vector<16x1024xf32> -> vector<16x1024xf32>
    %100 = arith.addf %91, %99 : vector<16x1024xf32>
    %c0_64 = arith.constant 0 : index
    %c416 = arith.constant 416 : index
    %101 = vector.load %arg16[%c0_64, %c416] : memref<16x1792xf32, #tpu.memory_space<vmem>>, vector<8x1024xf32>
    %c7 = arith.constant 7 : index
    %c0_65 = arith.constant 0 : index
    %c0_66 = arith.constant 0 : index
    %102 = vector.load %arg5[%c7, %c0_65, %c0_66] : memref<9x16x8xf32, #tpu.memory_space<vmem>>, vector<1x16x8xf32>
    %103 = vector.shape_cast %102 : vector<1x16x8xf32> to vector<16x8xf32>
    %cst_67 = arith.constant dense<0.000000e+00> : vector<16x1024xf32>
    %104 = tpu.matmul %103, %101, %cst_67 {dimension_numbers = #tpu.dot_dimension_numbers<[1], [0], [0], [1], [0, 0, 1, 1], [], []>} : vector<16x8xf32>, vector<8x1024xf32>, vector<16x1024xf32> -> vector<16x1024xf32>
    %105 = arith.addf %100, %104 : vector<16x1024xf32>
    %c0_68 = arith.constant 0 : index
    %c417 = arith.constant 417 : index
    %106 = vector.load %arg16[%c0_68, %c417] : memref<16x1792xf32, #tpu.memory_space<vmem>>, vector<8x1024xf32>
    %cst_69 = arith.constant 0.000000e+00 : f32
    %107 = vector.shape_cast %46 : vector<1x1024xi1> to vector<1x1024xi1>
    %108 = vector.broadcast %107 : vector<1x1024xi1> to vector<8x1024xi1>
    %109 = vector.broadcast %cst_69 : f32 to vector<8x1024xf32>
    %110 = arith.select %108, %106, %109 : vector<8x1024xi1>, vector<8x1024xf32>
    %c8 = arith.constant 8 : index
    %c0_70 = arith.constant 0 : index
    %c0_71 = arith.constant 0 : index
    %111 = vector.load %arg5[%c8, %c0_70, %c0_71] : memref<9x16x8xf32, #tpu.memory_space<vmem>>, vector<1x16x8xf32>
    %112 = vector.shape_cast %111 : vector<1x16x8xf32> to vector<16x8xf32>
    %cst_72 = arith.constant dense<0.000000e+00> : vector<16x1024xf32>
    %113 = tpu.matmul %112, %110, %cst_72 {dimension_numbers = #tpu.dot_dimension_numbers<[1], [0], [0], [1], [0, 0, 1, 1], [], []>} : vector<16x8xf32>, vector<8x1024xf32>, vector<16x1024xf32> -> vector<16x1024xf32>
    %114 = arith.addf %105, %113 : vector<16x1024xf32>
    %c0_73 = arith.constant 0 : index
    %c0_74 = arith.constant 0 : index
    %115 = vector.load %arg6[%c0_73, %c0_74] : memref<16x1xf32, #tpu.memory_space<vmem>>, vector<16x1xf32>
    %116 = vector.broadcast %115 : vector<16x1xf32> to vector<16x1024xf32>
    %117 = arith.addf %114, %116 : vector<16x1024xf32>
    %118 = vector.broadcast %38 : vector<16x1xf32> to vector<16x1024xf32>
    %119 = arith.mulf %117, %118 : vector<16x1024xf32>
    %120 = vector.broadcast %40 : vector<16x1xf32> to vector<16x1024xf32>
    %121 = arith.addf %119, %120 : vector<16x1024xf32>
    %cst_75 = arith.constant 0.000000e+00 : f32
    %122 = vector.broadcast %cst_75 : f32 to vector<16x1024xf32>
    %123 = arith.cmpf oge, %121, %122 : vector<16x1024xf32>
    %cst_76 = arith.constant 2.000000e-01 : f32
    %124 = vector.broadcast %cst_76 : f32 to vector<16x1024xf32>
    %125 = arith.mulf %124, %121 : vector<16x1024xf32>
    %126 = arith.select %123, %121, %125 : vector<16x1024xi1>, vector<16x1024xf32>
    %c0_77 = arith.constant 0 : index
    %c384_78 = arith.constant 384 : index
    %127 = vector.load %arg16[%c0_77, %c384_78] : memref<16x1792xf32, #tpu.memory_space<vmem>>, vector<16x1024xf32>
    tpu.vector_store %arg16[%c0_77, %c384_78], %126 {strides = array<i32>} : memref<16x1792xf32, #tpu.memory_space<vmem>>, vector<16x1024xf32>,
    %c2_i32 = arith.constant 2 : i32
    %128 = vector.broadcast %c2_i32 : i32 to vector<1x1024xi32>
    %129 = arith.cmpi sge, %32, %128 : vector<1x1024xi32>
    %c30_i32 = arith.constant 30 : i32
    %130 = vector.broadcast %c30_i32 : i32 to vector<1x1024xi32>
    %131 = arith.cmpi slt, %32, %130 : vector<1x1024xi32>
    %c0_79 = arith.constant 0 : index
    %c318 = arith.constant 318 : index
    %132 = vector.load %arg16[%c0_79, %c318] : memref<16x1792xf32, #tpu.memory_space<vmem>>, vector<16x1024xf32>
    %cst_80 = arith.constant 0.000000e+00 : f32
    %133 = vector.shape_cast %129 : vector<1x1024xi1> to vector<1x1024xi1>
    %134 = vector.broadcast %133 : vector<1x1024xi1> to vector<16x1024xi1>
    %135 = vector.broadcast %cst_80 : f32 to vector<16x1024xf32>
    %136 = arith.select %134, %132, %135 : vector<16x1024xi1>, vector<16x1024xf32>
    %c0_81 = arith.constant 0 : index
    %c0_82 = arith.constant 0 : index
    %c0_83 = arith.constant 0 : index
    %137 = vector.load %arg7[%c0_81, %c0_82, %c0_83] : memref<9x16x16xf32, #tpu.memory_space<vmem>>, vector<1x16x16xf32>
    %138 = vector.shape_cast %137 : vector<1x16x16xf32> to vector<16x16xf32>
    %cst_84 = arith.constant dense<0.000000e+00> : vector<16x1024xf32>
    %139 = tpu.matmul %138, %136, %cst_84 {dimension_numbers = #tpu.dot_dimension_numbers<[1], [0], [0], [1], [0, 0, 1, 1], [], []>} : vector<16x16xf32>, vector<16x1024xf32>, vector<16x1024xf32> -> vector<16x1024xf32>
    %c0_85 = arith.constant 0 : index
    %c320 = arith.constant 320 : index
    %140 = vector.load %arg16[%c0_85, %c320] : memref<16x1792xf32, #tpu.memory_space<vmem>>, vector<16x1024xf32>
    %c1_86 = arith.constant 1 : index
    %c0_87 = arith.constant 0 : index
    %c0_88 = arith.constant 0 : index
    %141 = vector.load %arg7[%c1_86, %c0_87, %c0_88] : memref<9x16x16xf32, #tpu.memory_space<vmem>>, vector<1x16x16xf32>
    %142 = vector.shape_cast %141 : vector<1x16x16xf32> to vector<16x16xf32>
    %cst_89 = arith.constant dense<0.000000e+00> : vector<16x1024xf32>
    %143 = tpu.matmul %142, %140, %cst_89 {dimension_numbers = #tpu.dot_dimension_numbers<[1], [0], [0], [1], [0, 0, 1, 1], [], []>} : vector<16x16xf32>, vector<16x1024xf32>, vector<16x1024xf32> -> vector<16x1024xf32>
    %144 = arith.addf %139, %143 : vector<16x1024xf32>
    %c0_90 = arith.constant 0 : index
    %c322 = arith.constant 322 : index
    %145 = vector.load %arg16[%c0_90, %c322] : memref<16x1792xf32, #tpu.memory_space<vmem>>, vector<16x1024xf32>
    %cst_91 = arith.constant 0.000000e+00 : f32
    %146 = vector.shape_cast %131 : vector<1x1024xi1> to vector<1x1024xi1>
    %147 = vector.broadcast %146 : vector<1x1024xi1> to vector<16x1024xi1>
    %148 = vector.broadcast %cst_91 : f32 to vector<16x1024xf32>
    %149 = arith.select %147, %145, %148 : vector<16x1024xi1>, vector<16x1024xf32>
    %c2_92 = arith.constant 2 : index
    %c0_93 = arith.constant 0 : index
    %c0_94 = arith.constant 0 : index
    %150 = vector.load %arg7[%c2_92, %c0_93, %c0_94] : memref<9x16x16xf32, #tpu.memory_space<vmem>>, vector<1x16x16xf32>
    %151 = vector.shape_cast %150 : vector<1x16x16xf32> to vector<16x16xf32>
    %cst_95 = arith.constant dense<0.000000e+00> : vector<16x1024xf32>
    %152 = tpu.matmul %151, %149, %cst_95 {dimension_numbers = #tpu.dot_dimension_numbers<[1], [0], [0], [1], [0, 0, 1, 1], [], []>} : vector<16x16xf32>, vector<16x1024xf32>, vector<16x1024xf32> -> vector<16x1024xf32>
    %153 = arith.addf %144, %152 : vector<16x1024xf32>
    %c0_96 = arith.constant 0 : index
    %c382 = arith.constant 382 : index
    %154 = vector.load %arg16[%c0_96, %c382] : memref<16x1792xf32, #tpu.memory_space<vmem>>, vector<16x1024xf32>
    %cst_97 = arith.constant 0.000000e+00 : f32
    %155 = vector.shape_cast %129 : vector<1x1024xi1> to vector<1x1024xi1>
    %156 = vector.broadcast %155 : vector<1x1024xi1> to vector<16x1024xi1>
    %157 = vector.broadcast %cst_97 : f32 to vector<16x1024xf32>
    %158 = arith.select %156, %154, %157 : vector<16x1024xi1>, vector<16x1024xf32>
    %c3_98 = arith.constant 3 : index
    %c0_99 = arith.constant 0 : index
    %c0_100 = arith.constant 0 : index
    %159 = vector.load %arg7[%c3_98, %c0_99, %c0_100] : memref<9x16x16xf32, #tpu.memory_space<vmem>>, vector<1x16x16xf32>
    %160 = vector.shape_cast %159 : vector<1x16x16xf32> to vector<16x16xf32>
    %cst_101 = arith.constant dense<0.000000e+00> : vector<16x1024xf32>
    %161 = tpu.matmul %160, %158, %cst_101 {dimension_numbers = #tpu.dot_dimension_numbers<[1], [0], [0], [1], [0, 0, 1, 1], [], []>} : vector<16x16xf32>, vector<16x1024xf32>, vector<16x1024xf32> -> vector<16x1024xf32>
    %162 = arith.addf %153, %161 : vector<16x1024xf32>
    %c0_102 = arith.constant 0 : index
    %c384_103 = arith.constant 384 : index
    %163 = vector.load %arg16[%c0_102, %c384_103] : memref<16x1792xf32, #tpu.memory_space<vmem>>, vector<16x1024xf32>
    %c4_104 = arith.constant 4 : index
    %c0_105 = arith.constant 0 : index
    %c0_106 = arith.constant 0 : index
    %164 = vector.load %arg7[%c4_104, %c0_105, %c0_106] : memref<9x16x16xf32, #tpu.memory_space<vmem>>, vector<1x16x16xf32>
    %165 = vector.shape_cast %164 : vector<1x16x16xf32> to vector<16x16xf32>
    %cst_107 = arith.constant dense<0.000000e+00> : vector<16x1024xf32>
    %166 = tpu.matmul %165, %163, %cst_107 {dimension_numbers = #tpu.dot_dimension_numbers<[1], [0], [0], [1], [0, 0, 1, 1], [], []>} : vector<16x16xf32>, vector<16x1024xf32>, vector<16x1024xf32> -> vector<16x1024xf32>
    %167 = arith.addf %162, %166 : vector<16x1024xf32>
    %c0_108 = arith.constant 0 : index
    %c386 = arith.constant 386 : index
    %168 = vector.load %arg16[%c0_108, %c386] : memref<16x1792xf32, #tpu.memory_space<vmem>>, vector<16x1024xf32>
    %cst_109 = arith.constant 0.000000e+00 : f32
    %169 = vector.shape_cast %131 : vector<1x1024xi1> to vector<1x1024xi1>
    %170 = vector.broadcast %169 : vector<1x1024xi1> to vector<16x1024xi1>
    %171 = vector.broadcast %cst_109 : f32 to vector<16x1024xf32>
    %172 = arith.select %170, %168, %171 : vector<16x1024xi1>, vector<16x1024xf32>
    %c5_110 = arith.constant 5 : index
    %c0_111 = arith.constant 0 : index
    %c0_112 = arith.constant 0 : index
    %173 = vector.load %arg7[%c5_110, %c0_111, %c0_112] : memref<9x16x16xf32, #tpu.memory_space<vmem>>, vector<1x16x16xf32>
    %174 = vector.shape_cast %173 : vector<1x16x16xf32> to vector<16x16xf32>
    %cst_113 = arith.constant dense<0.000000e+00> : vector<16x1024xf32>
    %175 = tpu.matmul %174, %172, %cst_113 {dimension_numbers = #tpu.dot_dimension_numbers<[1], [0], [0], [1], [0, 0, 1, 1], [], []>} : vector<16x16xf32>, vector<16x1024xf32>, vector<16x1024xf32> -> vector<16x1024xf32>
    %176 = arith.addf %167, %175 : vector<16x1024xf32>
    %c0_114 = arith.constant 0 : index
    %c446 = arith.constant 446 : index
    %177 = vector.load %arg16[%c0_114, %c446] : memref<16x1792xf32, #tpu.memory_space<vmem>>, vector<16x1024xf32>
    %cst_115 = arith.constant 0.000000e+00 : f32
    %178 = vector.shape_cast %129 : vector<1x1024xi1> to vector<1x1024xi1>
    %179 = vector.broadcast %178 : vector<1x1024xi1> to vector<16x1024xi1>
    %180 = vector.broadcast %cst_115 : f32 to vector<16x1024xf32>
    %181 = arith.select %179, %177, %180 : vector<16x1024xi1>, vector<16x1024xf32>
    %c6_116 = arith.constant 6 : index
    %c0_117 = arith.constant 0 : index
    %c0_118 = arith.constant 0 : index
    %182 = vector.load %arg7[%c6_116, %c0_117, %c0_118] : memref<9x16x16xf32, #tpu.memory_space<vmem>>, vector<1x16x16xf32>
    %183 = vector.shape_cast %182 : vector<1x16x16xf32> to vector<16x16xf32>
    %cst_119 = arith.constant dense<0.000000e+00> : vector<16x1024xf32>
    %184 = tpu.matmul %183, %181, %cst_119 {dimension_numbers = #tpu.dot_dimension_numbers<[1], [0], [0], [1], [0, 0, 1, 1], [], []>} : vector<16x16xf32>, vector<16x1024xf32>, vector<16x1024xf32> -> vector<16x1024xf32>
    %185 = arith.addf %176, %184 : vector<16x1024xf32>
    %c0_120 = arith.constant 0 : index
    %c448 = arith.constant 448 : index
    %186 = vector.load %arg16[%c0_120, %c448] : memref<16x1792xf32, #tpu.memory_space<vmem>>, vector<16x1024xf32>
    %c7_121 = arith.constant 7 : index
    %c0_122 = arith.constant 0 : index
    %c0_123 = arith.constant 0 : index
    %187 = vector.load %arg7[%c7_121, %c0_122, %c0_123] : memref<9x16x16xf32, #tpu.memory_space<vmem>>, vector<1x16x16xf32>
    %188 = vector.shape_cast %187 : vector<1x16x16xf32> to vector<16x16xf32>
    %cst_124 = arith.constant dense<0.000000e+00> : vector<16x1024xf32>
    %189 = tpu.matmul %188, %186, %cst_124 {dimension_numbers = #tpu.dot_dimension_numbers<[1], [0], [0], [1], [0, 0, 1, 1], [], []>} : vector<16x16xf32>, vector<16x1024xf32>, vector<16x1024xf32> -> vector<16x1024xf32>
    %190 = arith.addf %185, %189 : vector<16x1024xf32>
    %c0_125 = arith.constant 0 : index
    %c450 = arith.constant 450 : index
    %191 = vector.load %arg16[%c0_125, %c450] : memref<16x1792xf32, #tpu.memory_space<vmem>>, vector<16x1024xf32>
    %cst_126 = arith.constant 0.000000e+00 : f32
    %192 = vector.shape_cast %131 : vector<1x1024xi1> to vector<1x1024xi1>
    %193 = vector.broadcast %192 : vector<1x1024xi1> to vector<16x1024xi1>
    %194 = vector.broadcast %cst_126 : f32 to vector<16x1024xf32>
    %195 = arith.select %193, %191, %194 : vector<16x1024xi1>, vector<16x1024xf32>
    %c8_127 = arith.constant 8 : index
    %c0_128 = arith.constant 0 : index
    %c0_129 = arith.constant 0 : index
    %196 = vector.load %arg7[%c8_127, %c0_128, %c0_129] : memref<9x16x16xf32, #tpu.memory_space<vmem>>, vector<1x16x16xf32>
    %197 = vector.shape_cast %196 : vector<1x16x16xf32> to vector<16x16xf32>
    %cst_130 = arith.constant dense<0.000000e+00> : vector<16x1024xf32>
    %198 = tpu.matmul %197, %195, %cst_130 {dimension_numbers = #tpu.dot_dimension_numbers<[1], [0], [0], [1], [0, 0, 1, 1], [], []>} : vector<16x16xf32>, vector<16x1024xf32>, vector<16x1024xf32> -> vector<16x1024xf32>
    %199 = arith.addf %190, %198 : vector<16x1024xf32>
    %c0_131 = arith.constant 0 : index
    %c0_132 = arith.constant 0 : index
    %200 = vector.load %arg8[%c0_131, %c0_132] : memref<16x1xf32, #tpu.memory_space<vmem>>, vector<16x1xf32>
    %201 = vector.broadcast %200 : vector<16x1xf32> to vector<16x1024xf32>
    %202 = arith.addf %199, %201 : vector<16x1024xf32>
    %c0_133 = arith.constant 0 : index
    %c0_134 = arith.constant 0 : index
    %203 = vector.load %arg17[%c0_133, %c0_134] : memref<16x1024xf32, #tpu.memory_space<vmem>>, vector<16x1024xf32>
    %204 = arith.addf %202, %203 : vector<16x1024xf32>
    %c0_135 = arith.constant 0 : index
    %c0_136 = arith.constant 0 : index
    %205 = vector.load %arg17[%c0_135, %c0_136] : memref<16x1024xf32, #tpu.memory_space<vmem>>, vector<16x1024xf32>
    tpu.vector_store %arg17[%c0_135, %c0_136], %204 {strides = array<i32>} : memref<16x1024xf32, #tpu.memory_space<vmem>>, vector<16x1024xf32>,
    %206 = vector.broadcast %38 : vector<16x1xf32> to vector<16x1024xf32>
    %207 = arith.mulf %204, %206 : vector<16x1024xf32>
    %208 = vector.broadcast %40 : vector<16x1xf32> to vector<16x1024xf32>
    %209 = arith.addf %207, %208 : vector<16x1024xf32>
    %cst_137 = arith.constant 0.000000e+00 : f32
    %210 = vector.broadcast %cst_137 : f32 to vector<16x1024xf32>
    %211 = arith.cmpf oge, %209, %210 : vector<16x1024xf32>
    %cst_138 = arith.constant 2.000000e-01 : f32
    %212 = vector.broadcast %cst_138 : f32 to vector<16x1024xf32>
    %213 = arith.mulf %212, %209 : vector<16x1024xf32>
    %214 = arith.select %211, %209, %213 : vector<16x1024xi1>, vector<16x1024xf32>
    %c0_139 = arith.constant 0 : index
    %c384_140 = arith.constant 384 : index
    %215 = vector.load %arg16[%c0_139, %c384_140] : memref<16x1792xf32, #tpu.memory_space<vmem>>, vector<16x1024xf32>
    tpu.vector_store %arg16[%c0_139, %c384_140], %214 {strides = array<i32>} : memref<16x1792xf32, #tpu.memory_space<vmem>>, vector<16x1024xf32>,
    %c4_i32 = arith.constant 4 : i32
    %216 = vector.broadcast %c4_i32 : i32 to vector<1x1024xi32>
    %217 = arith.cmpi sge, %32, %216 : vector<1x1024xi32>
    %c28_i32 = arith.constant 28 : i32
    %218 = vector.broadcast %c28_i32 : i32 to vector<1x1024xi32>
    %219 = arith.cmpi slt, %32, %218 : vector<1x1024xi32>
    %c0_141 = arith.constant 0 : index
    %c252 = arith.constant 252 : index
    %220 = vector.load %arg16[%c0_141, %c252] : memref<16x1792xf32, #tpu.memory_space<vmem>>, vector<16x1024xf32>
    %cst_142 = arith.constant 0.000000e+00 : f32
    %221 = vector.shape_cast %217 : vector<1x1024xi1> to vector<1x1024xi1>
    %222 = vector.broadcast %221 : vector<1x1024xi1> to vector<16x1024xi1>
    %223 = vector.broadcast %cst_142 : f32 to vector<16x1024xf32>
    %224 = arith.select %222, %220, %223 : vector<16x1024xi1>, vector<16x1024xf32>
    %c0_143 = arith.constant 0 : index
    %c0_144 = arith.constant 0 : index
    %c0_145 = arith.constant 0 : index
    %225 = vector.load %arg11[%c0_143, %c0_144, %c0_145] : memref<9x16x16xf32, #tpu.memory_space<vmem>>, vector<1x16x16xf32>
    %226 = vector.shape_cast %225 : vector<1x16x16xf32> to vector<16x16xf32>
    %cst_146 = arith.constant dense<0.000000e+00> : vector<16x1024xf32>
    %227 = tpu.matmul %226, %224, %cst_146 {dimension_numbers = #tpu.dot_dimension_numbers<[1], [0], [0], [1], [0, 0, 1, 1], [], []>} : vector<16x16xf32>, vector<16x1024xf32>, vector<16x1024xf32> -> vector<16x1024xf32>
    %c0_147 = arith.constant 0 : index
    %c256 = arith.constant 256 : index
    %228 = vector.load %arg16[%c0_147, %c256] : memref<16x1792xf32, #tpu.memory_space<vmem>>, vector<16x1024xf32>
    %c1_148 = arith.constant 1 : index
    %c0_149 = arith.constant 0 : index
    %c0_150 = arith.constant 0 : index
    %229 = vector.load %arg11[%c1_148, %c0_149, %c0_150] : memref<9x16x16xf32, #tpu.memory_space<vmem>>, vector<1x16x16xf32>
    %230 = vector.shape_cast %229 : vector<1x16x16xf32> to vector<16x16xf32>
    %cst_151 = arith.constant dense<0.000000e+00> : vector<16x1024xf32>
    %231 = tpu.matmul %230, %228, %cst_151 {dimension_numbers = #tpu.dot_dimension_numbers<[1], [0], [0], [1], [0, 0, 1, 1], [], []>} : vector<16x16xf32>, vector<16x1024xf32>, vector<16x1024xf32> -> vector<16x1024xf32>
    %232 = arith.addf %227, %231 : vector<16x1024xf32>
    %c0_152 = arith.constant 0 : index
    %c260 = arith.constant 260 : index
    %233 = vector.load %arg16[%c0_152, %c260] : memref<16x1792xf32, #tpu.memory_space<vmem>>, vector<16x1024xf32>
    %cst_153 = arith.constant 0.000000e+00 : f32
    %234 = vector.shape_cast %219 : vector<1x1024xi1> to vector<1x1024xi1>
    %235 = vector.broadcast %234 : vector<1x1024xi1> to vector<16x1024xi1>
    %236 = vector.broadcast %cst_153 : f32 to vector<16x1024xf32>
    %237 = arith.select %235, %233, %236 : vector<16x1024xi1>, vector<16x1024xf32>
    %c2_154 = arith.constant 2 : index
    %c0_155 = arith.constant 0 : index
    %c0_156 = arith.constant 0 : index
    %238 = vector.load %arg11[%c2_154, %c0_155, %c0_156] : memref<9x16x16xf32, #tpu.memory_space<vmem>>, vector<1x16x16xf32>
    %239 = vector.shape_cast %238 : vector<1x16x16xf32> to vector<16x16xf32>
    %cst_157 = arith.constant dense<0.000000e+00> : vector<16x1024xf32>
    %240 = tpu.matmul %239, %237, %cst_157 {dimension_numbers = #tpu.dot_dimension_numbers<[1], [0], [0], [1], [0, 0, 1, 1], [], []>} : vector<16x16xf32>, vector<16x1024xf32>, vector<16x1024xf32> -> vector<16x1024xf32>
    %241 = arith.addf %232, %240 : vector<16x1024xf32>
    %c0_158 = arith.constant 0 : index
    %c380 = arith.constant 380 : index
    %242 = vector.load %arg16[%c0_158, %c380] : memref<16x1792xf32, #tpu.memory_space<vmem>>, vector<16x1024xf32>
    %cst_159 = arith.constant 0.000000e+00 : f32
    %243 = vector.shape_cast %217 : vector<1x1024xi1> to vector<1x1024xi1>
    %244 = vector.broadcast %243 : vector<1x1024xi1> to vector<16x1024xi1>
    %245 = vector.broadcast %cst_159 : f32 to vector<16x1024xf32>
    %246 = arith.select %244, %242, %245 : vector<16x1024xi1>, vector<16x1024xf32>
    %c3_160 = arith.constant 3 : index
    %c0_161 = arith.constant 0 : index
    %c0_162 = arith.constant 0 : index
    %247 = vector.load %arg11[%c3_160, %c0_161, %c0_162] : memref<9x16x16xf32, #tpu.memory_space<vmem>>, vector<1x16x16xf32>
    %248 = vector.shape_cast %247 : vector<1x16x16xf32> to vector<16x16xf32>
    %cst_163 = arith.constant dense<0.000000e+00> : vector<16x1024xf32>
    %249 = tpu.matmul %248, %246, %cst_163 {dimension_numbers = #tpu.dot_dimension_numbers<[1], [0], [0], [1], [0, 0, 1, 1], [], []>} : vector<16x16xf32>, vector<16x1024xf32>, vector<16x1024xf32> -> vector<16x1024xf32>
    %250 = arith.addf %241, %249 : vector<16x1024xf32>
    %c0_164 = arith.constant 0 : index
    %c384_165 = arith.constant 384 : index
    %251 = vector.load %arg16[%c0_164, %c384_165] : memref<16x1792xf32, #tpu.memory_space<vmem>>, vector<16x1024xf32>
    %c4_166 = arith.constant 4 : index
    %c0_167 = arith.constant 0 : index
    %c0_168 = arith.constant 0 : index
    %252 = vector.load %arg11[%c4_166, %c0_167, %c0_168] : memref<9x16x16xf32, #tpu.memory_space<vmem>>, vector<1x16x16xf32>
    %253 = vector.shape_cast %252 : vector<1x16x16xf32> to vector<16x16xf32>
    %cst_169 = arith.constant dense<0.000000e+00> : vector<16x1024xf32>
    %254 = tpu.matmul %253, %251, %cst_169 {dimension_numbers = #tpu.dot_dimension_numbers<[1], [0], [0], [1], [0, 0, 1, 1], [], []>} : vector<16x16xf32>, vector<16x1024xf32>, vector<16x1024xf32> -> vector<16x1024xf32>
    %255 = arith.addf %250, %254 : vector<16x1024xf32>
    %c0_170 = arith.constant 0 : index
    %c388 = arith.constant 388 : index
    %256 = vector.load %arg16[%c0_170, %c388] : memref<16x1792xf32, #tpu.memory_space<vmem>>, vector<16x1024xf32>
    %cst_171 = arith.constant 0.000000e+00 : f32
    %257 = vector.shape_cast %219 : vector<1x1024xi1> to vector<1x1024xi1>
    %258 = vector.broadcast %257 : vector<1x1024xi1> to vector<16x1024xi1>
    %259 = vector.broadcast %cst_171 : f32 to vector<16x1024xf32>
    %260 = arith.select %258, %256, %259 : vector<16x1024xi1>, vector<16x1024xf32>
    %c5_172 = arith.constant 5 : index
    %c0_173 = arith.constant 0 : index
    %c0_174 = arith.constant 0 : index
    %261 = vector.load %arg11[%c5_172, %c0_173, %c0_174] : memref<9x16x16xf32, #tpu.memory_space<vmem>>, vector<1x16x16xf32>
    %262 = vector.shape_cast %261 : vector<1x16x16xf32> to vector<16x16xf32>
    %cst_175 = arith.constant dense<0.000000e+00> : vector<16x1024xf32>
    %263 = tpu.matmul %262, %260, %cst_175 {dimension_numbers = #tpu.dot_dimension_numbers<[1], [0], [0], [1], [0, 0, 1, 1], [], []>} : vector<16x16xf32>, vector<16x1024xf32>, vector<16x1024xf32> -> vector<16x1024xf32>
    %264 = arith.addf %255, %263 : vector<16x1024xf32>
    %c0_176 = arith.constant 0 : index
    %c508 = arith.constant 508 : index
    %265 = vector.load %arg16[%c0_176, %c508] : memref<16x1792xf32, #tpu.memory_space<vmem>>, vector<16x1024xf32>
    %cst_177 = arith.constant 0.000000e+00 : f32
    %266 = vector.shape_cast %217 : vector<1x1024xi1> to vector<1x1024xi1>
    %267 = vector.broadcast %266 : vector<1x1024xi1> to vector<16x1024xi1>
    %268 = vector.broadcast %cst_177 : f32 to vector<16x1024xf32>
    %269 = arith.select %267, %265, %268 : vector<16x1024xi1>, vector<16x1024xf32>
    %c6_178 = arith.constant 6 : index
    %c0_179 = arith.constant 0 : index
    %c0_180 = arith.constant 0 : index
    %270 = vector.load %arg11[%c6_178, %c0_179, %c0_180] : memref<9x16x16xf32, #tpu.memory_space<vmem>>, vector<1x16x16xf32>
    %271 = vector.shape_cast %270 : vector<1x16x16xf32> to vector<16x16xf32>
    %cst_181 = arith.constant dense<0.000000e+00> : vector<16x1024xf32>
    %272 = tpu.matmul %271, %269, %cst_181 {dimension_numbers = #tpu.dot_dimension_numbers<[1], [0], [0], [1], [0, 0, 1, 1], [], []>} : vector<16x16xf32>, vector<16x1024xf32>, vector<16x1024xf32> -> vector<16x1024xf32>
    %273 = arith.addf %264, %272 : vector<16x1024xf32>
    %c0_182 = arith.constant 0 : index
    %c512 = arith.constant 512 : index
    %274 = vector.load %arg16[%c0_182, %c512] : memref<16x1792xf32, #tpu.memory_space<vmem>>, vector<16x1024xf32>
    %c7_183 = arith.constant 7 : index
    %c0_184 = arith.constant 0 : index
    %c0_185 = arith.constant 0 : index
    %275 = vector.load %arg11[%c7_183, %c0_184, %c0_185] : memref<9x16x16xf32, #tpu.memory_space<vmem>>, vector<1x16x16xf32>
    %276 = vector.shape_cast %275 : vector<1x16x16xf32> to vector<16x16xf32>
    %cst_186 = arith.constant dense<0.000000e+00> : vector<16x1024xf32>
    %277 = tpu.matmul %276, %274, %cst_186 {dimension_numbers = #tpu.dot_dimension_numbers<[1], [0], [0], [1], [0, 0, 1, 1], [], []>} : vector<16x16xf32>, vector<16x1024xf32>, vector<16x1024xf32> -> vector<16x1024xf32>
    %278 = arith.addf %273, %277 : vector<16x1024xf32>
    %c0_187 = arith.constant 0 : index
    %c516 = arith.constant 516 : index
    %279 = vector.load %arg16[%c0_187, %c516] : memref<16x1792xf32, #tpu.memory_space<vmem>>, vector<16x1024xf32>
    %cst_188 = arith.constant 0.000000e+00 : f32
    %280 = vector.shape_cast %219 : vector<1x1024xi1> to vector<1x1024xi1>
    %281 = vector.broadcast %280 : vector<1x1024xi1> to vector<16x1024xi1>
    %282 = vector.broadcast %cst_188 : f32 to vector<16x1024xf32>
    %283 = arith.select %281, %279, %282 : vector<16x1024xi1>, vector<16x1024xf32>
    %c8_189 = arith.constant 8 : index
    %c0_190 = arith.constant 0 : index
    %c0_191 = arith.constant 0 : index
    %284 = vector.load %arg11[%c8_189, %c0_190, %c0_191] : memref<9x16x16xf32, #tpu.memory_space<vmem>>, vector<1x16x16xf32>
    %285 = vector.shape_cast %284 : vector<1x16x16xf32> to vector<16x16xf32>
    %cst_192 = arith.constant dense<0.000000e+00> : vector<16x1024xf32>
    %286 = tpu.matmul %285, %283, %cst_192 {dimension_numbers = #tpu.dot_dimension_numbers<[1], [0], [0], [1], [0, 0, 1, 1], [], []>} : vector<16x16xf32>, vector<16x1024xf32>, vector<16x1024xf32> -> vector<16x1024xf32>
    %287 = arith.addf %278, %286 : vector<16x1024xf32>
    %c0_193 = arith.constant 0 : index
    %c0_194 = arith.constant 0 : index
    %288 = vector.load %arg12[%c0_193, %c0_194] : memref<16x1xf32, #tpu.memory_space<vmem>>, vector<16x1xf32>
    %289 = vector.broadcast %288 : vector<16x1xf32> to vector<16x1024xf32>
    %290 = arith.addf %287, %289 : vector<16x1024xf32>
    %291 = vector.broadcast %38 : vector<16x1xf32> to vector<16x1024xf32>
    %292 = arith.mulf %290, %291 : vector<16x1024xf32>
    %293 = vector.broadcast %40 : vector<16x1xf32> to vector<16x1024xf32>
    %294 = arith.addf %292, %293 : vector<16x1024xf32>
    %cst_195 = arith.constant 0.000000e+00 : f32
    %295 = vector.broadcast %cst_195 : f32 to vector<16x1024xf32>
    %296 = arith.cmpf oge, %294, %295 : vector<16x1024xf32>
    %cst_196 = arith.constant 2.000000e-01 : f32
    %297 = vector.broadcast %cst_196 : f32 to vector<16x1024xf32>
    %298 = arith.mulf %297, %294 : vector<16x1024xf32>
    %299 = arith.select %296, %294, %298 : vector<16x1024xi1>, vector<16x1024xf32>
    %c0_197 = arith.constant 0 : index
    %c384_198 = arith.constant 384 : index
    %300 = vector.load %arg16[%c0_197, %c384_198] : memref<16x1792xf32, #tpu.memory_space<vmem>>, vector<16x1024xf32>
    tpu.vector_store %arg16[%c0_197, %c384_198], %299 {strides = array<i32>} : memref<16x1792xf32, #tpu.memory_space<vmem>>, vector<16x1024xf32>,
    %c8_i32 = arith.constant 8 : i32
    %301 = vector.broadcast %c8_i32 : i32 to vector<1x1024xi32>
    %302 = arith.cmpi sge, %32, %301 : vector<1x1024xi32>
    %c24_i32 = arith.constant 24 : i32
    %303 = vector.broadcast %c24_i32 : i32 to vector<1x1024xi32>
    %304 = arith.cmpi slt, %32, %303 : vector<1x1024xi32>
    %c0_199 = arith.constant 0 : index
    %c120 = arith.constant 120 : index
    %305 = vector.load %arg16[%c0_199, %c120] : memref<16x1792xf32, #tpu.memory_space<vmem>>, vector<16x1024xf32>
    %cst_200 = arith.constant 0.000000e+00 : f32
    %306 = vector.shape_cast %302 : vector<1x1024xi1> to vector<1x1024xi1>
    %307 = vector.broadcast %306 : vector<1x1024xi1> to vector<16x1024xi1>
    %308 = vector.broadcast %cst_200 : f32 to vector<16x1024xf32>
    %309 = arith.select %307, %305, %308 : vector<16x1024xi1>, vector<16x1024xf32>
    %c0_201 = arith.constant 0 : index
    %c0_202 = arith.constant 0 : index
    %c0_203 = arith.constant 0 : index
    %310 = vector.load %arg13[%c0_201, %c0_202, %c0_203] : memref<9x16x16xf32, #tpu.memory_space<vmem>>, vector<1x16x16xf32>
    %311 = vector.shape_cast %310 : vector<1x16x16xf32> to vector<16x16xf32>
    %cst_204 = arith.constant dense<0.000000e+00> : vector<16x1024xf32>
    %312 = tpu.matmul %311, %309, %cst_204 {dimension_numbers = #tpu.dot_dimension_numbers<[1], [0], [0], [1], [0, 0, 1, 1], [], []>} : vector<16x16xf32>, vector<16x1024xf32>, vector<16x1024xf32> -> vector<16x1024xf32>
    %c0_205 = arith.constant 0 : index
    %c128 = arith.constant 128 : index
    %313 = vector.load %arg16[%c0_205, %c128] : memref<16x1792xf32, #tpu.memory_space<vmem>>, vector<16x1024xf32>
    %c1_206 = arith.constant 1 : index
    %c0_207 = arith.constant 0 : index
    %c0_208 = arith.constant 0 : index
    %314 = vector.load %arg13[%c1_206, %c0_207, %c0_208] : memref<9x16x16xf32, #tpu.memory_space<vmem>>, vector<1x16x16xf32>
    %315 = vector.shape_cast %314 : vector<1x16x16xf32> to vector<16x16xf32>
    %cst_209 = arith.constant dense<0.000000e+00> : vector<16x1024xf32>
    %316 = tpu.matmul %315, %313, %cst_209 {dimension_numbers = #tpu.dot_dimension_numbers<[1], [0], [0], [1], [0, 0, 1, 1], [], []>} : vector<16x16xf32>, vector<16x1024xf32>, vector<16x1024xf32> -> vector<16x1024xf32>
    %317 = arith.addf %312, %316 : vector<16x1024xf32>
    %c0_210 = arith.constant 0 : index
    %c136 = arith.constant 136 : index
    %318 = vector.load %arg16[%c0_210, %c136] : memref<16x1792xf32, #tpu.memory_space<vmem>>, vector<16x1024xf32>
    %cst_211 = arith.constant 0.000000e+00 : f32
    %319 = vector.shape_cast %304 : vector<1x1024xi1> to vector<1x1024xi1>
    %320 = vector.broadcast %319 : vector<1x1024xi1> to vector<16x1024xi1>
    %321 = vector.broadcast %cst_211 : f32 to vector<16x1024xf32>
    %322 = arith.select %320, %318, %321 : vector<16x1024xi1>, vector<16x1024xf32>
    %c2_212 = arith.constant 2 : index
    %c0_213 = arith.constant 0 : index
    %c0_214 = arith.constant 0 : index
    %323 = vector.load %arg13[%c2_212, %c0_213, %c0_214] : memref<9x16x16xf32, #tpu.memory_space<vmem>>, vector<1x16x16xf32>
    %324 = vector.shape_cast %323 : vector<1x16x16xf32> to vector<16x16xf32>
    %cst_215 = arith.constant dense<0.000000e+00> : vector<16x1024xf32>
    %325 = tpu.matmul %324, %322, %cst_215 {dimension_numbers = #tpu.dot_dimension_numbers<[1], [0], [0], [1], [0, 0, 1, 1], [], []>} : vector<16x16xf32>, vector<16x1024xf32>, vector<16x1024xf32> -> vector<16x1024xf32>
    %326 = arith.addf %317, %325 : vector<16x1024xf32>
    %c0_216 = arith.constant 0 : index
    %c376 = arith.constant 376 : index
    %327 = vector.load %arg16[%c0_216, %c376] : memref<16x1792xf32, #tpu.memory_space<vmem>>, vector<16x1024xf32>
    %cst_217 = arith.constant 0.000000e+00 : f32
    %328 = vector.shape_cast %302 : vector<1x1024xi1> to vector<1x1024xi1>
    %329 = vector.broadcast %328 : vector<1x1024xi1> to vector<16x1024xi1>
    %330 = vector.broadcast %cst_217 : f32 to vector<16x1024xf32>
    %331 = arith.select %329, %327, %330 : vector<16x1024xi1>, vector<16x1024xf32>
    %c3_218 = arith.constant 3 : index
    %c0_219 = arith.constant 0 : index
    %c0_220 = arith.constant 0 : index
    %332 = vector.load %arg13[%c3_218, %c0_219, %c0_220] : memref<9x16x16xf32, #tpu.memory_space<vmem>>, vector<1x16x16xf32>
    %333 = vector.shape_cast %332 : vector<1x16x16xf32> to vector<16x16xf32>
    %cst_221 = arith.constant dense<0.000000e+00> : vector<16x1024xf32>
    %334 = tpu.matmul %333, %331, %cst_221 {dimension_numbers = #tpu.dot_dimension_numbers<[1], [0], [0], [1], [0, 0, 1, 1], [], []>} : vector<16x16xf32>, vector<16x1024xf32>, vector<16x1024xf32> -> vector<16x1024xf32>
    %335 = arith.addf %326, %334 : vector<16x1024xf32>
    %c0_222 = arith.constant 0 : index
    %c384_223 = arith.constant 384 : index
    %336 = vector.load %arg16[%c0_222, %c384_223] : memref<16x1792xf32, #tpu.memory_space<vmem>>, vector<16x1024xf32>
    %c4_224 = arith.constant 4 : index
    %c0_225 = arith.constant 0 : index
    %c0_226 = arith.constant 0 : index
    %337 = vector.load %arg13[%c4_224, %c0_225, %c0_226] : memref<9x16x16xf32, #tpu.memory_space<vmem>>, vector<1x16x16xf32>
    %338 = vector.shape_cast %337 : vector<1x16x16xf32> to vector<16x16xf32>
    %cst_227 = arith.constant dense<0.000000e+00> : vector<16x1024xf32>
    %339 = tpu.matmul %338, %336, %cst_227 {dimension_numbers = #tpu.dot_dimension_numbers<[1], [0], [0], [1], [0, 0, 1, 1], [], []>} : vector<16x16xf32>, vector<16x1024xf32>, vector<16x1024xf32> -> vector<16x1024xf32>
    %340 = arith.addf %335, %339 : vector<16x1024xf32>
    %c0_228 = arith.constant 0 : index
    %c392 = arith.constant 392 : index
    %341 = vector.load %arg16[%c0_228, %c392] : memref<16x1792xf32, #tpu.memory_space<vmem>>, vector<16x1024xf32>
    %cst_229 = arith.constant 0.000000e+00 : f32
    %342 = vector.shape_cast %304 : vector<1x1024xi1> to vector<1x1024xi1>
    %343 = vector.broadcast %342 : vector<1x1024xi1> to vector<16x1024xi1>
    %344 = vector.broadcast %cst_229 : f32 to vector<16x1024xf32>
    %345 = arith.select %343, %341, %344 : vector<16x1024xi1>, vector<16x1024xf32>
    %c5_230 = arith.constant 5 : index
    %c0_231 = arith.constant 0 : index
    %c0_232 = arith.constant 0 : index
    %346 = vector.load %arg13[%c5_230, %c0_231, %c0_232] : memref<9x16x16xf32, #tpu.memory_space<vmem>>, vector<1x16x16xf32>
    %347 = vector.shape_cast %346 : vector<1x16x16xf32> to vector<16x16xf32>
    %cst_233 = arith.constant dense<0.000000e+00> : vector<16x1024xf32>
    %348 = tpu.matmul %347, %345, %cst_233 {dimension_numbers = #tpu.dot_dimension_numbers<[1], [0], [0], [1], [0, 0, 1, 1], [], []>} : vector<16x16xf32>, vector<16x1024xf32>, vector<16x1024xf32> -> vector<16x1024xf32>
    %349 = arith.addf %340, %348 : vector<16x1024xf32>
    %c0_234 = arith.constant 0 : index
    %c632 = arith.constant 632 : index
    %350 = vector.load %arg16[%c0_234, %c632] : memref<16x1792xf32, #tpu.memory_space<vmem>>, vector<16x1024xf32>
    %cst_235 = arith.constant 0.000000e+00 : f32
    %351 = vector.shape_cast %302 : vector<1x1024xi1> to vector<1x1024xi1>
    %352 = vector.broadcast %351 : vector<1x1024xi1> to vector<16x1024xi1>
    %353 = vector.broadcast %cst_235 : f32 to vector<16x1024xf32>
    %354 = arith.select %352, %350, %353 : vector<16x1024xi1>, vector<16x1024xf32>
    %c6_236 = arith.constant 6 : index
    %c0_237 = arith.constant 0 : index
    %c0_238 = arith.constant 0 : index
    %355 = vector.load %arg13[%c6_236, %c0_237, %c0_238] : memref<9x16x16xf32, #tpu.memory_space<vmem>>, vector<1x16x16xf32>
    %356 = vector.shape_cast %355 : vector<1x16x16xf32> to vector<16x16xf32>
    %cst_239 = arith.constant dense<0.000000e+00> : vector<16x1024xf32>
    %357 = tpu.matmul %356, %354, %cst_239 {dimension_numbers = #tpu.dot_dimension_numbers<[1], [0], [0], [1], [0, 0, 1, 1], [], []>} : vector<16x16xf32>, vector<16x1024xf32>, vector<16x1024xf32> -> vector<16x1024xf32>
    %358 = arith.addf %349, %357 : vector<16x1024xf32>
    %c0_240 = arith.constant 0 : index
    %c640 = arith.constant 640 : index
    %359 = vector.load %arg16[%c0_240, %c640] : memref<16x1792xf32, #tpu.memory_space<vmem>>, vector<16x1024xf32>
    %c7_241 = arith.constant 7 : index
    %c0_242 = arith.constant 0 : index
    %c0_243 = arith.constant 0 : index
    %360 = vector.load %arg13[%c7_241, %c0_242, %c0_243] : memref<9x16x16xf32, #tpu.memory_space<vmem>>, vector<1x16x16xf32>
    %361 = vector.shape_cast %360 : vector<1x16x16xf32> to vector<16x16xf32>
    %cst_244 = arith.constant dense<0.000000e+00> : vector<16x1024xf32>
    %362 = tpu.matmul %361, %359, %cst_244 {dimension_numbers = #tpu.dot_dimension_numbers<[1], [0], [0], [1], [0, 0, 1, 1], [], []>} : vector<16x16xf32>, vector<16x1024xf32>, vector<16x1024xf32> -> vector<16x1024xf32>
    %363 = arith.addf %358, %362 : vector<16x1024xf32>
    %c0_245 = arith.constant 0 : index
    %c648 = arith.constant 648 : index
    %364 = vector.load %arg16[%c0_245, %c648] : memref<16x1792xf32, #tpu.memory_space<vmem>>, vector<16x1024xf32>
    %cst_246 = arith.constant 0.000000e+00 : f32
    %365 = vector.shape_cast %304 : vector<1x1024xi1> to vector<1x1024xi1>
    %366 = vector.broadcast %365 : vector<1x1024xi1> to vector<16x1024xi1>
    %367 = vector.broadcast %cst_246 : f32 to vector<16x1024xf32>
    %368 = arith.select %366, %364, %367 : vector<16x1024xi1>, vector<16x1024xf32>
    %c8_247 = arith.constant 8 : index
    %c0_248 = arith.constant 0 : index
    %c0_249 = arith.constant 0 : index
    %369 = vector.load %arg13[%c8_247, %c0_248, %c0_249] : memref<9x16x16xf32, #tpu.memory_space<vmem>>, vector<1x16x16xf32>
    %370 = vector.shape_cast %369 : vector<1x16x16xf32> to vector<16x16xf32>
    %cst_250 = arith.constant dense<0.000000e+00> : vector<16x1024xf32>
    %371 = tpu.matmul %370, %368, %cst_250 {dimension_numbers = #tpu.dot_dimension_numbers<[1], [0], [0], [1], [0, 0, 1, 1], [], []>} : vector<16x16xf32>, vector<16x1024xf32>, vector<16x1024xf32> -> vector<16x1024xf32>
    %372 = arith.addf %363, %371 : vector<16x1024xf32>
    %c0_251 = arith.constant 0 : index
    %c0_252 = arith.constant 0 : index
    %373 = vector.load %arg14[%c0_251, %c0_252] : memref<16x1xf32, #tpu.memory_space<vmem>>, vector<16x1xf32>
    %374 = vector.broadcast %373 : vector<16x1xf32> to vector<16x1024xf32>
    %375 = arith.addf %372, %374 : vector<16x1024xf32>
    %c0_253 = arith.constant 0 : index
    %c0_254 = arith.constant 0 : index
    %376 = vector.load %arg17[%c0_253, %c0_254] : memref<16x1024xf32, #tpu.memory_space<vmem>>, vector<16x1024xf32>
    %377 = arith.addf %375, %376 : vector<16x1024xf32>
    %c0_255 = arith.constant 0 : index
    %c0_256 = arith.constant 0 : index
    %c0_257 = arith.constant 0 : index
    %378 = vector.load %arg15[%c0_255, %c0_256, %c0_257] : memref<1x16x1024xf32, #tpu.memory_space<vmem>>, vector<1x16x1024xf32>
    %379 = vector.shape_cast %378 : vector<1x16x1024xf32> to vector<16x1024xf32>
    %380 = vector.shape_cast %377 : vector<16x1024xf32> to vector<1x16x1024xf32>
    tpu.vector_store %arg15[%c0_255, %c0_256, %c0_257], %380 {strides = array<i32>} : memref<1x16x1024xf32, #tpu.memory_space<vmem>>, vector<1x16x1024xf32>,
    return
  }
  func.func @transform_0(%arg0: i32) -> (i32, i32, i32) {
    %c0_i32 = arith.constant 0 : i32
    %c0_i32_0 = arith.constant 0 : i32
    %c0_i32_1 = arith.constant 0 : i32
    return %arg0, %c0_i32, %c0_i32_0 : i32, i32, i32
  }
  func.func @transform_1(%arg0: i32) -> (i32, i32, i32) {
    %c0_i32 = arith.constant 0 : i32
    %c0_i32_0 = arith.constant 0 : i32
    %c0_i32_1 = arith.constant 0 : i32
    return %arg0, %c0_i32, %c0_i32_0 : i32, i32, i32
  }
  func.func @transform_2(%arg0: i32) -> (i32, i32, i32) {
    %c0_i32 = arith.constant 0 : i32
    %c0_i32_0 = arith.constant 0 : i32
    %c0_i32_1 = arith.constant 0 : i32
    return %arg0, %c0_i32, %c0_i32_0 : i32, i32, i32
  }
  func.func @transform_3(%arg0: i32) -> (i32, i32) {
    %c0_i32 = arith.constant 0 : i32
    %c0_i32_0 = arith.constant 0 : i32
    %c0_i32_1 = arith.constant 0 : i32
    return %c0_i32, %c0_i32_0 : i32, i32
  }
  func.func @transform_4(%arg0: i32) -> (i32, i32, i32) {
    %c0_i32 = arith.constant 0 : i32
    %c0_i32_0 = arith.constant 0 : i32
    %c0_i32_1 = arith.constant 0 : i32
    %c0_i32_2 = arith.constant 0 : i32
    return %c0_i32, %c0_i32_0, %c0_i32_1 : i32, i32, i32
  }
  func.func @transform_5(%arg0: i32) -> (i32, i32) {
    %c0_i32 = arith.constant 0 : i32
    %c0_i32_0 = arith.constant 0 : i32
    %c0_i32_1 = arith.constant 0 : i32
    return %c0_i32, %c0_i32_0 : i32, i32
  }
  func.func @transform_6(%arg0: i32) -> (i32, i32, i32) {
    %c0_i32 = arith.constant 0 : i32
    %c0_i32_0 = arith.constant 0 : i32
    %c0_i32_1 = arith.constant 0 : i32
    %c0_i32_2 = arith.constant 0 : i32
    return %c0_i32, %c0_i32_0, %c0_i32_1 : i32, i32, i32
  }
  func.func @transform_7(%arg0: i32) -> (i32, i32) {
    %c0_i32 = arith.constant 0 : i32
    %c0_i32_0 = arith.constant 0 : i32
    %c0_i32_1 = arith.constant 0 : i32
    return %c0_i32, %c0_i32_0 : i32, i32
  }
  func.func @transform_8(%arg0: i32) -> (i32, i32) {
    %c0_i32 = arith.constant 0 : i32
    %c0_i32_0 = arith.constant 0 : i32
    %c0_i32_1 = arith.constant 0 : i32
    return %c0_i32, %c0_i32_0 : i32, i32
  }
  func.func @transform_9(%arg0: i32) -> (i32, i32) {
    %c0_i32 = arith.constant 0 : i32
    %c0_i32_0 = arith.constant 0 : i32
    %c0_i32_1 = arith.constant 0 : i32
    return %c0_i32, %c0_i32_0 : i32, i32
  }
  func.func @transform_10(%arg0: i32) -> (i32, i32, i32) {
    %c0_i32 = arith.constant 0 : i32
    %c0_i32_0 = arith.constant 0 : i32
    %c0_i32_1 = arith.constant 0 : i32
    %c0_i32_2 = arith.constant 0 : i32
    return %c0_i32, %c0_i32_0, %c0_i32_1 : i32, i32, i32
  }
  func.func @transform_11(%arg0: i32) -> (i32, i32) {
    %c0_i32 = arith.constant 0 : i32
    %c0_i32_0 = arith.constant 0 : i32
    %c0_i32_1 = arith.constant 0 : i32
    return %c0_i32, %c0_i32_0 : i32, i32
  }
  func.func @transform_12(%arg0: i32) -> (i32, i32, i32) {
    %c0_i32 = arith.constant 0 : i32
    %c0_i32_0 = arith.constant 0 : i32
    %c0_i32_1 = arith.constant 0 : i32
    %c0_i32_2 = arith.constant 0 : i32
    return %c0_i32, %c0_i32_0, %c0_i32_1 : i32, i32, i32
  }
  func.func @transform_13(%arg0: i32) -> (i32, i32) {
    %c0_i32 = arith.constant 0 : i32
    %c0_i32_0 = arith.constant 0 : i32
    %c0_i32_1 = arith.constant 0 : i32
    return %c0_i32, %c0_i32_0 : i32, i32
  }
  func.func @transform_14(%arg0: i32) -> (i32, i32, i32) {
    %c0_i32 = arith.constant 0 : i32
    %c0_i32_0 = arith.constant 0 : i32
    %c0_i32_1 = arith.constant 0 : i32
    return %arg0, %c0_i32, %c0_i32_0 : i32, i32, i32
  }
}

</mosaic_0001>

<bundles_post_ra>
// kernel: tpu_custom_call.1
= control target key start
LH: loop header
LB: loop body
LE: loop exit
PB: predicated region body
PF: predicated region fallthrough
CT: control target
= control target key end

     0   :  { %s24112_s0 = inlined_call_operand.hbm [shape: f32[2,8,256], index: 0, kind: input, shape index: {}]   ;;  %s24113_s1 = inlined_call_operand.vmem [shape: f32[2,16,1], index: 1, kind: input, shape index: {}]   ;;  %s24114_s2 = inlined_call_operand.vmem [shape: f32[2,16,1], index: 2, kind: input, shape index: {}]   ;;  %s24115_s3 = inlined_call_operand.hbm [shape: f32[256,1024], index: 3, kind: input, shape index: {}]   ;;  %s24116_s4 = inlined_call_operand.vmem [shape: f32[9,16,8], index: 4, kind: input, shape index: {}]   ;;  %s24117_s5 = inlined_call_operand.vmem [shape: f32[16,1], index: 5, kind: input, shape index: {}]   ;;  %s24118_s6 = inlined_call_operand.vmem [shape: f32[9,16,16], index: 6, kind: input, shape index: {}]   ;;  %s24119_s7 = inlined_call_operand.vmem [shape: f32[16,1], index: 7, kind: input, shape index: {}]   ;;  %s24120_s8 = inlined_call_operand.vmem [shape: f32[16,16], index: 8, kind: input, shape index: {}]   ;;  %s24121_s9 = inlined_call_operand.vmem [shape: f32[16,1], index: 9, kind: input, shape index: {}]   ;;  %s24122_s10 = inlined_call_operand.vmem [shape: f32[9,16,16], index: 10, kind: input, shape index: {}]   ;;  %s24123_s11 = inlined_call_operand.vmem [shape: f32[16,1], index: 11, kind: input, shape index: {}]   ;;  %s24124_s12 = inlined_call_operand.hbm [shape: f32[9,16,16], index: 12, kind: input, shape index: {}]   ;;  %s24125_s13 = inlined_call_operand.vmem [shape: f32[16,1], index: 13, kind: input, shape index: {}]   ;;  %s24126_s14 = inlined_call_operand.hbm [shape: f32[2,16,1024], index: 14, kind: output, shape index: {}]  }
   0x1   :  { %24221 = sst [smem:[#allocation36_spill]] %s24112_s0 }
   0x2   :  { %24222 = sst [smem:[#allocation37_spill]] %s24113_s1 }
   0x3   :  { %24223 = sst [smem:[#allocation38_spill]] %s24122_s10 }
   0x4   :  { %24224 = sst [smem:[#allocation39_spill]] %s24123_s11 }
   0x5   :  { %24225 = sst [smem:[#allocation40_spill]] %s24125_s13 }
   0x6   :  { %24226 = sst [smem:[#allocation41_spill]] %s24126_s14 }
   0x7   :  { %19 = vsyncpa [#allocation5], 0 }
   0x8   :  { %21 = vsyncpa [#allocation5 + $0x1], 0 }
   0x9   :  { %22 = vsyncpa [#allocation8], 0 }
   0xa   :  { %23 = vsyncpa [#allocation6], 0 }
   0xb   :  { %25 = vsyncpa [#allocation6 + $0x1], 0  ;;  %s20086_s29 = smov 0   ;;  %s20088_s30 = smov 0  }
   0xc   :  { %s20090_s15 = smov 0   ;;  %s20092_s16 = smov 0  }
   0xd LB: > { %24227 = sst [smem:[#allocation14_spill]] %s19968_s29  ;;  %s20107_s17 = sadd.s32 4294967295, %s19980_s16   ;;  %s19980_s16 = sphi %s20092_s16, %s24839_s16   ;;  %s19976_s15 = sphi %s20090_s15, %s24838_s15   ;;  %s19972_s30 = sphi %s20088_s30, %s24837_s30   ;;  %s19968_s29 = sphi %s20086_s29, %s24836_s29  }
   0xe   : > { %s16746_s18 = sadd.s32 4294967294, %s19980_s16   ;;  %p51_p0 = scmp.ne.s32.totalorder %s19972_s30, %s19968_s29 }
   0xf   : > { %p24130_p1 = scmp.eq.s32.totalorder %s20107_s17, 0  ;;  %p364_p3 = scmp.eq.s32.totalorder %s16746_s18, 1 }
  0x10   : > { %p16747_p5 = scmp.ge.s32.totalorder %s19980_s16, 1  ;;  %p371_p7 = scmp.lt.s32.totalorder %s19980_s16, 3 }
  0x11   : > { %p20116_p4 = por %p24130_p1, %p51_p0  ;;  %p20121_p6 = por %p364_p3, %p51_p0 }
  0x12   : > { %p20126_p8 = pnand %p16747_p5, %p371_p7  ;;  %s19982_s22 = smov [#allocation7]  }
  0x13   : > { %s24228_s19 = scalar_select %p20116_p4, 1, 0 }
  0x14   : > { %s24229_s20 = scalar_select %p20121_p6, 1, 0 }
  0x15   : > { %s383_s23 = sshll.u32 %s19982_s22, 4  ;;  %p18842_p9 = pneg %p20126_p8  ;;  %s20130_s23 = int_to_ptr.vmem [resolvable:$true] %s383_s23 }
  0x16   : > { %24230 = sst [smem:[#allocation15_spill]] %s24229_s20  ;;  %s19983_s25 = smov [#allocation9]  }
  0x17   : > { %p20137_p11 = pnand %p18842_p9, %p24130_p1  ;;  %s420_s26 = sshll.u32 %s19983_s25, 4  ;;  %s20141_s26 = int_to_ptr.vmem [resolvable:$true] %s420_s26 }
  0x18   : > { %s19824_s18 = scalar_lea.hbm %s24115_s3, 32768 }
  0x19   : > { %p19825_p12 = scmp.ne.s32.totalorder %s24115_s3, %s19824_s18  ;;  %p19826_p13 = pneg %p20137_p11 }
  0x1a   : > { %p19831_p5 = scmp.lt.u32.totalorder %s19824_s18, %s24115_s3 }
  0x1b   : > { %p19827_p0 = pnand %p19826_p13, %p19825_p12 }
  0x1d   : > { %p19828_p3 = pneg %p19827_p0 }
  0x1f   : > { %p19833_p7 = pnand %p19831_p5, %p19828_p3 }
  0x21   : > { %19836 = shalt.err (!%p19833_p7)
}
  0x22   : > { %s19837_s25 = scalar_lea.vmem %s20130_s23, 32768  ;;  %p19845_p2 = scmp.lt.s32.totalorder %s20130_s23, %s20130_s23 }
  0x23   : > { %p19838_p9 = scmp.ne.s32.totalorder %s20130_s23, %s19837_s25  ;;  %p19846_p12 = scmp.lt.s32.totalorder %s19837_s25, %s19837_s25 }
  0x25   : > { %p19840_p10 = pnand %p19838_p9, %p19826_p13  ;;  %p19847_p0 = por %p19846_p12, %p19845_p2 }
  0x27   : > { %p19841_p1 = pneg %p19840_p10 }
  0x29   : > { %p19848_p6 = pnand %p19847_p0, %p19841_p1 }
  0x2b   : > { %19851 = shalt.err (!%p19848_p6)
}
  0x2c   : > { %s19984_s14 = smov 1024   ;;  %s19985_s29 = smov 64  }
  0x2d   : > { %18845 = dma.hbm_to_vmem [thread:$0]  (!%p20137_p11), %s24115_s3, 32768, %s20130_s23, [#allocation8], %s19984_s14, %s19984_s14, %s19985_s29  }
  0x2e   : > { %s19852_s22 = scalar_lea.hbm %s24124_s12, 2304 }
  0x2f   : > { %p19853_p2 = scmp.ne.s32.totalorder %s24124_s12, %s19852_s22  ;;  %p19859_p10 = scmp.lt.u32.totalorder %s19852_s22, %s24124_s12 }
  0x31   : > { %p19855_p1 = pnand %p19853_p2, %p19826_p13 }
  0x33   : > { %p19856_p6 = pneg %p19855_p1 }
  0x35   : > { %p19861_p3 = pnand %p19859_p10, %p19856_p6 }
  0x37   : > { %19864 = shalt.err (!%p19861_p3)
}
  0x38   : > { %s19865_s23 = scalar_lea.vmem %s20141_s26, 2304  ;;  %p19873_p12 = scmp.lt.s32.totalorder %s20141_s26, %s20141_s26 }
  0x39   : > { %p19866_p5 = scmp.ne.s32.totalorder %s20141_s26, %s19865_s23  ;;  %p19874_p0 = scmp.lt.s32.totalorder %s19865_s23, %s19865_s23 }
  0x3b   : > { %p19868_p7 = pnand %p19866_p5, %p19826_p13  ;;  %p19875_p2 = por %p19874_p0, %p19873_p12 }
  0x3d   : > { %p19869_p9 = pneg %p19868_p7 }
  0x3f   : > { %p19876_p1 = pnand %p19875_p2, %p19869_p9 }
  0x41   : > { %19879 = shalt.err (!%p19876_p1)
}
  0x42   : > { %s19986_s10 = smov 128   ;;  %s19987_s11 = smov 8  }
  0x43   : > { %18848 = dma.hbm_to_vmem [thread:$0]  (!%p20137_p11), %s24124_s12, 2304, %s20141_s26, [#allocation8], %s19986_s10, %s19986_s10, %s19987_s11  }
  0x44   : > { %s20196_s29 = sadd.s32 1, %s19980_s16   ;;  %s38_s27 = sadd.s32 1, %s19976_s15 }
  0x45   : > { %s35_s20 = ssub.s32 %s19980_s16, %s20196_s29  ;;  %p45_p6 = scmp.ne.s32.totalorder %s19976_s15, %s19972_s30 }
  0x46   : > { %p36_p13 = scmp.eq.s32.totalorder %s35_s20, 0  ;;  %p46_p10 = scmp.eq.s32.totalorder %s19980_s16, 0 }
  0x47   : > { %p24233_p5 = scmp.eq.s32.totalorder %s20107_s17, 1  ;;  %p18859_p9 = scmp.lt.s32.totalorder %s19980_s16, 2 }
  0x48   : > { %s20205_s28 = scalar_select %p36_p13, %s19976_s15, %s38_s27  }
  0x49   : > { %p47_p3 = por %p46_p10, %p45_p6  ;;  %p20209_p7 = por %p24233_p5, %p45_p6 }
  0x4a   : > { %s437_s24 = sand.u32 1, %s19976_s15   ;;  %s17448_s26 = sshll.u32 %s19980_s16, 8 }
  0x4b   : > { %s24234_s18 = scalar_select %p20209_p7, 1, 0 }
  0x4c   : > { %s16751_s22 = sshll.u32 %s437_s24, 4  ;;  %s24235_s0 = sld [smem:[#allocation36_spill]] }
  0x4d   : > { %s441_s11 = scalar_lea.vmem [#allocation4], %s16751_s22  ;;  %p20223_p11 = pnand %p18859_p9, %p47_p3 }
  0x4e   : > { %s449_s13 = sshll.u32 %s441_s11, 4  ;;  %s438_s20 = scalar_lea.sflag [#allocation5], %s437_s24  ;;  %s20221_s13 = int_to_ptr.vmem [resolvable:$true] %s449_s13 }
  0x4f   : > { %p19882_p0 = pneg %p20223_p11 }
  0x52   : > { %s20219_s10 = scalar_lea.hbm %s24235_s0, %s17448_s26  ;;  %s19885_s25 = scalar_lea.hbm %s24235_s0, 512 }
  0x53   : > { %s19880_s27 = scalar_lea.hbm %s20219_s10, 256  ;;  %p19886_p13 = scmp.lt.u32.totalorder %s20219_s10, %s24235_s0 }
  0x54   : > { %p19881_p12 = scmp.ne.s32.totalorder %s20219_s10, %s19880_s27  ;;  %p19887_p6 = scmp.lt.u32.totalorder %s19885_s25, %s19880_s27 }
  0x55   : > { %p19889_p3 = scmp.lt.u32.totalorder %s19880_s27, %s20219_s10 }
  0x56   : > { %p19883_p2 = pnand %p19882_p0, %p19881_p12  ;;  %p19888_p10 = por %p19887_p6, %p19886_p13 }
  0x58   : > { %p19884_p1 = pneg %p19883_p2  ;;  %p19890_p5 = por %p19889_p3, %p19888_p10 }
  0x5a   : > { %p19891_p9 = pnand %p19890_p5, %p19884_p1 }
  0x5c   : > { %19894 = shalt.err (!%p19891_p9)
}
  0x5d   : > { %s19895_s24 = scalar_lea.vmem %s20221_s13, 256  ;;  %s19988_s26 = smov [#allocation4]  }
  0x5e   : > { %p19896_p12 = scmp.ne.s32.totalorder %s20221_s13, %s19895_s24  ;;  %s19900_s22 = sshll.u32 %s19988_s26, 4  ;;  %s19901_s22 = int_to_ptr.vmem [resolvable:$false] %s19900_s22 }
  0x5f   : > { %s19902_s23 = scalar_lea.vmem %s19901_s22, 512  ;;  %p19903_p4 = scmp.lt.s32.totalorder %s20221_s13, %s19901_s22 }
  0x60   : > { %p19898_p2 = pnand %p19896_p12, %p19882_p0  ;;  %p19904_p13 = scmp.lt.s32.totalorder %s19902_s23, %s19895_s24 }
  0x62   : > { %p19899_p7 = pneg %p19898_p2  ;;  %p19905_p6 = por %p19904_p13, %p19903_p4 }
  0x64   : > { %p19906_p10 = pnand %p19905_p6, %p19899_p7 }
  0x66   : > { %19909 = shalt.err (!%p19906_p10)
}
  0x67   : > { %18852 = dma.hbm_to_vmem [thread:$0]  (!%p20223_p11), %s20219_s10, 256, %s20221_s13, %s438_s20  }
  0x68   : > { %474 = sbr.rel (%p20126_p8) target bundleno = 2429 (0x97d), region = 76 }
  0x6f   : > { %s20255_s27 = sand.u32 1, %s19972_s30   ;;  %p24237_p4 = scmp.ne.s32.totalorder %s24228_s19, 0 }
  0x70   : > { %s16755_s25 = sshll.u32 %s20255_s27, 4  ;;  %s477_s11 = scalar_lea.sflag [#allocation5], %s20255_s27 }
  0x71   : > { %s20259_s24 = scalar_lea.vmem [#allocation4], %s16755_s25 }
  0x72   : > { %19955 = dma.done.wait (%p24237_p4), %s477_s11, 256  }
  0x73   : > { %19957 = vsyncadd (%p24237_p4), %s477_s11, 4294967040  ;;  %p24238_p7 = scmp.eq.s32.totalorder %s20107_s17, 0 }
  0x75   : > { %19959 = dma.done.wait (%p24238_p7), [#allocation8], 35072   ;;  %p24239_p8 = pmov %p24238_p7 }
  0x76   : > { %v562_v0 = vld [vmem:[#allocation7 + $0x8] sm:$0xff]  ;;  %v564_v2 = vld [vmem:[#allocation7 + $0x18] sm:$0xff]  ;;  %v561_v5 = vld [vmem:[#allocation7] sm:$0xff]  ;;  %v24155_v47 = vmov 0.0   ;;  %s19990_s19 = smov 32   ;;  %s19991_s21 = smov 33  }
  0x77   : > { %19961 = vsyncadd (%p24239_p8), [#allocation8], 4294932224  ;;  %v570_v1 = vld [vmem:[#allocation7 + $0x48] sm:$0xff]  ;;  %v572_v4 = vld [vmem:[#allocation7 + $0x58] sm:$0xff]  ;;  %1697 = vrot.lane.b32.xlu1 %v24155_v47, %s19990_s19  ;;  %vm24136_vm2 = vcmask 130048   ;;  %s19992_s26 = smov 31  }
  0x78   : > { %v17479_v3 = vpack.c.bf16 %v570_v1, %v562_v0  ;;  %v569_v6 = vld [vmem:[#allocation7 + $0x40] sm:$0xff]  ;;  %v17543_v7 = vpack.c.bf16 %v572_v4, %v564_v2  ;;  %v563_v9 = vld [vmem:[#allocation7 + $0x10] sm:$0xff]  ;;  %v578_v11 = vld [vmem:[#allocation7 + $0x88] sm:$0xff]  ;;  %s19993_s22 = smov 1   ;;  %vm1715_vm3 = vcmask 261120   ;;  %vm24141_vm4 = vcmask 64512  }
  0x79   : > { %v17481_v8 = vpack.c.bf16 %v569_v6, %v561_v5  ;;  %v571_v10 = vld [vmem:[#allocation7 + $0x50] sm:$0xff]  ;;  %v586_v13 = vld [vmem:[#allocation7 + $0xc8] sm:$0xff]  ;;  %v580_v14 = vld [vmem:[#allocation7 + $0x98] sm:$0xff]  ;;  %s19994_s11 = smov 127   ;;  %s19996_s10 = smov 96   ;;  %vm1667_vm5 = vcmask 269312  }
  0x7a   : > { %17480 = vmatprep.subr.bf16.mxu0 %v17479_v3  ;;  %v17545_v12 = vpack.c.bf16 %v571_v10, %v563_v9  ;;  %v588_v15 = vld [vmem:[#allocation7 + $0xd8] sm:$0xff]  ;;  %17544 = vmatprep.subr.bf16.mxu1 %v17543_v7  ;;  %v17483_v16 = vpack.c.bf16 %v586_v13, %v578_v11  ;;  %v577_v18 = vld [vmem:[#allocation7 + $0x80] sm:$0xff]  ;;  %v579_v20 = vld [vmem:[#allocation7 + $0x90] sm:$0xff]  ;;  %s19997_s13 = smov 95   ;;  %p543_p11 = scmp.lt.s32.totalorder %s20107_s17, 1  ;;  %vm2395_vm14 = vcmask 252928  }
  0x7b   : > { %17482 = vmatpush1.bf16.msra.mxu0 %v17481_v8  ;;  %v17547_v17 = vpack.c.bf16 %v588_v15, %v580_v14  ;;  %v585_v19 = vld [vmem:[#allocation7 + $0xc0] sm:$0xff]  ;;  %v587_v22 = vld [vmem:[#allocation7 + $0xd0] sm:$0xff]  ;;  %v594_v23 = vld [vmem:[#allocation7 + $0x108] sm:$0xff]  ;;  %1649 = vrot.lane.b32.xlu1 %v24155_v47, %s19991_s21  ;;  %s24244_s1 = sld [smem:[#allocation37_spill]]  ;;  %s20004_s20 = smov 4  }
  0x7c   : > { %17546 = vmatpush1.bf16.msra.mxu1 %v17545_v12  ;;  %v17485_v21 = vpack.c.bf16 %v585_v19, %v577_v18  ;;  %v602_v24 = vld [vmem:[#allocation7 + $0x148] sm:$0xff]  ;;  %17484 = vmatprep.subr.bf16.mxu0 %v17483_v16  ;;  %v17549_v25 = vpack.c.bf16 %v587_v22, %v579_v20  ;;  %v596_v27 = vld [vmem:[#allocation7 + $0x118] sm:$0xff]  ;;  %v593_v29 = vld [vmem:[#allocation7 + $0x100] sm:$0xff]  ;;  %s24435_s23 = sld [smem:[#allocation38_spill]]  ;;  %s20006_s25 = smov 124  }
  0x7d   : > { %17548 = vmatprep.subr.bf16.mxu1 %v17547_v17  ;;  %v17487_v26 = vpack.c.bf16 %v602_v24, %v594_v23  ;;  %v604_v28 = vld [vmem:[#allocation7 + $0x158] sm:$0xff]  ;;  %v601_v31 = vld [vmem:[#allocation7 + $0x140] sm:$0xff]  ;;  %v595_v32 = vld [vmem:[#allocation7 + $0x110] sm:$0xff]  ;;  %p24828_p1 = scmp.ne.s32.totalorder %s24234_s18, 0 }
  0x7e   : > { %v17551_v30 = vpack.c.bf16 %v604_v28, %v596_v27  ;;  %v603_v33 = vld [vmem:[#allocation7 + $0x150] sm:$0xff]  ;;  %v17489_v34 = vpack.c.bf16 %v601_v31, %v593_v29  ;;  %v610_v35 = vld [vmem:[#allocation7 + $0x188] sm:$0xff]  ;;  %v612_v37 = vld [vmem:[#allocation7 + $0x198] sm:$0xff] }
  0x7f   : > { %17486 = vmatpush1.bf16.msra.mxu0 %v17485_v21  ;;  %v618_v36 = vld [vmem:[#allocation7 + $0x1c8] sm:$0xff]  ;;  %v17553_v38 = vpack.c.bf16 %v603_v33, %v595_v32  ;;  %v620_v40 = vld [vmem:[#allocation7 + $0x1d8] sm:$0xff]  ;;  %v609_v41 = vld [vmem:[#allocation7 + $0x180] sm:$0xff] }
  0x80   : > { %17550 = vmatpush1.bf16.msra.mxu1 %v17549_v25  ;;  %17488 = vmatprep.subr.bf16.mxu0 %v17487_v26  ;;  %v17491_v39 = vpack.c.bf16 %v618_v36, %v610_v35  ;;  %v617_v42 = vld [vmem:[#allocation7 + $0x1c0] sm:$0xff]  ;;  %v17555_v43 = vpack.c.bf16 %v620_v40, %v612_v37  ;;  %v611_v44 = vld [vmem:[#allocation7 + $0x190] sm:$0xff]  ;;  %v626_v46 = vld [vmem:[#allocation7 + $0x208] sm:$0xff] }
  0x81   : > { %17552 = vmatprep.subr.bf16.mxu1 %v17551_v30  ;;  %v619_v45 = vld [vmem:[#allocation7 + $0x1d0] sm:$0xff]  ;;  %v634_v48 = vld [vmem:[#allocation7 + $0x248] sm:$0xff]  ;;  %v628_v49 = vld [vmem:[#allocation7 + $0x218] sm:$0xff]  ;;  %v17493_v51 = vpack.c.bf16 %v617_v42, %v609_v41 }
  0x82   : > { %v636_v50 = vld [vmem:[#allocation7 + $0x258] sm:$0xff]  ;;  %v17557_v52 = vpack.c.bf16 %v619_v45, %v611_v44  ;;  %v17495_v53 = vpack.c.bf16 %v634_v48, %v626_v46  ;;  %v625_v54 = vld [vmem:[#allocation7 + $0x200] sm:$0xff]  ;;  %v627_v56 = vld [vmem:[#allocation7 + $0x210] sm:$0xff] }
  0x83   : > { %17490 = vmatpush1.bf16.msra.mxu0 %v17489_v34  ;;  %v633_v55 = vld [vmem:[#allocation7 + $0x240] sm:$0xff]  ;;  %v17559_v57 = vpack.c.bf16 %v636_v50, %v628_v49  ;;  %v635_v58 = vld [vmem:[#allocation7 + $0x250] sm:$0xff]  ;;  %v642_v59 = vld [vmem:[#allocation7 + $0x288] sm:$0xff] }
  0x84   : > { %17554 = vmatpush1.bf16.msra.mxu1 %v17553_v38  ;;  %17492 = vmatprep.subr.bf16.mxu0 %v17491_v39  ;;  %v650_v60 = vld [vmem:[#allocation7 + $0x2c8] sm:$0xff]  ;;  %v644_v61 = vld [vmem:[#allocation7 + $0x298] sm:$0xff]  ;;  %v17497_v63 = vpack.c.bf16 %v633_v55, %v625_v54  ;;  %v17561_v0 = vpack.c.bf16 %v635_v58, %v627_v56  ;;  %v641_v2 = vld [vmem:[#allocation7 + $0x280] sm:$0xff] }
  0x85   : > { %17556 = vmatprep.subr.bf16.mxu1 %v17555_v43  ;;  %v652_v62 = vld [vmem:[#allocation7 + $0x2d8] sm:$0xff]  ;;  %v17499_v1 = vpack.c.bf16 %v650_v60, %v642_v59  ;;  %v649_v3 = vld [vmem:[#allocation7 + $0x2c0] sm:$0xff]  ;;  %v643_v4 = vld [vmem:[#allocation7 + $0x290] sm:$0xff] }
  0x86   : > { %v17563_v5 = vpack.c.bf16 %v652_v62, %v644_v61  ;;  %v651_v6 = vld [vmem:[#allocation7 + $0x2d0] sm:$0xff]  ;;  %v658_v7 = vld [vmem:[#allocation7 + $0x308] sm:$0xff]  ;;  %v660_v9 = vld [vmem:[#allocation7 + $0x318] sm:$0xff]  ;;  %v17501_v11 = vpack.c.bf16 %v649_v3, %v641_v2 }
  0x87   : > { %17494 = vmatpush1.bf16.msra.mxu0 %v17493_v51  ;;  %v666_v8 = vld [vmem:[#allocation7 + $0x348] sm:$0xff]  ;;  %v668_v10 = vld [vmem:[#allocation7 + $0x358] sm:$0xff]  ;;  %v17565_v12 = vpack.c.bf16 %v651_v6, %v643_v4  ;;  %v657_v14 = vld [vmem:[#allocation7 + $0x300] sm:$0xff] }
  0x88   : > { %17558 = vmatpush1.bf16.msra.mxu1 %v17557_v52  ;;  %17496 = vmatprep.subr.bf16.mxu0 %v17495_v53  ;;  %v17503_v13 = vpack.c.bf16 %v666_v8, %v658_v7  ;;  %v665_v15 = vld [vmem:[#allocation7 + $0x340] sm:$0xff]  ;;  %v659_v16 = vld [vmem:[#allocation7 + $0x310] sm:$0xff]  ;;  %v17567_v17 = vpack.c.bf16 %v668_v10, %v660_v9  ;;  %v674_v19 = vld [vmem:[#allocation7 + $0x388] sm:$0xff] }
  0x89   : > { %17560 = vmatprep.subr.bf16.mxu1 %v17559_v57  ;;  %v667_v18 = vld [vmem:[#allocation7 + $0x350] sm:$0xff]  ;;  %v682_v20 = vld [vmem:[#allocation7 + $0x3c8] sm:$0xff]  ;;  %v676_v21 = vld [vmem:[#allocation7 + $0x398] sm:$0xff]  ;;  %v17505_v23 = vpack.c.bf16 %v665_v15, %v657_v14 }
  0x8a   : > { %v684_v22 = vld [vmem:[#allocation7 + $0x3d8] sm:$0xff]  ;;  %v17569_v24 = vpack.c.bf16 %v667_v18, %v659_v16  ;;  %v17507_v25 = vpack.c.bf16 %v682_v20, %v674_v19  ;;  %v673_v26 = vld [vmem:[#allocation7 + $0x380] sm:$0xff]  ;;  %v675_v28 = vld [vmem:[#allocation7 + $0x390] sm:$0xff] }
  0x8b   : > { %17498 = vmatpush1.bf16.msra.mxu0 %v17497_v63  ;;  %v681_v27 = vld [vmem:[#allocation7 + $0x3c0] sm:$0xff]  ;;  %v17571_v29 = vpack.c.bf16 %v684_v22, %v676_v21  ;;  %v683_v30 = vld [vmem:[#allocation7 + $0x3d0] sm:$0xff]  ;;  %v690_v31 = vld [vmem:[#allocation7 + $0x408] sm:$0xff] }
  0x8c   : > { %17562 = vmatpush1.bf16.msra.mxu1 %v17561_v0  ;;  %17500 = vmatprep.subr.bf16.mxu0 %v17499_v1  ;;  %v698_v32 = vld [vmem:[#allocation7 + $0x448] sm:$0xff]  ;;  %v692_v33 = vld [vmem:[#allocation7 + $0x418] sm:$0xff]  ;;  %v17509_v35 = vpack.c.bf16 %v681_v27, %v673_v26  ;;  %v17573_v36 = vpack.c.bf16 %v683_v30, %v675_v28  ;;  %v689_v38 = vld [vmem:[#allocation7 + $0x400] sm:$0xff] }
  0x8d   : > { %17564 = vmatprep.subr.bf16.mxu1 %v17563_v5  ;;  %v700_v34 = vld [vmem:[#allocation7 + $0x458] sm:$0xff]  ;;  %v17511_v37 = vpack.c.bf16 %v698_v32, %v690_v31  ;;  %v697_v39 = vld [vmem:[#allocation7 + $0x440] sm:$0xff]  ;;  %v691_v40 = vld [vmem:[#allocation7 + $0x410] sm:$0xff] }
  0x8e   : > { %v17575_v41 = vpack.c.bf16 %v700_v34, %v692_v33  ;;  %v699_v42 = vld [vmem:[#allocation7 + $0x450] sm:$0xff]  ;;  %v706_v43 = vld [vmem:[#allocation7 + $0x488] sm:$0xff]  ;;  %v708_v45 = vld [vmem:[#allocation7 + $0x498] sm:$0xff]  ;;  %v17513_v48 = vpack.c.bf16 %v697_v39, %v689_v38 }
  0x8f   : > { %17502 = vmatpush1.bf16.msra.mxu0 %v17501_v11  ;;  %v714_v44 = vld [vmem:[#allocation7 + $0x4c8] sm:$0xff]  ;;  %v716_v46 = vld [vmem:[#allocation7 + $0x4d8] sm:$0xff]  ;;  %v17577_v49 = vpack.c.bf16 %v699_v42, %v691_v40  ;;  %v705_v51 = vld [vmem:[#allocation7 + $0x480] sm:$0xff] }
  0x90   : > { %17566 = vmatpush1.bf16.msra.mxu1 %v17565_v12  ;;  %17504 = vmatprep.subr.bf16.mxu0 %v17503_v13  ;;  %v17515_v50 = vpack.c.bf16 %v714_v44, %v706_v43  ;;  %v713_v52 = vld [vmem:[#allocation7 + $0x4c0] sm:$0xff]  ;;  %v707_v53 = vld [vmem:[#allocation7 + $0x490] sm:$0xff]  ;;  %v17579_v54 = vpack.c.bf16 %v716_v46, %v708_v45  ;;  %v722_v56 = vld [vmem:[#allocation7 + $0x508] sm:$0xff] }
  0x91   : > { %17568 = vmatprep.subr.bf16.mxu1 %v17567_v17  ;;  %v715_v55 = vld [vmem:[#allocation7 + $0x4d0] sm:$0xff]  ;;  %v730_v57 = vld [vmem:[#allocation7 + $0x548] sm:$0xff]  ;;  %v724_v58 = vld [vmem:[#allocation7 + $0x518] sm:$0xff]  ;;  %v17517_v60 = vpack.c.bf16 %v713_v52, %v705_v51 }
  0x92   : > { %v732_v59 = vld [vmem:[#allocation7 + $0x558] sm:$0xff]  ;;  %v17581_v61 = vpack.c.bf16 %v715_v55, %v707_v53  ;;  %v17519_v62 = vpack.c.bf16 %v730_v57, %v722_v56  ;;  %v721_v63 = vld [vmem:[#allocation7 + $0x500] sm:$0xff]  ;;  %v723_v1 = vld [vmem:[#allocation7 + $0x510] sm:$0xff] }
  0x93   : > { %17506 = vmatpush1.bf16.msra.mxu0 %v17505_v23  ;;  %v729_v0 = vld [vmem:[#allocation7 + $0x540] sm:$0xff]  ;;  %v17583_v2 = vpack.c.bf16 %v732_v59, %v724_v58  ;;  %v731_v3 = vld [vmem:[#allocation7 + $0x550] sm:$0xff]  ;;  %v738_v4 = vld [vmem:[#allocation7 + $0x588] sm:$0xff] }
  0x94   : > { %17570 = vmatpush1.bf16.msra.mxu1 %v17569_v24  ;;  %17508 = vmatprep.subr.bf16.mxu0 %v17507_v25  ;;  %v746_v5 = vld [vmem:[#allocation7 + $0x5c8] sm:$0xff]  ;;  %v740_v6 = vld [vmem:[#allocation7 + $0x598] sm:$0xff]  ;;  %v17521_v8 = vpack.c.bf16 %v729_v0, %v721_v63  ;;  %v737_v9 = vld [vmem:[#allocation7 + $0x580] sm:$0xff]  ;;  %v17585_v10 = vpack.c.bf16 %v731_v3, %v723_v1 }
  0x95   : > { %17572 = vmatprep.subr.bf16.mxu1 %v17571_v29  ;;  %v748_v7 = vld [vmem:[#allocation7 + $0x5d8] sm:$0xff]  ;;  %v17523_v11 = vpack.c.bf16 %v746_v5, %v738_v4  ;;  %v745_v12 = vld [vmem:[#allocation7 + $0x5c0] sm:$0xff]  ;;  %v739_v13 = vld [vmem:[#allocation7 + $0x590] sm:$0xff] }
  0x96   : > { %v747_v14 = vld [vmem:[#allocation7 + $0x5d0] sm:$0xff]  ;;  %v17587_v15 = vpack.c.bf16 %v748_v7, %v740_v6  ;;  %v754_v16 = vld [vmem:[#allocation7 + $0x608] sm:$0xff]  ;;  %v756_v19 = vld [vmem:[#allocation7 + $0x618] sm:$0xff]  ;;  %v17525_v22 = vpack.c.bf16 %v745_v12, %v737_v9 }
  0x97   : > { %17510 = vmatpush1.bf16.msra.mxu0 %v17509_v35  ;;  %v762_v17 = vld [vmem:[#allocation7 + $0x648] sm:$0xff]  ;;  %v764_v20 = vld [vmem:[#allocation7 + $0x658] sm:$0xff]  ;;  %v17589_v23 = vpack.c.bf16 %v747_v14, %v739_v13  ;;  %v753_v25 = vld [vmem:[#allocation7 + $0x600] sm:$0xff] }
  0x98   : > { %17574 = vmatpush1.bf16.msra.mxu1 %v17573_v36  ;;  %17512 = vmatprep.subr.bf16.mxu0 %v17511_v37  ;;  %v20274_v18 = vld [vmem:[%s20259_s24 + $0x8] sm:$0xff]  ;;  %v17527_v24 = vpack.c.bf16 %v762_v17, %v754_v16  ;;  %v761_v26 = vld [vmem:[#allocation7 + $0x640] sm:$0xff]  ;;  %v755_v27 = vld [vmem:[#allocation7 + $0x610] sm:$0xff]  ;;  %v17591_v29 = vpack.c.bf16 %v764_v20, %v756_v19 }
  0x99   : > { %17576 = vmatprep.subr.bf16.mxu1 %v17575_v41  ;;  %vm556_vm0 = vcmp.ge.f32.partialorder %v20274_v18, 0.0  ;;  %v558_v21 = vmul.f32 0.2, %v20274_v18  ;;  %v763_v30 = vld [vmem:[#allocation7 + $0x650] sm:$0xff]  ;;  %v770_v31 = vld [vmem:[#allocation7 + $0x688] sm:$0xff]  ;;  %v772_v33 = vld [vmem:[#allocation7 + $0x698] sm:$0xff]  ;;  %v17529_v35 = vpack.c.bf16 %v761_v26, %v753_v25 }
  0x9a   : > { %v778_v32 = vld [vmem:[#allocation7 + $0x6c8] sm:$0xff]  ;;  %v780_v34 = vld [vmem:[#allocation7 + $0x6d8] sm:$0xff]  ;;  %v17593_v36 = vpack.c.bf16 %v763_v30, %v755_v27  ;;  %v769_v38 = vld [vmem:[#allocation7 + $0x680] sm:$0xff] }
  0x9b   : > { %17514 = vmatpush1.bf16.msra.mxu0 %v17513_v48  ;;  %v20279_v28 = vsel %vm556_vm0, %v20274_v18, %v558_v21  ;;  %v17531_v37 = vpack.c.bf16 %v778_v32, %v770_v31  ;;  %v777_v39 = vld [vmem:[#allocation7 + $0x6c0] sm:$0xff]  ;;  %v771_v40 = vld [vmem:[#allocation7 + $0x690] sm:$0xff]  ;;  %v17595_v41 = vpack.c.bf16 %v780_v34, %v772_v33  ;;  %v786_v43 = vld [vmem:[#allocation7 + $0x708] sm:$0xff] }
  0x9c   : > { %17578 = vmatpush1.bf16.msra.mxu1 %v17577_v49  ;;  %17516 = vmatprep.subr.bf16.mxu0 %v17515_v50  ;;  %v779_v42 = vld [vmem:[#allocation7 + $0x6d0] sm:$0xff]  ;;  %v794_v44 = vld [vmem:[#allocation7 + $0x748] sm:$0xff]  ;;  %v788_v45 = vld [vmem:[#allocation7 + $0x718] sm:$0xff]  ;;  %v17533_v48 = vpack.c.bf16 %v777_v39, %v769_v38 }
  0x9d   : > { %17580 = vmatprep.subr.bf16.mxu1 %v17579_v54  ;;  %881 = vmatprep.mubr.f32.mxu0 %v20279_v28  ;;  %v796_v46 = vld [vmem:[#allocation7 + $0x758] sm:$0xff]  ;;  %v17597_v49 = vpack.c.bf16 %v779_v42, %v771_v40  ;;  %v17535_v50 = vpack.c.bf16 %v794_v44, %v786_v43  ;;  %v785_v51 = vld [vmem:[#allocation7 + $0x700] sm:$0xff]  ;;  %v787_v53 = vld [vmem:[#allocation7 + $0x710] sm:$0xff] }
  0x9e   : > { %958 = vmatprep.mubr.f32.mxu1 %v20279_v28  ;;  %v793_v52 = vld [vmem:[#allocation7 + $0x740] sm:$0xff]  ;;  %v17599_v54 = vpack.c.bf16 %v796_v46, %v788_v45  ;;  %v795_v55 = vld [vmem:[#allocation7 + $0x750] sm:$0xff]  ;;  %v802_v56 = vld [vmem:[#allocation7 + $0x788] sm:$0xff] }
  0x9f   : > { %17518 = vmatpush1.bf16.msra.mxu0 %v17517_v60  ;;  %v810_v57 = vld [vmem:[#allocation7 + $0x7c8] sm:$0xff]  ;;  %v804_v58 = vld [vmem:[#allocation7 + $0x798] sm:$0xff]  ;;  %v17537_v60 = vpack.c.bf16 %v793_v52, %v785_v51  ;;  %v809_v0 = vld [vmem:[#allocation7 + $0x7c0] sm:$0xff] }
  0xa0   : > { %17582 = vmatpush1.bf16.msra.mxu1 %v17581_v61  ;;  %17520 = vmatprep.subr.bf16.mxu0 %v17519_v62  ;;  %v812_v59 = vld [vmem:[#allocation7 + $0x7d8] sm:$0xff]  ;;  %v801_v61 = vld [vmem:[#allocation7 + $0x780] sm:$0xff]  ;;  %v17601_v62 = vpack.c.bf16 %v795_v55, %v787_v53  ;;  %v17539_v63 = vpack.c.bf16 %v810_v57, %v802_v56  ;;  %v803_v1 = vld [vmem:[#allocation7 + $0x790] sm:$0xff] }
  0xa1   : > { %17584 = vmatprep.subr.bf16.mxu1 %v17583_v2  ;;  %v20284_v2 = vld [vmem:[%s20259_s24] sm:$0xff]  ;;  %v17603_v3 = vpack.c.bf16 %v812_v59, %v804_v58  ;;  %v566_v5 = vld [vmem:[#allocation7 + $0x28] sm:$0xff]  ;;  %v568_v7 = vld [vmem:[#allocation7 + $0x38] sm:$0xff]  ;;  %v17541_v9 = vpack.c.bf16 %v809_v0, %v801_v61 }
  0xa2   : > { %v811_v4 = vld [vmem:[#allocation7 + $0x7d0] sm:$0xff]  ;;  %v574_v6 = vld [vmem:[#allocation7 + $0x68] sm:$0xff]  ;;  %vm555_vm1 = vcmp.ge.f32.partialorder %v20284_v2, 0.0  ;;  %v565_v13 = vld [vmem:[#allocation7 + $0x20] sm:$0xff] }
  0xa3   : > { %17522 = vmatpush1.bf16.msra.mxu0 %v17521_v8  ;;  %v576_v8 = vld [vmem:[#allocation7 + $0x78] sm:$0xff]  ;;  %v17607_v12 = vpack.c.bf16 %v574_v6, %v566_v5  ;;  %v573_v14 = vld [vmem:[#allocation7 + $0x60] sm:$0xff]  ;;  %v567_v16 = vld [vmem:[#allocation7 + $0x30] sm:$0xff] }
  0xa4   : > { %17586 = vmatpush1.bf16.msra.mxu1 %v17585_v10  ;;  %17524 = vmatprep.subr.bf16.mxu0 %v17523_v11  ;;  %v557_v10 = vmul.f32 0.2, %v20284_v2  ;;  %v17605_v11 = vpack.c.bf16 %v811_v4, %v803_v1  ;;  %v575_v17 = vld [vmem:[#allocation7 + $0x70] sm:$0xff]  ;;  %v582_v19 = vld [vmem:[#allocation7 + $0xa8] sm:$0xff]  ;;  %v581_v26 = vld [vmem:[#allocation7 + $0xa0] sm:$0xff] }
  0xa5   : > { %17588 = vmatprep.subr.bf16.mxu1 %v17587_v15  ;;  %v17671_v15 = vpack.c.bf16 %v576_v8, %v568_v7  ;;  %v590_v20 = vld [vmem:[#allocation7 + $0xe8] sm:$0xff]  ;;  %v17673_v25 = vpack.c.bf16 %v575_v17, %v567_v16  ;;  %v589_v27 = vld [vmem:[#allocation7 + $0xe0] sm:$0xff]  ;;  %v591_v31 = vld [vmem:[#allocation7 + $0xf0] sm:$0xff] }
  0xa6   : > { %v20289_v21 = vsel %vm555_vm1, %v20284_v2, %v557_v10  ;;  %v17611_v30 = vpack.c.bf16 %v590_v20, %v582_v19  ;;  %v598_v32 = vld [vmem:[#allocation7 + $0x128] sm:$0xff]  ;;  %v597_v40 = vld [vmem:[#allocation7 + $0x120] sm:$0xff]  ;;  %v599_v42 = vld [vmem:[#allocation7 + $0x130] sm:$0xff] }
  0xa7   : > { %17526 = vmatpush1.bf16.msra.mxu0 %v17525_v22  ;;  %v17609_v22 = vpack.c.bf16 %v573_v14, %v565_v13  ;;  %v606_v33 = vld [vmem:[#allocation7 + $0x168] sm:$0xff]  ;;  %v607_v44 = vld [vmem:[#allocation7 + $0x170] sm:$0xff]  ;;  %v613_v53 = vld [vmem:[#allocation7 + $0x1a0] sm:$0xff] }
  0xa8   : > { %17590 = vmatpush1.bf16.msra.mxu1 %v17589_v23  ;;  %17528 = vmatprep.subr.bf16.mxu0 %v17527_v24  ;;  %v584_v23 = vld [vmem:[#allocation7 + $0xb8] sm:$0xff]  ;;  %v17615_v39 = vpack.c.bf16 %v606_v33, %v598_v32  ;;  %v614_v45 = vld [vmem:[#allocation7 + $0x1a8] sm:$0xff]  ;;  %v17681_v51 = vpack.c.bf16 %v607_v44, %v599_v42  ;;  %v615_v55 = vld [vmem:[#allocation7 + $0x1b0] sm:$0xff] }
  0xa9   : > { %17592 = vmatprep.subr.bf16.mxu1 %v17591_v29  ;;  %v592_v24 = vld [vmem:[#allocation7 + $0xf8] sm:$0xff]  ;;  %v583_v29 = vld [vmem:[#allocation7 + $0xb0] sm:$0xff]  ;;  %v622_v46 = vld [vmem:[#allocation7 + $0x1e8] sm:$0xff] }
  0xaa   : > { %v17675_v34 = vpack.c.bf16 %v592_v24, %v584_v23  ;;  %v17677_v38 = vpack.c.bf16 %v591_v31, %v583_v29  ;;  %v17619_v52 = vpack.c.bf16 %v622_v46, %v614_v45  ;;  %v623_v57 = vld [vmem:[#allocation7 + $0x1f0] sm:$0xff]  ;;  %v630_v58 = vld [vmem:[#allocation7 + $0x228] sm:$0xff]  ;;  %v640_v61 = vld [vmem:[#allocation7 + $0x278] sm:$0xff] }
  0xab   : > { %17530 = vmatpush1.bf16.msra.mxu0 %v17529_v35  ;;  %v600_v35 = vld [vmem:[#allocation7 + $0x138] sm:$0xff]  ;;  %v638_v59 = vld [vmem:[#allocation7 + $0x268] sm:$0xff]  ;;  %v629_v1 = vld [vmem:[#allocation7 + $0x220] sm:$0xff] }
  0xac   : > { %17594 = vmatpush1.bf16.msra.mxu1 %v17593_v36  ;;  %17532 = vmatprep.subr.bf16.mxu0 %v17531_v37  ;;  %v608_v36 = vld [vmem:[#allocation7 + $0x178] sm:$0xff]  ;;  %v17613_v37 = vpack.c.bf16 %v589_v27, %v581_v26  ;;  %v17623_v0 = vpack.c.bf16 %v638_v59, %v630_v58  ;;  %v631_v4 = vld [vmem:[#allocation7 + $0x230] sm:$0xff]  ;;  %v646_v7 = vld [vmem:[#allocation7 + $0x2a8] sm:$0xff] }
  0xad   : > { %17596 = vmatprep.subr.bf16.mxu1 %v17595_v41  ;;  %v605_v41 = vld [vmem:[#allocation7 + $0x160] sm:$0xff]  ;;  %v17679_v43 = vpack.c.bf16 %v608_v36, %v600_v35  ;;  %v639_v6 = vld [vmem:[#allocation7 + $0x270] sm:$0xff]  ;;  %v654_v8 = vld [vmem:[#allocation7 + $0x2e8] sm:$0xff] }
  0xae   : > { %v656_v10 = vld [vmem:[#allocation7 + $0x2f8] sm:$0xff]  ;;  %v645_v13 = vld [vmem:[#allocation7 + $0x2a0] sm:$0xff]  ;;  %v655_v17 = vld [vmem:[#allocation7 + $0x2f0] sm:$0xff] }
  0xaf   : > { %17534 = vmatpush1.bf16.msra.mxu0 %v17533_v48  ;;  %v616_v48 = vld [vmem:[#allocation7 + $0x1b8] sm:$0xff]  ;;  %v653_v14 = vld [vmem:[#allocation7 + $0x2e0] sm:$0xff]  ;;  %v662_v19 = vld [vmem:[#allocation7 + $0x328] sm:$0xff] }
  0xb0   : > { %17598 = vmatpush1.bf16.msra.mxu1 %v17597_v49  ;;  %17536 = vmatprep.subr.bf16.mxu0 %v17535_v50  ;;  %v624_v49 = vld [vmem:[#allocation7 + $0x1f8] sm:$0xff]  ;;  %v17617_v50 = vpack.c.bf16 %v605_v41, %v597_v40  ;;  %v670_v20 = vld [vmem:[#allocation7 + $0x368] sm:$0xff]  ;;  %v17629_v24 = vpack.c.bf16 %v653_v14, %v645_v13  ;;  %v661_v27 = vld [vmem:[#allocation7 + $0x320] sm:$0xff] }
  0xb1   : > { %17600 = vmatprep.subr.bf16.mxu1 %v17599_v54  ;;  %v621_v54 = vld [vmem:[#allocation7 + $0x1e0] sm:$0xff]  ;;  %v17683_v56 = vpack.c.bf16 %v624_v49, %v616_v48  ;;  %v672_v23 = vld [vmem:[#allocation7 + $0x378] sm:$0xff]  ;;  %v17631_v26 = vpack.c.bf16 %v670_v20, %v662_v19  ;;  %v671_v32 = vld [vmem:[#allocation7 + $0x370] sm:$0xff] }
  0xb2   : > { %v669_v29 = vld [vmem:[#allocation7 + $0x360] sm:$0xff]  ;;  %v678_v33 = vld [vmem:[#allocation7 + $0x3a8] sm:$0xff]  ;;  %v680_v35 = vld [vmem:[#allocation7 + $0x3b8] sm:$0xff] }
  0xb3   : > { %17538 = vmatpush1.bf16.msra.mxu0 %v17537_v60  ;;  %v632_v60 = vld [vmem:[#allocation7 + $0x238] sm:$0xff]  ;;  %v677_v40 = vld [vmem:[#allocation7 + $0x3a0] sm:$0xff]  ;;  %v679_v42 = vld [vmem:[#allocation7 + $0x3b0] sm:$0xff] }
  0xb4   : > { %17602 = vmatpush1.bf16.msra.mxu1 %v17601_v62  ;;  %17540 = vmatprep.subr.bf16.mxu0 %v17539_v63  ;;  %v17621_v62 = vpack.c.bf16 %v621_v54, %v613_v53  ;;  %v17685_v63 = vpack.c.bf16 %v623_v57, %v615_v55  ;;  %v17687_v5 = vpack.c.bf16 %v640_v61, %v632_v60  ;;  %v688_v36 = vld [vmem:[#allocation7 + $0x3f8] sm:$0xff]  ;;  %v685_v41 = vld [vmem:[#allocation7 + $0x3e0] sm:$0xff]  ;;  %v687_v44 = vld [vmem:[#allocation7 + $0x3f0] sm:$0xff] }
  0xb5   : > { %17604 = vmatprep.subr.bf16.mxu1 %v17603_v3  ;;  %v637_v3 = vld [vmem:[#allocation7 + $0x260] sm:$0xff]  ;;  %v694_v45 = vld [vmem:[#allocation7 + $0x428] sm:$0xff]  ;;  %v696_v48 = vld [vmem:[#allocation7 + $0x438] sm:$0xff] }
  0xb6   : > { %v702_v46 = vld [vmem:[#allocation7 + $0x468] sm:$0xff]  ;;  %v704_v49 = vld [vmem:[#allocation7 + $0x478] sm:$0xff]  ;;  %v693_v53 = vld [vmem:[#allocation7 + $0x420] sm:$0xff] }
  0xb7   : > { %17542 = vmatpush1.bf16.msra.mxu0 %v17541_v9  ;;  %v648_v9 = vld [vmem:[#allocation7 + $0x2b8] sm:$0xff]  ;;  %v701_v54 = vld [vmem:[#allocation7 + $0x460] sm:$0xff]  ;;  %v695_v55 = vld [vmem:[#allocation7 + $0x430] sm:$0xff] }
  0xb8   : > { %17606 = vmatpush1.bf16.msra.mxu1 %v17605_v11  ;;  %17608 = vmatprep.subr.bf16.mxu0 %v17607_v12  ;;  %v17625_v11 = vpack.c.bf16 %v637_v3, %v629_v1  ;;  %v17627_v12 = vpack.c.bf16 %v654_v8, %v646_v7  ;;  %v17691_v16 = vpack.c.bf16 %v656_v10, %v648_v9  ;;  %v703_v57 = vld [vmem:[#allocation7 + $0x470] sm:$0xff]  ;;  %v710_v58 = vld [vmem:[#allocation7 + $0x4a8] sm:$0xff]  ;;  %v712_v60 = vld [vmem:[#allocation7 + $0x4b8] sm:$0xff] }
  0xb9   : > { %17672 = vmatprep.subr.bf16.mxu1 %v17671_v15  ;;  %v647_v15 = vld [vmem:[#allocation7 + $0x2b0] sm:$0xff]  ;;  %v718_v59 = vld [vmem:[#allocation7 + $0x4e8] sm:$0xff]  ;;  %v720_v61 = vld [vmem:[#allocation7 + $0x4f8] sm:$0xff] }
  0xba   : > { %882 = vmatmul.mubr.f32.vlgmr.msra.gmra.mrb[0].mxu0 %v20289_v21  ;;  %v709_v1 = vld [vmem:[#allocation7 + $0x4a0] sm:$0xff]  ;;  %v726_v7 = vld [vmem:[#allocation7 + $0x528] sm:$0xff]  ;;  %v728_v9 = vld [vmem:[#allocation7 + $0x538] sm:$0xff] }
  0xbb   : > { %959 = vmatmul.mubr.f32.vlgmr.msra.gmra.mrb[0].mxu1 %v20289_v21  ;;  %17610 = vmatpush1.bf16.msra.mxu0 %v17609_v22  ;;  %v664_v22 = vld [vmem:[#allocation7 + $0x338] sm:$0xff]  ;;  %v717_v3 = vld [vmem:[#allocation7 + $0x4e0] sm:$0xff]  ;;  %v734_v8 = vld [vmem:[#allocation7 + $0x568] sm:$0xff] }
  0xbc   : > { %17674 = vmatpush1.bf16.msra.mxu1 %v17673_v25  ;;  %887 = vmatprep.mubr.f32.mxu0 %v20274_v18  ;;  %v17693_v25 = vpack.c.bf16 %v655_v17, %v647_v15  ;;  %v17695_v31 = vpack.c.bf16 %v672_v23, %v664_v22  ;;  %v736_v10 = vld [vmem:[#allocation7 + $0x578] sm:$0xff]  ;;  %v725_v13 = vld [vmem:[#allocation7 + $0x520] sm:$0xff]  ;;  %v727_v15 = vld [vmem:[#allocation7 + $0x530] sm:$0xff] }
  0xbd   : > { %964 = vmatprep.mubr.f32.mxu1 %v20274_v18  ;;  %17612 = vmatprep.subr.bf16.mxu0 %v17611_v30  ;;  %v663_v30 = vld [vmem:[#allocation7 + $0x330] sm:$0xff]  ;;  %v733_v14 = vld [vmem:[#allocation7 + $0x560] sm:$0xff]  ;;  %v742_v19 = vld [vmem:[#allocation7 + $0x5a8] sm:$0xff] }
  0xbe   : > { %888 = vmatmul.mubr.f32.gmra.mrb[2].mxu0 %v20284_v2  ;;  %17676 = vmatprep.subr.bf16.mxu1 %v17675_v34  ;;  %v686_v34 = vld [vmem:[#allocation7 + $0x3e8] sm:$0xff]  ;;  %v735_v17 = vld [vmem:[#allocation7 + $0x570] sm:$0xff]  ;;  %v744_v22 = vld [vmem:[#allocation7 + $0x5b8] sm:$0xff] }
  0xbf   : > { %965 = vmatmul.mubr.f32.gmra.mrb[2].mxu1 %v20284_v2  ;;  %17614 = vmatpush1.bf16.msra.mxu0 %v17613_v37  ;;  %v17633_v37 = vpack.c.bf16 %v669_v29, %v661_v27  ;;  %v750_v20 = vld [vmem:[#allocation7 + $0x5e8] sm:$0xff]  ;;  %v752_v23 = vld [vmem:[#allocation7 + $0x5f8] sm:$0xff]  ;;  %v741_v27 = vld [vmem:[#allocation7 + $0x5a0] sm:$0xff] }
  0xc0   : > { %17678 = vmatpush1.bf16.msra.mxu1 %v17677_v38  ;;  %17616 = vmatprep.subr.bf16.mxu0 %v17615_v39  ;;  %v17697_v38 = vpack.c.bf16 %v671_v32, %v663_v30  ;;  %v17635_v39 = vpack.c.bf16 %v686_v34, %v678_v33  ;;  %v749_v29 = vld [vmem:[#allocation7 + $0x5e0] sm:$0xff]  ;;  %v743_v30 = vld [vmem:[#allocation7 + $0x5b0] sm:$0xff]  ;;  %v758_v33 = vld [vmem:[#allocation7 + $0x628] sm:$0xff] }
  0xc1   : > { %17680 = vmatprep.subr.bf16.mxu1 %v17679_v43  ;;  %1035 = vmatprep.mubr.f32.mxu0 %v20279_v28  ;;  %v17699_v43 = vpack.c.bf16 %v688_v36, %v680_v35  ;;  %v751_v32 = vld [vmem:[#allocation7 + $0x5f0] sm:$0xff]  ;;  %v766_v34 = vld [vmem:[#allocation7 + $0x668] sm:$0xff]  ;;  %v760_v35 = vld [vmem:[#allocation7 + $0x638] sm:$0xff] }
  0xc2   : > { %1112 = vmatprep.mubr.f32.mxu1 %v20279_v28  ;;  %v17689_v28 = vpack.c.bf16 %v639_v6, %v631_v4  ;;  %v711_v4 = vld [vmem:[#allocation7 + $0x4b0] sm:$0xff]  ;;  %v768_v36 = vld [vmem:[#allocation7 + $0x678] sm:$0xff] }
  0xc3   : > { %17618 = vmatpush1.bf16.msra.mxu0 %v17617_v50  ;;  %v17637_v50 = vpack.c.bf16 %v685_v41, %v677_v40  ;;  %v719_v6 = vld [vmem:[#allocation7 + $0x4f0] sm:$0xff]  ;;  %v757_v40 = vld [vmem:[#allocation7 + $0x620] sm:$0xff] }
  0xc4   : > { %17682 = vmatpush1.bf16.msra.mxu1 %v17681_v51  ;;  %17620 = vmatprep.subr.bf16.mxu0 %v17619_v52  ;;  %v17701_v51 = vpack.c.bf16 %v687_v44, %v679_v42  ;;  %v17639_v52 = vpack.c.bf16 %v702_v46, %v694_v45  ;;  %v765_v41 = vld [vmem:[#allocation7 + $0x660] sm:$0xff]  ;;  %v759_v42 = vld [vmem:[#allocation7 + $0x630] sm:$0xff]  ;;  %v774_v45 = vld [vmem:[#allocation7 + $0x6a8] sm:$0xff] }
  0xc5   : > { %17684 = vmatprep.subr.bf16.mxu1 %v17683_v56  ;;  %v17703_v56 = vpack.c.bf16 %v704_v49, %v696_v48  ;;  %v767_v44 = vld [vmem:[#allocation7 + $0x670] sm:$0xff]  ;;  %v782_v46 = vld [vmem:[#allocation7 + $0x6e8] sm:$0xff]  ;;  %v776_v48 = vld [vmem:[#allocation7 + $0x6b8] sm:$0xff] }
  0xc6   : > { %v784_v49 = vld [vmem:[#allocation7 + $0x6f8] sm:$0xff] }
  0xc7   : > { %17622 = vmatpush1.bf16.msra.mxu0 %v17621_v62  ;;  %v17641_v62 = vpack.c.bf16 %v701_v54, %v693_v53  ;;  %v773_v53 = vld [vmem:[#allocation7 + $0x6a0] sm:$0xff] }
  0xc8   : > { %17686 = vmatpush1.bf16.msra.mxu1 %v17685_v63  ;;  %17624 = vmatprep.subr.bf16.mxu0 %v17623_v0  ;;  %v17705_v63 = vpack.c.bf16 %v703_v57, %v695_v55  ;;  %v17643_v0 = vpack.c.bf16 %v718_v59, %v710_v58  ;;  %v781_v54 = vld [vmem:[#allocation7 + $0x6e0] sm:$0xff]  ;;  %v775_v55 = vld [vmem:[#allocation7 + $0x6b0] sm:$0xff]  ;;  %v790_v58 = vld [vmem:[#allocation7 + $0x728] sm:$0xff] }
  0xc9   : > { %17688 = vmatprep.subr.bf16.mxu1 %v17687_v5  ;;  %v17707_v5 = vpack.c.bf16 %v720_v61, %v712_v60  ;;  %v783_v57 = vld [vmem:[#allocation7 + $0x6f0] sm:$0xff]  ;;  %v798_v59 = vld [vmem:[#allocation7 + $0x768] sm:$0xff]  ;;  %v792_v60 = vld [vmem:[#allocation7 + $0x738] sm:$0xff] }
  0xca   : > { %v800_v61 = vld [vmem:[#allocation7 + $0x778] sm:$0xff] }
  0xcb   : > { %17626 = vmatpush1.bf16.msra.mxu0 %v17625_v11  ;;  %v17645_v11 = vpack.c.bf16 %v717_v3, %v709_v1  ;;  %v789_v1 = vld [vmem:[#allocation7 + $0x720] sm:$0xff] }
  0xcc   : > { %17690 = vmatpush1.bf16.msra.mxu1 %v17689_v28  ;;  %17628 = vmatprep.subr.bf16.mxu0 %v17627_v12  ;;  %v17709_v28 = vpack.c.bf16 %v719_v6, %v711_v4  ;;  %v17647_v12 = vpack.c.bf16 %v734_v8, %v726_v7  ;;  %v797_v3 = vld [vmem:[#allocation7 + $0x760] sm:$0xff]  ;;  %v791_v4 = vld [vmem:[#allocation7 + $0x730] sm:$0xff]  ;;  %v806_v7 = vld [vmem:[#allocation7 + $0x7a8] sm:$0xff] }
  0xcd   : > { %17692 = vmatprep.subr.bf16.mxu1 %v17691_v16  ;;  %v17711_v16 = vpack.c.bf16 %v736_v10, %v728_v9  ;;  %v799_v6 = vld [vmem:[#allocation7 + $0x770] sm:$0xff]  ;;  %v814_v8 = vld [vmem:[#allocation7 + $0x7e8] sm:$0xff]  ;;  %v808_v9 = vld [vmem:[#allocation7 + $0x7b8] sm:$0xff] }
  0xce   : > { %v816_v10 = vld [vmem:[#allocation7 + $0x7f8] sm:$0xff] }
  0xcf   : > { %17630 = vmatpush1.bf16.msra.mxu0 %v17629_v24  ;;  %v17649_v24 = vpack.c.bf16 %v733_v14, %v725_v13  ;;  %v805_v13 = vld [vmem:[#allocation7 + $0x7a0] sm:$0xff] }
  0xd0   : > { %17694 = vmatpush1.bf16.msra.mxu1 %v17693_v25  ;;  %17632 = vmatprep.subr.bf16.mxu0 %v17631_v26  ;;  %v17713_v25 = vpack.c.bf16 %v735_v17, %v727_v15  ;;  %v17651_v26 = vpack.c.bf16 %v750_v20, %v742_v19  ;;  %v813_v14 = vld [vmem:[#allocation7 + $0x7e0] sm:$0xff]  ;;  %v17731_v15 = vpack.c.bf16 %v816_v10, %v808_v9  ;;  %v815_v17 = vld [vmem:[#allocation7 + $0x7f0] sm:$0xff] }
  0xd1   : > { %17696 = vmatprep.subr.bf16.mxu1 %v17695_v31  ;;  %v17715_v31 = vpack.c.bf16 %v752_v23, %v744_v22  ;;  %v17669_v19 = vpack.c.bf16 %v813_v14, %v805_v13 }
  0xd3   : > { %17634 = vmatpush1.bf16.msra.mxu0 %v17633_v37  ;;  %v17653_v37 = vpack.c.bf16 %v749_v29, %v741_v27 }
  0xd4   : > { %17698 = vmatpush1.bf16.msra.mxu1 %v17697_v38  ;;  %17636 = vmatprep.subr.bf16.mxu0 %v17635_v39  ;;  %v17717_v38 = vpack.c.bf16 %v751_v32, %v743_v30  ;;  %v17655_v39 = vpack.c.bf16 %v766_v34, %v758_v33  ;;  %v1125_v32 = vld [vmem:[%s24120_s8] sm:$0xff]  ;;  %v1126_v33 = vld [vmem:[%s24120_s8 + $0x8] sm:$0xff] }
  0xd5   : > { %17700 = vmatprep.subr.bf16.mxu1 %v17699_v43  ;;  %v17719_v43 = vpack.c.bf16 %v768_v36, %v760_v35 }
  0xd7   : > { %17638 = vmatpush1.bf16.msra.mxu0 %v17637_v50  ;;  %v17657_v50 = vpack.c.bf16 %v765_v41, %v757_v40 }
  0xd8   : > { %17702 = vmatpush1.bf16.msra.mxu1 %v17701_v51  ;;  %17640 = vmatprep.subr.bf16.mxu0 %v17639_v52  ;;  %v17721_v51 = vpack.c.bf16 %v767_v44, %v759_v42  ;;  %v17659_v52 = vpack.c.bf16 %v782_v46, %v774_v45 }
  0xd9   : > { %17704 = vmatprep.subr.bf16.mxu1 %v17703_v56  ;;  %v17723_v56 = vpack.c.bf16 %v784_v49, %v776_v48 }
  0xdb   : > { %17642 = vmatpush1.bf16.msra.mxu0 %v17641_v62  ;;  %v17661_v62 = vpack.c.bf16 %v781_v54, %v773_v53 }
  0xdc   : > { %17706 = vmatpush1.bf16.msra.mxu1 %v17705_v63  ;;  %17644 = vmatprep.subr.bf16.mxu0 %v17643_v0  ;;  %v17725_v63 = vpack.c.bf16 %v783_v57, %v775_v55  ;;  %v17663_v0 = vpack.c.bf16 %v798_v59, %v790_v58  ;;  %v20423_v58 = vld [vmem:[%s24116_s4 + $0x18] sm:$0xff]  ;;  %v1470_v59 = vlaneseq }
  0xdd   : > { %17708 = vmatprep.subr.bf16.mxu1 %v17707_v5  ;;  %v17727_v5 = vpack.c.bf16 %v800_v61, %v792_v60 }
  0xde   : > { %v1471_v60 = vand.u32 127, %v1470_v59 }
  0xdf   : > { %17646 = vmatpush1.bf16.msra.mxu0 %v17645_v11  ;;  %v17665_v11 = vpack.c.bf16 %v797_v3, %v789_v1 }
  0xe0   : > { %17710 = vmatpush1.bf16.msra.mxu1 %v17709_v28  ;;  %17648 = vmatprep.subr.bf16.mxu0 %v17647_v12  ;;  %v17729_v28 = vpack.c.bf16 %v799_v6, %v791_v4  ;;  %v17667_v12 = vpack.c.bf16 %v814_v8, %v806_v7  ;;  %v1472_v61 = vadd.s32 128, %v1471_v60  ;;  %v20464_v1 = vand.u32 31, %v1471_v60 }
  0xe1   : > { %17712 = vmatprep.subr.bf16.mxu1 %v17711_v16  ;;  %v807_v16 = vld [vmem:[#allocation7 + $0x7b0] sm:$0xff]  ;;  %v1473_v7 = vadd.s32 256, %v1471_v60 }
  0xe2   : > { %v17733_v20 = vpack.c.bf16 %v815_v17, %v807_v16  ;;  %vm1599_vm7 = vcmp.ge.s32.totalorder %v20464_v1, 1  ;;  %v1476_v16 = vadd.s32 640, %v1471_v60  ;;  %vm24138_vm0 = vcmp.lt.s32.totalorder %v20464_v1, 31 }
  0xe3   : > { %17650 = vmatpush1.bf16.msra.mxu0 %v17649_v24  ;;  %v20490_v14 = vand.u32 31, %v1473_v7 }
  0xe4   : > { %17714 = vmatpush1.bf16.msra.mxu1 %v17713_v25  ;;  %17652 = vmatprep.subr.bf16.mxu0 %v17651_v26 }
  0xe5   : > { %17716 = vmatprep.subr.bf16.mxu1 %v17715_v31  ;;  %24240 = vst [vmem:[#allocation16_spill] sm:$0xff] %v20490_v14  ;;  %vm1601_vm9 = vcmp.ge.s32.totalorder %v20490_v14, 1 }
  0xe7   : > { %17654 = vmatpush1.bf16.msra.mxu0 %v17653_v37 }
  0xe8   : > { %17718 = vmatpush1.bf16.msra.mxu1 %v17717_v38  ;;  %17656 = vmatprep.subr.bf16.mxu0 %v17655_v39 }
  0xe9   : > { %17720 = vmatprep.subr.bf16.mxu1 %v17719_v43  ;;  %v1698_v46 = vpop.permute.xlu1 %1697 }
  0xeb   : > { %17658 = vmatpush1.bf16.msra.mxu0 %v17657_v50 }
  0xec   : > { %17722 = vmatpush1.bf16.msra.mxu1 %v17721_v51  ;;  %17660 = vmatprep.subr.bf16.mxu0 %v17659_v52  ;;  %v20409_v52 = vld [vmem:[%s24116_s4 + $0x10] sm:$0xff] }
  0xed   : > { %17724 = vmatprep.subr.bf16.mxu1 %v17723_v56  ;;  %v20401_v49 = vpop.permute.xlu1 %1649 }
  0xef   : > { %17662 = vmatpush1.bf16.msra.mxu0 %v17661_v62 }
  0xf0   : > { %17726 = vmatpush1.bf16.msra.mxu1 %v17725_v63  ;;  %17664 = vmatprep.subr.bf16.mxu0 %v17663_v0  ;;  %v20462_v0 = vand.u32 31, %v1472_v61 }
  0xf1   : > { %17728 = vmatprep.subr.bf16.mxu1 %v17727_v5  ;;  %v1474_v5 = vadd.s32 384, %v1471_v60 }
  0xf2   : > { %vm1600_vm6 = vcmp.ge.s32.totalorder %v20462_v0, 1  ;;  %vm1608_vm15 = vcmp.lt.s32.totalorder %v20462_v0, 31 }
  0xf3   : > { %17666 = vmatpush1.bf16.msra.mxu0 %v17665_v11 }
  0xf4   : > { %17730 = vmatpush1.bf16.msra.mxu1 %v17729_v28  ;;  %17668 = vmatprep.subr.bf16.mxu0 %v17667_v12  ;;  %v20483_v12 = vand.u32 31, %v1474_v5 }
  0xf5   : > { %17732 = vmatprep.subr.bf16.mxu1 %v17731_v15 }
  0xf6   : > { %vm1602_vm8 = vcmp.ge.s32.totalorder %v20483_v12, 1  ;;  %vm24140_vm1 = vcmp.lt.s32.totalorder %v20483_v12, 31 }
  0xf7   : > { %17670 = vmatpush1.bf16.msra.mxu0 %v17669_v19  ;;  %v1475_v19 = vadd.s32 512, %v1471_v60 }
  0xf8   : > { %17734 = vmatpush1.bf16.msra.mxu1 %v17733_v20 }
  0xfa   : > { %1036 = vmatmul.mubr.f32.vlgmr.msra.gmra.mrb[4].mxu0 %v20289_v21 }
  0xfb   : > { %1113 = vmatmul.mubr.f32.vlgmr.msra.gmra.mrb[4].mxu1 %v20289_v21  ;;  %1041 = vmatprep.mubr.f32.mxu0 %v20274_v18 }
  0xfc   : > { %1118 = vmatprep.mubr.f32.mxu1 %v20274_v18 }
  0xfe   : > { %1042 = vmatmul.mubr.f32.gmra.mrb[6].mxu0 %v20284_v2 }
  0xff   : > { %1119 = vmatmul.mubr.f32.gmra.mrb[6].mxu1 %v20284_v2  ;;  %1210 = vmatprep.mubr.f32.mxu0 %v24155_v47 }
 0x100   : > { %1287 = vmatprep.mubr.f32.mxu1 %v24155_v47 }
 0x18d   : > { %v20307_v22 = vpop.f32.mrb[0].mxu0 }
 0x18e   : > { %v20309_v23 = vpop.f32.mrb[0].mxu1  ;;  %1699 = vrot.lane.b32.xlu0 %v20307_v22, %s19990_s19  ;;  %v20313_v21 = vpop.f32.mrb[1].mxu0 }
 0x18f   : > { %1703 = vrot.lane.b32.xlu1 %v20309_v23, %s19990_s19  ;;  %v20317_v18 = vpop.f32.mrb[1].mxu1 }
 0x191   : > { %v889_v24 = vpop.f32.mrb[2].mxu0 }
 0x192   : > { %v17737_v2 = vpack.c.bf16 %v889_v24, %v20307_v22  ;;  %v966_v25 = vpop.f32.mrb[2].mxu1  ;;  %1701 = vrot.lane.b32.xlu0 %v20313_v21, %s19990_s19  ;;  %v891_v26 = vpop.f32.mrb[3].mxu0  ;;  %v20508_v24 = vld [vmem:[%s24116_s4] sm:$0xff] }
 0x193   : > { %v17741_v27 = vpack.c.bf16 %v966_v25, %v20309_v23  ;;  %v968_v29 = vpop.f32.mrb[3].mxu1  ;;  %1651 = vrot.lane.b32.xlu1 %v20307_v22, %s19991_s21  ;;  %v17735_v30 = vpack.c.bf16 %v891_v26, %v20313_v21  ;;  %v20513_v26 = vand.u32 31, %v1476_v16 }
 0x194   : > { %v17739_v31 = vpack.c.bf16 %v968_v29, %v20317_v18 }
 0x195   : > { %17736 = vmatprep.subr.bf16.mxu0 %v17735_v30  ;;  %v20521_v30 = vand.u32 31, %v1475_v19  ;;  %vm1604_vm10 = vcmp.ge.s32.totalorder %v20513_v26, 1 }
 0x196   : > { %17740 = vmatprep.subr.bf16.mxu1 %v17739_v31  ;;  %1705 = vrot.lane.b32.xlu0 %v20317_v18, %s19990_s19  ;;  %v1477_v31 = vadd.s32 768, %v1471_v60 }
 0x197   : > { %17742 = vmatpush1.bf16.msra.mxu1 %v17741_v27  ;;  %17738 = vmatpush1.bf16.msra.mxu0 %v17737_v2  ;;  %v1478_v27 = vadd.s32 896, %v1471_v60  ;;  %24241 = vst [vmem:[#allocation17_spill] sm:$0xff] %v20521_v30  ;;  %vm1603_vm11 = vcmp.ge.s32.totalorder %v20521_v30, 1 }
 0x19a   : > { %1653 = vrot.lane.b32.xlu0 %v20313_v21, %s19991_s21  ;;  %16763 = vmatmul.mubr.msk.f32.vlgmr.msra.gmra.mrb[8].mxu0 %vm24136_vm2, %v1125_v32 }
 0x19b   : > { %16765 = vmatmul.mubr.msk.f32.vlgmr.msra.gmra.mrb[8].mxu1 %vm24136_vm2, %v1125_v32  ;;  %1216 = vmatprep.mubr.f32.mxu0 %v24155_v47 }
 0x19c   : > { %1293 = vmatprep.mubr.f32.mxu1 %v24155_v47 }
 0x19e   : > { %16764 = vmatmul.mubr.msk.f32.gmra.mrb[10].mxu0 %vm24136_vm2, %v1126_v33 }
 0x19f   : > { %1364 = vmatprep.mubr.f32.mxu0 %v24155_v47  ;;  %16766 = vmatmul.mubr.msk.f32.gmra.mrb[10].mxu1 %vm24136_vm2, %v1126_v33 }
 0x1a0   : > { %1441 = vmatprep.mubr.f32.mxu1 %v24155_v47 }
 0x1cd   : > { %v20345_v34 = vpop.f32.mrb[4].mxu0 }
 0x1ce   : > { %1707 = vrot.lane.b32.xlu1 %v20345_v34, %s19990_s19  ;;  %v20349_v35 = vpop.f32.mrb[5].mxu0  ;;  %v20351_v36 = vpop.f32.mrb[4].mxu1 }
 0x1cf   : > { %1709 = vrot.lane.b32.xlu0 %v20349_v35, %s19990_s19  ;;  %v20355_v37 = vpop.f32.mrb[5].mxu1 }
 0x1d1   : > { %v1043_v38 = vpop.f32.mrb[6].mxu0 }
 0x1d2   : > { %v17745_v39 = vpack.c.bf16 %v1043_v38, %v20345_v34  ;;  %v1120_v40 = vpop.f32.mrb[6].mxu1  ;;  %1711 = vrot.lane.b32.xlu1 %v20351_v36, %s19990_s19  ;;  %v1045_v41 = vpop.f32.mrb[7].mxu0  ;;  %v20537_v38 = vand.u32 31, %v1478_v27  ;;  %v16816_v27 = vld [vmem:[%s24116_s4 + $0x38] sm:$0xff] }
 0x1d3   : > { %v17749_v42 = vpack.c.bf16 %v1120_v40, %v20351_v36  ;;  %v1122_v43 = vpop.f32.mrb[7].mxu1  ;;  %v17743_v44 = vpack.c.bf16 %v1045_v41, %v20349_v35  ;;  %1713 = vrot.lane.b32.xlu0 %v20355_v37, %s19990_s19  ;;  %v20544_v41 = vand.u32 31, %v1477_v31  ;;  %s24220_s19 = smov 64  }
 0x1d4   : > { %v17747_v45 = vpack.c.bf16 %v1122_v43, %v20355_v37  ;;  %24242 = vst [vmem:[#allocation18_spill] sm:$0xff] %v20537_v38  ;;  %vm1606_vm12 = vcmp.ge.s32.totalorder %v20537_v38, 1 }
 0x1d5   : > { %17744 = vmatprep.subr.bf16.mxu0 %v17743_v44  ;;  %24243 = vst [vmem:[#allocation19_spill] sm:$0xff] %v20544_v41  ;;  %v4976_v44 = vld [vmem:[%s24117_s5] sm:$0xff]  ;;  %vm1605_vm13 = vcmp.ge.s32.totalorder %v20544_v41, 1 }
 0x1d6   : > { %17748 = vmatprep.subr.bf16.mxu1 %v17747_v45  ;;  %1657 = vrot.lane.b32.xlu1 %v20317_v18, %s19991_s21 }
 0x1d7   : > { %17750 = vmatpush1.bf16.msra.mxu1 %v17749_v42  ;;  %17746 = vmatpush1.bf16.msra.mxu0 %v17745_v39  ;;  %v4977_v39 = vld [vmem:[%s24117_s5 + $0x8] sm:$0xff]  ;;  %v19998_v42 = vmov 0  }
 0x1d8   : > { %1655 = vrot.lane.b32.xlu0 %v20309_v23, %s19991_s21  ;;  %18923 = vset.pattern.permute.xlu1 %v19998_v42 }
 0x1d9   : > { %18922 = vset.pattern.permute.xlu0 %v19998_v42 }
 0x1da   : > { %2381 = vrot.lane.b32.xlu1 %v20313_v21, %s19992_s26  ;;  %16767 = vmatmul.mubr.msk.f32.vlgmr.msra.gmra.mrb[12].mxu0 %vm24136_vm2, %v1125_v32 }
 0x1db   : > { %16769 = vmatmul.mubr.msk.f32.vlgmr.msra.gmra.mrb[12].mxu1 %vm24136_vm2, %v1125_v32  ;;  %1370 = vmatprep.mubr.f32.mxu0 %v24155_v47 }
 0x1dc   : > { %1659 = vrot.lane.b32.xlu0 %v20345_v34, %s19991_s21  ;;  %1447 = vmatprep.mubr.f32.mxu1 %v24155_v47 }
 0x1de   : > { %1661 = vrot.lane.b32.xlu1 %v20349_v35, %s19991_s21  ;;  %16768 = vmatmul.mubr.msk.f32.gmra.mrb[14].mxu0 %vm24136_vm2, %v1126_v33 }
 0x1df   : > { %1803 = vmatprep.mubr.f32.mxu0 %v24155_v47  ;;  %16770 = vmatmul.mubr.msk.f32.gmra.mrb[14].mxu1 %vm24136_vm2, %v1126_v33  ;;  %v20533_v33 = vld [vmem:[%s24116_s4 + $0x8] sm:$0xff]  ;;  %vm24139_vm2 = vcmp.lt.s32.totalorder %v20521_v30, 31 }
 0x1e0   : > { %1663 = vrot.lane.b32.xlu0 %v20351_v36, %s19991_s21  ;;  %1880 = vmatprep.mubr.f32.mxu1 %v24155_v47 }
 0x1e2   : > { %1665 = vrot.lane.b32.xlu1 %v20355_v37, %s19991_s21  ;;  %s19995_s21 = smov 97  }
 0x1e4   : > { %2379 = vrot.lane.b32.xlu0 %v20307_v22, %s19992_s26 }
 0x1e6   : > { %2383 = vrot.lane.b32.xlu1 %v20309_v23, %s19992_s26 }
 0x1e8   : > { %2377 = vrot.lane.b32.xlu0 %v24155_v47, %s19992_s26 }
 0x1ea   : > { %2387 = vrot.lane.b32.xlu1 %v20345_v34, %s19992_s26 }
 0x1ec   : > { %2385 = vrot.lane.b32.xlu0 %v20317_v18, %s19992_s26 }
 0x1ee   : > { %2391 = vrot.lane.b32.xlu1 %v20351_v36, %s19992_s26 }
 0x1f0   : > { %2389 = vrot.lane.b32.xlu0 %v20349_v35, %s19992_s26 }
 0x1f2   : > { %2755 = vrot.lane.b32.xlu1 %v20307_v22, %s19993_s22 }
 0x1f4   : > { %2393 = vrot.lane.b32.xlu0 %v20355_v37, %s19992_s26  ;;  %s24641_s26 = sld [smem:[#allocation40_spill]] }
 0x1f6   : > { %2753 = vrot.lane.b32.xlu1 %v24155_v47, %s19993_s22 }
 0x1f8   : > { %2757 = vrot.lane.b32.xlu0 %v20313_v21, %s19993_s22 }
 0x1fa   : > { %2761 = vrot.lane.b32.xlu1 %v20317_v18, %s19993_s22 }
 0x1fc   : > { %2759 = vrot.lane.b32.xlu0 %v20309_v23, %s19993_s22 }
 0x1fe   : > { %2765 = vrot.lane.b32.xlu1 %v20349_v35, %s19993_s22 }
 0x200   : > { %2763 = vrot.lane.b32.xlu0 %v20345_v34, %s19993_s22  ;;  %v1700_v48 = vpop.permute.xlu0 %1699 }
 0x201   : > { %v1716_v53 = vsel %vm1715_vm3, %v1698_v46, %v1700_v48  ;;  %v1704_v54 = vpop.permute.xlu1 %1703 }
 0x202   : > { %2769 = vrot.lane.b32.xlu1 %v20355_v37, %s19993_s22 }
 0x204   : > { %2767 = vrot.lane.b32.xlu0 %v20351_v36, %s19993_s22  ;;  %v1702_v50 = vpop.permute.xlu0 %1701 }
 0x205   : > { %v1717_v51 = vsel %vm1715_vm3, %v1700_v48, %v1702_v50  ;;  %v1718_v57 = vsel %vm1715_vm3, %v1702_v50, %v1704_v54  ;;  %v1652_v62 = vpop.permute.xlu1 %1651 }
 0x206   : > { %3484 = vrot.lane.b32.xlu1 %v20309_v23, %s19994_s11  ;;  %1739 = vmatprep.subr.mxu0 %v1717_v51  ;;  %v1668_v11 = vsel %vm1667_vm5, %v20401_v49, %v1652_v62 }
 0x207   : > { %1740 = vmatpush1.msra.mxu0 %v1716_v53 }
 0x208   : > { %3482 = vrot.lane.b32.xlu0 %v20313_v21, %s19994_s11  ;;  %v1706_v55 = vpop.permute.xlu0 %1705  ;;  %16773 = vmatmul.mubr.msk.f32.vlgmr.msra.gmra.mrb[16].mxu0 %vm24141_vm4, %v20409_v52 }
 0x209   : > { %v1719_v56 = vsel %vm1715_vm3, %v1704_v54, %v1706_v55  ;;  %1809 = vmatprep.mubr.f32.mxu0 %v24155_v47 }
 0x20a   : > { %1816 = vmatprep.subr.mxu1 %v1719_v56  ;;  %3486 = vrot.lane.b32.xlu1 %v20317_v18, %s19994_s11 }
 0x20b   : > { %1817 = vmatpush1.msra.mxu1 %v1718_v57  ;;  %v16797_v57 = vld [vmem:[%s24116_s4 + $0x20] sm:$0xff] }
 0x20c   : > { %3480 = vrot.lane.b32.xlu0 %v20307_v22, %s19994_s11  ;;  %16775 = vmatmul.mubr.msk.f32.vlgmr.msra.gmra.mrb[16].mxu1 %vm24141_vm4, %v20409_v52  ;;  %v1654_v63 = vpop.permute.xlu0 %1653 }
 0x20d   : > { %16774 = vmatmul.mubr.msk.f32.gmra.mrb[18].mxu0 %vm24141_vm4, %v20423_v58  ;;  %1886 = vmatprep.mubr.f32.mxu1 %v24155_v47  ;;  %v1669_v10 = vsel %vm1667_vm5, %v1652_v62, %v1654_v63 }
 0x20e   : > { %3858 = vrot.lane.b32.xlu1 %v20313_v21, %s19995_s21  ;;  %1957 = vmatprep.mubr.f32.mxu0 %v24155_v47 }
 0x210   : > { %3488 = vrot.lane.b32.xlu0 %v20345_v34, %s19994_s11  ;;  %16776 = vmatmul.mubr.msk.f32.gmra.mrb[18].mxu1 %vm24141_vm4, %v20423_v58 }
 0x211   : > { %2034 = vmatprep.mubr.f32.mxu1 %v24155_v47 }
 0x212   : > { %3856 = vrot.lane.b32.xlu1 %v20307_v22, %s19995_s21 }
 0x214   : > { %3492 = vrot.lane.b32.xlu0 %v20351_v36, %s19994_s11 }
 0x216   : > { %3490 = vrot.lane.b32.xlu1 %v20349_v35, %s19994_s11 }
 0x218   : > { %3496 = vrot.lane.b32.xlu0 %v24155_v47, %s19994_s11 }
 0x21a   : > { %3494 = vrot.lane.b32.xlu1 %v20355_v37, %s19994_s11  ;;  %s544_s11 = scalar_select %p543_p11, %s20107_s17, 1 }
 0x21c   : > { %3860 = vrot.lane.b32.xlu0 %v20309_v23, %s19995_s21 }
 0x21e   : > { %3864 = vrot.lane.b32.xlu1 %v20345_v34, %s19995_s21 }
 0x220   : > { %3862 = vrot.lane.b32.xlu0 %v20317_v18, %s19995_s21 }
 0x222   : > { %3868 = vrot.lane.b32.xlu1 %v20351_v36, %s19995_s21 }
 0x224   : > { %4237 = vrot.lane.b32.xlu0 %v20313_v21, %s19996_s10 }
 0x226   : > { %3872 = vrot.lane.b32.xlu1 %v24155_v47, %s19995_s21 }
 0x228   : > { %3866 = vrot.lane.b32.xlu0 %v20349_v35, %s19995_s21 }
 0x22a   : > { %4239 = vrot.lane.b32.xlu1 %v20309_v23, %s19996_s10 }
 0x22c   : > { %3870 = vrot.lane.b32.xlu0 %v20355_v37, %s19995_s21  ;;  %s17449_s21 = sshll.u32 %s544_s11, 4  ;;  %s16758_s11 = sshll.u32 %s20255_s27, 7 }
 0x22d   : > { %s547_s14 = scalar_lea.vmem %s24244_s1, %s17449_s21  ;;  %s552_s22 = scalar_lea.vmem %s24114_s2, %s17449_s21 }
 0x22e   : > { %4241 = vrot.lane.b32.xlu1 %v20317_v18, %s19996_s10  ;;  %v1590_v61 = vld [vmem:[%s552_s22 + $0x8] sm:$0xff]  ;;  %s20000_s21 = smov 66   ;;  %s24028_s24 = scalar_lea.vmem [#allocation10], %s16758_s11 }
 0x230   : > { %4235 = vrot.lane.b32.xlu0 %v20307_v22, %s19996_s10 }
 0x232   : > { %4602 = vrot.lane.b32.xlu1 %v20313_v21, %s19997_s13 }
 0x234   : > { %4243 = vrot.lane.b32.xlu0 %v20345_v34, %s19996_s10 }
 0x236   : > { %4245 = vrot.lane.b32.xlu1 %v20349_v35, %s19996_s10 }
 0x238   : > { %4247 = vrot.lane.b32.xlu0 %v20351_v36, %s19996_s10 }
 0x23a   : > { %4249 = vrot.lane.b32.xlu1 %v20355_v37, %s19996_s10 }
 0x23c   : > { %4251 = vrot.lane.b32.xlu0 %v24155_v47, %s19996_s10  ;;  %s20001_s10 = smov 62  }
 0x23e   : > { %4600 = vrot.lane.b32.xlu1 %v20307_v22, %s19997_s13 }
 0x240   : > { %4604 = vrot.lane.b32.xlu0 %v20309_v23, %s19997_s13  ;;  %v1708_v3 = vpop.permute.xlu1 %1707 }
 0x241   : > { %v1710_v4 = vpop.permute.xlu0 %1709  ;;  %v1720_v8 = vsel %vm1715_vm3, %v1706_v55, %v1708_v3  ;;  %v1588_v55 = vld [vmem:[%s547_s14 + $0x8] sm:$0xff] }
 0x242   : > { %4608 = vrot.lane.b32.xlu1 %v20345_v34, %s19997_s13  ;;  %v1721_v6 = vsel %vm1715_vm3, %v1708_v3, %v1710_v4 }
 0x243   : > { %1893 = vmatprep.subr.mxu0 %v1721_v6 }
 0x244   : > { %4606 = vrot.lane.b32.xlu0 %v20317_v18, %s19997_s13  ;;  %v1712_v9 = vpop.permute.xlu1 %1711  ;;  %1894 = vmatpush1.msra.mxu0 %v1720_v8 }
 0x245   : > { %v1714_v28 = vpop.permute.xlu0 %1713  ;;  %16777 = vmatmul.mubr.msk.f32.vlgmr.msra.gmra.mrb[20].mxu0 %vm24141_vm4, %v20409_v52  ;;  %16781 = vmatprep.subr.msk.mxu0 %vm1600_vm6, %v1669_v10  ;;  %v1722_v15 = vsel %vm1715_vm3, %v1710_v4, %v1712_v9 }
 0x246   : > { %4612 = vrot.lane.b32.xlu1 %v20351_v36, %s19997_s13  ;;  %16782 = vmatpush1.msk.msra.mxu0 %vm1599_vm7, %v1668_v11  ;;  %v1723_v13 = vsel %vm1715_vm3, %v1712_v9, %v1714_v28  ;;  %vm24137_vm3 = vcmp.lt.s32.totalorder %v20490_v14, 31 }
 0x247   : > { %1970 = vmatprep.subr.mxu1 %v1723_v13  ;;  %1963 = vmatprep.mubr.f32.mxu0 %v24155_v47 }
 0x248   : > { %4610 = vrot.lane.b32.xlu0 %v20349_v35, %s19997_s13  ;;  %v1658_v17 = vpop.permute.xlu1 %1657  ;;  %1971 = vmatpush1.msra.mxu1 %v1722_v15 }
 0x249   : > { %16779 = vmatmul.mubr.msk.f32.vlgmr.msra.gmra.mrb[20].mxu1 %vm24141_vm4, %v20409_v52  ;;  %16778 = vmatmul.mubr.msk.f32.gmra.mrb[22].mxu0 %vm24141_vm4, %v20423_v58  ;;  %v1587_v52 = vld [vmem:[%s547_s14] sm:$0xff]  ;;  %s20003_s14 = smov 126  }
 0x24a   : > { %v1656_v20 = vpop.permute.xlu0 %1655  ;;  %4616 = vrot.lane.b32.xlu1 %v24155_v47, %s19997_s13  ;;  %2040 = vmatprep.mubr.f32.mxu1 %v24155_v47 }
 0x24b   : > { %v1670_v2 = vsel %vm1667_vm5, %v1654_v63, %v1656_v20  ;;  %v1671_v25 = vsel %vm1667_vm5, %v1656_v20, %v1658_v17  ;;  %2117 = vmatprep.mubr.f32.mxu0 %v24155_v47  ;;  %v16798_v63 = vld [vmem:[%s24116_s4 + $0x28] sm:$0xff] }
 0x24c   : > { %4614 = vrot.lane.b32.xlu0 %v20355_v37, %s19997_s13  ;;  %16785 = vmatprep.subr.msk.mxu1 %vm1602_vm8, %v1671_v25  ;;  %v20519_v29 = vpop.permute.xlu1 %2381  ;;  %s20002_s13 = smov 2  }
 0x24d   : > { %16786 = vmatpush1.msk.msra.mxu1 %vm1601_vm9, %v1670_v2  ;;  %16783 = vmatmul.mubr.msk.f32.vlgmr.msra.gmra.mrb[16].mxu0 %vm24141_vm4, %v20508_v24 }
 0x24e   : > { %16780 = vmatmul.mubr.msk.f32.gmra.mrb[22].mxu1 %vm24141_vm4, %v20423_v58  ;;  %v1660_v32 = vpop.permute.xlu0 %1659  ;;  %2123 = vmatprep.mubr.f32.mxu0 %v24155_v47  ;;  %v1589_v58 = vld [vmem:[%s552_s22] sm:$0xff]  ;;  %s24826_s22 = sld [smem:[#allocation41_spill]] }
 0x24f   : > { %2194 = vmatprep.mubr.f32.mxu1 %v24155_v47  ;;  %4985 = vperm.xlu1 %18923, %v4977_v39   ;;  %v1672_v45 = vsel %vm1667_vm5, %v1658_v17, %v1660_v32  ;;  %v16815_v17 = vld [vmem:[%s24116_s4 + $0x30] sm:$0xff] }
 0x250   : > { %v1662_v40 = vpop.permute.xlu1 %1661  ;;  %4980 = vperm.xlu0 %18922, %v4976_v44  }
 0x251   : > { %16784 = vmatmul.mubr.msk.f32.gmra.mrb[18].mxu0 %vm24141_vm4, %v20533_v33  ;;  %v1673_v43 = vsel %vm1667_vm5, %v1660_v32, %v1662_v40 }
 0x252   : > { %16787 = vmatmul.mubr.msk.f32.vlgmr.msra.gmra.mrb[16].mxu1 %vm24141_vm4, %v20508_v24  ;;  %v1664_v46 = vpop.permute.xlu0 %1663  ;;  %16789 = vmatprep.subr.msk.mxu0 %vm1604_vm10, %v1673_v43 }
 0x253   : > { %16790 = vmatpush1.msk.msra.mxu0 %vm1603_vm11, %v1672_v45  ;;  %2200 = vmatprep.mubr.f32.mxu1 %v24155_v47  ;;  %v1674_v50 = vsel %vm1667_vm5, %v1662_v40, %v1664_v46 }
 0x254   : > { %v1666_v48 = vpop.permute.xlu1 %1665  ;;  %2271 = vmatprep.mubr.f32.mxu0 %v24155_v47  ;;  %5006 = vperm.xlu1 %18923, %v1587_v52  }
 0x255   : > { %v1675_v49 = vsel %vm1667_vm5, %v1664_v46, %v1666_v48  ;;  %16791 = vmatmul.mubr.msk.f32.vlgmr.msra.gmra.mrb[20].mxu0 %vm24141_vm4, %v20508_v24  ;;  %5011 = vperm.xlu0 %18922, %v1588_v55   ;;  %vm1612_vm5 = vcmp.lt.s32.totalorder %v20513_v26, 31  ;;  %v16834_v46 = vld [vmem:[%s24116_s4 + $0x48] sm:$0xff]  ;;  %v16843_v55 = vld [vmem:[%s24116_s4 + $0x50] sm:$0xff] }
 0x256   : > { %16788 = vmatmul.mubr.msk.f32.gmra.mrb[18].mxu1 %vm24141_vm4, %v20533_v33  ;;  %v2380_v51 = vpop.permute.xlu0 %2379  ;;  %16793 = vmatprep.subr.msk.mxu1 %vm1606_vm12, %v1675_v49 }
 0x257   : > { %16794 = vmatpush1.msk.msra.mxu1 %vm1605_vm13, %v1674_v50  ;;  %v2397_v53 = vsel %vm2395_vm14, %v2380_v51, %v20519_v29  ;;  %2277 = vmatprep.mubr.f32.mxu0 %v24155_v47 }
 0x258   : > { %16799 = vmatprep.subr.msk.mxu0 %vm1608_vm15, %v2397_v53  ;;  %v2384_v54 = vpop.permute.xlu1 %2383  ;;  %2348 = vmatprep.mubr.f32.mxu1 %v24155_v47 }
 0x259   : > { %16792 = vmatmul.mubr.msk.f32.gmra.mrb[22].mxu0 %vm24141_vm4, %v20533_v33  ;;  %5032 = vperm.xlu1 %18923, %v1589_v58   ;;  %v2398_v4 = vsel %vm2395_vm14, %v20519_v29, %v2384_v54 }
 0x25a   : > { %16795 = vmatmul.mubr.msk.f32.vlgmr.msra.gmra.mrb[20].mxu1 %vm24141_vm4, %v20508_v24  ;;  %v2378_v56 = vpop.permute.xlu0 %2377  ;;  %2493 = vmatprep.mubr.f32.mxu0 %v24155_v47 }
 0x25b   : > { %v2396_v59 = vsel %vm2395_vm14, %v2378_v56, %v2380_v51  ;;  %2354 = vmatprep.mubr.f32.mxu1 %v24155_v47  ;;  %5037 = vperm.xlu0 %18922, %v1590_v61   ;;  %v16844_v61 = vld [vmem:[%s24116_s4 + $0x58] sm:$0xff] }
 0x25c   : > { %16800 = vmatpush1.msk.msra.mxu0 %vm24138_vm0, %v2396_v59  ;;  %v2388_v60 = vpop.permute.xlu1 %2387  ;;  %vm1613_vm0 = vcmp.lt.s32.totalorder %v20544_v41, 31 }
 0x25d   : > { %16801 = vmatmul.mubr.msk.f32.vlgmr.msra.gmra.mrb[16].mxu0 %vm24141_vm4, %v16797_v57  ;;  %18925 = vrot.lane.b32.xlu1 %v24155_v47, %s24220_s19 }
 0x25e   : > { %16796 = vmatmul.mubr.msk.f32.gmra.mrb[22].mxu1 %vm24141_vm4, %v20533_v33  ;;  %v2386_v62 = vpop.permute.xlu0 %2385  ;;  %2499 = vmatprep.mubr.f32.mxu0 %v24155_v47 }
 0x25f   : > { %v2399_v3 = vsel %vm2395_vm14, %v2384_v54, %v2386_v62  ;;  %2570 = vmatprep.mubr.f32.mxu1 %v24155_v47  ;;  %v2400_v8 = vsel %vm2395_vm14, %v2386_v62, %v2388_v60 }
 0x260   : > { %16803 = vmatprep.subr.msk.mxu1 %vm24140_vm1, %v2399_v3  ;;  %v2392_v5 = vpop.permute.xlu1 %2391 }
 0x261   : > { %16804 = vmatpush1.msk.msra.mxu1 %vm24137_vm3, %v2398_v4  ;;  %16802 = vmatmul.mubr.msk.f32.gmra.mrb[18].mxu0 %vm24141_vm4, %v16798_v63  ;;  %vm1614_vm3 = vcmp.lt.s32.totalorder %v20537_v38, 31 }
 0x262   : > { %16805 = vmatmul.mubr.msk.f32.vlgmr.msra.gmra.mrb[16].mxu1 %vm24141_vm4, %v16797_v57  ;;  %v2390_v6 = vpop.permute.xlu0 %2389  ;;  %2647 = vmatprep.mubr.f32.mxu0 %v24155_v47 }
 0x263   : > { %v2401_v7 = vsel %vm2395_vm14, %v2388_v60, %v2390_v6  ;;  %2576 = vmatprep.mubr.f32.mxu1 %v24155_v47  ;;  %v2402_v28 = vsel %vm2395_vm14, %v2390_v6, %v2392_v5 }
 0x264   : > { %16807 = vmatprep.subr.msk.mxu0 %vm1612_vm5, %v2401_v7  ;;  %v2756_v9 = vpop.permute.xlu1 %2755 }
 0x265   : > { %16808 = vmatpush1.msk.msra.mxu0 %vm24139_vm2, %v2400_v8  ;;  %vm2771_vm2 = vcmask 7168  }
 0x266   : > { %16806 = vmatmul.mubr.msk.f32.gmra.mrb[18].mxu1 %vm24141_vm4, %v16798_v63  ;;  %v2394_v10 = vpop.permute.xlu0 %2393  ;;  %16809 = vmatmul.mubr.msk.f32.vlgmr.msra.gmra.mrb[20].mxu0 %vm24141_vm4, %v16797_v57 }
 0x267   : > { %v2403_v11 = vsel %vm2395_vm14, %v2392_v5, %v2394_v10  ;;  %2653 = vmatprep.mubr.f32.mxu0 %v24155_v47  ;;  %2724 = vmatprep.mubr.f32.mxu1 %v24155_v47  ;;  %vm24245_vm14 = vcmp.lt.s32.totalorder %v20464_v1, 31 }
 0x268   : > { %16811 = vmatprep.subr.msk.mxu1 %vm1614_vm3, %v2403_v11  ;;  %v2754_v13 = vpop.permute.xlu1 %2753 }
 0x269   : > { %16812 = vmatpush1.msk.msra.mxu1 %vm1613_vm0, %v2402_v28  ;;  %v2772_v19 = vsel %vm2771_vm2, %v2754_v13, %v2756_v9  ;;  %v16861_v28 = vld [vmem:[%s24116_s4 + $0x60] sm:$0xff] }
 0x26a   : > { %16813 = vmatmul.mubr.msk.f32.vlgmr.msra.gmra.mrb[20].mxu1 %vm24141_vm4, %v16797_v57  ;;  %v2758_v15 = vpop.permute.xlu0 %2757  ;;  %16810 = vmatmul.mubr.msk.f32.gmra.mrb[22].mxu0 %vm24141_vm4, %v16798_v63 }
 0x26b   : > { %v2773_v16 = vsel %vm2771_vm2, %v2756_v9, %v2758_v15  ;;  %2730 = vmatprep.mubr.f32.mxu1 %v24155_v47  ;;  %2869 = vmatprep.mubr.f32.mxu0 %v24155_v47 }
 0x26c   : > { %16817 = vmatprep.subr.msk.mxu0 %vm1600_vm6, %v2773_v16  ;;  %v2762_v20 = vpop.permute.xlu1 %2761 }
 0x26d   : > { %16818 = vmatpush1.msk.msra.mxu0 %vm1599_vm7, %v2772_v19 }
 0x26e   : > { %16814 = vmatmul.mubr.msk.f32.gmra.mrb[22].mxu1 %vm24141_vm4, %v16798_v63  ;;  %v2760_v24 = vpop.permute.xlu0 %2759  ;;  %16819 = vmatmul.mubr.msk.f32.vlgmr.msra.gmra.mrb[16].mxu0 %vm24141_vm4, %v16815_v17 }
 0x26f   : > { %v2774_v2 = vsel %vm2771_vm2, %v2758_v15, %v2760_v24  ;;  %v2775_v25 = vsel %vm2771_vm2, %v2760_v24, %v2762_v20  ;;  %2875 = vmatprep.mubr.f32.mxu0 %v24155_v47  ;;  %2946 = vmatprep.mubr.f32.mxu1 %v24155_v47 }
 0x270   : > { %16821 = vmatprep.subr.msk.mxu1 %vm1602_vm8, %v2775_v25  ;;  %v2766_v29 = vpop.permute.xlu1 %2765 }
 0x271   : > { %16822 = vmatpush1.msk.msra.mxu1 %vm1601_vm9, %v2774_v2 }
 0x272   : > { %16823 = vmatmul.mubr.msk.f32.vlgmr.msra.gmra.mrb[16].mxu1 %vm24141_vm4, %v16815_v17  ;;  %v2764_v31 = vpop.permute.xlu0 %2763  ;;  %16820 = vmatmul.mubr.msk.f32.gmra.mrb[18].mxu0 %vm24141_vm4, %v16816_v27 }
 0x273   : > { %v2776_v32 = vsel %vm2771_vm2, %v2762_v20, %v2764_v31  ;;  %v2777_v33 = vsel %vm2771_vm2, %v2764_v31, %v2766_v29  ;;  %2952 = vmatprep.mubr.f32.mxu1 %v24155_v47  ;;  %3023 = vmatprep.mubr.f32.mxu0 %v24155_v47  ;;  %v16862_v20 = vld [vmem:[%s24116_s4 + $0x68] sm:$0xff] }
 0x274   : > { %16825 = vmatprep.subr.msk.mxu0 %vm1604_vm10, %v2777_v33  ;;  %v2770_v39 = vpop.permute.xlu1 %2769 }
 0x275   : > { %16826 = vmatpush1.msk.msra.mxu0 %vm1603_vm11, %v2776_v32 }
 0x276   : > { %16824 = vmatmul.mubr.msk.f32.gmra.mrb[18].mxu1 %vm24141_vm4, %v16816_v27  ;;  %v2768_v40 = vpop.permute.xlu0 %2767  ;;  %16827 = vmatmul.mubr.msk.f32.vlgmr.msra.gmra.mrb[20].mxu0 %vm24141_vm4, %v16815_v17 }
 0x277   : > { %v2778_v42 = vsel %vm2771_vm2, %v2766_v29, %v2768_v40  ;;  %3138 = vmatprep.subr.mxu0 %v20313_v21  ;;  %v2779_v43 = vsel %vm2771_vm2, %v2768_v40, %v2770_v39  ;;  %3029 = vmatprep.mubr.f32.mxu0 %v24155_v47  ;;  %vm3498_vm2 = vcmask 1039360  }
 0x278   : > { %3139 = vmatpush1.msra.mxu0 %v20307_v22  ;;  %16829 = vmatprep.subr.msk.mxu1 %vm1606_vm12, %v2779_v43  ;;  %v3485_v44 = vpop.permute.xlu1 %3484  ;;  %v16879_v43 = vld [vmem:[%s24116_s4 + $0x70] sm:$0xff] }
 0x279   : > { %3292 = vmatprep.subr.mxu0 %v20349_v35  ;;  %16830 = vmatpush1.msk.msra.mxu1 %vm1605_vm13, %v2778_v42  ;;  %v16833_v35 = vld [vmem:[%s24116_s4 + $0x40] sm:$0xff] }
 0x27a   : > { %3100 = vmatprep.mubr.f32.mxu1 %v24155_v47  ;;  %3215 = vmatprep.subr.mxu1 %v20317_v18  ;;  %v3483_v21 = vpop.permute.xlu0 %3482 }
 0x27b   : > { %16831 = vmatmul.mubr.msk.f32.vlgmr.msra.gmra.mrb[20].mxu1 %vm24141_vm4, %v16815_v17  ;;  %16828 = vmatmul.mubr.msk.f32.gmra.mrb[22].mxu0 %vm24141_vm4, %v16816_v27 }
 0x27c   : > { %3216 = vmatpush1.msra.mxu1 %v20309_v23  ;;  %v3487_v22 = vpop.permute.xlu1 %3486  ;;  %3106 = vmatprep.mubr.f32.mxu1 %v24155_v47  ;;  %v3500_v23 = vsel %vm3498_vm2, %v3483_v21, %v3485_v44 }
 0x27d   : > { %3369 = vmatprep.subr.mxu1 %v20355_v37  ;;  %3202 = vmatprep.mubr.f32.mxu0 %v24155_v47  ;;  %v3501_v53 = vsel %vm3498_vm2, %v3485_v44, %v3487_v22 }
 0x27e   : > { %v3481_v18 = vpop.permute.xlu0 %3480 }
 0x27f   : > { %16832 = vmatmul.mubr.msk.f32.gmra.mrb[22].mxu1 %vm24141_vm4, %v16816_v27  ;;  %16835 = vmatmul.mubr.msk.f32.vlgmr.msra.gmra.mrb[16].mxu0 %vm24141_vm4, %v16833_v35  ;;  %v3499_v50 = vsel %vm3498_vm2, %v3481_v18, %v3483_v21  ;;  %v16880_v18 = vld [vmem:[%s24116_s4 + $0x78] sm:$0xff] }
 0x280   : > { %3293 = vmatpush1.msra.mxu0 %v20345_v34  ;;  %v3859_v45 = vpop.permute.xlu1 %3858  ;;  %3208 = vmatprep.mubr.f32.mxu0 %v24155_v47 }
 0x281   : > { %16845 = vmatprep.subr.msk.mxu0 %vm1608_vm15, %v3500_v23  ;;  %3279 = vmatprep.mubr.f32.mxu1 %v24155_v47 }
 0x282   : > { %v3489_v37 = vpop.permute.xlu0 %3488 }
 0x283   : > { %16837 = vmatmul.mubr.msk.f32.vlgmr.msra.gmra.mrb[16].mxu1 %vm24141_vm4, %v16833_v35  ;;  %16836 = vmatmul.mubr.msk.f32.gmra.mrb[18].mxu0 %vm24141_vm4, %v16834_v46  ;;  %v3502_v34 = vsel %vm3498_vm2, %v3487_v22, %v3489_v37 }
 0x284   : > { %3370 = vmatpush1.msra.mxu1 %v20351_v36  ;;  %v3857_v48 = vpop.permute.xlu1 %3856  ;;  %3285 = vmatprep.mubr.f32.mxu1 %v24155_v47 }
 0x285   : > { %16849 = vmatprep.subr.msk.mxu1 %vm24140_vm1, %v3502_v34  ;;  %3356 = vmatprep.mubr.f32.mxu0 %v24155_v47  ;;  %vm24246_vm1 = vcmp.lt.s32.totalorder %v20490_v14, 31 }
 0x286   : > { %v3493_v49 = vpop.permute.xlu0 %3492 }
 0x287   : > { %16838 = vmatmul.mubr.msk.f32.gmra.mrb[18].mxu1 %vm24141_vm4, %v16834_v46  ;;  %16839 = vmatmul.mubr.msk.f32.vlgmr.msra.gmra.mrb[20].mxu0 %vm24141_vm4, %v16833_v35 }
 0x288   : > { %16846 = vmatpush1.msk.msra.mxu0 %vm24245_vm14, %v3499_v50  ;;  %v3491_v51 = vpop.permute.xlu1 %3490  ;;  %3362 = vmatprep.mubr.f32.mxu0 %v24155_v47  ;;  %vm3874_vm14 = vcmask 793600  }
 0x289   : > { %3433 = vmatprep.mubr.f32.mxu1 %v24155_v47  ;;  %v3504_v36 = vsel %vm3498_vm2, %v3491_v51, %v3493_v49  ;;  %v3503_v58 = vsel %vm3498_vm2, %v3489_v37, %v3491_v51  ;;  %v3875_v6 = vsel %vm3874_vm14, %v3857_v48, %v3859_v45 }
 0x28a   : > { %v3497_v52 = vpop.permute.xlu0 %3496  ;;  %16853 = vmatprep.subr.msk.mxu0 %vm1612_vm5, %v3504_v36 }
 0x28b   : > { %16841 = vmatmul.mubr.msk.f32.vlgmr.msra.gmra.mrb[20].mxu1 %vm24141_vm4, %v16833_v35  ;;  %16840 = vmatmul.mubr.msk.f32.gmra.mrb[22].mxu0 %vm24141_vm4, %v16834_v46 }
 0x28c   : > { %16850 = vmatpush1.msk.msra.mxu1 %vm24246_vm1, %v3501_v53  ;;  %v3495_v54 = vpop.permute.xlu1 %3494  ;;  %3439 = vmatprep.mubr.f32.mxu1 %v24155_v47  ;;  %vm24247_vm1 = vcmp.lt.s32.totalorder %v20521_v30, 31 }
 0x28d   : > { %3596 = vmatprep.mubr.f32.mxu0 %v24155_v47  ;;  %v3506_v56 = vsel %vm3498_vm2, %v3495_v54, %v3497_v52  ;;  %v3505_v63 = vsel %vm3498_vm2, %v3493_v49, %v3495_v54  ;;  %v16889_v54 = vld [vmem:[%s24116_s4 + $0x80] sm:$0xff] }
 0x28e   : > { %v3861_v57 = vpop.permute.xlu0 %3860  ;;  %16857 = vmatprep.subr.msk.mxu1 %vm1614_vm3, %v3506_v56 }
 0x28f   : > { %16842 = vmatmul.mubr.msk.f32.gmra.mrb[22].mxu1 %vm24141_vm4, %v16834_v46  ;;  %16847 = vmatmul.mubr.msk.f32.vlgmr.msra.gmra.mrb[16].mxu0 %vm24141_vm4, %v16843_v55  ;;  %v3876_v59 = vsel %vm3874_vm14, %v3859_v45, %v3861_v57 }
 0x290   : > { %16854 = vmatpush1.msk.msra.mxu0 %vm24247_vm1, %v3503_v58  ;;  %v3865_v60 = vpop.permute.xlu1 %3864  ;;  %3602 = vmatprep.mubr.f32.mxu0 %v24155_v47  ;;  %v16890_v58 = vld [vmem:[%s24116_s4 + $0x88] sm:$0xff] }
 0x291   : > { %16863 = vmatprep.subr.msk.mxu0 %vm1600_vm6, %v3876_v59  ;;  %3673 = vmatprep.mubr.f32.mxu1 %v24155_v47  ;;  %vm4253_vm6 = vcmask 785408  }
 0x292   : > { %v3863_v62 = vpop.permute.xlu0 %3862 }
 0x293   : > { %16851 = vmatmul.mubr.msk.f32.vlgmr.msra.gmra.mrb[16].mxu1 %vm24141_vm4, %v16843_v55  ;;  %16848 = vmatmul.mubr.msk.f32.gmra.mrb[18].mxu0 %vm24141_vm4, %v16844_v61  ;;  %v3878_v3 = vsel %vm3874_vm14, %v3863_v62, %v3865_v60  ;;  %v3877_v9 = vsel %vm3874_vm14, %v3861_v57, %v3863_v62 }
 0x294   : > { %16858 = vmatpush1.msk.msra.mxu1 %vm1613_vm0, %v3505_v63  ;;  %v3869_v4 = vpop.permute.xlu1 %3868  ;;  %3679 = vmatprep.mubr.f32.mxu1 %v24155_v47 }
 0x295   : > { %16867 = vmatprep.subr.msk.mxu1 %vm1602_vm8, %v3878_v3  ;;  %3750 = vmatprep.mubr.f32.mxu0 %v24155_v47  ;;  %vm24248_vm8 = vcmp.lt.s32.totalorder %v20464_v1, 31 }
 0x296   : > { %v4238_v5 = vpop.permute.xlu0 %4237 }
 0x297   : > { %16852 = vmatmul.mubr.msk.f32.gmra.mrb[18].mxu1 %vm24141_vm4, %v16844_v61  ;;  %16855 = vmatmul.mubr.msk.f32.vlgmr.msra.gmra.mrb[20].mxu0 %vm24141_vm4, %v16843_v55 }
 0x298   : > { %16864 = vmatpush1.msk.msra.mxu0 %vm1599_vm7, %v3875_v6  ;;  %v3873_v7 = vpop.permute.xlu1 %3872  ;;  %3756 = vmatprep.mubr.f32.mxu0 %v24155_v47  ;;  %vm4618_vm7 = vcmask 777216  }
 0x299   : > { %3827 = vmatprep.mubr.f32.mxu1 %v24155_v47 }
 0x29a   : > { %v3867_v8 = vpop.permute.xlu0 %3866 }
 0x29b   : > { %16859 = vmatmul.mubr.msk.f32.vlgmr.msra.gmra.mrb[20].mxu1 %vm24141_vm4, %v16843_v55  ;;  %16856 = vmatmul.mubr.msk.f32.gmra.mrb[22].mxu0 %vm24141_vm4, %v16844_v61  ;;  %v3880_v10 = vsel %vm3874_vm14, %v3867_v8, %v3869_v4  ;;  %v3879_v16 = vsel %vm3874_vm14, %v3865_v60, %v3867_v8 }
 0x29c   : > { %16868 = vmatpush1.msk.msra.mxu1 %vm1601_vm9, %v3877_v9  ;;  %16871 = vmatprep.subr.msk.mxu0 %vm1604_vm10, %v3880_v10  ;;  %v4240_v11 = vpop.permute.xlu1 %4239  ;;  %vm24249_vm9 = vcmp.lt.s32.totalorder %v20483_v12, 31  ;;  %vm24250_vm10 = vcmp.lt.s32.totalorder %v20490_v14, 31 }
 0x29d   : > { %3833 = vmatprep.mubr.f32.mxu1 %v24155_v47  ;;  %3972 = vmatprep.mubr.f32.mxu0 %v24155_v47  ;;  %v4255_v15 = vsel %vm4253_vm6, %v4238_v5, %v4240_v11 }
 0x29e   : > { %v3871_v13 = vpop.permute.xlu0 %3870 }
 0x29f   : > { %16860 = vmatmul.mubr.msk.f32.gmra.mrb[22].mxu1 %vm24141_vm4, %v16844_v61  ;;  %16865 = vmatmul.mubr.msk.f32.vlgmr.msra.gmra.mrb[16].mxu0 %vm24141_vm4, %v16861_v28  ;;  %v3882_v17 = vsel %vm3874_vm14, %v3871_v13, %v3873_v7  ;;  %v3881_v2 = vsel %vm3874_vm14, %v3869_v4, %v3871_v13 }
 0x2a0   : > { %16872 = vmatpush1.msk.msra.mxu0 %vm1603_vm11, %v3879_v16  ;;  %16875 = vmatprep.subr.msk.mxu1 %vm1606_vm12, %v3882_v17  ;;  %v4242_v19 = vpop.permute.xlu1 %4241  ;;  %vm24251_vm11 = vmmov %vm24247_vm1 }
 0x2a1   : > { %4276 = vmatprep.subr.mxu0 %v4255_v15  ;;  %3978 = vmatprep.mubr.f32.mxu0 %v24155_v47  ;;  %v4256_v39 = vsel %vm4253_vm6, %v4240_v11, %v4242_v19 }
 0x2a2   : > { %4049 = vmatprep.mubr.f32.mxu1 %v24155_v47  ;;  %v4236_v24 = vpop.permute.xlu0 %4235 }
 0x2a3   : > { %16869 = vmatmul.mubr.msk.f32.vlgmr.msra.gmra.mrb[16].mxu1 %vm24141_vm4, %v16861_v28  ;;  %16866 = vmatmul.mubr.msk.f32.gmra.mrb[18].mxu0 %vm24141_vm4, %v16862_v20  ;;  %v4254_v29 = vsel %vm4253_vm6, %v4236_v24, %v4238_v5 }
 0x2a4   : > { %16876 = vmatpush1.msk.msra.mxu1 %vm1605_vm13, %v3881_v2  ;;  %v4603_v25 = vpop.permute.xlu1 %4602  ;;  %4055 = vmatprep.mubr.f32.mxu1 %v24155_v47 }
 0x2a5   : > { %4126 = vmatprep.mubr.f32.mxu0 %v24155_v47 }
 0x2a6   : > { %v4244_v27 = vpop.permute.xlu0 %4243 }
 0x2a7   : > { %16870 = vmatmul.mubr.msk.f32.gmra.mrb[18].mxu1 %vm24141_vm4, %v16862_v20  ;;  %16873 = vmatmul.mubr.msk.f32.vlgmr.msra.gmra.mrb[20].mxu0 %vm24141_vm4, %v16861_v28  ;;  %v4257_v31 = vsel %vm4253_vm6, %v4242_v19, %v4244_v27 }
 0x2a8   : > { %4277 = vmatpush1.msra.mxu0 %v4254_v29  ;;  %4353 = vmatprep.subr.mxu1 %v4257_v31  ;;  %v4246_v32 = vpop.permute.xlu1 %4245 }
 0x2a9   : > { %4132 = vmatprep.mubr.f32.mxu0 %v24155_v47  ;;  %4203 = vmatprep.mubr.f32.mxu1 %v24155_v47  ;;  %v4258_v21 = vsel %vm4253_vm6, %v4244_v27, %v4246_v32 }
 0x2aa   : > { %v4248_v33 = vpop.permute.xlu0 %4247 }
 0x2ab   : > { %16877 = vmatmul.mubr.msk.f32.vlgmr.msra.gmra.mrb[20].mxu1 %vm24141_vm4, %v16861_v28  ;;  %16874 = vmatmul.mubr.msk.f32.gmra.mrb[22].mxu0 %vm24141_vm4, %v16862_v20  ;;  %v4259_v40 = vsel %vm4253_vm6, %v4246_v32, %v4248_v33 }
 0x2ac   : > { %4354 = vmatpush1.msra.mxu1 %v4256_v39  ;;  %4430 = vmatprep.subr.mxu0 %v4259_v40  ;;  %v4250_v42 = vpop.permute.xlu1 %4249 }
 0x2ad   : > { %4209 = vmatprep.mubr.f32.mxu1 %v24155_v47  ;;  %4340 = vmatprep.mubr.f32.mxu0 %v24155_v47  ;;  %v4260_v45 = vsel %vm4253_vm6, %v4248_v33, %v4250_v42 }
 0x2ae   : > { %v4252_v44 = vpop.permute.xlu0 %4251 }
 0x2af   : > { %16878 = vmatmul.mubr.msk.f32.gmra.mrb[22].mxu1 %vm24141_vm4, %v16862_v20  ;;  %16881 = vmatmul.mubr.msk.f32.vlgmr.msra.gmra.mrb[16].mxu0 %vm24141_vm4, %v16879_v43  ;;  %v4261_v22 = vsel %vm4253_vm6, %v4250_v42, %v4252_v44 }
 0x2b0   : > { %4431 = vmatpush1.msra.mxu0 %v4258_v21  ;;  %4507 = vmatprep.subr.mxu1 %v4261_v22  ;;  %v4601_v35 = vpop.permute.xlu1 %4600 }
 0x2b1   : > { %4346 = vmatprep.mubr.f32.mxu0 %v24155_v47  ;;  %4417 = vmatprep.mubr.f32.mxu1 %v24155_v47  ;;  %v4619_v48 = vsel %vm4618_vm7, %v4601_v35, %v4603_v25 }
 0x2b2   : > { %v4605_v23 = vpop.permute.xlu0 %4604 }
 0x2b3   : > { %16883 = vmatmul.mubr.msk.f32.vlgmr.msra.gmra.mrb[16].mxu1 %vm24141_vm4, %v16879_v43  ;;  %16882 = vmatmul.mubr.msk.f32.gmra.mrb[18].mxu0 %vm24141_vm4, %v16880_v18  ;;  %v4620_v46 = vsel %vm4618_vm7, %v4603_v25, %v4605_v23 }
 0x2b4   : > { %4508 = vmatpush1.msra.mxu1 %v4260_v45  ;;  %16891 = vmatprep.subr.msk.mxu0 %vm1608_vm15, %v4620_v46  ;;  %v4609_v37 = vpop.permute.xlu1 %4608 }
 0x2b5   : > { %4423 = vmatprep.mubr.f32.mxu1 %v24155_v47  ;;  %4494 = vmatprep.mubr.f32.mxu0 %v24155_v47 }
 0x2b6   : > { %v4607_v34 = vpop.permute.xlu0 %4606 }
 0x2b7   : > { %16884 = vmatmul.mubr.msk.f32.gmra.mrb[18].mxu1 %vm24141_vm4, %v16880_v18  ;;  %16885 = vmatmul.mubr.msk.f32.vlgmr.msra.gmra.mrb[20].mxu0 %vm24141_vm4, %v16879_v43  ;;  %v4622_v49 = vsel %vm4618_vm7, %v4607_v34, %v4609_v37  ;;  %v4621_v36 = vsel %vm4618_vm7, %v4605_v23, %v4607_v34 }
 0x2b8   : > { %16892 = vmatpush1.msk.msra.mxu0 %vm24248_vm8, %v4619_v48  ;;  %16895 = vmatprep.subr.msk.mxu1 %vm24249_vm9, %v4622_v49  ;;  %v4613_v50 = vpop.permute.xlu1 %4612 }
 0x2b9   : > { %4500 = vmatprep.mubr.f32.mxu0 %v24155_v47  ;;  %4571 = vmatprep.mubr.f32.mxu1 %v24155_v47 }
 0x2ba   : > { %v4611_v51 = vpop.permute.xlu0 %4610 }
 0x2bb   : > { %16887 = vmatmul.mubr.msk.f32.vlgmr.msra.gmra.mrb[20].mxu1 %vm24141_vm4, %v16879_v43  ;;  %16886 = vmatmul.mubr.msk.f32.gmra.mrb[22].mxu0 %vm24141_vm4, %v16880_v18  ;;  %v4624_v52 = vsel %vm4618_vm7, %v4611_v51, %v4613_v50  ;;  %v4623_v56 = vsel %vm4618_vm7, %v4609_v37, %v4611_v51 }
 0x2bc   : > { %16896 = vmatpush1.msk.msra.mxu1 %vm24250_vm10, %v4621_v36  ;;  %16899 = vmatprep.subr.msk.mxu0 %vm1612_vm5, %v4624_v52  ;;  %v4617_v53 = vpop.permute.xlu1 %4616 }
 0x2bd   : > { %4577 = vmatprep.mubr.f32.mxu1 %v24155_v47  ;;  %4716 = vmatprep.mubr.f32.mxu0 %v24155_v47 }
 0x2be   : > { %v4615_v55 = vpop.permute.xlu0 %4614 }
 0x2bf   : > { %16888 = vmatmul.mubr.msk.f32.gmra.mrb[22].mxu1 %vm24141_vm4, %v16880_v18  ;;  %16893 = vmatmul.mubr.msk.f32.vlgmr.msra.gmra.mrb[16].mxu0 %vm24141_vm4, %v16889_v54  ;;  %v4626_v57 = vsel %vm4618_vm7, %v4615_v55, %v4617_v53  ;;  %v4625_v59 = vsel %vm4618_vm7, %v4613_v50, %v4615_v55 }
 0x2c0   : > { %16900 = vmatpush1.msk.msra.mxu0 %vm24251_vm11, %v4623_v56  ;;  %16903 = vmatprep.subr.msk.mxu1 %vm1614_vm3, %v4626_v57 }
 0x2c1   : > { %4722 = vmatprep.mubr.f32.mxu0 %v24155_v47  ;;  %4793 = vmatprep.mubr.f32.mxu1 %v24155_v47 }
 0x2c3   : > { %16894 = vmatmul.mubr.msk.f32.gmra.mrb[18].mxu0 %vm24141_vm4, %v16890_v58  ;;  %16897 = vmatmul.mubr.msk.f32.vlgmr.msra.gmra.mrb[16].mxu1 %vm24141_vm4, %v16889_v54 }
 0x2c4   : > { %16904 = vmatpush1.msk.msra.mxu1 %vm1613_vm0, %v4625_v59  ;;  %4799 = vmatprep.mubr.f32.mxu1 %v24155_v47 }
 0x2c5   : > { %4870 = vmatprep.mubr.f32.mxu0 %v24155_v47 }
 0x2c7   : > { %16898 = vmatmul.mubr.msk.f32.gmra.mrb[18].mxu1 %vm24141_vm4, %v16890_v58  ;;  %16901 = vmatmul.mubr.msk.f32.vlgmr.msra.gmra.mrb[20].mxu0 %vm24141_vm4, %v16889_v54 }
 0x2c8   : > { %4876 = vmatprep.mubr.f32.mxu0 %v24155_v47  ;;  %4947 = vmatprep.mubr.f32.mxu1 %v24155_v47 }
 0x2cb   : > { %16902 = vmatmul.mubr.msk.f32.gmra.mrb[22].mxu0 %vm24141_vm4, %v16890_v58  ;;  %16905 = vmatmul.mubr.msk.f32.vlgmr.msra.gmra.mrb[20].mxu1 %vm24141_vm4, %v16889_v54 }
 0x2cc   : > { %4953 = vmatprep.mubr.f32.mxu1 %v24155_v47  ;;  %5417 = vmatprep.mubr.f32.mxu0 %v24155_v47 }
 0x2ce   : > { %v20893_v60 = vpop.permute.xlu1 %4985 }
 0x2cf   : > { %16906 = vmatmul.mubr.msk.f32.gmra.mrb[22].mxu1 %vm24141_vm4, %v16890_v58  ;;  %v20897_v62 = vpop.permute.xlu0 %4980 }
 0x2d0   : > { %5494 = vmatprep.mubr.f32.mxu1 %v24155_v47 }
 0x2d3   : > { %v20895_v61 = vpop.permute.xlu1 %5006 }
 0x2d4   : > { %v20904_v8 = vpop.permute.xlu0 %5011 }
 0x2d8   : > { %v20902_v7 = vpop.permute.xlu1 %5032 }
 0x2da   : > { %v20931_v37 = vpop.permute.xlu0 %5037 }
 0x392   : > { %v4718_v63 = vpop.f32.mrb[16].mxu0 }
 0x393   : > { %v4988_v3 = vadd.f32 %v20897_v62, %v4718_v63  ;;  %v4720_v4 = vpop.f32.mrb[17].mxu0 }
 0x394   : > { %v4989_v5 = vadd.f32 %v20897_v62, %v4720_v4 }
 0x395   : > { %v5014_v6 = vmul.f32 %v20895_v61, %v4988_v3 }
 0x396   : > { %v5015_v9 = vmul.f32 %v20895_v61, %v4989_v5  ;;  %v4724_v10 = vpop.f32.mrb[18].mxu0  ;;  %v4795_v11 = vpop.f32.mrb[16].mxu1 }
 0x397   : > { %v4996_v28 = vadd.f32 %v20893_v60, %v4724_v10  ;;  %v4990_v13 = vadd.f32 %v20897_v62, %v4795_v11  ;;  %v4726_v15 = vpop.f32.mrb[19].mxu0  ;;  %v4797_v16 = vpop.f32.mrb[17].mxu1  ;;  %v5040_v17 = vadd.f32 %v20902_v7, %v5014_v6 }
 0x398   : > { %v4997_v19 = vadd.f32 %v20893_v60, %v4726_v15  ;;  %v4991_v20 = vadd.f32 %v20897_v62, %v4797_v16  ;;  %v5041_v24 = vadd.f32 %v20902_v7, %v5015_v9 }
 0x399   : > { %v20914_v2 = vmul.f32 %v20904_v8, %v4996_v28  ;;  %v5016_v25 = vmul.f32 %v20895_v61, %v4990_v13  ;;  %vm5056_vm12 = vcmp.ge.f32.partialorder %v5040_v17, 0.0  ;;  %v5072_v27 = vmul.f32 0.2, %v5040_v17 }
 0x39a   : > { %v20918_v29 = vmul.f32 %v20904_v8, %v4997_v19  ;;  %v5017_v31 = vmul.f32 %v20895_v61, %v4991_v20  ;;  %v4801_v32 = vpop.f32.mrb[18].mxu1  ;;  %v4872_v33 = vpop.f32.mrb[20].mxu0  ;;  %vm5057_vm13 = vcmp.ge.f32.partialorder %v5041_v24, 0.0  ;;  %v5073_v39 = vmul.f32 0.2, %v5041_v24 }
 0x39b   : > { %v5042_v40 = vadd.f32 %v20902_v7, %v5016_v25  ;;  %v4998_v42 = vadd.f32 %v20893_v60, %v4801_v32  ;;  %v4992_v43 = vadd.f32 %v20897_v62, %v4872_v33  ;;  %v4803_v44 = vpop.f32.mrb[19].mxu1  ;;  %v4874_v21 = vpop.f32.mrb[21].mxu0  ;;  %v20924_v22 = vsel %vm5056_vm12, %v5040_v17, %v5072_v27 }
 0x39c   : > { %v5043_v35 = vadd.f32 %v20902_v7, %v5017_v31  ;;  %v4999_v18 = vadd.f32 %v20893_v60, %v4803_v44  ;;  %v4993_v23 = vadd.f32 %v20897_v62, %v4874_v21  ;;  %v20929_v45 = vsel %vm5057_vm13, %v5041_v24, %v5073_v39 }
 0x39d   : > { %vm5058_vm15 = vcmp.ge.f32.partialorder %v5042_v40, 0.0  ;;  %v5074_v46 = vmul.f32 0.2, %v5042_v40  ;;  %v5024_v34 = vmul.f32 %v20904_v8, %v4998_v42  ;;  %v5018_v48 = vmul.f32 %v20895_v61, %v4992_v43 }
 0x39e   : > { %vm5059_vm0 = vcmp.ge.f32.partialorder %v5043_v35, 0.0  ;;  %v5075_v49 = vmul.f32 0.2, %v5043_v35  ;;  %v5025_v50 = vmul.f32 %v20904_v8, %v4999_v18  ;;  %v5019_v51 = vmul.f32 %v20895_v61, %v4993_v23  ;;  %v4878_v36 = vpop.f32.mrb[22].mxu0  ;;  %v4949_v52 = vpop.f32.mrb[20].mxu1 }
 0x39f   : > { %v20937_v53 = vsel %vm5058_vm15, %v5042_v40, %v5074_v46  ;;  %v5050_v54 = vadd.f32 %v20931_v37, %v5024_v34  ;;  %v5044_v55 = vadd.f32 %v20902_v7, %v5018_v48  ;;  %v5000_v56 = vadd.f32 %v20893_v60, %v4878_v36  ;;  %v4951_v57 = vpop.f32.mrb[21].mxu1  ;;  %v4880_v58 = vpop.f32.mrb[23].mxu0 }
 0x3a0   : > { %v20942_v59 = vsel %vm5059_vm0, %v5043_v35, %v5075_v49  ;;  %v5051_v63 = vadd.f32 %v20931_v37, %v5025_v50  ;;  %v5045_v3 = vadd.f32 %v20902_v7, %v5019_v51  ;;  %v4994_v4 = vadd.f32 %v20897_v62, %v4949_v52 }
 0x3a1   : > { %vm5066_vm3 = vcmp.ge.f32.partialorder %v5050_v54, 0.0  ;;  %v5082_v5 = vmul.f32 0.2, %v5050_v54  ;;  %vm5060_vm5 = vcmp.ge.f32.partialorder %v5044_v55, 0.0  ;;  %v5076_v6 = vmul.f32 0.2, %v5044_v55 }
 0x3a2   : > { %vm5067_vm2 = vcmp.ge.f32.partialorder %v5051_v63, 0.0  ;;  %v5083_v9 = vmul.f32 0.2, %v5051_v63  ;;  %vm5061_vm14 = vcmp.ge.f32.partialorder %v5045_v3, 0.0  ;;  %v5077_v10 = vmul.f32 0.2, %v5045_v3 }
 0x3a3   : > { %v20947_v11 = vsel %vm5066_vm3, %v5050_v54, %v5082_v5  ;;  %v20949_v28 = vsel %vm5060_vm5, %v5044_v55, %v5076_v6  ;;  %v5026_v13 = vmul.f32 %v20904_v8, %v5000_v56  ;;  %v5020_v15 = vmul.f32 %v20895_v61, %v4994_v4  ;;  %v4955_v16 = vpop.f32.mrb[22].mxu1 }
 0x3a4   : > { %v20953_v17 = vsel %vm5067_vm2, %v5051_v63, %v5083_v9  ;;  %v20955_v19 = vsel %vm5061_vm14, %v5045_v3, %v5077_v10  ;;  %v4995_v20 = vadd.f32 %v20897_v62, %v4951_v57  ;;  %v20960_v24 = vpack.i.bf16 %v20929_v45, %v20924_v22  ;;  %v4957_v25 = vpop.f32.mrb[23].mxu1 }
 0x3a5   : > { %v5052_v27 = vadd.f32 %v20931_v37, %v5026_v13  ;;  %v5046_v31 = vadd.f32 %v20902_v7, %v5020_v15  ;;  %v5001_v32 = vadd.f32 %v20893_v60, %v4880_v58  ;;  %v5002_v33 = vadd.f32 %v20893_v60, %v4955_v16 }
 0x3a6   : > { %v5021_v39 = vmul.f32 %v20895_v61, %v4995_v20  ;;  %18930 = vrot.lane.b32.xlu1 %v20960_v24, %s24220_s19  ;;  %v5003_v62 = vadd.f32 %v20893_v60, %v4957_v25  ;;  %v20972_v40 = vpack.i.bf16 %v20942_v59, %v20937_v53  ;;  %v20986_v46 = vpack.i.bf16 %v20953_v17, %v20947_v11 }
 0x3a7   : > { %vm5068_vm1 = vcmp.ge.f32.partialorder %v5052_v27, 0.0  ;;  %v5084_v42 = vmul.f32 0.2, %v5052_v27  ;;  %vm5062_vm6 = vcmp.ge.f32.partialorder %v5046_v31, 0.0  ;;  %v5078_v43 = vmul.f32 0.2, %v5046_v31 }
 0x3a8   : > { %v5047_v44 = vadd.f32 %v20902_v7, %v5021_v39  ;;  %v5027_v21 = vmul.f32 %v20904_v8, %v5001_v32  ;;  %v5028_v35 = vmul.f32 %v20904_v8, %v5002_v33  ;;  %v5029_v18 = vmul.f32 %v20904_v8, %v5003_v62  ;;  %18935 = vrot.lane.b32.xlu0 %v20972_v40, %s24220_s19 }
 0x3a9   : > { %v20980_v60 = vsel %vm5068_vm1, %v5052_v27, %v5084_v42  ;;  %v20982_v23 = vsel %vm5062_vm6, %v5046_v31, %v5078_v43  ;;  %v5048_v34 = vadd.f32 %v20931_v37, %v20914_v2  ;;  %v5049_v36 = vadd.f32 %v20931_v37, %v20918_v29 }
 0x3aa   : > { %vm5063_vm7 = vcmp.ge.f32.partialorder %v5047_v44, 0.0  ;;  %v5079_v48 = vmul.f32 0.2, %v5047_v44  ;;  %v5053_v49 = vadd.f32 %v20931_v37, %v5027_v21  ;;  %v5054_v50 = vadd.f32 %v20931_v37, %v5028_v35  ;;  %18955 = vrot.lane.b32.xlu1 %v20986_v46, %s24220_s19 }
 0x3ab   : > { %v5055_v51 = vadd.f32 %v20931_v37, %v5029_v18  ;;  %vm5064_vm8 = vcmp.ge.f32.partialorder %v5048_v34, 0.0  ;;  %v5080_v52 = vmul.f32 0.2, %v5048_v34  ;;  %vm5065_vm12 = vcmp.ge.f32.partialorder %v5049_v36, 0.0  ;;  %v18926_v18 = vpop.permute.xlu1 %18925 }
 0x3ac   : > { %v20997_v54 = vsel %vm5063_vm7, %v5047_v44, %v5079_v48  ;;  %vm5069_vm9 = vcmp.ge.f32.partialorder %v5053_v49, 0.0  ;;  %v5085_v2 = vmul.f32 0.2, %v5053_v49  ;;  %vm5070_vm10 = vcmp.ge.f32.partialorder %v5054_v50, 0.0  ;;  %18940 = vrot.lane.b32.xlu0 %v20960_v24, %s20000_s21 }
 0x3ad   : > { %v5086_v55 = vmul.f32 0.2, %v5054_v50  ;;  %vm5071_vm11 = vcmp.ge.f32.partialorder %v5055_v51, 0.0  ;;  %v5087_v56 = vmul.f32 0.2, %v5055_v51  ;;  %v21003_v63 = vsel %vm5064_vm8, %v5048_v34, %v5080_v52 }
 0x3ae   : > { %v21001_v57 = vsel %vm5069_vm9, %v5053_v49, %v5085_v2  ;;  %v5081_v58 = vmul.f32 0.2, %v5049_v36  ;;  %v18964_v29 = vpack.i.bf16 %v20955_v19, %v20949_v28  ;;  %v18969_v6 = vpack.i.bf16 %v20997_v54, %v20982_v23 }
 0x3af   : > { %v21007_v3 = vsel %vm5070_vm10, %v5054_v50, %v5086_v55  ;;  %v21009_v4 = vsel %vm5071_vm11, %v5055_v51, %v5087_v56  ;;  %v18974_v5 = vpack.i.bf16 %v21001_v57, %v20980_v60  ;;  %v21025_v15 = vpack.i.bf16 %v20937_v53, %v20929_v45 }
 0x3b0   : > { %v21015_v9 = vsel %vm5065_vm12, %v5049_v36, %v5081_v58  ;;  %v18979_v10 = vpack.i.bf16 %v21009_v4, %v21007_v3  ;;  %v21036_v20 = vpack.i.bf16 %v21003_v63, %v20924_v22  ;;  %v21040_v25 = vpack.i.bf16 %v20949_v28, %v20942_v59 }
 0x3b1   : > { %v18959_v13 = vpack.i.bf16 %v21015_v9, %v21003_v63  ;;  %v21032_v16 = vpack.i.bf16 %v20947_v11, %v21015_v9  ;;  %v21044_v27 = vpack.i.bf16 %v20980_v60, %v20953_v17  ;;  %v21048_v31 = vpack.i.bf16 %v20982_v23, %v20955_v19 }
 0x3b2   : > { %v21052_v32 = vpack.i.bf16 %v21007_v3, %v21001_v57  ;;  %vm24142_vm13 = vcmask 523264   ;;  %v18927_v58 = vunpack.i.l.bf16 %v18926_v18  ;;  %vm24143_vm15 = vcmask 539648  }
 0x3b3   : > { %18960 = vrot.lane.b32.xlu1 %v18959_v13, %s20000_s21  ;;  %18945 = vrot.lane.b32.xlu0 %v18959_v13, %s24220_s19  ;;  %vm24252_vm0 = vcmask 130048   ;;  %vm5121_vm5 = vcmp.ge.s32.totalorder %v20462_v0, 2  ;;  %vm5120_vm1 = vcmp.ge.s32.totalorder %v20464_v1, 2  ;;  %vm5123_vm7 = vcmp.ge.s32.totalorder %v20483_v12, 2 }
 0x3b4   : > { %vm24253_vm3 = vmmov %vm24252_vm0  ;;  %vm5122_vm11 = vcmp.ge.s32.totalorder %v20490_v14, 2  ;;  %vm24144_vm12 = vcmask 506880  }
 0x3b5   : > { %vm24254_vm2 = vmmov %vm24252_vm0 }
 0x3b6   : > { %vm21217_vm14 = vmpackc.low %vm5121_vm5, %vm5121_vm5 }
 0x3b7   : > { %18950 = vrot.lane.b32.xlu0 %v24155_v47, %s20000_s21  ;;  %18975 = vrot.lane.b32.xlu1 %v18974_v5, %s24220_s19  ;;  %vm24257_vm6 = vmmov %vm24252_vm0 }
 0x3b8   : > { %vm21253_vm8 = vmpackc.low %vm5120_vm1, %vm5120_vm1  ;;  %vm5129_vm1 = vcmp.lt.s32.totalorder %v20462_v0, 30 }
 0x3b9   : > { %vm24260_vm9 = vmmov %vm24252_vm0 }
 0x3ba   : > { %vm21278_vm10 = vmpackc.low %vm5123_vm7, %vm5123_vm7  ;;  %vm5127_vm7 = vcmp.ge.s32.totalorder %v20537_v38, 2 }
 0x3bb   : > { %18965 = vrot.lane.b32.xlu0 %v18964_v29, %s24220_s19  ;;  %18980 = vrot.lane.b32.xlu1 %v18979_v10, %s24220_s19  ;;  %vm24265_vm5 = vmmov %vm24254_vm2 }
 0x3bf   : > { %18970 = vrot.lane.b32.xlu0 %v18969_v6, %s24220_s19  ;;  %18985 = vrot.lane.b32.xlu1 %v20972_v40, %s20000_s21 }
 0x3c3   : > { %18990 = vrot.lane.b32.xlu0 %v20986_v46, %s20000_s21  ;;  %18995 = vrot.lane.b32.xlu1 %v18964_v29, %s20000_s21 }
 0x3c7   : > { %19010 = vrot.lane.b32.xlu0 %v18959_v13, %s20001_s10  ;;  %19000 = vrot.lane.b32.xlu1 %v18969_v6, %s20000_s21 }
 0x3cb   : > { %19020 = vrot.lane.b32.xlu0 %v18974_v5, %s20000_s21  ;;  %19005 = vrot.lane.b32.xlu1 %v20960_v24, %s20001_s10 }
 0x3cf   : > { %19025 = vrot.lane.b32.xlu0 %v18979_v10, %s20000_s21  ;;  %19015 = vrot.lane.b32.xlu1 %v24155_v47, %s20001_s10 }
 0x3d3   : > { %19030 = vrot.lane.b32.xlu0 %v20972_v40, %s20001_s10  ;;  %19035 = vrot.lane.b32.xlu1 %v20986_v46, %s20001_s10 }
 0x3d7   : > { %19040 = vrot.lane.b32.xlu0 %v18964_v29, %s20001_s10  ;;  %19055 = vrot.lane.b32.xlu1 %v18974_v5, %s20001_s10 }
 0x3db   : > { %19045 = vrot.lane.b32.xlu0 %v18969_v6, %s20001_s10  ;;  %19060 = vrot.lane.b32.xlu1 %v18979_v10, %s20001_s10 }
 0x3df   : > { %19050 = vrot.lane.b32.xlu0 %v20960_v24, %s20002_s13  ;;  %19065 = vrot.lane.b32.xlu1 %v18959_v13, %s20002_s13  ;;  %v21108_v24 = vpack.i.bf16 %v24155_v47, %v20997_v54  ;;  %v18928_v13 = vunpack.i.h.bf16 %v18926_v18 }
 0x3e3   : > { %19070 = vrot.lane.b32.xlu0 %v24155_v47, %s20002_s13  ;;  %19075 = vrot.lane.b32.xlu1 %v20972_v40, %s20002_s13  ;;  %v21114_v40 = vpack.i.bf16 %v24155_v47, %v21009_v4 }
 0x3e7   : > { %19080 = vrot.lane.b32.xlu0 %v20986_v46, %s20002_s13  ;;  %19085 = vrot.lane.b32.xlu1 %v18964_v29, %s20002_s13 }
 0x3eb   : > { %19090 = vrot.lane.b32.xlu0 %v18974_v5, %s20002_s13  ;;  %19095 = vrot.lane.b32.xlu1 %v18969_v6, %s20002_s13 }
 0x3ef   : > { %19100 = vrot.lane.b32.xlu0 %v18979_v10, %s20002_s13  ;;  %19105 = vrot.lane.b32.xlu1 %v21025_v15, %s20003_s14  ;;  %s24443_s13 = sld [smem:[#allocation39_spill]] }
 0x3f3   : > { %19110 = vrot.lane.b32.xlu0 %v21032_v16, %s20003_s14  ;;  %19115 = vrot.lane.b32.xlu1 %v21036_v20, %s20003_s14 }
 0x3f7   : > { %19120 = vrot.lane.b32.xlu0 %v21040_v25, %s20003_s14  ;;  %19125 = vrot.lane.b32.xlu1 %v21044_v27, %s20003_s14 }
 0x3fb   : > { %19130 = vrot.lane.b32.xlu0 %v21048_v31, %s20003_s14  ;;  %19145 = vrot.lane.b32.xlu1 %v21032_v16, %s20000_s21 }
 0x3ff   : > { %19135 = vrot.lane.b32.xlu0 %v21108_v24, %s20003_s14  ;;  %19155 = vrot.lane.b32.xlu1 %v21052_v32, %s20003_s14 }
 0x403   : > { %19140 = vrot.lane.b32.xlu0 %v21025_v15, %s20000_s21  ;;  %19160 = vrot.lane.b32.xlu1 %v21114_v40, %s20003_s14 }
 0x407   : > { %19150 = vrot.lane.b32.xlu0 %v21036_v20, %s20000_s21  ;;  %19165 = vrot.lane.b32.xlu1 %v21040_v25, %s20000_s21 }
 0x40b   : > { %19170 = vrot.lane.b32.xlu0 %v21044_v27, %s20000_s21  ;;  %19175 = vrot.lane.b32.xlu1 %v21048_v31, %s20000_s21 }
 0x40f   : > { %19190 = vrot.lane.b32.xlu0 %v21032_v16, %s24220_s19  ;;  %19180 = vrot.lane.b32.xlu1 %v21108_v24, %s20000_s21 }
 0x413   : > { %19200 = vrot.lane.b32.xlu0 %v21052_v32, %s20000_s21  ;;  %19185 = vrot.lane.b32.xlu1 %v21025_v15, %s24220_s19 }
 0x417   : > { %19205 = vrot.lane.b32.xlu0 %v21114_v40, %s20000_s21  ;;  %19195 = vrot.lane.b32.xlu1 %v21036_v20, %s24220_s19  ;;  %s20007_s21 = smov 8  }
 0x418   : > { %v18931_v46 = vpop.permute.xlu1 %18930 }
 0x419   : > { %v18933_v29 = vunpack.i.h.bf16 %v18931_v46  ;;  %v18932_v5 = vunpack.i.l.bf16 %v18931_v46 }
 0x41a   : > { %v18936_v34 = vpop.permute.xlu0 %18935 }
 0x41b   : > { %19210 = vrot.lane.b32.xlu0 %v21040_v25, %s24220_s19  ;;  %19215 = vrot.lane.b32.xlu1 %v21044_v27, %s24220_s19  ;;  %v18938_v48 = vunpack.i.h.bf16 %v18936_v34  ;;  %v18937_v49 = vunpack.i.l.bf16 %v18936_v34  ;;  %v5315_v35 = vsel %vm24142_vm13, %v18927_v58, %v18932_v5  ;;  %v5316_v46 = vsel %vm24142_vm13, %v18932_v5, %v18933_v29 }
 0x41c   : > { %v18956_v50 = vpop.permute.xlu1 %18955 }
 0x41d   : > { %v18958_v51 = vunpack.i.h.bf16 %v18956_v50  ;;  %v18957_v36 = vunpack.i.l.bf16 %v18956_v50  ;;  %v5318_v2 = vsel %vm24142_vm13, %v18937_v49, %v18938_v48 }
 0x41e   : > { %v21147_v52 = vpop.permute.xlu0 %18940 }
 0x41f   : > { %19220 = vrot.lane.b32.xlu0 %v21048_v31, %s24220_s19  ;;  %19235 = vrot.lane.b32.xlu1 %v21052_v32, %s24220_s19  ;;  %v5326_v55 = vsel %vm24142_vm13, %v18957_v36, %v18958_v51 }
 0x420   : > { %v17755_v56 = vpack.c.bf16 %v5326_v55, %v5318_v2  ;;  %v5317_v2 = vsel %vm24142_vm13, %v18933_v29, %v18937_v49 }
 0x422   : > { %17756 = vmatprep.subr.bf16.mxu1 %v17755_v56 }
 0x423   : > { %19225 = vrot.lane.b32.xlu0 %v21108_v24, %s24220_s19  ;;  %19240 = vrot.lane.b32.xlu1 %v21114_v40, %s24220_s19  ;;  %s20009_s19 = smov [#allocation10]  }
 0x424   : > { %s19914_s0 = sshll.u32 %s20009_s19, 4  ;;  %s19915_s0 = int_to_ptr.vmem [resolvable:$false] %s19914_s0 }
 0x425   : > { %v21155_v6 = vpop.permute.xlu1 %18960  ;;  %v18946_v10 = vpop.permute.xlu0 %18945 }
 0x426   : > { %v18948_v34 = vunpack.i.h.bf16 %v18946_v10  ;;  %v18947_v50 = vunpack.i.l.bf16 %v18946_v10 }
 0x427   : > { %19230 = vrot.lane.b32.xlu0 %v21025_v15, %s20001_s10  ;;  %19245 = vrot.lane.b32.xlu1 %v21032_v16, %s20001_s10  ;;  %v18963_v15 = vunpack.i.h.bf16 %v21155_v6  ;;  %v18962_v16 = vunpack.i.l.bf16 %v21155_v6 }
 0x428   : > { %v5325_v55 = vsel %vm24142_vm13, %v18948_v34, %v18957_v36  ;;  %v5323_v56 = vsel %vm24142_vm13, %v18928_v13, %v18947_v50  ;;  %v5324_v18 = vsel %vm24142_vm13, %v18947_v50, %v18948_v34 }
 0x429   : > { %v18951_v21 = vpop.permute.xlu0 %18950  ;;  %v21167_v10 = vpop.permute.xlu1 %18975  ;;  %v17751_v58 = vpack.c.bf16 %v5324_v18, %v5316_v46  ;;  %v17757_v44 = vpack.c.bf16 %v5325_v55, %v5317_v2  ;;  %v17753_v43 = vpack.c.bf16 %v5323_v56, %v5315_v35  ;;  %v21180_v35 = vld [vmem:[%s24118_s6 + $0x10] sm:$0xff] }
 0x42a   : > { %v18977_v5 = vunpack.i.l.bf16 %v21167_v10  ;;  %v18978_v49 = vunpack.i.h.bf16 %v21167_v10  ;;  %v18953_v55 = vunpack.i.h.bf16 %v18951_v21  ;;  %v18952_v56 = vunpack.i.l.bf16 %v18951_v21 }
 0x42b   : > { %17752 = vmatprep.subr.bf16.mxu0 %v17751_v58  ;;  %17758 = vmatpush1.bf16.msra.mxu1 %v17757_v44  ;;  %v18943_v44 = vunpack.i.h.bf16 %v21147_v52 }
 0x42c   : > { %19250 = vrot.lane.b32.xlu0 %v21036_v20, %s20001_s10  ;;  %19255 = vrot.lane.b32.xlu1 %v21040_v25, %s20001_s10  ;;  %v18942_v20 = vunpack.i.l.bf16 %v21147_v52  ;;  %v5234_v25 = vsel %vm24143_vm15, %v18962_v16, %v18963_v15  ;;  %v5328_v2 = vsel %vm24142_vm13, %v18977_v5, %v18978_v49 }
 0x42d   : > { %17754 = vmatpush1.bf16.msra.mxu0 %v17753_v43  ;;  %v18966_v36 = vpop.permute.xlu0 %18965  ;;  %v18981_v29 = vpop.permute.xlu1 %18980  ;;  %v5327_v43 = vsel %vm24142_vm13, %v18958_v51, %v18977_v5 }
 0x42e   : > { %v18968_v13 = vunpack.i.h.bf16 %v18966_v36  ;;  %v18967_v34 = vunpack.i.l.bf16 %v18966_v36  ;;  %16911 = vmatmul.mubr.msk.f32.vlgmr.msra.gmra.mrb[8].mxu1 %vm24252_vm0, %v21180_v35  ;;  %v18983_v58 = vunpack.i.h.bf16 %v18981_v29  ;;  %v18982_v5 = vunpack.i.l.bf16 %v18981_v29  ;;  %vm21296_vm0 = vmpackc.low %vm5122_vm11, %vm5122_vm11 }
 0x42f   : > { %5500 = vmatprep.mubr.f32.mxu1 %v24155_v47  ;;  %vm24269_vm11 = vmmov %vm24265_vm5 }
 0x430   : > { %v5319_v50 = vsel %vm24142_vm13, %v18938_v48, %v18967_v34  ;;  %16909 = vmatmul.mubr.msk.f32.vlgmr.msra.gmra.mrb[8].mxu0 %vm24253_vm3, %v21180_v35  ;;  %19260 = vrot.lane.b32.xlu0 %v21044_v27, %s20001_s10  ;;  %v5320_v46 = vsel %vm24142_vm13, %v18967_v34, %v18968_v13  ;;  %v21207_v27 = vld [vmem:[%s24118_s6 + $0x18] sm:$0xff]  ;;  %v5329_v39 = vsel %vm24142_vm13, %v18978_v49, %v18982_v5  ;;  %vm5125_vm3 = vcmp.ge.s32.totalorder %v20513_v26, 2 }
 0x431   : > { %19265 = vrot.lane.b32.xlu1 %v21048_v31, %s20001_s10  ;;  %v18971_v51 = vpop.permute.xlu0 %18970  ;;  %v21201_v18 = vpop.permute.xlu1 %18985  ;;  %5423 = vmatprep.mubr.f32.mxu0 %v24155_v47  ;;  %v17759_v48 = vpack.c.bf16 %v5328_v2, %v5320_v46  ;;  %v17761_v10 = vpack.c.bf16 %v5327_v43, %v5319_v50  ;;  %v5226_v31 = vsel %vm24143_vm15, %v18942_v20, %v18943_v44 }
 0x432   : > { %v18973_v36 = vunpack.i.h.bf16 %v18971_v51  ;;  %v18972_v34 = vunpack.i.l.bf16 %v18971_v51  ;;  %16912 = vmatmul.mubr.msk.f32.gmra.mrb[10].mxu1 %vm24254_vm2, %v21207_v27  ;;  %v18988_v43 = vunpack.i.h.bf16 %v21201_v18  ;;  %v18987_v50 = vunpack.i.l.bf16 %v21201_v18 }
 0x433   : > { %17760 = vmatprep.subr.bf16.mxu0 %v17759_v48  ;;  %5648 = vmatprep.mubr.f32.mxu1 %v24155_v47  ;;  %v17767_v46 = vpack.c.bf16 %v5234_v25, %v5226_v31  ;;  %v5233_v2 = vsel %vm24143_vm15, %v18953_v55, %v18962_v16  ;;  %v5225_v51 = vsel %vm24143_vm15, %v18952_v56, %v18942_v20  ;;  %vm5124_vm2 = vcmp.ge.s32.totalorder %v20521_v30, 2 }
 0x434   : > { %v5321_v29 = vsel %vm24142_vm13, %v18968_v13, %v18972_v34  ;;  %16910 = vmatmul.mubr.msk.f32.gmra.mrb[10].mxu0 %vm24257_vm6, %v21207_v27  ;;  %19270 = vrot.lane.b32.xlu0 %v21052_v32, %s20001_s10  ;;  %v5322_v42 = vsel %vm24142_vm13, %v18972_v34, %v18973_v36  ;;  %v5330_v20 = vsel %vm24142_vm13, %v18982_v5, %v18983_v58  ;;  %v1128_v5 = vld [vmem:[%s24121_s9 + $0x8] sm:$0xff]  ;;  %v8849_v34 = vld [vmem:[%s24119_s7] sm:$0xff]  ;;  %vm24266_vm6 = vmmov %vm24265_vm5 }
 0x435   : > { %19275 = vrot.lane.b32.xlu1 %v21108_v24, %s20001_s10  ;;  %17762 = vmatpush1.bf16.msra.mxu0 %v17761_v10  ;;  %v21234_v13 = vpop.permute.xlu0 %18990  ;;  %v21236_v48 = vpop.permute.xlu1 %18995  ;;  %v1127_v24 = vld [vmem:[%s24121_s9] sm:$0xff]  ;;  %v17763_v25 = vpack.c.bf16 %v5330_v20, %v5322_v42  ;;  %v17765_v55 = vpack.c.bf16 %v5329_v39, %v5321_v29  ;;  %v17770_v56 = vpack.c.bf16 %v5233_v2, %v5225_v51  ;;  %vm24278_vm13 = vmmov %vm24266_vm6 }
 0x436   : > { %v18993_v32 = vunpack.i.h.bf16 %v21234_v13  ;;  %v18992_v16 = vunpack.i.l.bf16 %v21234_v13  ;;  %17769 = vmatprep.subr.msk.bf16.mxu0 %vm21217_vm14, %v17767_v46  ;;  %5571 = vmatprep.mubr.f32.mxu0 %v24155_v47  ;;  %v5228_v10 = vsel %vm24143_vm15, %v18987_v50, %v18988_v43  ;;  %v18997_v29 = vunpack.i.l.bf16 %v21236_v48  ;;  %v8850_v13 = vld [vmem:[%s24119_s7 + $0x8] sm:$0xff] }
 0x437   : > { %17764 = vmatprep.subr.bf16.mxu1 %v17763_v25  ;;  %v18998_v46 = vunpack.i.h.bf16 %v21236_v48  ;;  %v21320_v25 = vld [vmem:[%s24118_s6] sm:$0xff] }
 0x438   : > { %v5235_v36 = vsel %vm24143_vm15, %v18963_v15, %v18992_v16  ;;  %v5236_v58 = vsel %vm24143_vm15, %v18992_v16, %v18993_v32  ;;  %19280 = vrot.lane.b32.xlu0 %v21114_v40, %s20001_s10  ;;  %16913 = vmatmul.mubr.msk.f32.vlgmr.msra.gmra.mrb[12].mxu0 %vm24260_vm9, %v21180_v35  ;;  %v5227_v40 = vsel %vm24143_vm15, %v18943_v44, %v18987_v50  ;;  %vm21340_vm9 = vmpackc.low %vm5125_vm3, %vm5125_vm3  ;;  %vm5126_vm3 = vcmp.ge.s32.totalorder %v20544_v41, 2  ;;  %s20008_s10 = smov 120  }
 0x439   : > { %1131 = vperm.xlu1 %18923, %v1127_v24   ;;  %v21268_v39 = vpop.permute.xlu0 %19010  ;;  %v21270_v42 = vpop.permute.xlu1 %19000  ;;  %v17773_v6 = vpack.c.bf16 %v5236_v58, %v5228_v10  ;;  %17772 = vmatpush1.bf16.msk.msra.mxu0 %vm21253_vm8, %v17770_v56  ;;  %v17776_v31 = vpack.c.bf16 %v5235_v36, %v5227_v40  ;;  %v5230_v10 = vsel %vm24143_vm15, %v18997_v29, %v18998_v46  ;;  %vm21398_vm4 = vmpackc.low %vm5126_vm3, %vm5126_vm3 }
 0x43a   : > { %17766 = vmatpush1.bf16.msra.mxu1 %v17765_v55  ;;  %5577 = vmatprep.mubr.f32.mxu0 %v24155_v47  ;;  %v19013_v44 = vunpack.i.h.bf16 %v21268_v39  ;;  %v19012_v50 = vunpack.i.l.bf16 %v21268_v39  ;;  %v5229_v55 = vsel %vm24143_vm15, %v18988_v43, %v18997_v29  ;;  %v19003_v56 = vunpack.i.h.bf16 %v21270_v42 }
 0x43b   : > { %17775 = vmatprep.subr.msk.bf16.mxu1 %vm21278_vm10, %v17773_v6 }
 0x43c   : > { %1136 = vperm.xlu0 %18922, %v1128_v5   ;;  %16914 = vmatmul.mubr.msk.f32.gmra.mrb[14].mxu0 %vm24265_vm5, %v21207_v27  ;;  %vm21352_vm5 = vmpackc.low %vm5124_vm2, %vm5124_vm2 }
 0x43d   : > { %8853 = vperm.xlu1 %18923, %v8849_v34   ;;  %v19021_v2 = vpop.permute.xlu0 %19020  ;;  %v21305_v51 = vpop.permute.xlu1 %19005  ;;  %16915 = vmatmul.mubr.msk.f32.vlgmr.msra.gmra.mrb[12].mxu1 %vm24266_vm6, %v21180_v35  ;;  %v19002_v35 = vunpack.i.l.bf16 %v21270_v42  ;;  %v6037_v42 = vsel %vm24144_vm12, %v19012_v50, %v19013_v44  ;;  %vm21368_vm2 = vmpackc.low %vm5129_vm1, %vm5129_vm1 }
 0x43e   : > { %v19023_v48 = vunpack.i.h.bf16 %v19021_v2  ;;  %v19022_v16 = vunpack.i.l.bf16 %v19021_v2  ;;  %v19008_v24 = vunpack.i.h.bf16 %v21305_v51  ;;  %v19007_v20 = vunpack.i.l.bf16 %v21305_v51  ;;  %5731 = vmatprep.mubr.f32.mxu0 %v24155_v47  ;;  %17778 = vmatpush1.bf16.msk.msra.mxu1 %vm21296_vm0, %v17776_v31  ;;  %vm21387_vm1 = vmpackc.low %vm5127_vm7, %vm5127_vm7 }
 0x43f   : > { %5654 = vmatprep.mubr.f32.mxu1 %v24155_v47  ;;  %vm5131_vm7 = vcmp.lt.s32.totalorder %v20483_v12, 30  ;;  %v24282_v51 = vmov 0 }
 0x440   : > { %v5237_v36 = vsel %vm24143_vm15, %v18993_v32, %v19022_v16  ;;  %v5238_v58 = vsel %vm24143_vm15, %v19022_v16, %v19023_v48  ;;  %v6029_v18 = vsel %vm24144_vm12, %v19007_v20, %v19008_v24  ;;  %8858 = vperm.xlu0 %18922, %v8850_v13   ;;  %16921 = vmatmul.mubr.msk.f32.vlgmr.msra.gmra.mrb[8].mxu0 %vm24269_vm11, %v21320_v25  ;;  %v21363_v16 = vld [vmem:[%s24118_s6 + $0x8] sm:$0xff]  ;;  %vm5128_vm11 = vcmp.lt.s32.totalorder %v20464_v1, 30 }
 0x441   : > { %v17782_v5 = vpack.c.bf16 %v5237_v36, %v5229_v55  ;;  %v19026_v32 = vpop.permute.xlu0 %19025  ;;  %v19016_v6 = vpop.permute.xlu1 %19015  ;;  %v17779_v40 = vpack.c.bf16 %v5238_v58, %v5230_v10  ;;  %16916 = vmatmul.mubr.msk.f32.gmra.mrb[14].mxu1 %vm24266_vm6, %v21207_v27  ;;  %5737 = vmatprep.mubr.f32.mxu0 %v24155_v47  ;;  %v24272_v55 = vmov 0  ;;  %v5231_v27 = vsel %vm24143_vm15, %v18998_v46, %v19002_v35  ;;  %vm21412_vm3 = vmpackc.low %vm5128_vm11, %vm5128_vm11 }
 0x442   : > { %v19028_v31 = vunpack.i.h.bf16 %v19026_v32  ;;  %v19027_v29 = vunpack.i.l.bf16 %v19026_v32  ;;  %v19018_v2 = vunpack.i.h.bf16 %v19016_v6  ;;  %v19017_v13 = vunpack.i.l.bf16 %v19016_v6  ;;  %5808 = vmatprep.mubr.f32.mxu1 %v24155_v47  ;;  %vm21431_vm11 = vmpackc.low %vm5131_vm7, %vm5131_vm7 }
 0x443   : > { %v24273_v55 = vsel %vm21368_vm2, 4294967295, %v24272_v55  ;;  %v5232_v10 = vsel %vm24143_vm15, %v19002_v35, %v19003_v56  ;;  %17781 = vmatprep.subr.msk.bf16.mxu0 %vm21340_vm9, %v17779_v40  ;;  %v17791_v36 = vpack.c.bf16 %v6037_v42, %v6029_v18  ;;  %v24283_v51 = vsel %vm21431_vm11, 4294967295, %v24282_v51 }
 0x444   : > { %v5239_v58 = vsel %vm24143_vm15, %v19023_v48, %v19027_v29  ;;  %v5240_v32 = vsel %vm24143_vm15, %v19027_v29, %v19028_v31  ;;  %v6036_v6 = vsel %vm24144_vm12, %v19018_v2, %v19012_v50  ;;  %v6028_v62 = vsel %vm24144_vm12, %v19017_v13, %v19007_v20  ;;  %17784 = vmatpush1.bf16.msk.msra.mxu0 %vm21352_vm5, %v17782_v5 }
 0x445   : > { %v17788_v56 = vpack.c.bf16 %v5239_v58, %v5231_v27  ;;  %v17794_v35 = vpack.c.bf16 %v6036_v6, %v6028_v62  ;;  %16922 = vmatmul.mubr.msk.f32.gmra.mrb[10].mxu0 %vm24266_vm6, %v21363_v16  ;;  %v19031_v48 = vpop.permute.xlu0 %19030  ;;  %v19036_v18 = vpop.permute.xlu1 %19035  ;;  %17793 = vmatprep.subr.msk.bf16.mxu0 %vm21368_vm2, %v17791_v36  ;;  %v17785_v50 = vpack.c.bf16 %v5240_v32, %v5232_v10  ;;  %v24276_v20 = vmov 0 }
 0x446   : > { %v24277_v20 = vsel %vm21398_vm4, 4294967295, %v24276_v20  ;;  %16927 = vmatmul.mubr.msk.f32.vlgmr.msra.gmra.mrb[8].mxu1 %vm24278_vm13, %v21320_v25  ;;  %v19033_v62 = vunpack.i.h.bf16 %v19031_v48  ;;  %v19032_v42 = vunpack.i.l.bf16 %v19031_v48  ;;  %v19038_v5 = vunpack.i.h.bf16 %v19036_v18  ;;  %5885 = vmatprep.mubr.f32.mxu0 %v24155_v47  ;;  %vm24281_vm13 = vmmov %vm24266_vm6 }
 0x447   : > { %v19037_v40 = vunpack.i.l.bf16 %v19036_v18  ;;  %5814 = vmatprep.mubr.f32.mxu1 %v24155_v47  ;;  %17787 = vmatprep.subr.msk.bf16.mxu1 %vm21387_vm1, %v17785_v50  ;;  %v24279_v31 = vmov 0  ;;  %vm24292_vm7 = vcmask 130048  }
 0x448   : > { %v24280_v31 = vsel %vm21412_vm3, 4294967295, %v24279_v31  ;;  %v6030_v29 = vsel %vm24144_vm12, %v19008_v24, %v19032_v42  ;;  %v6031_v2 = vsel %vm24144_vm12, %v19032_v42, %v19033_v62  ;;  %17790 = vmatpush1.bf16.msk.msra.mxu1 %vm21398_vm4, %v17788_v56  ;;  %vm6445_vm4 = vcmask 15360  }
 0x449   : > { %v6038_v13 = vsel %vm24144_vm12, %v19013_v44, %v19037_v40  ;;  %v6039_v27 = vsel %vm24144_vm12, %v19037_v40, %v19038_v5  ;;  %16933 = vmatmul.mubr.msk.f32.vlgmr.msra.gmra.mrb[12].mxu0 %vm24281_vm13, %v21320_v25  ;;  %v19041_v10 = vpop.permute.xlu0 %19040  ;;  %v19056_v36 = vpop.permute.xlu1 %19055  ;;  %vm24284_vm12 = vmmov %vm24266_vm6  ;;  %vm24285_vm13 = vcmask 506880  }
 0x44a   : > { %v17797_v58 = vpack.c.bf16 %v6039_v27, %v6031_v2  ;;  %16928 = vmatmul.mubr.msk.f32.gmra.mrb[10].mxu1 %vm24284_vm12, %v21363_v16  ;;  %17796 = vmatpush1.bf16.msk.msra.mxu0 %vm21412_vm3, %v17794_v35  ;;  %v19043_v39 = vunpack.i.h.bf16 %v19041_v10  ;;  %v19042_v44 = vunpack.i.l.bf16 %v19041_v10  ;;  %v19058_v24 = vunpack.i.h.bf16 %v19056_v36  ;;  %vm24286_vm15 = vmmov %vm24285_vm13 }
 0x44b   : > { %v19057_v32 = vunpack.i.l.bf16 %v19056_v36  ;;  %v17800_v6 = vpack.c.bf16 %v6038_v13, %v6030_v29  ;;  %5891 = vmatprep.mubr.f32.mxu0 %v24155_v47  ;;  %5962 = vmatprep.mubr.f32.mxu1 %v24155_v47  ;;  %vm24287_vm6 = vmmov %vm24285_vm13  ;;  %vm24289_vm3 = vcmp.lt.s32.totalorder %v20490_v14, 30  ;;  %v24290_v35 = vmov 0  ;;  %v21473_v36 = vld [vmem:[%s24118_s6 + $0x20] sm:$0xff] }
 0x44c   : > { %v6032_v56 = vsel %vm24285_vm13, %v19033_v62, %v19042_v44  ;;  %v6033_v48 = vsel %vm24286_vm15, %v19042_v44, %v19043_v39  ;;  %vm24288_vm12 = vmmov %vm24287_vm6  ;;  %17799 = vmatprep.subr.msk.bf16.mxu1 %vm21431_vm11, %v17797_v58  ;;  %vm24293_vm15 = vcmp.lt.s32.totalorder %v20513_v26, 30 }
 0x44d   : > { %v6040_v18 = vsel %vm24287_vm6, %v19038_v5, %v19057_v32  ;;  %v6041_v50 = vsel %vm24288_vm12, %v19057_v32, %v19058_v24  ;;  %vm21453_vm2 = vmpackc.low %vm24289_vm3, %vm24289_vm3  ;;  %16934 = vmatmul.mubr.msk.f32.gmra.mrb[14].mxu0 %vm24292_vm7, %v21363_v16  ;;  %v19046_v62 = vpop.permute.xlu0 %19045  ;;  %v19061_v40 = vpop.permute.xlu1 %19060  ;;  %v24294_v5 = vmov 0 }
 0x44e   : > { %v24291_v35 = vsel %vm21453_vm2, 4294967295, %v24290_v35  ;;  %v17806_v42 = vpack.c.bf16 %v6040_v18, %v6032_v56  ;;  %v17803_v29 = vpack.c.bf16 %v6041_v50, %v6033_v48  ;;  %vm21462_vm6 = vmpackc.low %vm24293_vm15, %vm24293_vm15  ;;  %v19048_v2 = vunpack.i.h.bf16 %v19046_v62  ;;  %6149 = vmatprep.mubr.f32.mxu0 %v24155_v47 }
 0x44f   : > { %v24295_v5 = vsel %vm21462_vm6, 4294967295, %v24294_v5  ;;  %vm24296_vm3 = vmmov %vm24292_vm7  ;;  %v19047_v13 = vunpack.i.l.bf16 %v19046_v62  ;;  %v19063_v27 = vunpack.i.h.bf16 %v19061_v40  ;;  %v19062_v10 = vunpack.i.l.bf16 %v19061_v40 }
 0x450   : > { %16939 = vmatmul.mubr.msk.f32.vlgmr.msra.gmra.mrb[12].mxu1 %vm24296_vm3, %v21320_v25  ;;  %vm24297_vm7 = vcmp.lt.s32.totalorder %v20521_v30, 30  ;;  %vm24300_vm15 = vmmov %vm24285_vm13  ;;  %17805 = vmatprep.subr.msk.bf16.mxu0 %vm21462_vm6, %v17803_v29  ;;  %v21508_v29 = vld [vmem:[%s24118_s6 + $0x28] sm:$0xff] }
 0x451   : > { %17802 = vmatpush1.bf16.msk.msra.mxu1 %vm21453_vm2, %v17800_v6  ;;  %5968 = vmatprep.mubr.f32.mxu1 %v24155_v47  ;;  %vm21481_vm12 = vmpackc.low %vm24297_vm7, %vm24297_vm7  ;;  %v6034_v58 = vsel %vm24300_vm15, %v19043_v39, %v19047_v13  ;;  %vm24304_vm2 = vcmask 130048   ;;  %v19051_v6 = vpop.permute.xlu0 %19050  ;;  %v19066_v48 = vpop.permute.xlu1 %19065  ;;  %vm24305_vm7 = vcmp.lt.s32.totalorder %v20537_v38, 30 }
 0x452   : > { %vm24301_vm3 = vmmov %vm24285_vm13  ;;  %16947 = vmatmul.mubr.msk.f32.vlgmr.msra.gmra.mrb[8].mxu0 %vm24304_vm2, %v21473_v36  ;;  %v19052_v50 = vunpack.i.l.bf16 %v19051_v6  ;;  %v19068_v62 = vunpack.i.h.bf16 %v19066_v48  ;;  %v19067_v40 = vunpack.i.l.bf16 %v19066_v48 }
 0x453   : > { %v6035_v44 = vsel %vm24301_vm3, %v19047_v13, %v19048_v2  ;;  %vm24302_vm13 = vmmov %vm24301_vm3  ;;  %17808 = vmatpush1.bf16.msk.msra.mxu0 %vm21481_vm12, %v17806_v42  ;;  %6155 = vmatprep.mubr.f32.mxu0 %v24155_v47 }
 0x454   : > { %v6042_v32 = vsel %vm24302_vm13, %v19058_v24, %v19062_v10  ;;  %vm24303_vm11 = vmmov %vm24301_vm3  ;;  %vm5134_vm13 = vcmp.lt.s32.totalorder %v20544_v41, 30  ;;  %v19053_v24 = vunpack.i.h.bf16 %v19051_v6  ;;  %v24316_v41 = vmov 0.0  }
 0x455   : > { %v6043_v56 = vsel %vm24303_vm11, %v19062_v10, %v19063_v27  ;;  %vm21496_vm15 = vmpackc.low %vm24305_vm7, %vm24305_vm7  ;;  %v17812_v2 = vpack.c.bf16 %v6042_v32, %v6034_v58  ;;  %v19071_v27 = vpop.permute.xlu0 %19070  ;;  %v19076_v10 = vpop.permute.xlu1 %19075  ;;  %19285 = vrot.lane.b32.xlu1 %v24316_v41, %s20004_s20 }
 0x456   : > { %v17809_v18 = vpack.c.bf16 %v6043_v56, %v6035_v44  ;;  %vm24308_vm11 = vmmov %vm24304_vm2  ;;  %v6447_v13 = vsel %vm6445_vm4, %v19052_v50, %v19053_v24  ;;  %v19073_v44 = vunpack.i.h.bf16 %v19071_v27  ;;  %v19072_v32 = vunpack.i.l.bf16 %v19071_v27 }
 0x457   : > { %16940 = vmatmul.mubr.msk.f32.gmra.mrb[14].mxu1 %vm24308_vm11, %v21363_v16  ;;  %v6455_v16 = vsel %vm6445_vm4, %v19067_v40, %v19068_v62  ;;  %vm21516_vm2 = vmpackc.low %vm5134_vm13, %vm5134_vm13  ;;  %v19078_v48 = vunpack.i.h.bf16 %v19076_v10 }
 0x458   : > { %6226 = vmatprep.mubr.f32.mxu1 %v24155_v47  ;;  %17811 = vmatprep.subr.msk.bf16.mxu1 %vm21496_vm15, %v17809_v18  ;;  %vm24311_vm3 = vmmov %vm24308_vm11  ;;  %v17815_v58 = vpack.c.bf16 %v6455_v16, %v6447_v13  ;;  %v6446_v56 = vsel %vm6445_vm4, %v19072_v32, %v19052_v50  ;;  %v6454_v6 = vsel %vm6445_vm4, %v19073_v44, %v19067_v40  ;;  %v19077_v18 = vunpack.i.l.bf16 %v19076_v10 }
 0x459   : > { %16948 = vmatmul.mubr.msk.f32.gmra.mrb[10].mxu0 %vm24311_vm3, %v21508_v29  ;;  %vm24312_vm7 = vmmov %vm24311_vm3  ;;  %v17818_v13 = vpack.c.bf16 %v6454_v6, %v6446_v56  ;;  %v19081_v16 = vpop.permute.xlu0 %19080  ;;  %v19086_v27 = vpop.permute.xlu1 %19085 }
 0x45a   : > { %6303 = vmatprep.mubr.f32.mxu0 %v24155_v47  ;;  %17817 = vmatprep.subr.msk.bf16.mxu0 %vm21217_vm14, %v17815_v58  ;;  %vm24313_vm13 = vmmov %vm24311_vm3  ;;  %v19082_v33 = vunpack.i.l.bf16 %v19081_v16  ;;  %v19088_v50 = vunpack.i.h.bf16 %v19086_v27  ;;  %v19087_v40 = vunpack.i.l.bf16 %v19086_v27  ;;  %v6448_v10 = vsel %vm6445_vm4, %v19053_v24, %v19077_v18  ;;  %v16967_v24 = vld [vmem:[%s24118_s6 + $0x30] sm:$0xff] }
 0x45b   : > { %16953 = vmatmul.mubr.msk.f32.vlgmr.msra.gmra.mrb[8].mxu1 %vm24312_vm7, %v21473_v36  ;;  %vm24314_vm11 = vmmov %vm24311_vm3  ;;  %v6449_v58 = vsel %vm6445_vm4, %v19077_v18, %v19078_v48 }
 0x45c   : > { %17814 = vmatpush1.bf16.msk.msra.mxu1 %vm21516_vm2, %v17812_v2  ;;  %6232 = vmatprep.mubr.f32.mxu1 %v24155_v47  ;;  %v19083_v2 = vunpack.i.h.bf16 %v19081_v16  ;;  %v6456_v44 = vsel %vm6445_vm4, %v19068_v62, %v19082_v33  ;;  %vm24315_vm7 = vmmov %vm24311_vm3  ;;  %v6451_v62 = vsel %vm6445_vm4, %v19087_v40, %v19088_v50 }
 0x45d   : > { %16959 = vmatmul.mubr.msk.f32.vlgmr.msra.gmra.mrb[12].mxu0 %vm24313_vm13, %v21473_v36  ;;  %v17824_v56 = vpack.c.bf16 %v6456_v44, %v6448_v10  ;;  %v19091_v6 = vpop.permute.xlu0 %19090  ;;  %v19096_v16 = vpop.permute.xlu1 %19095  ;;  %vm24317_vm13 = vmmov %vm24311_vm3 }
 0x45e   : > { %6309 = vmatprep.mubr.f32.mxu0 %v24155_v47  ;;  %17820 = vmatpush1.bf16.msk.msra.mxu0 %vm21253_vm8, %v17818_v13  ;;  %v6457_v32 = vsel %vm6445_vm4, %v19082_v33, %v19083_v2  ;;  %v19092_v13 = vunpack.i.l.bf16 %v19091_v6  ;;  %v6450_v33 = vsel %vm6445_vm4, %v19078_v48, %v19087_v40  ;;  %v19098_v10 = vunpack.i.h.bf16 %v19096_v16 }
 0x45f   : > { %16954 = vmatmul.mubr.msk.f32.gmra.mrb[10].mxu1 %vm24314_vm11, %v21508_v29  ;;  %v17821_v27 = vpack.c.bf16 %v6457_v32, %v6449_v58  ;;  %v19097_v58 = vunpack.i.l.bf16 %v19096_v16  ;;  %vm24318_vm11 = vmmov %vm24311_vm3 }
 0x460   : > { %6380 = vmatprep.mubr.f32.mxu1 %v24155_v47  ;;  %v19093_v47 = vunpack.i.h.bf16 %v19091_v6  ;;  %v6458_v18 = vsel %vm6445_vm4, %v19083_v2, %v19092_v13  ;;  %v16968_v2 = vld [vmem:[%s24118_s6 + $0x38] sm:$0xff] }
 0x461   : > { %16960 = vmatmul.mubr.msk.f32.gmra.mrb[14].mxu0 %vm24311_vm3, %v21508_v29  ;;  %17823 = vmatprep.subr.msk.bf16.mxu1 %vm21278_vm10, %v17821_v27  ;;  %v17830_v44 = vpack.c.bf16 %v6458_v18, %v6450_v33  ;;  %v19101_v48 = vpop.permute.xlu0 %19100  ;;  %v21562_v32 = vpop.permute.xlu1 %19105  ;;  %v6453_v16 = vsel %vm6445_vm4, %v19097_v58, %v19098_v10 }
 0x462   : > { %6567 = vmatprep.mubr.f32.mxu0 %v24316_v41  ;;  %v19103_v6 = vunpack.i.h.bf16 %v19101_v48  ;;  %v19102_v27 = vunpack.i.l.bf16 %v19101_v48  ;;  %v24326_v48 = vpack.c.bf16 %v21001_v57, %v20955_v19  ;;  %v21626_v19 = vld [vmem:[%s24118_s6 + $0x40] sm:$0xff] }
 0x463   : > { %16965 = vmatmul.mubr.msk.f32.vlgmr.msra.gmra.mrb[12].mxu1 %vm24315_vm7, %v21473_v36  ;;  %v6459_v36 = vsel %vm6445_vm4, %v19092_v13, %v19093_v47  ;;  %vm24320_vm7 = vmmov %vm24311_vm3 }
 0x464   : > { %6386 = vmatprep.mubr.f32.mxu1 %v24316_v41  ;;  %17826 = vmatpush1.bf16.msk.msra.mxu1 %vm21296_vm0, %v17824_v56  ;;  %v17827_v40 = vpack.c.bf16 %v6459_v36, %v6451_v62  ;;  %v6452_v56 = vsel %vm6445_vm4, %v19088_v50, %v19097_v58  ;;  %v6460_v13 = vsel %vm6445_vm4, %v19093_v47, %v19102_v27 }
 0x465   : > { %16973 = vmatmul.mubr.msk.f32.vlgmr.msra.gmra.mrb[8].mxu0 %vm24317_vm13, %v16967_v24  ;;  %v17836_v33 = vpack.c.bf16 %v6460_v13, %v6452_v56  ;;  %v21580_v62 = vpop.permute.xlu0 %19110  ;;  %v19116_v18 = vpop.permute.xlu1 %19115  ;;  %v24319_v36 = vpack.c.bf16 %v21015_v9, %v20929_v45  ;;  %vm24322_vm13 = vmmov %vm24311_vm3  ;;  %v24323_v45 = vpack.c.bf16 %v20953_v17, %v20942_v59  ;;  %v19107_v59 = vunpack.i.l.bf16 %v21562_v32 }
 0x466   : > { %6573 = vmatprep.mubr.f32.mxu0 %v24316_v41  ;;  %17829 = vmatprep.subr.msk.bf16.mxu0 %vm21340_vm9, %v17827_v40  ;;  %v19113_v9 = vunpack.i.h.bf16 %v21580_v62  ;;  %v19112_v58 = vunpack.i.l.bf16 %v21580_v62  ;;  %v19108_v40 = vunpack.i.h.bf16 %v21562_v32  ;;  %v24328_v56 = vpack.c.bf16 %v20947_v11, %v20937_v53 }
 0x467   : > { %16966 = vmatmul.mubr.msk.f32.gmra.mrb[14].mxu1 %vm24318_vm11, %v21508_v29  ;;  %v6461_v29 = vsel %vm6445_vm4, %v19102_v27, %v19103_v6  ;;  %17832 = vmatpush1.bf16.msk.msra.mxu0 %vm21352_vm5, %v17830_v44  ;;  %vm24321_vm4 = vnez %v24277_v20  ;;  %vm24324_vm11 = vmmov %vm24311_vm3  ;;  %v24325_v44 = vpack.c.bf16 %v21003_v63, %v20924_v22  ;;  %v19118_v13 = vunpack.i.h.bf16 %v19116_v18 }
 0x468   : > { %6644 = vmatprep.mubr.f32.mxu1 %v24316_v41  ;;  %17840 = vmatprep.subr.bf16.mxu0 %v24319_v36  ;;  %v17833_v50 = vpack.c.bf16 %v6461_v29, %v6453_v16  ;;  %v24329_v16 = vpack.c.bf16 %v21009_v4, %v20997_v54  ;;  %v19117_v29 = vunpack.i.l.bf16 %v19116_v18  ;;  %v24331_v54 = vpack.c.bf16 %v20980_v60, %v20949_v28 }
 0x469   : > { %16974 = vmatmul.mubr.msk.f32.gmra.mrb[10].mxu0 %vm24311_vm3, %v16968_v2  ;;  %v21593_v47 = vpop.permute.xlu0 %19120  ;;  %v21595_v10 = vpop.permute.xlu1 %19125  ;;  %vm24160_vm3 = vcmask 1031168  }
 0x46a   : > { %6721 = vmatprep.mubr.f32.mxu0 %v24316_v41  ;;  %17835 = vmatprep.subr.msk.bf16.mxu1 %vm21387_vm1, %v17833_v50  ;;  %v7242_v22 = vsel %vm24160_vm3, %v19112_v58, %v19113_v9  ;;  %v19123_v57 = vunpack.i.h.bf16 %v21593_v47  ;;  %v19122_v63 = vunpack.i.l.bf16 %v21593_v47  ;;  %v19128_v32 = vunpack.i.h.bf16 %v21595_v10 }
 0x46b   : > { %16979 = vmatmul.mubr.msk.f32.vlgmr.msra.gmra.mrb[8].mxu1 %vm24320_vm7, %v16967_v24  ;;  %v19127_v27 = vunpack.i.l.bf16 %v21595_v10  ;;  %v21657_v10 = vld [vmem:[%s24118_s6 + $0x48] sm:$0xff]  ;;  %v7241_v60 = vsel %vm24160_vm3, %v19118_v13, %v19112_v58  ;;  %v24334_v13 = vpack.c.bf16 %v21007_v3, %v20982_v23 }
 0x46c   : > { %6650 = vmatprep.mubr.f32.mxu1 %v24316_v41  ;;  %17838 = vmatpush1.bf16.msk.msra.mxu1 %vm24321_vm4, %v17836_v33 }
 0x46d   : > { %16985 = vmatmul.mubr.msk.f32.vlgmr.msra.gmra.mrb[12].mxu0 %vm24322_vm13, %v16967_v24  ;;  %17844 = vmatprep.subr.bf16.mxu1 %v24323_v45  ;;  %v21614_v17 = vpop.permute.xlu0 %19130  ;;  %v21616_v6 = vpop.permute.xlu1 %19145  ;;  %vm24327_vm13 = vmmov %vm24320_vm7  ;;  %v7236_v45 = vsel %vm24160_vm3, %v19122_v63, %v19123_v57  ;;  %v7243_v23 = vsel %vm24160_vm3, %v19113_v9, %v19127_v27 }
 0x46e   : > { %17842 = vmatpush1.bf16.msra.mxu0 %v24325_v44  ;;  %6727 = vmatprep.mubr.f32.mxu0 %v24316_v41  ;;  %v19133_v53 = vunpack.i.h.bf16 %v21614_v17  ;;  %v19132_v11 = vunpack.i.l.bf16 %v21614_v17  ;;  %v7244_v44 = vsel %vm24160_vm3, %v19127_v27, %v19128_v32  ;;  %v19148_v62 = vunpack.i.h.bf16 %v21616_v6 }
 0x46f   : > { %16980 = vmatmul.mubr.msk.f32.gmra.mrb[10].mxu1 %vm24324_vm11, %v16968_v2  ;;  %17848 = vmatprep.subr.bf16.mxu0 %v24326_v48  ;;  %vm24330_vm11 = vmmov %vm24320_vm7  ;;  %v19147_v9 = vunpack.i.l.bf16 %v21616_v6 }
 0x470   : > { %6798 = vmatprep.mubr.f32.mxu1 %v24316_v41 }
 0x471   : > { %16986 = vmatmul.mubr.msk.f32.gmra.mrb[14].mxu0 %vm24320_vm7, %v16968_v2  ;;  %v21642_v36 = vpop.permute.xlu0 %19135  ;;  %v21644_v50 = vpop.permute.xlu1 %19155 }
 0x472   : > { %6900 = vmatprep.mubr.f32.mxu0 %v24316_v41  ;;  %v19158_v4 = vunpack.i.h.bf16 %v21644_v50  ;;  %v19157_v18 = vunpack.i.l.bf16 %v21644_v50  ;;  %v19138_v58 = vunpack.i.h.bf16 %v21642_v36 }
 0x473   : > { %16991 = vmatmul.mubr.msk.f32.vlgmr.msra.gmra.mrb[12].mxu1 %vm24327_vm13, %v16967_v24  ;;  %v7234_v24 = vsel %vm24160_vm3, %v19107_v59, %v19108_v40  ;;  %vm24332_vm13 = vnez %v24273_v55 }
 0x474   : > { %17846 = vmatpush1.bf16.msra.mxu1 %v24328_v56  ;;  %6804 = vmatprep.mubr.f32.mxu1 %v24316_v41  ;;  %v17855_v33 = vpack.c.bf16 %v7242_v22, %v7234_v24  ;;  %v7246_v28 = vsel %vm24160_vm3, %v19157_v18, %v19158_v4  ;;  %v7238_v56 = vsel %vm24160_vm3, %v19132_v11, %v19133_v53 }
 0x475   : > { %17852 = vmatprep.subr.bf16.mxu1 %v24329_v16  ;;  %16995 = vmatmul.mubr.msk.f32.vlgmr.msra.gmra.mrb[8].mxu0 %vm24330_vm11, %v21626_v19  ;;  %vm24333_vm11 = vmmov %vm24320_vm7  ;;  %v21674_v48 = vpop.permute.xlu0 %19140  ;;  %v19161_v22 = vpop.permute.xlu1 %19160  ;;  %v17861_v24 = vpack.c.bf16 %v7244_v44, %v7236_v45  ;;  %v7245_v27 = vsel %vm24160_vm3, %v19128_v32, %v19157_v18  ;;  %v21730_v32 = vld [vmem:[%s24118_s6 + $0x50] sm:$0xff]  ;;  %v7237_v18 = vsel %vm24160_vm3, %v19123_v57, %v19132_v11 }
 0x476   : > { %17850 = vmatpush1.bf16.msra.mxu0 %v24331_v54  ;;  %6906 = vmatprep.mubr.f32.mxu0 %v24316_v41  ;;  %v19163_v16 = vunpack.i.h.bf16 %v19161_v22  ;;  %v19143_v3 = vunpack.i.h.bf16 %v21674_v48 }
 0x477   : > { %16992 = vmatmul.mubr.msk.f32.gmra.mrb[14].mxu1 %vm24320_vm7, %v16968_v2  ;;  %17857 = vmatprep.subr.msk.bf16.mxu0 %vm24332_vm13, %v17855_v33  ;;  %v7233_v2 = vsel %vm24160_vm3, %v19117_v29, %v19107_v59  ;;  %v19162_v33 = vunpack.i.l.bf16 %v19161_v22  ;;  %v19137_v59 = vunpack.i.l.bf16 %v21642_v36  ;;  %v17867_v29 = vpack.c.bf16 %v7246_v28, %v7238_v56 }
 0x478   : > { %6977 = vmatprep.mubr.f32.mxu1 %v24316_v41  ;;  %v17858_v54 = vpack.c.bf16 %v7241_v60, %v7233_v2  ;;  %v7235_v36 = vsel %vm24160_vm3, %v19108_v40, %v19122_v63  ;;  %v19142_v28 = vunpack.i.l.bf16 %v21674_v48  ;;  %vm24337_vm13 = vnez %v24280_v31 }
 0x479   : > { %16996 = vmatmul.mubr.msk.f32.gmra.mrb[10].mxu0 %vm24333_vm11, %v21657_v10  ;;  %vm24335_vm11 = vnez %v24283_v51  ;;  %v7248_v45 = vsel %vm24160_vm3, %v19162_v33, %v19163_v16  ;;  %v19151_v44 = vpop.permute.xlu0 %19150  ;;  %v21693_v22 = vpop.permute.xlu1 %19165  ;;  %v7240_v60 = vsel %vm24160_vm3, %v19137_v59, %v19138_v58  ;;  %v17864_v63 = vpack.c.bf16 %v7243_v23, %v7235_v36 }
 0x47a   : > { %7054 = vmatprep.mubr.f32.mxu0 %v24316_v41  ;;  %v17873_v40 = vpack.c.bf16 %v7248_v45, %v7240_v60  ;;  %v17870_v45 = vpack.c.bf16 %v7245_v27, %v7237_v18  ;;  %v19153_v36 = vunpack.i.h.bf16 %v19151_v44  ;;  %vm24343_vm3 = vcmask 130048  }
 0x47b   : > { %16997 = vmatmul.mubr.msk.f32.vlgmr.msra.gmra.mrb[8].mxu1 %vm24320_vm7, %v21626_v19 }
 0x47c   : > { %17854 = vmatpush1.bf16.msra.mxu1 %v24334_v13  ;;  %6983 = vmatprep.mubr.f32.mxu1 %v24316_v41  ;;  %v19152_v13 = vunpack.i.l.bf16 %v19151_v44  ;;  %v21764_v44 = vld [vmem:[%s24118_s6 + $0x58] sm:$0xff] }
 0x47d   : > { %17863 = vmatprep.subr.msk.bf16.mxu1 %vm24335_vm11, %v17861_v24  ;;  %16999 = vmatmul.mubr.msk.f32.vlgmr.msra.gmra.mrb[12].mxu0 %vm24320_vm7, %v21626_v19  ;;  %vm24336_vm11 = vmmov %vm24320_vm7  ;;  %v21715_v2 = vpop.permute.xlu0 %19170  ;;  %v21717_v56 = vpop.permute.xlu1 %19175 }
 0x47e   : > { %17860 = vmatpush1.bf16.msk.msra.mxu0 %vm24337_vm13, %v17858_v54  ;;  %7060 = vmatprep.mubr.f32.mxu0 %v24316_v41  ;;  %v19173_v16 = vunpack.i.h.bf16 %v21715_v2  ;;  %v19172_v58 = vunpack.i.l.bf16 %v21715_v2 }
 0x47f   : > { %16998 = vmatmul.mubr.msk.f32.gmra.mrb[10].mxu1 %vm24336_vm11, %v21657_v10  ;;  %17869 = vmatprep.subr.msk.bf16.mxu0 %vm21462_vm6, %v17867_v29  ;;  %vm24338_vm11 = vmmov %vm24320_vm7  ;;  %vm24339_vm7 = vcmask 539648   ;;  %v19168_v29 = vunpack.i.h.bf16 %v21693_v22 }
 0x480   : > { %7131 = vmatprep.mubr.f32.mxu1 %v24316_v41  ;;  %v7651_v24 = vsel %vm24339_vm7, %v19142_v28, %v19143_v3  ;;  %vm24340_vm6 = vmmov %vm24338_vm11  ;;  %v7661_v47 = vsel %vm24339_vm7, %v19172_v58, %v19173_v16 }
 0x481   : > { %17000 = vmatmul.mubr.msk.f32.gmra.mrb[14].mxu0 %vm24338_vm11, %v21657_v10  ;;  %vm24342_vm11 = vmmov %vm24339_vm7  ;;  %v21750_v11 = vpop.permute.xlu0 %19190  ;;  %v21752_v23 = vpop.permute.xlu1 %19180 }
 0x482   : > { %7354 = vmatprep.mubr.f32.mxu0 %v24316_v41  ;;  %v7659_v54 = vsel %vm24342_vm11, %v19147_v9, %v19148_v62  ;;  %vm24344_vm11 = vcmask 1031168   ;;  %v19183_v18 = vunpack.i.h.bf16 %v21752_v23 }
 0x483   : > { %17001 = vmatmul.mubr.msk.f32.vlgmr.msra.gmra.mrb[12].mxu1 %vm24340_vm6, %v21626_v19  ;;  %v19167_v19 = vunpack.i.l.bf16 %v21693_v22  ;;  %vm24341_vm6 = vnez %v24291_v35  ;;  %v17879_v57 = vpack.c.bf16 %v7659_v54, %v7651_v24  ;;  %v7247_v60 = vsel %vm24344_vm11, %v19158_v4, %v19162_v33 }
 0x484   : > { %17866 = vmatpush1.bf16.msk.msra.mxu1 %vm24341_vm6, %v17864_v63  ;;  %7137 = vmatprep.mubr.f32.mxu1 %v24316_v41  ;;  %vm24345_vm6 = vmmov %vm24343_vm3  ;;  %v7650_v63 = vsel %vm24339_vm7, %v19152_v13, %v19142_v28  ;;  %v19177_v33 = vunpack.i.l.bf16 %v21717_v56  ;;  %v19182_v13 = vunpack.i.l.bf16 %v21752_v23 }
 0x485   : > { %17875 = vmatprep.subr.msk.bf16.mxu1 %vm21496_vm15, %v17873_v40  ;;  %17009 = vmatmul.mubr.msk.f32.vlgmr.msra.gmra.mrb[8].mxu0 %vm24343_vm3, %v21730_v32  ;;  %vm24346_vm3 = vmmov %vm24344_vm11  ;;  %v21782_v28 = vpop.permute.xlu1 %19185 }
 0x486   : > { %17872 = vmatpush1.bf16.msk.msra.mxu0 %vm21481_vm12, %v17870_v45  ;;  %v7239_v40 = vsel %vm24346_vm3, %v19133_v53, %v19137_v59  ;;  %vm24347_vm11 = vmmov %vm24339_vm7  ;;  %7360 = vmatprep.mubr.f32.mxu0 %v24316_v41  ;;  %vm24349_vm3 = vcmask 130048   ;;  %v19201_v59 = vpop.permute.xlu0 %19200  ;;  %v19188_v45 = vunpack.i.h.bf16 %v21782_v28 }
 0x487   : > { %17002 = vmatmul.mubr.msk.f32.gmra.mrb[14].mxu1 %vm24345_vm6, %v21657_v10  ;;  %v7653_v50 = vsel %vm24347_vm11, %v19167_v19, %v19168_v29  ;;  %17881 = vmatprep.subr.msk.bf16.mxu0 %vm21217_vm14, %v17879_v57  ;;  %vm24348_vm6 = vmmov %vm24339_vm7  ;;  %v19178_v10 = vunpack.i.h.bf16 %v21717_v56  ;;  %v17876_v53 = vpack.c.bf16 %v7247_v60, %v7239_v40  ;;  %v19203_v21 = vunpack.i.h.bf16 %v19201_v59 }
 0x488   : > { %v7658_v4 = vsel %vm24348_vm6, %v19153_v36, %v19147_v9  ;;  %7431 = vmatprep.mubr.f32.mxu1 %v24316_v41  ;;  %v17885_v17 = vpack.c.bf16 %v7661_v47, %v7653_v50  ;;  %vm24350_vm14 = vmmov %vm24349_vm3  ;;  %v19202_v27 = vunpack.i.l.bf16 %v19201_v59  ;;  %v19187_v36 = vunpack.i.l.bf16 %v21782_v28  ;;  %v21844_v59 = vld [vmem:[%s24118_s6 + $0x60] sm:$0xff] }
 0x489   : > { %17010 = vmatmul.mubr.msk.f32.gmra.mrb[10].mxu0 %vm24349_vm3, %v21764_v44  ;;  %v17882_v9 = vpack.c.bf16 %v7658_v4, %v7650_v63  ;;  %vm24351_vm7 = vmmov %vm24348_vm6  ;;  %v19196_v57 = vpop.permute.xlu1 %19195  ;;  %v19193_v63 = vunpack.i.h.bf16 %v21750_v11  ;;  %v19192_v50 = vunpack.i.l.bf16 %v21750_v11 }
 0x48a   : > { %7508 = vmatprep.mubr.f32.mxu0 %v24316_v41  ;;  %v7655_v24 = vsel %vm24351_vm7, %v19177_v33, %v19178_v10  ;;  %vm24352_vm11 = vmmov %vm24348_vm6  ;;  %v19206_v47 = vpop.permute.xlu0 %19205  ;;  %v19197_v22 = vunpack.i.l.bf16 %v19196_v57 }
 0x48b   : > { %17015 = vmatmul.mubr.msk.f32.vlgmr.msra.gmra.mrb[8].mxu1 %vm24350_vm14, %v21730_v32  ;;  %v7663_v54 = vsel %vm24352_vm11, %v19202_v27, %v19203_v21  ;;  %vm24353_vm6 = vmmov %vm24349_vm3  ;;  %v19208_v15 = vunpack.i.h.bf16 %v19206_v47  ;;  %v19207_v23 = vunpack.i.l.bf16 %v19206_v47 }
 0x48c   : > { %17878 = vmatpush1.bf16.msk.msra.mxu1 %vm21516_vm2, %v17876_v53  ;;  %7437 = vmatprep.mubr.f32.mxu1 %v24316_v41  ;;  %v17891_v60 = vpack.c.bf16 %v7663_v54, %v7655_v24  ;;  %vm24354_vm3 = vmmov %vm24351_vm7  ;;  %v19198_v24 = vunpack.i.h.bf16 %v19196_v57 }
 0x48d   : > { %17887 = vmatprep.subr.msk.bf16.mxu1 %vm21278_vm10, %v17885_v17  ;;  %17021 = vmatmul.mubr.msk.f32.vlgmr.msra.gmra.mrb[12].mxu0 %vm24353_vm6, %v21730_v32  ;;  %v7660_v40 = vsel %vm24354_vm3, %v19148_v62, %v19172_v58  ;;  %vm24355_vm14 = vmmov %vm24353_vm6  ;;  %v21827_v48 = vpop.permute.xlu1 %19215 }
 0x48e   : > { %17884 = vmatpush1.bf16.msk.msra.mxu0 %vm21253_vm8, %v17882_v9  ;;  %7514 = vmatprep.mubr.f32.mxu0 %v24316_v41  ;;  %vm24356_vm10 = vmmov %vm24354_vm3  ;;  %v21825_v17 = vpop.permute.xlu0 %19210  ;;  %v19217_v53 = vunpack.i.l.bf16 %v21827_v48 }
 0x48f   : > { %17016 = vmatmul.mubr.msk.f32.gmra.mrb[10].mxu1 %vm24355_vm14, %v21764_v44  ;;  %v7652_v6 = vsel %vm24356_vm10, %v19143_v3, %v19167_v19  ;;  %vm24357_vm7 = vmmov %vm24354_vm3  ;;  %17893 = vmatprep.subr.msk.bf16.mxu0 %vm21340_vm9, %v17891_v60  ;;  %v19213_v2 = vunpack.i.h.bf16 %v21825_v17  ;;  %v19218_v19 = vunpack.i.h.bf16 %v21827_v48 }
 0x490   : > { %7585 = vmatprep.mubr.f32.mxu1 %v24316_v41  ;;  %v7657_v62 = vsel %vm24357_vm7, %v19182_v13, %v19183_v18  ;;  %vm24358_vm11 = vmmov %vm24354_vm3  ;;  %v17888_v49 = vpack.c.bf16 %v7660_v40, %v7652_v6  ;;  %v7664_v54 = vsel %vm24357_vm7, %v19203_v21, %v19207_v23  ;;  %v21881_v40 = vld [vmem:[%s24118_s6 + $0x68] sm:$0xff] }
 0x491   : > { %v7665_v58 = vsel %vm24358_vm11, %v19207_v23, %v19208_v15  ;;  %vm24359_vm8 = vmmov %vm24354_vm3  ;;  %17022 = vmatmul.mubr.msk.f32.gmra.mrb[14].mxu0 %vm24353_vm6, %v21764_v44  ;;  %vm24360_vm3 = vcmask 523264  }
 0x492   : > { %v7662_v4 = vsel %vm24359_vm8, %v19173_v16, %v19202_v27  ;;  %v17897_v3 = vpack.c.bf16 %v7665_v58, %v7657_v62  ;;  %v8071_v43 = vsel %vm24360_vm3, %v19187_v36, %v19188_v45  ;;  %vm24361_vm9 = vmmov %vm24353_vm6  ;;  %v19212_v16 = vunpack.i.l.bf16 %v21825_v17  ;;  %7771 = vmatprep.mubr.f32.mxu0 %v24316_v41  ;;  %v21860_v52 = vpop.permute.xlu0 %19220  ;;  %v21948_v17 = vld [vmem:[%s24118_s6 + $0x70] sm:$0xff] }
 0x493   : > { %17027 = vmatmul.mubr.msk.f32.vlgmr.msra.gmra.mrb[12].mxu1 %vm24361_vm9, %v21730_v32  ;;  %vm24362_vm14 = vmmov %vm24357_vm7  ;;  %v19223_v21 = vunpack.i.h.bf16 %v21860_v52  ;;  %v19222_v47 = vunpack.i.l.bf16 %v21860_v52 }
 0x494   : > { %v7654_v27 = vsel %vm24362_vm14, %v19168_v29, %v19177_v33  ;;  %17890 = vmatpush1.bf16.msk.msra.mxu1 %vm21296_vm0, %v17888_v49  ;;  %7591 = vmatprep.mubr.f32.mxu1 %v24316_v41  ;;  %vm24363_vm10 = vmmov %vm24360_vm3  ;;  %v21862_v29 = vpop.permute.xlu1 %19235 }
 0x495   : > { %v8079_v32 = vsel %vm24363_vm10, %v19192_v50, %v19193_v63  ;;  %v17894_v9 = vpack.c.bf16 %v7662_v4, %v7654_v27  ;;  %17899 = vmatprep.subr.msk.bf16.mxu1 %vm21387_vm1, %v17897_v3  ;;  %vm24364_vm11 = vmmov %vm24353_vm6  ;;  %v19238_v57 = vunpack.i.h.bf16 %v21862_v29  ;;  %v19237_v60 = vunpack.i.l.bf16 %v21862_v29 }
 0x496   : > { %v17903_v18 = vpack.c.bf16 %v8079_v32, %v8071_v43  ;;  %17035 = vmatmul.mubr.msk.f32.vlgmr.msra.gmra.mrb[8].mxu0 %vm24364_vm11, %v21844_v59  ;;  %vm24365_vm0 = vmmov %vm24360_vm3 }
 0x497   : > { %v8073_v33 = vsel %vm24365_vm0, %v19212_v16, %v19213_v2  ;;  %vm24366_vm8 = vmmov %vm24365_vm0  ;;  %17896 = vmatpush1.bf16.msk.msra.mxu0 %vm21352_vm5, %v17894_v9  ;;  %7777 = vmatprep.mubr.f32.mxu0 %v24316_v41  ;;  %v8080_v27 = vsel %vm24365_vm0, %v19193_v63, %v19217_v53 }
 0x498   : > { %v8081_v46 = vsel %vm24366_vm8, %v19217_v53, %v19218_v19  ;;  %vm24367_vm1 = vmmov %vm24353_vm6  ;;  %17904 = vmatprep.subr.bf16.mxu0 %v17903_v18 }
 0x499   : > { %17028 = vmatmul.mubr.msk.f32.gmra.mrb[14].mxu1 %vm24367_vm1, %v21764_v44  ;;  %vm24368_vm6 = vmmov %vm24357_vm7  ;;  %v17907_v44 = vpack.c.bf16 %v8081_v46, %v8073_v33 }
 0x49a   : > { %v7656_v34 = vsel %vm24368_vm6, %v19178_v10, %v19182_v13  ;;  %7848 = vmatprep.mubr.f32.mxu1 %v24316_v41  ;;  %vm24369_vm5 = vmmov %vm24365_vm0  ;;  %v19226_v10 = vpop.permute.xlu0 %19225  ;;  %v19241_v13 = vpop.permute.xlu1 %19240 }
 0x49b   : > { %v8075_v15 = vsel %vm24369_vm5, %v19222_v47, %v19223_v21  ;;  %vm24370_vm3 = vmmov %vm24365_vm0  ;;  %v17900_v6 = vpack.c.bf16 %v7664_v54, %v7656_v34  ;;  %v19228_v58 = vunpack.i.h.bf16 %v19226_v10  ;;  %v19227_v49 = vunpack.i.l.bf16 %v19226_v10 }
 0x49c   : > { %v8083_v23 = vsel %vm24370_vm3, %v19237_v60, %v19238_v57  ;;  %vm24371_vm9 = vmmov %vm24365_vm0  ;;  %v19243_v4 = vunpack.i.h.bf16 %v19241_v13  ;;  %v19242_v3 = vunpack.i.l.bf16 %v19241_v13  ;;  %vm24380_vm5 = vcmask 506880  }
 0x49d   : > { %v8078_v62 = vsel %vm24371_vm9, %v19198_v24, %v19192_v50  ;;  %vm24372_vm14 = vmmov %vm24365_vm0 }
 0x49e   : > { %v8070_v56 = vsel %vm24372_vm14, %v19197_v22, %v19187_v36  ;;  %vm24373_vm10 = vmmov %vm24367_vm1  ;;  %v17911_v36 = vpack.c.bf16 %v8083_v23, %v8075_v15  ;;  %v21914_v32 = vpop.permute.xlu0 %19230  ;;  %v21916_v20 = vpop.permute.xlu1 %19245 }
 0x49f   : > { %17036 = vmatmul.mubr.msk.f32.gmra.mrb[10].mxu0 %vm24373_vm10, %v21881_v40  ;;  %vm24374_vm7 = vmmov %vm24367_vm1  ;;  %v17905_v50 = vpack.c.bf16 %v8078_v62, %v8070_v56  ;;  %v19233_v28 = vunpack.i.h.bf16 %v21914_v32  ;;  %v19232_v11 = vunpack.i.l.bf16 %v21914_v32  ;;  %v19247_v63 = vunpack.i.l.bf16 %v21916_v20  ;;  %v17065_v32 = vld [vmem:[%s24118_s6 + $0x80] sm:$0xff] }
 0x4a0   : > { %17041 = vmatmul.mubr.msk.f32.vlgmr.msra.gmra.mrb[8].mxu1 %vm24374_vm7, %v21844_v59  ;;  %7925 = vmatprep.mubr.f32.mxu0 %v24316_v41  ;;  %vm24375_vm11 = vmmov %vm24365_vm0 }
 0x4a1   : > { %17902 = vmatpush1.bf16.msk.msra.mxu1 %vm24321_vm4, %v17900_v6  ;;  %7854 = vmatprep.mubr.f32.mxu1 %v24316_v41  ;;  %v8072_v43 = vsel %vm24375_vm11, %v19188_v45, %v19212_v16  ;;  %vm24376_vm8 = vmmov %vm24367_vm1  ;;  %v19248_v45 = vunpack.i.h.bf16 %v21916_v20  ;;  %v8469_v16 = vsel %vm24380_vm5, %v19232_v11, %v19233_v28  ;;  %v17056_v6 = vld [vmem:[%s24118_s6 + $0x78] sm:$0xff] }
 0x4a2   : > { %17908 = vmatprep.subr.bf16.mxu1 %v17907_v44  ;;  %vm24377_vm4 = vmmov %vm24365_vm0  ;;  %v17909_v33 = vpack.c.bf16 %v8080_v27, %v8072_v43  ;;  %v19251_v46 = vpop.permute.xlu0 %19250  ;;  %v21942_v34 = vpop.permute.xlu1 %19255 }
 0x4a3   : > { %17047 = vmatmul.mubr.msk.f32.vlgmr.msra.gmra.mrb[12].mxu0 %vm24376_vm8, %v21844_v59  ;;  %v8077_v9 = vsel %vm24377_vm4, %v19227_v49, %v19228_v58  ;;  %vm24378_vm1 = vmmov %vm24365_vm0  ;;  %v19258_v44 = vunpack.i.h.bf16 %v21942_v34  ;;  %v19257_v15 = vunpack.i.l.bf16 %v21942_v34 }
 0x4a4   : > { %v8085_v24 = vsel %vm24378_vm1, %v19242_v3, %v19243_v4  ;;  %vm24379_vm6 = vmmov %vm24374_vm7  ;;  %17906 = vmatpush1.bf16.msra.mxu0 %v17905_v50  ;;  %7931 = vmatprep.mubr.f32.mxu0 %v24316_v41  ;;  %vm24389_vm1 = vnez %v24273_v55 }
 0x4a5   : > { %17042 = vmatmul.mubr.msk.f32.gmra.mrb[10].mxu1 %vm24379_vm6, %v21881_v40  ;;  %17912 = vmatprep.subr.bf16.mxu0 %v17911_v36  ;;  %vm24381_vm3 = vmmov %vm24380_vm5  ;;  %v17915_v18 = vpack.c.bf16 %v8085_v24, %v8077_v9 }
 0x4a6   : > { %v8477_v53 = vsel %vm24381_vm3, %v19247_v63, %v19248_v45  ;;  %8002 = vmatprep.mubr.f32.mxu1 %v24316_v41  ;;  %vm24382_vm9 = vmmov %vm24365_vm0  ;;  %v19261_v23 = vpop.permute.xlu0 %19260 }
 0x4a7   : > { %v8074_v54 = vsel %vm24382_vm9, %v19213_v2, %v19222_v47  ;;  %vm24383_vm14 = vmmov %vm24365_vm0  ;;  %v17919_v48 = vpack.c.bf16 %v8477_v53, %v8469_v16  ;;  %v19252_v47 = vunpack.i.l.bf16 %v19251_v46  ;;  %v19263_v52 = vunpack.i.h.bf16 %v19261_v23 }
 0x4a8   : > { %v8082_v22 = vsel %vm24383_vm14, %v19218_v19, %v19237_v60  ;;  %vm24384_vm10 = vmmov %vm24379_vm6  ;;  %v19253_v19 = vunpack.i.h.bf16 %v19251_v46  ;;  %v19262_v29 = vunpack.i.l.bf16 %v19261_v23 }
 0x4a9   : > { %17048 = vmatmul.mubr.msk.f32.gmra.mrb[14].mxu0 %vm24384_vm10, %v21881_v40  ;;  %vm24385_vm7 = vmmov %vm24379_vm6  ;;  %v17913_v2 = vpack.c.bf16 %v8082_v22, %v8074_v54 }
 0x4aa   : > { %17053 = vmatmul.mubr.msk.f32.vlgmr.msra.gmra.mrb[12].mxu1 %vm24385_vm7, %v21844_v59  ;;  %8172 = vmatprep.mubr.f32.mxu0 %v24316_v41  ;;  %vm24386_vm11 = vmmov %vm24379_vm6  ;;  %v8076_v59 = vsel %vm24365_vm0, %v19223_v21, %v19227_v49  ;;  %v19266_v21 = vpop.permute.xlu1 %19265  ;;  %v8479_v62 = vsel %vm24381_vm3, %v19262_v29, %v19263_v52  ;;  %v19271_v58 = vpop.permute.xlu0 %19270 }
 0x4ab   : > { %17910 = vmatpush1.bf16.msra.mxu1 %v17909_v33  ;;  %8008 = vmatprep.mubr.f32.mxu1 %v24316_v41  ;;  %vm24387_vm8 = vmmov %vm24365_vm0  ;;  %v19268_v55 = vunpack.i.h.bf16 %v19266_v21  ;;  %v19267_v13 = vunpack.i.l.bf16 %v19266_v21  ;;  %v19273_v49 = vunpack.i.h.bf16 %v19271_v58  ;;  %v19272_v4 = vunpack.i.l.bf16 %v19271_v58 }
 0x4ac   : > { %17916 = vmatprep.subr.bf16.mxu1 %v17915_v18  ;;  %v8084_v60 = vsel %vm24387_vm8, %v19238_v57, %v19242_v3  ;;  %vm24388_vm4 = vmmov %vm24379_vm6  ;;  %vm24398_vm8 = vnez %v24283_v51 }
 0x4ad   : > { %17057 = vmatmul.mubr.msk.f32.vlgmr.msra.gmra.mrb[8].mxu0 %vm24386_vm11, %v21948_v17  ;;  %vm24390_vm6 = vmmov %vm24381_vm3  ;;  %v17917_v56 = vpack.c.bf16 %v8084_v60, %v8076_v59 }
 0x4ae   : > { %17054 = vmatmul.mubr.msk.f32.gmra.mrb[14].mxu1 %vm24388_vm4, %v21881_v40  ;;  %17914 = vmatpush1.bf16.msra.mxu0 %v17913_v2  ;;  %v8468_v57 = vsel %vm24390_vm6, %v19252_v47, %v19232_v11  ;;  %vm24391_vm5 = vmmov %vm24381_vm3  ;;  %v19276_v3 = vpop.permute.xlu1 %19275  ;;  %v19281_v11 = vpop.permute.xlu0 %19280 }
 0x4af   : > { %17921 = vmatprep.subr.msk.bf16.mxu0 %vm24389_vm1, %v17919_v48  ;;  %8178 = vmatprep.mubr.f32.mxu0 %v24316_v41  ;;  %v8476_v40 = vsel %vm24391_vm5, %v19253_v19, %v19247_v63  ;;  %vm24392_vm9 = vmmov %vm24388_vm4  ;;  %v19278_v20 = vunpack.i.h.bf16 %v19276_v3  ;;  %v19277_v9 = vunpack.i.l.bf16 %v19276_v3  ;;  %v19283_v63 = vunpack.i.h.bf16 %v19281_v11 }
 0x4b0   : > { %8249 = vmatprep.mubr.f32.mxu1 %v24316_v41  ;;  %vm24393_vm14 = vmmov %vm24381_vm3  ;;  %v17922_v50 = vpack.c.bf16 %v8476_v40, %v8468_v57  ;;  %v19282_v16 = vunpack.i.l.bf16 %v19281_v11 }
 0x4b1   : > { %17058 = vmatmul.mubr.msk.f32.gmra.mrb[10].mxu0 %vm24392_vm9, %v17056_v6  ;;  %v8471_v10 = vsel %vm24393_vm14, %v19257_v15, %v19258_v44  ;;  %vm24394_vm10 = vmmov %vm24388_vm4  ;;  %v8475_v54 = vsel %vm24381_vm3, %v19277_v9, %v19278_v20  ;;  %vm24405_vm14 = vnez %v24295_v5 }
 0x4b2   : > { %17059 = vmatmul.mubr.msk.f32.vlgmr.msra.gmra.mrb[8].mxu1 %vm24394_vm10, %v21948_v17  ;;  %8326 = vmatprep.mubr.f32.mxu0 %v24316_v41  ;;  %v17925_v36 = vpack.c.bf16 %v8479_v62, %v8471_v10  ;;  %vm24395_vm7 = vmmov %vm24381_vm3 }
 0x4b3   : > { %17918 = vmatpush1.bf16.msra.mxu1 %v17917_v56  ;;  %8255 = vmatprep.mubr.f32.mxu1 %v24316_v41  ;;  %v8478_v43 = vsel %vm24395_vm7, %v19248_v45, %v19262_v29  ;;  %vm24396_vm11 = vmmov %vm24381_vm3 }
 0x4b4   : > { %v8481_v27 = vsel %vm24396_vm11, %v19272_v4, %v19273_v49  ;;  %vm24397_vm0 = vmmov %vm24388_vm4  ;;  %17927 = vmatprep.subr.msk.bf16.mxu1 %vm24398_vm8, %v17925_v36  ;;  %vm24408_vm11 = vnez %v24291_v35  ;;  %v17066_v35 = vld [vmem:[%s24118_s6 + $0x88] sm:$0xff] }
 0x4b5   : > { %17061 = vmatmul.mubr.msk.f32.vlgmr.msra.gmra.mrb[12].mxu0 %vm24397_vm0, %v21948_v17  ;;  %vm24399_vm4 = vmmov %vm24381_vm3 }
 0x4b6   : > { %v8473_v24 = vsel %vm24399_vm4, %v19267_v13, %v19268_v55  ;;  %vm24400_vm1 = vmmov %vm24397_vm0  ;;  %17924 = vmatpush1.bf16.msk.msra.mxu0 %vm24337_vm13, %v17922_v50  ;;  %8332 = vmatprep.mubr.f32.mxu0 %v24316_v41 }
 0x4b7   : > { %17060 = vmatmul.mubr.msk.f32.gmra.mrb[10].mxu1 %vm24400_vm1, %v17056_v6  ;;  %vm24401_vm6 = vmmov %vm24381_vm3  ;;  %v17931_v51 = vpack.c.bf16 %v8481_v27, %v8473_v24 }
 0x4b8   : > { %v8470_v45 = vsel %vm24401_vm6, %v19233_v28, %v19257_v15  ;;  %8403 = vmatprep.mubr.f32.mxu1 %v24316_v41  ;;  %vm24402_vm5 = vmmov %vm24381_vm3  ;;  %v22041_v25 = vpop.permute.xlu1 %1131 }
 0x4b9   : > { %v17928_v53 = vpack.c.bf16 %v8478_v43, %v8470_v45  ;;  %v8480_v18 = vsel %vm24402_vm5, %v19263_v52, %v19272_v4  ;;  %vm24403_vm9 = vmmov %vm24381_vm3  ;;  %17933 = vmatprep.subr.msk.bf16.mxu0 %vm24405_vm14, %v17931_v51 }
 0x4ba   : > { %v8483_v31 = vsel %vm24403_vm9, %v19282_v16, %v19283_v63  ;;  %vm24404_vm13 = vmmov %vm24397_vm0 }
 0x4bb   : > { %17062 = vmatmul.mubr.msk.f32.gmra.mrb[14].mxu0 %vm24404_vm13, %v17056_v6  ;;  %vm24406_vm10 = vmmov %vm24397_vm0  ;;  %v17937_v28 = vpack.c.bf16 %v8483_v31, %v8475_v54  ;;  %v22043_v42 = vpop.permute.xlu0 %1136 }
 0x4bc   : > { %17063 = vmatmul.mubr.msk.f32.vlgmr.msra.gmra.mrb[12].mxu1 %vm24406_vm10, %v21948_v17  ;;  %8589 = vmatprep.mubr.f32.mxu0 %v24316_v41  ;;  %vm24407_vm7 = vmmov %vm24381_vm3  ;;  %v22046_v2 = vpop.permute.xlu1 %8853 }
 0x4bd   : > { %v8472_v22 = vsel %vm24407_vm7, %v19258_v44, %v19267_v13  ;;  %17930 = vmatpush1.bf16.msk.msra.mxu1 %vm24408_vm11, %v17928_v53  ;;  %8409 = vmatprep.mubr.f32.mxu1 %v24316_v41  ;;  %vm24409_vm8 = vmmov %vm24381_vm3 }
 0x4be   : > { %v17934_v33 = vpack.c.bf16 %v8480_v18, %v8472_v22  ;;  %17939 = vmatprep.subr.msk.bf16.mxu1 %vm21496_vm15, %v17937_v28  ;;  %v8482_v5 = vsel %vm24409_vm8, %v19273_v49, %v19282_v16  ;;  %vm24410_vm4 = vmmov %vm24397_vm0 }
 0x4bf   : > { %17071 = vmatmul.mubr.msk.f32.vlgmr.msra.gmra.mrb[8].mxu0 %vm24397_vm0, %v17065_v32  ;;  %vm24411_vm1 = vmmov %vm24381_vm3 }
 0x4c0   : > { %17064 = vmatmul.mubr.msk.f32.gmra.mrb[14].mxu1 %vm24410_vm4, %v17056_v6  ;;  %17936 = vmatpush1.bf16.msk.msra.mxu0 %vm21481_vm12, %v17934_v33  ;;  %v8474_v39 = vsel %vm24411_vm1, %v19268_v55, %v19277_v9  ;;  %vm24412_vm15 = vmmov %vm24397_vm0  ;;  %v22056_v6 = vpop.permute.xlu0 %8858 }
 0x4c1   : > { %8595 = vmatprep.mubr.f32.mxu0 %v24316_v41  ;;  %8666 = vmatprep.mubr.f32.mxu1 %v24316_v41  ;;  %v17940_v46 = vpack.c.bf16 %v8482_v5, %v8474_v39  ;;  %vm24413_vm6 = vmmov %vm24397_vm0 }
 0x4c2   : > { %vm24414_vm12 = vmmov %vm24397_vm0 }
 0x4c3   : > { %17072 = vmatmul.mubr.msk.f32.gmra.mrb[10].mxu0 %vm24412_vm15, %v17066_v35  ;;  %vm24415_vm5 = vmmov %vm24397_vm0 }
 0x4c4   : > { %17077 = vmatmul.mubr.msk.f32.vlgmr.msra.gmra.mrb[8].mxu1 %vm24413_vm6, %v17065_v32  ;;  %8743 = vmatprep.mubr.f32.mxu0 %v24316_v41  ;;  %vm24416_vm3 = vmmov %vm24397_vm0 }
 0x4c5   : > { %17942 = vmatpush1.bf16.msk.msra.mxu1 %vm21516_vm2, %v17940_v46  ;;  %8672 = vmatprep.mubr.f32.mxu1 %v24316_v41  ;;  %vm24417_vm9 = vmmov %vm24397_vm0 }
 0x4c6   : > { %vm24418_vm13 = vmmov %vm24397_vm0 }
 0x4c7   : > { %17083 = vmatmul.mubr.msk.f32.vlgmr.msra.gmra.mrb[12].mxu0 %vm24414_vm12, %v17065_v32 }
 0x4c8   : > { %17078 = vmatmul.mubr.msk.f32.gmra.mrb[10].mxu1 %vm24415_vm5, %v17066_v35  ;;  %8749 = vmatprep.mubr.f32.mxu0 %v24316_v41 }
 0x4c9   : > { %8820 = vmatprep.mubr.f32.mxu1 %v24316_v41 }
 0x4cb   : > { %17084 = vmatmul.mubr.msk.f32.gmra.mrb[14].mxu0 %vm24416_vm3, %v17066_v35 }
 0x4cc   : > { %17089 = vmatmul.mubr.msk.f32.vlgmr.msra.gmra.mrb[12].mxu1 %vm24417_vm9, %v17065_v32  ;;  %9249 = vmatprep.mubr.f32.mxu0 %v24316_v41 }
 0x4cd   : > { %8826 = vmatprep.mubr.f32.mxu1 %v24316_v41 }
 0x4d0   : > { %17090 = vmatmul.mubr.msk.f32.gmra.mrb[14].mxu1 %vm24418_vm13, %v17066_v35  ;;  %vm24436_vm13 = vmmov %vm24417_vm9 }
 0x4d1   : > { %9326 = vmatprep.mubr.f32.mxu1 %v24316_v41 }
 0x592   : > { %v8591_v34 = vpop.f32.mrb[8].mxu0 }
 0x593   : > { %v18318_v17 = vadd.f32 %v8591_v34, %v22041_v25  ;;  %v8593_v48 = vpop.f32.mrb[9].mxu0 }
 0x594   : > { %v18320_v19 = vadd.f32 %v8593_v48, %v22041_v25 }
 0x595   : > { %v22050_v47 = vadd.f32 %v18318_v17, %v22046_v2 }
 0x596   : > { %v22053_v59 = vadd.f32 %v18320_v19, %v22046_v2  ;;  %v8597_v60 = vpop.f32.mrb[10].mxu0 }
 0x597   : > { %24419 = vst [vmem:[#allocation20_spill] sm:$0xff] %v22050_v47  ;;  %v18322_v44 = vadd.f32 %v8597_v60, %v22043_v42  ;;  %v8668_v15 = vpop.f32.mrb[8].mxu1  ;;  %v8599_v23 = vpop.f32.mrb[11].mxu0  ;;  %v8925_v52 = vmul.f32 %v22050_v47, %v20895_v61 }
 0x598   : > { %24420 = vst [vmem:[#allocation21_spill] sm:$0xff] %v22053_v59  ;;  %v18326_v29 = vadd.f32 %v8668_v15, %v22041_v25  ;;  %v18324_v21 = vadd.f32 %v8599_v23, %v22043_v42  ;;  %v8670_v57 = vpop.f32.mrb[9].mxu1  ;;  %v8926_v40 = vmul.f32 %v22053_v59, %v20895_v61 }
 0x599   : > { %v22065_v62 = vadd.f32 %v18322_v44, %v22056_v6  ;;  %v18328_v10 = vadd.f32 %v8670_v57, %v22041_v25  ;;  %v8941_v4 = vadd.f32 %v8925_v52, %v20902_v7 }
 0x59a   : > { %v22068_v56 = vadd.f32 %v18326_v29, %v22046_v2  ;;  %v8745_v55 = vpop.f32.mrb[12].mxu0  ;;  %v22072_v13 = vadd.f32 %v18324_v21, %v22056_v6  ;;  %v8942_v36 = vadd.f32 %v8926_v40, %v20902_v7 }
 0x59b   : > { %24421 = vst [vmem:[#allocation22_spill] sm:$0xff] %v22065_v62  ;;  %v8674_v58 = vpop.f32.mrb[10].mxu1  ;;  %v8747_v49 = vpop.f32.mrb[13].mxu0  ;;  %v8933_v50 = vmul.f32 %v22065_v62, %v20904_v8  ;;  %v22082_v20 = vadd.f32 %v18328_v10, %v22046_v2  ;;  %v18334_v9 = vadd.f32 %v8745_v55, %v22041_v25  ;;  %vm8957_vm2 = vcmp.ge.f32.partialorder %v8941_v4, 0.0 }
 0x59c   : > { %24422 = vst [vmem:[#allocation23_spill] sm:$0xff] %v22068_v56  ;;  %24423 = vst [vmem:[#allocation24_spill] sm:$0xff] %v22072_v13  ;;  %v8676_v3 = vpop.f32.mrb[11].mxu1  ;;  %v18330_v43 = vadd.f32 %v8674_v58, %v22043_v42  ;;  %v8927_v27 = vmul.f32 %v22068_v56, %v20895_v61  ;;  %v8934_v11 = vmul.f32 %v22072_v13, %v20904_v8  ;;  %v8973_v51 = vmul.f32 0.2, %v8941_v4 }
 0x59d   : > { %24424 = vst [vmem:[#allocation25_spill] sm:$0xff] %v22082_v20  ;;  %vm8958_vm14 = vcmp.ge.f32.partialorder %v8942_v36, 0.0  ;;  %v8974_v53 = vmul.f32 0.2, %v8942_v36  ;;  %v8949_v18 = vadd.f32 %v8933_v50, %v20931_v37  ;;  %v8928_v28 = vmul.f32 %v22082_v20, %v20895_v61 }
 0x59e   : > { %v8751_v24 = vpop.f32.mrb[14].mxu0  ;;  %v22088_v45 = vadd.f32 %v18330_v43, %v22056_v6  ;;  %v8943_v32 = vadd.f32 %v8927_v27, %v20902_v7  ;;  %v22097_v22 = vadd.f32 %v18334_v9, %v22046_v2  ;;  %v18332_v33 = vadd.f32 %v8676_v3, %v22043_v42 }
 0x59f   : > { %v8822_v63 = vpop.f32.mrb[12].mxu1  ;;  %v8753_v16 = vpop.f32.mrb[15].mxu0  ;;  %v8950_v5 = vadd.f32 %v8934_v11, %v20931_v37  ;;  %v18336_v39 = vadd.f32 %v8747_v49, %v22041_v25  ;;  %v18338_v46 = vadd.f32 %v8751_v24, %v22043_v42  ;;  %v22112_v15 = vsel %vm8957_vm2, %v8941_v4, %v8973_v51 }
 0x5a0   : > { %24425 = vst [vmem:[#allocation26_spill] sm:$0xff] %v22088_v45  ;;  %v8935_v54 = vmul.f32 %v22088_v45, %v20904_v8  ;;  %v8824_v31 = vpop.f32.mrb[13].mxu1  ;;  %24426 = vst [vmem:[#allocation27_spill] sm:$0xff] %v22097_v22  ;;  %v8929_v17 = vmul.f32 %v22097_v22, %v20895_v61  ;;  %v22107_v48 = vadd.f32 %v18332_v33, %v22056_v6  ;;  %vm8965_vm10 = vcmp.ge.f32.partialorder %v8949_v18, 0.0 }
 0x5a1   : > { %v18342_v19 = vadd.f32 %v8822_v63, %v22041_v25  ;;  %v18340_v60 = vadd.f32 %v8753_v16, %v22043_v42  ;;  %v22115_v23 = vadd.f32 %v18336_v39, %v22046_v2  ;;  %v22118_v52 = vadd.f32 %v18338_v46, %v22056_v6 }
 0x5a2   : > { %v8951_v35 = vadd.f32 %v8935_v54, %v20931_v37  ;;  %24427 = vst [vmem:[#allocation28_spill] sm:$0xff] %v22107_v48  ;;  %v8981_v29 = vmul.f32 0.2, %v8949_v18  ;;  %v22121_v21 = vadd.f32 %v8928_v28, %v20902_v7  ;;  %v8936_v57 = vmul.f32 %v22107_v48, %v20904_v8 }
 0x5a3   : > { %v8828_v34 = vpop.f32.mrb[14].mxu1  ;;  %24428 = vst [vmem:[#allocation29_spill] sm:$0xff] %v22115_v23  ;;  %24429 = vst [vmem:[#allocation30_spill] sm:$0xff] %v22118_v52  ;;  %v22126_v40 = vadd.f32 %v18342_v19, %v22046_v2  ;;  %v8975_v10 = vmul.f32 0.2, %v8943_v32  ;;  %v8937_v58 = vmul.f32 %v22118_v52, %v20904_v8  ;;  %v22131_v49 = vadd.f32 %v18340_v60, %v22056_v6 }
 0x5a4   : > { %v8830_v44 = vpop.f32.mrb[15].mxu1  ;;  %v8982_v55 = vmul.f32 0.2, %v8950_v5  ;;  %vm8959_vm7 = vcmp.ge.f32.partialorder %v8943_v32, 0.0  ;;  %vm8966_vm11 = vcmp.ge.f32.partialorder %v8950_v5, 0.0  ;;  %v8945_v3 = vadd.f32 %v8929_v17, %v20902_v7 }
 0x5a5   : > { %24430 = vst [vmem:[#allocation31_spill] sm:$0xff] %v22126_v40  ;;  %24431 = vst [vmem:[#allocation32_spill] sm:$0xff] %v22131_v49  ;;  %v8983_v4 = vmul.f32 0.2, %v8951_v35  ;;  %vm8967_vm0 = vcmp.ge.f32.partialorder %v8951_v35, 0.0  ;;  %v8930_v50 = vmul.f32 %v22115_v23, %v20895_v61  ;;  %v8953_v43 = vadd.f32 %v8937_v58, %v20931_v37 }
 0x5a6   : > { %v18344_v27 = vadd.f32 %v8824_v31, %v22041_v25  ;;  %v22139_v9 = vsel %vm8958_vm14, %v8942_v36, %v8974_v53  ;;  %v22142_v24 = vsel %vm8965_vm10, %v8949_v18, %v8981_v29  ;;  %v8952_v11 = vadd.f32 %v8936_v57, %v20931_v37  ;;  %vm24437_vm14 = vmmov %vm24417_vm9 }
 0x5a7   : > { %v8931_v63 = vmul.f32 %v22126_v40, %v20895_v61  ;;  %v22147_v16 = vsel %vm8959_vm7, %v8943_v32, %v8975_v10  ;;  %v22149_v51 = vsel %vm8966_vm11, %v8950_v5, %v8982_v55  ;;  %v8976_v54 = vmul.f32 0.2, %v22121_v21  ;;  %vm24438_vm7 = vmmov %vm24417_vm9 }
 0x5a8   : > { %v8938_v25 = vmul.f32 %v22131_v49, %v20904_v8  ;;  %v22154_v31 = vsel %vm8967_vm0, %v8951_v35, %v8983_v4  ;;  %vm8961_vm8 = vcmp.ge.f32.partialorder %v8945_v3, 0.0  ;;  %v8977_v36 = vmul.f32 0.2, %v8945_v3  ;;  %vm24439_vm11 = vmmov %vm24438_vm7 }
 0x5a9   : > { %v8985_v53 = vmul.f32 0.2, %v8953_v43  ;;  %v8946_v18 = vadd.f32 %v8930_v50, %v20902_v7  ;;  %vm8969_vm4 = vcmp.ge.f32.partialorder %v8953_v43, 0.0  ;;  %v22158_v28 = vadd.f32 %v18344_v27, %v22046_v2  ;;  %v22222_v27 = vld [vmem:[%s24435_s23 + $0x10] sm:$0xff]  ;;  %vm24440_vm0 = vmmov %vm24438_vm7 }
 0x5aa   : > { %v19289_v32 = vpack.i.bf16 %v22112_v15, %v24316_v41  ;;  %vm8968_vm1 = vcmp.ge.f32.partialorder %v8952_v11, 0.0  ;;  %v8984_v33 = vmul.f32 0.2, %v8952_v11  ;;  %v8947_v5 = vadd.f32 %v8931_v63, %v20902_v7 }
 0x5ab   : > { %24432 = vst [vmem:[#allocation33_spill] sm:$0xff] %v22158_v28  ;;  %v18346_v39 = vadd.f32 %v8828_v34, %v22043_v42  ;;  %v8954_v35 = vadd.f32 %v8938_v25, %v20931_v37  ;;  %v18348_v46 = vadd.f32 %v8830_v44, %v22043_v42  ;;  %v19294_v17 = vpack.i.bf16 %v22142_v24, %v24316_v41 }
 0x5ac   : > { %19290 = vrot.lane.b32.xlu1 %v19289_v32, %s20004_s20  ;;  %v22171_v2 = vpack.c.bf16 %v22142_v24, %v22112_v15  ;;  %v22173_v19 = vsel %vm8969_vm4, %v8953_v43, %v8985_v53  ;;  %v22180_v34 = vpack.i.bf16 %v22149_v51, %v22139_v9  ;;  %v22184_v29 = vpack.c.bf16 %v22154_v31, %v22147_v16  ;;  %vm24442_vm4 = vmmov %vm24440_vm0 }
 0x5ad   : > { %v22176_v60 = vadd.f32 %v18346_v39, %v22056_v6  ;;  %vm8960_vm15 = vcmp.ge.f32.partialorder %v22121_v21, 0.0  ;;  %v22188_v42 = vsel %vm8961_vm8, %v8945_v3, %v8977_v36  ;;  %v22191_v44 = vadd.f32 %v18348_v46, %v22056_v6  ;;  %19295 = vrot.lane.b32.xlu0 %v19294_v17, %s20004_s20  ;;  %vm24441_vm8 = vmmov %vm24440_vm0 }
 0x5ae   : > { %17944 = vmatprep.subr.bf16.mxu0 %v22171_v2  ;;  %v22197_v57 = vpack.i.bf16 %v22154_v31, %v22147_v16  ;;  %v22200_v10 = vsel %vm8968_vm1, %v8952_v11, %v8984_v33  ;;  %17947 = vmatprep.subr.bf16.mxu1 %v22184_v29  ;;  %v20005_v58 = vmov 0.0|0.0   ;;  %v22207_v6 = vpack.c.bf16 %v22149_v51, %v22139_v9 }
 0x5af   : > { %24433 = vst [vmem:[#allocation34_spill] sm:$0xff] %v22176_v60  ;;  %24434 = vst [vmem:[#allocation35_spill] sm:$0xff] %v22191_v44  ;;  %v8939_v55 = vmul.f32 %v22176_v60, %v20904_v8  ;;  %17945 = vmatpush1.bf16.msra.mxu0 %v20005_v58  ;;  %v8986_v4 = vmul.f32 0.2, %v8954_v35  ;;  %v8940_v3 = vmul.f32 %v22191_v44, %v20904_v8  ;;  %v8979_v63 = vmul.f32 0.2, %v8947_v5 }
 0x5b0   : > { %19305 = vrot.lane.b32.xlu1 %v22180_v34, %s20004_s20  ;;  %v19319_v50 = vpack.i.bf16 %v22173_v19, %v22200_v10  ;;  %v22217_v43 = vpack.c.bf16 %v22173_v19, %v22188_v42  ;;  %v22227_v11 = vsel %vm8960_vm15, %v22121_v21, %v8976_v54  ;;  %vm8970_vm6 = vcmp.ge.f32.partialorder %v8954_v35, 0.0  ;;  %17949 = vmatpush1.bf16.msra.mxu1 %v22207_v6 }
 0x5b1   : > { %v8955_v25 = vadd.f32 %v8939_v55, %v20931_v37  ;;  %v8978_v36 = vmul.f32 0.2, %v8946_v18  ;;  %vm8963_vm12 = vcmp.ge.f32.partialorder %v8947_v5, 0.0  ;;  %19300 = vrot.lane.b32.xlu0 %v22197_v57, %s20004_s20  ;;  %v22236_v53 = vpack.c.bf16 %v22200_v10, %v22227_v11 }
 0x5b2   : > { %17951 = vmatprep.subr.bf16.mxu0 %v22217_v43  ;;  %vm8962_vm5 = vcmp.ge.f32.partialorder %v8946_v18, 0.0  ;;  %v8956_v54 = vadd.f32 %v8940_v3, %v20931_v37  ;;  %17093 = vmatmul.mubr.msk.f32.vlgmr.msra.gmra.mrb[24].mxu0 %vm24417_vm9, %v22222_v27  ;;  %v9002_v32 = vsel %vm8970_vm6, %v8954_v35, %v8986_v4  ;;  %v8932_v33 = vmul.f32 %v22158_v28, %v20895_v61 }
 0x5b3   : > { %vm8971_vm3 = vcmp.ge.f32.partialorder %v8955_v25, 0.0  ;;  %v8987_v21 = vmul.f32 0.2, %v8955_v25  ;;  %v19309_v39 = vpack.i.bf16 %v22188_v42, %v22227_v11  ;;  %17953 = vmatpush1.bf16.msra.mxu0 %v22236_v53  ;;  %v8995_v46 = vsel %vm8963_vm12, %v8947_v5, %v8979_v63  ;;  %17095 = vmatmul.mubr.msk.f32.vlgmr.msra.gmra.mrb[24].mxu1 %vm24436_vm13, %v22222_v27  ;;  %v17092_v5 = vld [vmem:[%s24435_s23 + $0x18] sm:$0xff] }
 0x5b4   : > { %19320 = vrot.lane.b32.xlu1 %v19319_v50, %s20004_s20  ;;  %v8994_v55 = vsel %vm8962_vm5, %v8946_v18, %v8978_v36  ;;  %v19324_v35 = vpack.i.bf16 %v22149_v51, %v22142_v24  ;;  %v8988_v4 = vmul.f32 0.2, %v8956_v54  ;;  %9255 = vmatprep.mubr.f32.mxu0 %v24316_v41  ;;  %v8948_v50 = vadd.f32 %v8932_v33, %v20902_v7 }
 0x5b5   : > { %v9003_v17 = vsel %vm8971_vm3, %v8955_v25, %v8987_v21  ;;  %19310 = vrot.lane.b32.xlu0 %v19309_v39, %s20004_s20  ;;  %v22254_v3 = vpack.c.bf16 %v9002_v32, %v8994_v55  ;;  %vm8972_vm2 = vcmp.ge.f32.partialorder %v8956_v54, 0.0  ;;  %v19314_v18 = vpack.i.bf16 %v22139_v9, %v22112_v15  ;;  %9332 = vmatprep.mubr.f32.mxu1 %v24316_v41 }
 0x5b6   : > { %v22250_v58 = vpack.c.bf16 %v9003_v17, %v8995_v46  ;;  %v22267_v63 = vpack.i.bf16 %v8995_v46, %v8994_v55  ;;  %v19464_v25 = vpack.i.bf16 %v22142_v24, %v22112_v15  ;;  %v9004_v36 = vsel %vm8972_vm2, %v8956_v54, %v8988_v4  ;;  %17094 = vmatmul.mubr.msk.f32.gmra.mrb[26].mxu0 %vm24437_vm14, %v17092_v5 }
 0x5b7   : > { %v19459_v21 = vpack.i.bf16 %v22154_v31, %v22149_v51  ;;  %vm8964_vm10 = vcmp.ge.f32.partialorder %v8948_v50, 0.0  ;;  %v19494_v33 = vpack.i.bf16 %v22200_v10, %v22227_v11  ;;  %v19479_v39 = vpack.i.bf16 %v22173_v19, %v22188_v42  ;;  %9403 = vmatprep.mubr.f32.mxu0 %v24316_v41  ;;  %17096 = vmatmul.mubr.msk.f32.gmra.mrb[26].mxu1 %vm24439_vm11, %v17092_v5  ;;  %vm24452_vm11 = vmmov %vm24440_vm0 }
 0x5b8   : > { %17955 = vmatprep.subr.bf16.mxu1 %v22250_v58  ;;  %19325 = vrot.lane.b32.xlu1 %v19324_v35, %s20006_s25  ;;  %v8980_v44 = vmul.f32 0.2, %v8948_v50  ;;  %v19514_v15 = vpack.i.bf16 %v22200_v10, %v22154_v31  ;;  %v19509_v24 = vpack.i.bf16 %v22227_v11, %v22147_v16  ;;  %v19524_v51 = vpack.i.bf16 %v8994_v55, %v22188_v42 }
 0x5b9   : > { %17957 = vmatpush1.bf16.msra.mxu1 %v22254_v3  ;;  %19315 = vrot.lane.b32.xlu0 %v19314_v18, %s20006_s25  ;;  %v19534_v54 = vpack.i.bf16 %v9002_v32, %v22173_v19  ;;  %v19539_v4 = vpack.i.bf16 %v9004_v36, %v9003_v17  ;;  %v19349_v31 = vpack.i.bf16 %v9003_v17, %v9002_v32  ;;  %vm24168_vm1 = vcmask 31744  }
 0x5ba   : > { %17097 = vmatmul.mubr.msk.f32.vlgmr.msra.gmra.mrb[28].mxu0 %vm24438_vm7, %v22222_v27  ;;  %v8996_v42 = vsel %vm8964_vm10, %v8948_v50, %v8980_v44  ;;  %9480 = vmatprep.mubr.f32.mxu1 %v24316_v41  ;;  %v19419_v10 = vpack.i.bf16 %v22147_v16, %v22139_v9  ;;  %v19484_v9 = vpack.i.bf16 %v24316_v41, %v9004_v36  ;;  %vm9022_vm15 = vcmp.ge.s32.totalorder %v20462_v0, 4 }
 0x5bb   : > { %9409 = vmatprep.mubr.f32.mxu0 %v24316_v41  ;;  %v22298_v19 = vpack.c.bf16 %v9004_v36, %v8996_v42  ;;  %v19379_v44 = vpack.i.bf16 %v8996_v42, %v8995_v46  ;;  %v19469_v16 = vpack.i.bf16 %v24316_v41, %v8996_v42  ;;  %vm9021_vm6 = vcmp.ge.s32.totalorder %v20464_v1, 4  ;;  %vm22372_vm12 = vmpackc.low %vm9022_vm15, %vm9022_vm15 }
 0x5bc   : > { %19335 = vrot.lane.b32.xlu1 %v22267_v63, %s20004_s20  ;;  %17099 = vmatmul.mubr.msk.f32.vlgmr.msra.gmra.mrb[28].mxu1 %vm24441_vm8, %v22222_v27  ;;  %v19286_v27 = vpop.permute.xlu1 %19285  ;;  %vm22376_vm5 = vmpackc.low %vm9021_vm6, %vm9021_vm6  ;;  %vm9024_vm3 = vcmp.ge.s32.totalorder %v20483_v12, 4  ;;  %vm9023_vm9 = vcmp.ge.s32.totalorder %v20490_v14, 4  ;;  %vm9026_vm14 = vcmp.ge.s32.totalorder %v20513_v26, 4  ;;  %vm9025_vm10 = vcmp.ge.s32.totalorder %v20521_v30, 4 }
 0x5bd   : > { %19330 = vrot.lane.b32.xlu0 %v24316_v41, %s20006_s25  ;;  %9486 = vmatprep.mubr.f32.mxu1 %v24316_v41  ;;  %v19287_v11 = vunpack.i.l.bf16 %v19286_v27  ;;  %vm22394_vm13 = vmpackc.low %vm9024_vm3, %vm9024_vm3  ;;  %vm24170_vm7 = vcmask 1014784   ;;  %v24473_v40 = vmov 0 }
 0x5be   : > { %17098 = vmatmul.mubr.msk.f32.gmra.mrb[30].mxu0 %vm24440_vm0, %v17092_v5  ;;  %vm22406_vm2 = vmpackc.low %vm9023_vm9, %vm9023_vm9  ;;  %vm9029_vm9 = vcmp.lt.s32.totalorder %v20464_v1, 28 }
 0x5bf   : > { %9563 = vmatprep.mubr.f32.mxu0 %v24316_v41  ;;  %vm22428_vm0 = vmpackc.low %vm9026_vm14, %vm9026_vm14 }
 0x5c0   : > { %19340 = vrot.lane.b32.xlu1 %v19524_v51, %s20006_s25  ;;  %17100 = vmatmul.mubr.msk.f32.gmra.mrb[30].mxu1 %vm24442_vm4, %v17092_v5  ;;  %vm22443_vm8 = vmpackc.low %vm9025_vm10, %vm9025_vm10  ;;  %vm9030_vm4 = vcmp.lt.s32.totalorder %v20462_v0, 28 }
 0x5c1   : > { %19350 = vrot.lane.b32.xlu0 %v19349_v31, %s20004_s20  ;;  %9640 = vmatprep.mubr.f32.mxu1 %v24316_v41  ;;  %vm24457_vm15 = vmmov %vm24452_vm11 }
 0x5c2   : > { %vm22462_vm6 = vmpackc.low %vm9030_vm4, %vm9030_vm4  ;;  %vm9028_vm4 = vcmp.ge.s32.totalorder %v20537_v38, 4 }
 0x5c3   : > { %vm24460_vm3 = vmmov %vm24452_vm11 }
 0x5c4   : > { %19345 = vrot.lane.b32.xlu1 %v19494_v33, %s20006_s25  ;;  %vm24461_vm14 = vmmov %vm24460_vm3 }
 0x5c5   : > { %19355 = vrot.lane.b32.xlu0 %v19534_v54, %s20006_s25  ;;  %vm22479_vm10 = vmpackc.low %vm9029_vm9, %vm9029_vm9 }
 0x5c6   : > { %vm22504_vm9 = vmpackc.low %vm9028_vm4, %vm9028_vm4  ;;  %vm9033_vm4 = vcmp.lt.s32.totalorder %v20521_v30, 28 }
 0x5c8   : > { %19365 = vrot.lane.b32.xlu1 %v19314_v18, %s20004_s20 }
 0x5c9   : > { %19360 = vrot.lane.b32.xlu0 %v22197_v57, %s20006_s25 }
 0x5cc   : > { %19375 = vrot.lane.b32.xlu1 %v24316_v41, %s20004_s20 }
 0x5cd   : > { %19370 = vrot.lane.b32.xlu0 %v19324_v35, %s20004_s20  ;;  %v19288_v35 = vunpack.i.h.bf16 %v19286_v27 }
 0x5d0   : > { %19395 = vrot.lane.b32.xlu1 %v19539_v4, %s20006_s25 }
 0x5d1   : > { %19380 = vrot.lane.b32.xlu0 %v19379_v44, %s20006_s25 }
 0x5d4   : > { %19400 = vrot.lane.b32.xlu1 %v19534_v54, %s20004_s20 }
 0x5d5   : > { %19385 = vrot.lane.b32.xlu0 %v19524_v51, %s20004_s20 }
 0x5d8   : > { %19405 = vrot.lane.b32.xlu1 %v22197_v57, %s20004_s20  ;;  %v12683_v57 = vld [vmem:[%s24443_s13] sm:$0xff] }
 0x5d9   : > { %19390 = vrot.lane.b32.xlu0 %v19494_v33, %s20004_s20 }
 0x5dc   : > { %19415 = vrot.lane.b32.xlu1 %v19539_v4, %s20004_s20 }
 0x5dd   : > { %19410 = vrot.lane.b32.xlu0 %v19379_v44, %s20004_s20 }
 0x5e0   : > { %19425 = vrot.lane.b32.xlu1 %v19459_v21, %s20006_s25 }
 0x5e1   : > { %19420 = vrot.lane.b32.xlu0 %v19419_v10, %s20006_s25 }
 0x5e4   : > { %19435 = vrot.lane.b32.xlu1 %v22267_v63, %s20006_s25 }
 0x5e5   : > { %19430 = vrot.lane.b32.xlu0 %v19464_v25, %s20006_s25 }
 0x5e8   : > { %19440 = vrot.lane.b32.xlu1 %v19479_v39, %s20006_s25 }
 0x5e9   : > { %19445 = vrot.lane.b32.xlu0 %v19349_v31, %s20006_s25 }
 0x5ec   : > { %19455 = vrot.lane.b32.xlu1 %v19419_v10, %s20004_s20 }
 0x5ed   : > { %19450 = vrot.lane.b32.xlu0 %v19494_v33, %s20006_s25 }
 0x5f0   : > { %19465 = vrot.lane.b32.xlu1 %v19464_v25, %s20004_s20 }
 0x5f1   : > { %19460 = vrot.lane.b32.xlu0 %v19459_v21, %s20004_s20 }
 0x5f4   : > { %19485 = vrot.lane.b32.xlu1 %v19484_v9, %s20006_s25 }
 0x5f5   : > { %19470 = vrot.lane.b32.xlu0 %v19469_v16, %s20006_s25 }
 0x5f8   : > { %19490 = vrot.lane.b32.xlu1 %v19349_v31, %s20004_s20 }
 0x5f9   : > { %19475 = vrot.lane.b32.xlu0 %v22267_v63, %s20004_s20 }
 0x5fc   : > { %19495 = vrot.lane.b32.xlu1 %v19494_v33, %s20004_s20 }
 0x5fd   : > { %19480 = vrot.lane.b32.xlu0 %v19479_v39, %s20004_s20 }
 0x600   : > { %19505 = vrot.lane.b32.xlu1 %v19484_v9, %s20004_s20 }
 0x601   : > { %19500 = vrot.lane.b32.xlu0 %v19469_v16, %s20004_s20 }
 0x604   : > { %19515 = vrot.lane.b32.xlu1 %v19514_v15, %s20006_s25 }
 0x605   : > { %19510 = vrot.lane.b32.xlu0 %v19509_v24, %s20006_s25 }
 0x608   : > { %19525 = vrot.lane.b32.xlu1 %v19524_v51, %s20006_s25 }
 0x609   : > { %19520 = vrot.lane.b32.xlu0 %v22180_v34, %s20006_s25  ;;  %v12684_v34 = vld [vmem:[%s24443_s13 + $0x8] sm:$0xff] }
 0x60c   : > { %19530 = vrot.lane.b32.xlu1 %v19379_v44, %s20006_s25 }
 0x60d   : > { %19535 = vrot.lane.b32.xlu0 %v19534_v54, %s20006_s25 }
 0x610   : > { %19545 = vrot.lane.b32.xlu1 %v24316_v41, %s20006_s25 }
 0x611   : > { %19540 = vrot.lane.b32.xlu0 %v19539_v4, %s20006_s25 }
 0x614   : > { %12687 = vperm.xlu1 %18923, %v12683_v57  }
 0x615   : > { %19550 = vrot.lane.b32.xlu0 %v24316_v41, %s20006_s25 }
 0x618   : > { %19555 = vrot.lane.b32.xlu1 %v24316_v41, %s20007_s21 }
 0x619   : > { %12692 = vperm.xlu0 %18922, %v12684_v34  }
 0x61c   : > { %19565 = vrot.lane.b32.xlu1 %v24316_v41, %s20007_s21 }
 0x61d   : > { %19560 = vrot.lane.b32.xlu0 %v24316_v41, %s20007_s21 }
 0x61e   : > { %v19291_v32 = vpop.permute.xlu1 %19290 }
 0x61f   : > { %v19293_v46 = vunpack.i.h.bf16 %v19291_v32  ;;  %v19292_v17 = vunpack.i.l.bf16 %v19291_v32  ;;  %v19296_v55 = vpop.permute.xlu0 %19295  ;;  %v22401_v32 = vld [vmem:[%s24435_s23] sm:$0xff] }
 0x620   : > { %v19298_v50 = vunpack.i.h.bf16 %v19296_v55  ;;  %v19297_v18 = vunpack.i.l.bf16 %v19296_v55 }
 0x621   : > { %v9126_v5 = vsel %vm24168_vm1, %v19287_v11, %v19292_v17  ;;  %v9127_v63 = vsel %vm24168_vm1, %v19292_v17, %v19293_v46 }
 0x622   : > { %v19306_v25 = vpop.permute.xlu1 %19305  ;;  %v9134_v36 = vsel %vm24168_vm1, %v19288_v35, %v19297_v18  ;;  %v9135_v21 = vsel %vm24168_vm1, %v19297_v18, %v19298_v50 }
 0x623   : > { %v19308_v33 = vunpack.i.h.bf16 %v19306_v25  ;;  %v19307_v39 = vunpack.i.l.bf16 %v19306_v25  ;;  %v17961_v24 = vpack.c.bf16 %v9134_v36, %v9126_v5  ;;  %v19301_v51 = vpop.permute.xlu0 %19300  ;;  %v17958_v54 = vpack.c.bf16 %v9135_v21, %v9127_v63 }
 0x624   : > { %v19303_v44 = vunpack.i.h.bf16 %v19301_v51  ;;  %v19302_v10 = vunpack.i.l.bf16 %v19301_v51  ;;  %v22436_v51 = vld [vmem:[%s24435_s23 + $0x8] sm:$0xff] }
 0x625   : > { %v9136_v31 = vsel %vm24168_vm1, %v19298_v50, %v19308_v33  ;;  %v9128_v42 = vsel %vm24168_vm1, %v19293_v46, %v19307_v39  ;;  %17960 = vmatprep.subr.msk.bf16.mxu0 %vm22372_vm12, %v17958_v54 }
 0x626   : > { %v22386_v9 = vpop.permute.xlu1 %19320  ;;  %v9129_v16 = vsel %vm24168_vm1, %v19307_v39, %v19302_v10  ;;  %v9137_v57 = vsel %vm24168_vm1, %v19308_v33, %v19303_v44  ;;  %17963 = vmatpush1.bf16.msk.msra.mxu0 %vm22376_vm5, %v17961_v24  ;;  %v17967_v46 = vpack.c.bf16 %v9136_v31, %v9128_v42  ;;  %v24453_v24 = vmov 0 }
 0x627   : > { %v19323_v34 = vunpack.i.h.bf16 %v22386_v9  ;;  %v19322_v27 = vunpack.i.l.bf16 %v22386_v9  ;;  %v19311_v17 = vpop.permute.xlu0 %19310  ;;  %v17964_v55 = vpack.c.bf16 %v9137_v57, %v9129_v16  ;;  %v24454_v24 = vsel %vm22428_vm0, 4294967295, %v24453_v24 }
 0x628   : > { %v19313_v50 = vunpack.i.h.bf16 %v19311_v17  ;;  %v19312_v18 = vunpack.i.l.bf16 %v19311_v17  ;;  %v24458_v17 = vmov 0 }
 0x629   : > { %v9138_v5 = vsel %vm24168_vm1, %v19303_v44, %v19322_v27  ;;  %v9139_v63 = vsel %vm24168_vm1, %v19322_v27, %v19323_v34  ;;  %17966 = vmatprep.subr.msk.bf16.mxu1 %vm22394_vm13, %v17964_v55  ;;  %17105 = vmatmul.mubr.msk.f32.vlgmr.msra.gmra.mrb[24].mxu0 %vm24452_vm11, %v22401_v32  ;;  %v24459_v17 = vsel %vm22462_vm6, 4294967295, %v24458_v17  ;;  %vm24464_vm11 = vmmov %vm24460_vm3 }
 0x62a   : > { %v22418_v25 = vpop.permute.xlu1 %19325  ;;  %v9130_v36 = vsel %vm24168_vm1, %v19302_v10, %v19312_v18  ;;  %v9131_v21 = vsel %vm24168_vm1, %v19312_v18, %v19313_v50  ;;  %17969 = vmatpush1.bf16.msk.msra.mxu1 %vm22406_vm2, %v17967_v46  ;;  %9569 = vmatprep.mubr.f32.mxu0 %v24316_v41 }
 0x62b   : > { %v24163_v33 = vunpack.i.h.bf16 %v22418_v25  ;;  %v19327_v39 = vunpack.i.l.bf16 %v22418_v25  ;;  %v17973_v54 = vpack.c.bf16 %v9138_v5, %v9130_v36  ;;  %v22438_v31 = vpop.permute.xlu0 %19315  ;;  %v17970_v42 = vpack.c.bf16 %v9139_v63, %v9131_v21 }
 0x62c   : > { %v24162_v10 = vunpack.i.h.bf16 %v22438_v31  ;;  %v19317_v16 = vunpack.i.l.bf16 %v22438_v31  ;;  %v24479_v23 = vunpack.i.h.bf16 %v22438_v31 }
 0x62d   : > { %v9905_v57 = vsel %vm24170_vm7, %v19327_v39, %v24163_v33  ;;  %17972 = vmatprep.subr.msk.bf16.mxu0 %vm22428_vm0, %v17970_v42  ;;  %17106 = vmatmul.mubr.msk.f32.gmra.mrb[26].mxu0 %vm24457_vm15, %v22436_v51  ;;  %v24465_v33 = vld [vmem:[#allocation19_spill] sm:$0xff] }
 0x62e   : > { %v19336_v27 = vpop.permute.xlu1 %19335  ;;  %v9897_v46 = vsel %vm24170_vm7, %v19317_v16, %v24162_v10  ;;  %17975 = vmatpush1.bf16.msk.msra.mxu0 %vm22443_vm8, %v17973_v54  ;;  %9717 = vmatprep.mubr.f32.mxu0 %v24316_v41  ;;  %vm9027_vm15 = vcmp.ge.s32.totalorder %v24465_v33, 4 }
 0x62f   : > { %v19331_v55 = vpop.permute.xlu0 %19330  ;;  %v17982_v18 = vpack.c.bf16 %v9905_v57, %v9897_v46  ;;  %17111 = vmatmul.mubr.msk.f32.vlgmr.msra.gmra.mrb[24].mxu1 %vm24460_vm3, %v22401_v32  ;;  %v19338_v36 = vunpack.i.h.bf16 %v19336_v27  ;;  %v19337_v21 = vunpack.i.l.bf16 %v19336_v27  ;;  %v24462_v46 = vmov 0 }
 0x630   : > { %v19333_v5 = vunpack.i.h.bf16 %v19331_v55  ;;  %v19332_v63 = vunpack.i.l.bf16 %v19331_v55  ;;  %9646 = vmatprep.mubr.f32.mxu1 %v24316_v41  ;;  %v24463_v46 = vsel %vm22479_vm10, 4294967295, %v24462_v46 }
 0x631   : > { %17984 = vmatprep.subr.msk.bf16.mxu0 %vm22462_vm6, %v17982_v18  ;;  %17117 = vmatmul.mubr.msk.f32.vlgmr.msra.gmra.mrb[28].mxu0 %vm24461_vm14, %v22401_v32  ;;  %vm22513_vm14 = vmpackc.low %vm9027_vm15, %vm9027_vm15 }
 0x632   : > { %v22473_v54 = vpop.permute.xlu1 %19340  ;;  %v9896_v42 = vsel %vm24170_vm7, %v19332_v63, %v19317_v16  ;;  %v9904_v57 = vsel %vm24170_vm7, %v19333_v5, %v19327_v39  ;;  %9723 = vmatprep.mubr.f32.mxu0 %v24316_v41  ;;  %v9132_v39 = vsel %vm24168_vm1, %v19313_v50, %v19337_v21  ;;  %v9133_v16 = vsel %vm24168_vm1, %v19337_v21, %v19338_v36  ;;  %vm24470_vm15 = vmmov %vm24460_vm3 }
 0x633   : > { %v17985_v55 = vpack.c.bf16 %v9904_v57, %v9896_v42  ;;  %v19351_v27 = vpop.permute.xlu0 %19350  ;;  %17112 = vmatmul.mubr.msk.f32.gmra.mrb[26].mxu1 %vm24464_vm11, %v22436_v51  ;;  %v24173_v5 = vunpack.i.h.bf16 %v22473_v54  ;;  %v19342_v63 = vunpack.i.l.bf16 %v22473_v54  ;;  %vm9034_vm11 = vcmp.lt.s32.totalorder %v20513_v26, 28 }
 0x634   : > { %v19353_v18 = vunpack.i.h.bf16 %v19351_v27  ;;  %v19352_v10 = vunpack.i.l.bf16 %v19351_v27  ;;  %9794 = vmatprep.mubr.f32.mxu1 %v24316_v41 }
 0x635   : > { %17987 = vmatpush1.bf16.msk.msra.mxu0 %vm22479_vm10, %v17985_v55 }
 0x636   : > { %v19346_v42 = vpop.permute.xlu1 %19345  ;;  %v9140_v57 = vsel %vm24168_vm1, %v19323_v34, %v19352_v10  ;;  %v9141_v27 = vsel %vm24168_vm1, %v19352_v10, %v19353_v18  ;;  %17118 = vmatmul.mubr.msk.f32.gmra.mrb[30].mxu0 %vm24460_vm3, %v22436_v51  ;;  %v24468_v34 = vmov 0  ;;  %v22521_v10 = vld [vmem:[%s24435_s23 + $0x20] sm:$0xff]  ;;  %vm22541_vm3 = vmpackc.low %vm9034_vm11, %vm9034_vm11 }
 0x637   : > { %v19348_v60 = vunpack.i.h.bf16 %v19346_v42  ;;  %v19347_v49 = vunpack.i.l.bf16 %v19346_v42  ;;  %v17979_v36 = vpack.c.bf16 %v9140_v57, %v9132_v39  ;;  %v22508_v21 = vpop.permute.xlu0 %19355  ;;  %v17976_v9 = vpack.c.bf16 %v9141_v27, %v9133_v16  ;;  %10017 = vmatprep.mubr.f32.mxu0 %v24316_v41  ;;  %vm22545_vm1 = vmpackc.low %vm9033_vm4, %vm9033_vm4 }
 0x638   : > { %v24469_v34 = vsel %vm22513_vm14, 4294967295, %v24468_v34  ;;  %v19358_v18 = vunpack.i.h.bf16 %v22508_v21  ;;  %v19357_v39 = vunpack.i.l.bf16 %v22508_v21  ;;  %v9901_v42 = vsel %vm24170_vm7, %v19342_v63, %v24173_v5  ;;  %vm24475_vm4 = vmmov %vm24470_vm15  ;;  %v17249_v21 = vld [vmem:[%s24435_s23 + $0x80] sm:$0xff] }
 0x639   : > { %v9900_v55 = vsel %vm24170_vm7, %v19347_v49, %v19342_v63  ;;  %17978 = vmatprep.subr.msk.bf16.mxu1 %vm22504_vm9, %v17976_v9  ;;  %v24474_v40 = vsel %vm22545_vm1, 4294967295, %v24473_v40 }
 0x63a   : > { %v22530_v16 = vpop.permute.xlu1 %19365  ;;  %v9908_v57 = vsel %vm24170_vm7, %v19348_v60, %v19357_v39  ;;  %v9909_v27 = vsel %vm24170_vm7, %v19357_v39, %v19358_v18  ;;  %17981 = vmatpush1.bf16.msk.msra.mxu1 %vm22513_vm14, %v17979_v36  ;;  %17131 = vmatmul.mubr.msk.f32.vlgmr.msra.gmra.mrb[24].mxu0 %vm24470_vm15, %v22521_v10  ;;  %vm9032_vm7 = vcmp.lt.s32.totalorder %v20483_v12, 28  ;;  %v22554_v39 = vld [vmem:[%s24435_s23 + $0x28] sm:$0xff]  ;;  %vm24477_vm15 = vcmask 1014784  }
 0x63b   : > { %v17997_v9 = vpack.c.bf16 %v9908_v57, %v9900_v55  ;;  %v19361_v52 = vpop.permute.xlu0 %19360  ;;  %v17994_v28 = vpack.c.bf16 %v9909_v27, %v9901_v42  ;;  %10023 = vmatprep.mubr.f32.mxu0 %v24316_v41  ;;  %v19367_v42 = vunpack.i.l.bf16 %v22530_v16  ;;  %vm24478_vm10 = vmmov %vm24477_vm15 }
 0x63c   : > { %v19363_v63 = vunpack.i.h.bf16 %v19361_v52  ;;  %v19362_v36 = vunpack.i.l.bf16 %v19361_v52  ;;  %v24476_v52 = vunpack.i.h.bf16 %v22418_v25  ;;  %vm24480_vm11 = vmmov %vm24478_vm10 }
 0x63d   : > { %17123 = vmatmul.mubr.msk.f32.vlgmr.msra.gmra.mrb[28].mxu1 %vm24475_vm4, %v22401_v32  ;;  %17996 = vmatprep.subr.msk.bf16.mxu0 %vm22541_vm3, %v17994_v28  ;;  %vm24481_vm6 = vmmov %vm24478_vm10 }
 0x63e   : > { %v19376_v57 = vpop.permute.xlu1 %19375  ;;  %v9906_v27 = vsel %vm24477_vm15, %v24476_v52, %v19363_v63  ;;  %v9907_v5 = vsel %vm24478_vm10, %v19363_v63, %v19348_v60  ;;  %v9898_v22 = vsel %vm24480_vm11, %v24479_v23, %v19362_v36  ;;  %v9899_v55 = vsel %vm24481_vm6, %v19362_v36, %v19347_v49  ;;  %17999 = vmatpush1.bf16.msk.msra.mxu0 %vm22545_vm1, %v17997_v9  ;;  %vm22573_vm4 = vmpackc.low %vm9032_vm7, %vm9032_vm7 }
 0x63f   : > { %v17988_v28 = vpack.c.bf16 %v9907_v5, %v9899_v55  ;;  %v17991_v13 = vpack.c.bf16 %v9906_v27, %v9898_v22  ;;  %v19378_v25 = vunpack.i.h.bf16 %v19376_v57  ;;  %v19377_v48 = vunpack.i.l.bf16 %v19376_v57  ;;  %v22577_v52 = vpop.permute.xlu0 %19370  ;;  %9800 = vmatprep.mubr.f32.mxu1 %v24316_v41 }
 0x640   : > { %vm24484_vm10 = vcmask 130048   ;;  %vm24485_vm6 = vcmp.lt.s32.totalorder %v20490_v14, 28  ;;  %v24486_v23 = vmov 0  ;;  %v19373_v49 = vunpack.i.h.bf16 %v22577_v52 }
 0x641   : > { %17132 = vmatmul.mubr.msk.f32.gmra.mrb[26].mxu0 %vm24484_vm10, %v22554_v39  ;;  %vm22585_vm11 = vmpackc.low %vm24485_vm6, %vm24485_vm6  ;;  %v19372_v22 = vunpack.i.l.bf16 %v22577_v52  ;;  %v24488_v60 = vunpack.i.h.bf16 %v22530_v16  ;;  %vm24489_vm7 = vcmask 31744   ;;  %17124 = vmatmul.mubr.msk.f32.gmra.mrb[30].mxu1 %vm24484_vm10, %v22436_v51 }
 0x642   : > { %v24487_v23 = vsel %vm22585_vm11, 4294967295, %v24486_v23  ;;  %10171 = vmatprep.mubr.f32.mxu0 %v24316_v41  ;;  %vm24490_vm15 = vmmov %vm24489_vm7  ;;  %17990 = vmatprep.subr.msk.bf16.mxu1 %vm22573_vm4, %v17988_v28  ;;  %v19396_v9 = vpop.permute.xlu1 %19395 }
 0x643   : > { %v10314_v31 = vsel %vm24489_vm7, %v19367_v42, %v24488_v60  ;;  %v10313_v5 = vsel %vm24490_vm15, %v19377_v48, %v19367_v42  ;;  %vm24491_vm6 = vmmov %vm24489_vm7  ;;  %17993 = vmatpush1.bf16.msk.msra.mxu1 %vm22585_vm11, %v17991_v13  ;;  %v19398_v55 = vunpack.i.h.bf16 %v19396_v9  ;;  %v19397_v57 = vunpack.i.l.bf16 %v19396_v9  ;;  %10094 = vmatprep.mubr.f32.mxu1 %v24316_v41  ;;  %v19381_v42 = vpop.permute.xlu0 %19380 }
 0x644   : > { %v10321_v63 = vsel %vm24491_vm6, %v19378_v25, %v19372_v22  ;;  %vm24492_vm1 = vmmov %vm24491_vm6  ;;  %vm9036_vm15 = vcmp.lt.s32.totalorder %v20537_v38, 28  ;;  %vm24494_vm6 = vcmask 1014784   ;;  %v19383_v25 = vunpack.i.h.bf16 %v19381_v42 }
 0x645   : > { %v10322_v36 = vsel %vm24492_vm1, %v19372_v22, %v19373_v49  ;;  %v18009_v48 = vpack.c.bf16 %v10321_v63, %v10313_v5  ;;  %vm24493_vm7 = vmmov %vm24484_vm10  ;;  %v9910_v51 = vsel %vm24494_vm6, %v19358_v18, %v19397_v57  ;;  %v19382_v13 = vunpack.i.l.bf16 %v19381_v42  ;;  %v22644_v42 = vld [vmem:[%s24435_s23 + $0x30] sm:$0xff] }
 0x646   : > { %v18006_v27 = vpack.c.bf16 %v10322_v36, %v10314_v31  ;;  %17143 = vmatmul.mubr.msk.f32.vlgmr.msra.gmra.mrb[28].mxu0 %vm24493_vm7, %v22521_v10  ;;  %vm24495_vm1 = vmmov %vm24494_vm6  ;;  %v19401_v52 = vpop.permute.xlu1 %19400  ;;  %v24497_v22 = vunpack.i.h.bf16 %v22473_v54  ;;  %v24500_v9 = vmov 0  ;;  %vm24502_vm6 = vcmask 130048  }
 0x647   : > { %v9911_v28 = vsel %vm24495_vm1, %v19397_v57, %v19398_v55  ;;  %10177 = vmatprep.mubr.f32.mxu0 %v24316_v41  ;;  %vm24496_vm11 = vmmov %vm24493_vm7  ;;  %v19403_v18 = vunpack.i.h.bf16 %v19401_v52  ;;  %v19402_v5 = vunpack.i.l.bf16 %v19401_v52  ;;  %v19386_v36 = vpop.permute.xlu0 %19385  ;;  %v24504_v55 = vmov 0 }
 0x648   : > { %17137 = vmatmul.mubr.msk.f32.vlgmr.msra.gmra.mrb[24].mxu1 %vm24496_vm11, %v22521_v10  ;;  %18008 = vmatprep.subr.msk.bf16.mxu0 %vm22372_vm12, %v18006_v27  ;;  %vm24498_vm7 = vmmov %vm24495_vm1  ;;  %v19388_v27 = vunpack.i.h.bf16 %v19386_v36 }
 0x649   : > { %v9902_v60 = vsel %vm24498_vm7, %v24497_v22, %v19382_v13  ;;  %vm24499_vm10 = vmmov %vm24495_vm1  ;;  %18011 = vmatpush1.bf16.msk.msra.mxu0 %vm22376_vm5, %v18009_v48  ;;  %10100 = vmatprep.mubr.f32.mxu1 %v24316_v41  ;;  %vm24506_vm7 = vcmask 31744   ;;  %v19387_v48 = vunpack.i.l.bf16 %v19386_v36 }
 0x64a   : > { %v9903_v31 = vsel %vm24499_vm10, %v19382_v13, %v19383_v25  ;;  %vm22626_vm11 = vmpackc.low %vm9036_vm15, %vm9036_vm15  ;;  %v18003_v54 = vpack.c.bf16 %v9910_v51, %v9902_v60  ;;  %17144 = vmatmul.mubr.msk.f32.gmra.mrb[30].mxu0 %vm24502_vm6, %v22554_v39  ;;  %vm24503_vm10 = vcmp.lt.s32.totalorder %v24465_v33, 28  ;;  %v10326_v57 = vsel %vm24506_vm7, %v19402_v5, %v19403_v18  ;;  %v19406_v51 = vpop.permute.xlu1 %19405 }
 0x64b   : > { %v24501_v9 = vsel %vm22626_vm11, 4294967295, %v24500_v9  ;;  %v18000_v63 = vpack.c.bf16 %v9911_v28, %v9903_v31  ;;  %vm22635_vm1 = vmpackc.low %vm24503_vm10, %vm24503_vm10  ;;  %10434 = vmatprep.mubr.f32.mxu0 %v24316_v41  ;;  %v19408_v25 = vunpack.i.h.bf16 %v19406_v51  ;;  %v19407_v13 = vunpack.i.l.bf16 %v19406_v51  ;;  %v19391_v22 = vpop.permute.xlu0 %19390 }
 0x64c   : > { %v24505_v55 = vsel %vm22635_vm1, 4294967295, %v24504_v55  ;;  %vm24507_vm15 = vmmov %vm24502_vm6  ;;  %v24510_v60 = vunpack.i.h.bf16 %v22530_v16  ;;  %v19393_v36 = vunpack.i.h.bf16 %v19391_v22  ;;  %v19392_v62 = vunpack.i.l.bf16 %v19391_v22 }
 0x64d   : > { %17138 = vmatmul.mubr.msk.f32.gmra.mrb[26].mxu1 %vm24507_vm15, %v22554_v39  ;;  %18002 = vmatprep.subr.msk.bf16.mxu1 %vm22626_vm11, %v18000_v63  ;;  %vm24508_vm6 = vmmov %vm24506_vm7 }
 0x64e   : > { %v10318_v28 = vsel %vm24508_vm6, %v19387_v48, %v19388_v27  ;;  %18005 = vmatpush1.bf16.msk.msra.mxu1 %vm22635_vm1, %v18003_v54  ;;  %10248 = vmatprep.mubr.f32.mxu1 %v24316_v41  ;;  %vm24509_vm10 = vmmov %vm24507_vm15  ;;  %v22664_v54 = vld [vmem:[%s24435_s23 + $0x38] sm:$0xff]  ;;  %v19416_v16 = vpop.permute.xlu1 %19415 }
 0x64f   : > { %v18018_v52 = vpack.c.bf16 %v10326_v57, %v10318_v28  ;;  %17157 = vmatmul.mubr.msk.f32.vlgmr.msra.gmra.mrb[24].mxu0 %vm24509_vm10, %v22644_v42  ;;  %vm24511_vm7 = vmmov %vm24508_vm6  ;;  %v19411_v59 = vpop.permute.xlu0 %19410 }
 0x650   : > { %v10315_v31 = vsel %vm24511_vm7, %v24510_v60, %v19407_v13  ;;  %vm24512_vm15 = vmmov %vm24508_vm6  ;;  %10440 = vmatprep.mubr.f32.mxu0 %v24316_v41 }
 0x651   : > { %v10323_v63 = vsel %vm24512_vm15, %v19373_v49, %v19408_v25  ;;  %vm24513_vm6 = vmmov %vm24509_vm10  ;;  %18020 = vmatprep.subr.msk.bf16.mxu0 %vm22428_vm0, %v18018_v52  ;;  %v10325_v49 = vsel %vm24511_vm7, %v19393_v36, %v19402_v5  ;;  %v19412_v52 = vunpack.i.l.bf16 %v19411_v59 }
 0x652   : > { %v18015_v57 = vpack.c.bf16 %v10323_v63, %v10315_v31  ;;  %17149 = vmatmul.mubr.msk.f32.vlgmr.msra.gmra.mrb[28].mxu1 %vm24513_vm6, %v22521_v10  ;;  %vm24514_vm10 = vmmov %vm24511_vm7  ;;  %v19418_v31 = vunpack.i.h.bf16 %v19416_v16  ;;  %v19417_v63 = vunpack.i.l.bf16 %v19416_v16  ;;  %v19413_v10 = vunpack.i.h.bf16 %v19411_v59 }
 0x653   : > { %v10324_v51 = vsel %vm24514_vm10, %v19408_v25, %v19393_v36  ;;  %vm24515_vm15 = vmmov %vm24511_vm7  ;;  %10254 = vmatprep.mubr.f32.mxu1 %v24316_v41  ;;  %17158 = vmatmul.mubr.msk.f32.gmra.mrb[26].mxu0 %vm24513_vm6, %v22664_v54 }
 0x654   : > { %v10316_v28 = vsel %vm24515_vm15, %v19407_v13, %v19392_v62  ;;  %vm24516_vm1 = vmmov %vm24511_vm7  ;;  %10588 = vmatprep.mubr.f32.mxu0 %v24316_v41 }
 0x655   : > { %v10317_v22 = vsel %vm24516_vm1, %v19392_v62, %v19387_v48  ;;  %v18012_v60 = vpack.c.bf16 %v10324_v51, %v10316_v28  ;;  %vm24517_vm10 = vmmov %vm24516_vm1  ;;  %v22684_v62 = vpop.permute.xlu1 %19425 }
 0x656   : > { %v18021_v45 = vpack.c.bf16 %v10325_v49, %v10317_v22  ;;  %v10327_v5 = vsel %vm24517_vm10, %v19403_v18, %v19417_v63  ;;  %vm24518_vm7 = vmmov %vm24516_vm1  ;;  %v19427_v36 = vunpack.i.l.bf16 %v22684_v62  ;;  %v22729_v22 = vld [vmem:[%s24435_s23 + $0x40] sm:$0xff] }
 0x657   : > { %v10328_v25 = vsel %vm24518_vm7, %v19417_v63, %v19418_v31  ;;  %vm24519_vm1 = vmmov %vm24513_vm6  ;;  %18014 = vmatprep.subr.msk.bf16.mxu1 %vm22394_vm13, %v18012_v60 }
 0x658   : > { %17150 = vmatmul.mubr.msk.f32.gmra.mrb[30].mxu1 %vm24519_vm1, %v22554_v39  ;;  %vm24520_vm15 = vmmov %vm24518_vm7  ;;  %18023 = vmatpush1.bf16.msk.msra.mxu0 %vm22443_vm8, %v18021_v45  ;;  %v22693_v39 = vpop.permute.xlu0 %19420  ;;  %v24191_v45 = vunpack.i.h.bf16 %v22684_v62 }
 0x659   : > { %v10319_v48 = vsel %vm24520_vm15, %v19388_v27, %v19412_v52  ;;  %vm24521_vm0 = vmmov %vm24518_vm7  ;;  %18017 = vmatpush1.bf16.msk.msra.mxu1 %vm22406_vm2, %v18015_v57  ;;  %18031 = vmatprep.subr.bf16.mxu0 %v22207_v6  ;;  %v22700_v27 = vpop.permute.xlu1 %19435  ;;  %v24190_v57 = vunpack.i.h.bf16 %v22693_v39  ;;  %v19422_v16 = vunpack.i.l.bf16 %v22693_v39  ;;  %vm24525_vm7 = vcmask 1014784  }
 0x65a   : > { %v10320_v13 = vsel %vm24521_vm0, %v19412_v52, %v19413_v10  ;;  %v18027_v18 = vpack.c.bf16 %v10327_v5, %v10319_v48  ;;  %10511 = vmatprep.mubr.f32.mxu1 %v24316_v41  ;;  %vm24522_vm6 = vmmov %vm24519_vm1  ;;  %v22746_v48 = vld [vmem:[%s24435_s23 + $0x48] sm:$0xff] }
 0x65b   : > { %v18024_v59 = vpack.c.bf16 %v10328_v25, %v10320_v13  ;;  %17169 = vmatmul.mubr.msk.f32.vlgmr.msra.gmra.mrb[28].mxu0 %vm24522_vm6, %v22644_v42  ;;  %vm24523_vm10 = vmmov %vm24519_vm1 }
 0x65c   : > { %17163 = vmatmul.mubr.msk.f32.vlgmr.msra.gmra.mrb[24].mxu1 %vm24523_vm10, %v22644_v42  ;;  %18033 = vmatpush1.bf16.msra.mxu0 %v22171_v2  ;;  %v19431_v51 = vpop.permute.xlu0 %19430  ;;  %vm24524_vm0 = vmmov %vm24519_vm1  ;;  %v11108_v2 = vsel %vm24525_vm7, %v19427_v36, %v24191_v45 }
 0x65d   : > { %18026 = vmatprep.subr.msk.bf16.mxu1 %vm22504_vm9, %v18024_v59  ;;  %18039 = vmatprep.subr.bf16.mxu0 %v22254_v3  ;;  %v19441_v49 = vpop.permute.xlu1 %19440  ;;  %vm24526_vm1 = vmmov %vm24525_vm7  ;;  %v19433_v63 = vunpack.i.h.bf16 %v19431_v51  ;;  %v19432_v10 = vunpack.i.l.bf16 %v19431_v51  ;;  %v19437_v59 = vunpack.i.l.bf16 %v22700_v27 }
 0x65e   : > { %18029 = vmatpush1.bf16.msk.msra.mxu1 %vm22513_vm14, %v18027_v18  ;;  %10594 = vmatprep.mubr.f32.mxu0 %v24316_v41  ;;  %v11100_v28 = vsel %vm24526_vm1, %v19422_v16, %v24190_v57  ;;  %vm24527_vm15 = vmmov %vm24524_vm0  ;;  %v19443_v51 = vunpack.i.h.bf16 %v19441_v49 }
 0x65f   : > { %18035 = vmatprep.subr.bf16.mxu1 %v22236_v53  ;;  %10517 = vmatprep.mubr.f32.mxu1 %v24316_v41  ;;  %v18046_v31 = vpack.c.bf16 %v11108_v2, %v11100_v28  ;;  %vm24528_vm6 = vmmov %vm24524_vm0  ;;  %v19442_v2 = vunpack.i.l.bf16 %v19441_v49  ;;  %v11099_v45 = vsel %vm24526_vm1, %v19432_v10, %v19422_v16  ;;  %v24537_v16 = vunpack.i.h.bf16 %v22700_v27 }
 0x660   : > { %17170 = vmatmul.mubr.msk.f32.gmra.mrb[30].mxu0 %vm24524_vm0, %v22664_v54  ;;  %17164 = vmatmul.mubr.msk.f32.gmra.mrb[26].mxu1 %vm24527_vm15, %v22664_v54  ;;  %v22731_v60 = vpop.permute.xlu0 %19445  ;;  %vm24529_vm10 = vmmov %vm24524_vm0  ;;  %vm24530_vm0 = vnez %v24459_v17 }
 0x661   : > { %10767 = vmatprep.mubr.f32.mxu0 %v24316_v41  ;;  %10665 = vmatprep.mubr.f32.mxu1 %v24316_v41  ;;  %v22736_v52 = vpop.permute.xlu1 %19455  ;;  %v24194_v5 = vunpack.i.h.bf16 %v22731_v60  ;;  %v19447_v25 = vunpack.i.l.bf16 %v22731_v60  ;;  %vm24531_vm7 = vmmov %vm24526_vm1 }
 0x662   : > { %v11107_v57 = vsel %vm24531_vm7, %v19433_v63, %v19427_v36  ;;  %vm24532_vm15 = vmmov %vm24528_vm6 }
 0x663   : > { %vm24536_vm14 = vmmov %vm24532_vm15  ;;  %v18049_v10 = vpack.c.bf16 %v11107_v57, %v11099_v45 }
 0x664   : > { %17179 = vmatmul.mubr.msk.f32.vlgmr.msra.gmra.mrb[24].mxu0 %vm24528_vm6, %v22729_v22  ;;  %17175 = vmatmul.mubr.msk.f32.vlgmr.msra.gmra.mrb[28].mxu1 %vm24529_vm10, %v22644_v42  ;;  %v19451_v18 = vpop.permute.xlu0 %19450  ;;  %vm24533_vm6 = vmmov %vm24526_vm1 }
 0x665   : > { %18041 = vmatpush1.bf16.msra.mxu0 %v22217_v43  ;;  %18037 = vmatpush1.bf16.msra.mxu1 %v22184_v29  ;;  %v19453_v42 = vunpack.i.h.bf16 %v19451_v18  ;;  %v19452_v28 = vunpack.i.l.bf16 %v19451_v18  ;;  %v22760_v13 = vpop.permute.xlu1 %19465  ;;  %v11112_v49 = vsel %vm24533_vm6, %v19447_v25, %v24194_v5  ;;  %vm24534_vm10 = vmmov %vm24526_vm1  ;;  %v11111_v57 = vsel %vm24533_vm6, %v19443_v51, %v19447_v25 }
 0x666   : > { %18048 = vmatprep.subr.msk.bf16.mxu0 %vm24530_vm0, %v18046_v31  ;;  %18043 = vmatprep.subr.bf16.mxu1 %v22298_v19  ;;  %vm24535_vm0 = vmmov %vm24526_vm1 }
 0x667   : > { %10773 = vmatprep.mubr.f32.mxu0 %v24316_v41  ;;  %10671 = vmatprep.mubr.f32.mxu1 %v24316_v41  ;;  %v11110_v31 = vsel %vm24534_vm10, %v19453_v42, %v19443_v51  ;;  %v11102_v18 = vsel %vm24535_vm0, %v19452_v28, %v19442_v2  ;;  %vm24538_vm7 = vmmov %vm24535_vm0 }
 0x668   : > { %17180 = vmatmul.mubr.msk.f32.gmra.mrb[26].mxu0 %vm24532_vm15, %v22746_v48  ;;  %17176 = vmatmul.mubr.msk.f32.gmra.mrb[30].mxu1 %vm24536_vm14, %v22664_v54  ;;  %v22769_v36 = vpop.permute.xlu0 %19460  ;;  %v11104_v63 = vsel %vm24538_vm7, %v19437_v59, %v24537_v16  ;;  %v18052_v20 = vpack.c.bf16 %v11110_v31, %v11102_v18  ;;  %vm24539_vm1 = vmmov %vm24536_vm14  ;;  %vm24540_vm14 = vnez %v24463_v46  ;;  %v19458_v31 = vunpack.i.h.bf16 %v22736_v52 }
 0x669   : > { %10921 = vmatprep.mubr.f32.mxu0 %v24316_v41  ;;  %10844 = vmatprep.mubr.f32.mxu1 %v24316_v41  ;;  %v18058_v5 = vpack.c.bf16 %v11112_v49, %v11104_v63  ;;  %v19486_v47 = vpop.permute.xlu1 %19485  ;;  %v24200_v56 = vunpack.i.h.bf16 %v22769_v36  ;;  %v19462_v54 = vunpack.i.l.bf16 %v22769_v36  ;;  %vm24541_vm0 = vmmov %vm24539_vm1  ;;  %v19457_v18 = vunpack.i.l.bf16 %v22736_v52 }
 0x66a   : > { %v19488_v33 = vunpack.i.h.bf16 %v19486_v47  ;;  %v19487_v38 = vunpack.i.l.bf16 %v19486_v47  ;;  %vm24542_vm15 = vmmov %vm24533_vm6  ;;  %v24543_v47 = vunpack.i.h.bf16 %v22684_v62  ;;  %v24573_v11 = vunpack.i.h.bf16 %v22769_v36 }
 0x66b   : > { %v11103_v45 = vsel %vm24542_vm15, %v19442_v2, %v19437_v59  ;;  %vm24544_vm10 = vmmov %vm24533_vm6  ;;  %v24545_v59 = vunpack.i.h.bf16 %v22693_v39  ;;  %vm24548_vm15 = vcmask 31744  }
 0x66c   : > { %17183 = vmatmul.mubr.msk.f32.vlgmr.msra.gmra.mrb[28].mxu0 %vm24539_vm1, %v22729_v22  ;;  %17181 = vmatmul.mubr.msk.f32.vlgmr.msra.gmra.mrb[24].mxu1 %vm24541_vm0, %v22729_v22  ;;  %v19471_v49 = vpop.permute.xlu0 %19470  ;;  %v11109_v25 = vsel %vm24544_vm10, %v24543_v47, %v19453_v42  ;;  %vm24546_vm7 = vmmov %vm24533_vm6  ;;  %v11525_v2 = vsel %vm24548_vm15, %v19462_v54, %v24200_v56  ;;  %v18061_v39 = vpack.c.bf16 %v11111_v57, %v11103_v45  ;;  %v19468_v47 = vunpack.i.h.bf16 %v22760_v13 }
 0x66d   : > { %18051 = vmatpush1.bf16.msk.msra.mxu0 %vm24540_vm14, %v18049_v10  ;;  %18045 = vmatpush1.bf16.msra.mxu1 %v22250_v58  ;;  %v19473_v16 = vunpack.i.h.bf16 %v19471_v49  ;;  %v19472_v63 = vunpack.i.l.bf16 %v19471_v49  ;;  %vm24547_vm1 = vmmov %vm24533_vm6  ;;  %v19467_v49 = vunpack.i.l.bf16 %v22760_v13 }
 0x66e   : > { %18060 = vmatprep.subr.msk.bf16.mxu0 %vm22541_vm3, %v18058_v5  ;;  %18054 = vmatprep.subr.msk.bf16.mxu1 %vm22573_vm4, %v18052_v20  ;;  %v11101_v5 = vsel %vm24546_vm7, %v24545_v59, %v19452_v28  ;;  %v11114_v51 = vsel %vm24547_vm1, %v19487_v38, %v19488_v33  ;;  %v22804_v20 = vpop.permute.xlu1 %19490  ;;  %vm24549_vm6 = vmmov %vm24547_vm1  ;;  %v22816_v33 = vld [vmem:[%s24435_s23 + $0x50] sm:$0xff] }
 0x66f   : > { %10927 = vmatprep.mubr.f32.mxu0 %v24316_v41  ;;  %10850 = vmatprep.mubr.f32.mxu1 %v24316_v41  ;;  %v11106_v62 = vsel %vm24549_vm6, %v19472_v63, %v19473_v16  ;;  %vm24550_vm10 = vmmov %vm24541_vm0  ;;  %v18055_v10 = vpack.c.bf16 %v11109_v25, %v11101_v5  ;;  %v19493_v56 = vunpack.i.h.bf16 %v22804_v20  ;;  %v19492_v14 = vunpack.i.l.bf16 %v22804_v20  ;;  %v22839_v5 = vld [vmem:[%s24435_s23 + $0x58] sm:$0xff] }
 0x670   : > { %17184 = vmatmul.mubr.msk.f32.gmra.mrb[30].mxu0 %vm24541_vm0, %v22746_v48  ;;  %17182 = vmatmul.mubr.msk.f32.gmra.mrb[26].mxu1 %vm24550_vm10, %v22746_v48  ;;  %v22818_v42 = vpop.permute.xlu0 %19475  ;;  %vm24551_vm7 = vmmov %vm24548_vm15  ;;  %v18064_v16 = vpack.c.bf16 %v11114_v51, %v11106_v62  ;;  %vm24555_vm6 = vnez %v24487_v23 }
 0x671   : > { %11220 = vmatprep.mubr.f32.mxu0 %v24316_v41  ;;  %10998 = vmatprep.mubr.f32.mxu1 %v24316_v41  ;;  %v11517_v28 = vsel %vm24551_vm7, %v19457_v18, %v19458_v31  ;;  %vm24552_vm1 = vmmov %vm24541_vm0  ;;  %v19478_v57 = vunpack.i.h.bf16 %v22818_v42  ;;  %v19477_v30 = vunpack.i.l.bf16 %v22818_v42  ;;  %vm24553_vm0 = vnez %v24474_v40 }
 0x672   : > { %v18070_v59 = vpack.c.bf16 %v11525_v2, %v11517_v28  ;;  %v19496_v45 = vpop.permute.xlu1 %19495  ;;  %vm24554_vm15 = vmmov %vm24552_vm1  ;;  %v24557_v28 = vunpack.i.h.bf16 %v22731_v60 }
 0x673   : > { %v19498_v13 = vunpack.i.h.bf16 %v19496_v45  ;;  %v19497_v25 = vunpack.i.l.bf16 %v19496_v45  ;;  %vm24556_vm10 = vmmov %vm24551_vm7 }
 0x674   : > { %17193 = vmatmul.mubr.msk.f32.vlgmr.msra.gmra.mrb[24].mxu0 %vm24552_vm1, %v22816_v33  ;;  %17185 = vmatmul.mubr.msk.f32.vlgmr.msra.gmra.mrb[28].mxu1 %vm24554_vm15, %v22729_v22  ;;  %v19481_v51 = vpop.permute.xlu0 %19480  ;;  %v11516_v2 = vsel %vm24556_vm10, %v19467_v49, %v19457_v18  ;;  %vm24558_vm1 = vcmask 1014784   ;;  %vm24562_vm10 = vmmov %vm24551_vm7 }
 0x675   : > { %18063 = vmatpush1.bf16.msk.msra.mxu0 %vm24553_vm0, %v18061_v39  ;;  %18057 = vmatpush1.bf16.msk.msra.mxu1 %vm24555_vm6, %v18055_v10  ;;  %v19483_v22 = vunpack.i.h.bf16 %v19481_v51  ;;  %v19482_v62 = vunpack.i.l.bf16 %v19481_v51  ;;  %v11524_v39 = vsel %vm24551_vm7, %v19468_v47, %v19462_v54  ;;  %v11113_v45 = vsel %vm24558_vm1, %v24557_v28, %v19487_v38  ;;  %vm24560_vm15 = vmmov %vm24558_vm1 }
 0x676   : > { %18072 = vmatprep.subr.msk.bf16.mxu0 %vm22372_vm12, %v18070_v59  ;;  %18066 = vmatprep.subr.msk.bf16.mxu1 %vm22626_vm11, %v18064_v16  ;;  %v24559_v10 = vunpack.i.h.bf16 %v22700_v27  ;;  %vm24561_vm12 = vcmask 130048   ;;  %v11529_v18 = vsel %vm24562_vm10, %v19492_v14, %v19493_v56  ;;  %v11521_v54 = vsel %vm24551_vm7, %v19477_v30, %v19478_v57  ;;  %vm24563_vm11 = vmmov %vm24551_vm7  ;;  %v19506_v16 = vpop.permute.xlu1 %19505 }
 0x677   : > { %11226 = vmatprep.mubr.f32.mxu0 %v24316_v41  ;;  %11004 = vmatprep.mubr.f32.mxu1 %v24316_v41  ;;  %v11527_v60 = vsel %vm24563_vm11, %v19498_v13, %v19483_v22  ;;  %vm24564_vm1 = vmmov %vm24551_vm7  ;;  %v18082_v59 = vpack.c.bf16 %v11529_v18, %v11521_v54  ;;  %v19507_v51 = vunpack.i.l.bf16 %v19506_v16 }
 0x678   : > { %v11105_v15 = vsel %vm24560_vm15, %v24559_v10, %v19472_v63  ;;  %17194 = vmatmul.mubr.msk.f32.gmra.mrb[26].mxu0 %vm24561_vm12, %v22839_v5  ;;  %v11519_v38 = vsel %vm24564_vm1, %v19497_v25, %v19482_v62  ;;  %vm24565_vm6 = vmmov %vm24561_vm12  ;;  %v19501_v27 = vpop.permute.xlu0 %19500  ;;  %v18073_v63 = vpack.c.bf16 %v11524_v39, %v11516_v2  ;;  %vm24569_vm12 = vnez %v24454_v24 }
 0x679   : > { %17186 = vmatmul.mubr.msk.f32.gmra.mrb[30].mxu1 %vm24565_vm6, %v22746_v48  ;;  %11374 = vmatprep.mubr.f32.mxu0 %v24316_v41  ;;  %v18076_v49 = vpack.c.bf16 %v11527_v60, %v11519_v38  ;;  %v18067_v47 = vpack.c.bf16 %v11113_v45, %v11105_v15  ;;  %vm24566_vm15 = vmmov %vm24565_vm6  ;;  %v19508_v48 = vunpack.i.h.bf16 %v19506_v16  ;;  %v19503_v28 = vunpack.i.h.bf16 %v19501_v27 }
 0x67a   : > { %11297 = vmatprep.mubr.f32.mxu1 %v24316_v41  ;;  %vm24567_vm11 = vmmov %vm24565_vm6  ;;  %v19502_v10 = vunpack.i.l.bf16 %v19501_v27  ;;  %vm24568_vm6 = vnez %v24505_v55  ;;  %v11518_v24 = vsel %vm24564_vm1, %v19458_v31, %v19497_v25  ;;  %v22922_v44 = vpop.permute.xlu1 %19515  ;;  %v17240_v27 = vld [vmem:[%s24435_s23 + $0x78] sm:$0xff] }
 0x67b   : > { %vm24570_vm10 = vmmov %vm24564_vm1  ;;  %v19518_v20 = vunpack.i.h.bf16 %v22922_v44 }
 0x67c   : > { %17205 = vmatmul.mubr.msk.f32.vlgmr.msra.gmra.mrb[28].mxu0 %vm24566_vm15, %v22816_v33  ;;  %v11528_v4 = vsel %vm24570_vm10, %v19483_v22, %v19492_v14  ;;  %v22886_v39 = vpop.permute.xlu0 %19510  ;;  %vm24572_vm7 = vmmov %vm24567_vm11  ;;  %v17213_v14 = vld [vmem:[%s24435_s23 + $0x60] sm:$0xff] }
 0x67d   : > { %18075 = vmatpush1.bf16.msk.msra.mxu0 %vm22376_vm5, %v18073_v63  ;;  %17199 = vmatmul.mubr.msk.f32.vlgmr.msra.gmra.mrb[24].mxu1 %vm24567_vm11, %v22816_v33  ;;  %vm24571_vm5 = vmmov %vm24564_vm1  ;;  %v19513_v42 = vunpack.i.h.bf16 %v22886_v39 }
 0x67e   : > { %18069 = vmatpush1.bf16.msk.msra.mxu1 %vm24568_vm6, %v18067_v47  ;;  %18084 = vmatprep.subr.msk.bf16.mxu0 %vm24569_vm12, %v18082_v59  ;;  %v11520_v2 = vsel %vm24571_vm5, %v19482_v62, %v19477_v30  ;;  %vm24575_vm15 = vmmov %vm24572_vm7 }
 0x67f   : > { %18078 = vmatprep.subr.msk.bf16.mxu1 %vm22394_vm13, %v18076_v49  ;;  %11380 = vmatprep.mubr.f32.mxu0 %v24316_v41  ;;  %vm24574_vm13 = vmmov %vm24564_vm1  ;;  %v18085_v52 = vpack.c.bf16 %v11528_v4, %v11520_v2 }
 0x680   : > { %11303 = vmatprep.mubr.f32.mxu1 %v24316_v41  ;;  %17206 = vmatmul.mubr.msk.f32.gmra.mrb[30].mxu0 %vm24572_vm7, %v22839_v5  ;;  %v11526_v45 = vsel %vm24574_vm13, %v24573_v11, %v19498_v13  ;;  %vm24576_vm11 = vmmov %vm24564_vm1  ;;  %v22914_v13 = vld [vmem:[%s24435_s23 + $0x68] sm:$0xff]  ;;  %v19521_v25 = vpop.permute.xlu0 %19520 }
 0x681   : > { %17200 = vmatmul.mubr.msk.f32.gmra.mrb[26].mxu1 %vm24575_vm15, %v22839_v5  ;;  %11637 = vmatprep.mubr.f32.mxu0 %v24316_v41  ;;  %v11531_v30 = vsel %vm24576_vm11, %v19507_v51, %v19508_v48  ;;  %vm24577_vm12 = vmmov %vm24564_vm1  ;;  %v18079_v31 = vpack.c.bf16 %v11526_v45, %v11518_v24  ;;  %vm24586_vm15 = vnez %v24469_v34  ;;  %v19523_v15 = vunpack.i.h.bf16 %v19521_v25 }
 0x682   : > { %v11523_v22 = vsel %vm24577_vm12, %v19502_v10, %v19503_v28  ;;  %11451 = vmatprep.mubr.f32.mxu1 %v24316_v41  ;;  %vm24578_vm10 = vmmov %vm24572_vm7  ;;  %vm24588_vm12 = vcmask 1014784   ;;  %v19522_v18 = vunpack.i.l.bf16 %v19521_v25 }
 0x683   : > { %v18088_v36 = vpack.c.bf16 %v11531_v30, %v11523_v22  ;;  %vm24579_vm5 = vmmov %vm24572_vm7 }
 0x684   : > { %17219 = vmatmul.mubr.msk.f32.vlgmr.msra.gmra.mrb[24].mxu0 %vm24578_vm10, %v17213_v14  ;;  %vm24581_vm7 = vmmov %vm24564_vm1  ;;  %v22937_v50 = vpop.permute.xlu0 %19535 }
 0x685   : > { %18087 = vmatpush1.bf16.msk.msra.mxu0 %vm22443_vm8, %v18085_v52  ;;  %17211 = vmatmul.mubr.msk.f32.vlgmr.msra.gmra.mrb[28].mxu1 %vm24579_vm5, %v22816_v33  ;;  %vm24580_vm8 = vmmov %vm24579_vm5  ;;  %v11530_v33 = vsel %vm24581_vm7, %v19493_v56, %v19507_v51  ;;  %v19517_v56 = vunpack.i.l.bf16 %v22922_v44  ;;  %v19538_v63 = vunpack.i.h.bf16 %v22937_v50  ;;  %v19537_v49 = vunpack.i.l.bf16 %v22937_v50 }
 0x686   : > { %18081 = vmatpush1.bf16.msk.msra.mxu1 %vm22406_vm2, %v18079_v31  ;;  %18095 = vmatprep.subr.bf16.mxu0 %v22184_v29  ;;  %vm24582_vm2 = vmmov %vm24564_vm1 }
 0x687   : > { %18090 = vmatprep.subr.msk.bf16.mxu1 %vm22504_vm9, %v18088_v36  ;;  %11643 = vmatprep.mubr.f32.mxu0 %v24316_v41  ;;  %v11522_v29 = vsel %vm24582_vm2, %v19478_v57, %v19502_v10  ;;  %vm24583_vm1 = vmmov %vm24579_vm5  ;;  %v19512_v57 = vunpack.i.l.bf16 %v22886_v39  ;;  %vm24593_vm2 = vnez %v24459_v17 }
 0x688   : > { %11457 = vmatprep.mubr.f32.mxu1 %v24316_v41  ;;  %17220 = vmatmul.mubr.msk.f32.gmra.mrb[26].mxu0 %vm24580_vm8, %v22914_v13  ;;  %v18091_v35 = vpack.c.bf16 %v11530_v33, %v11522_v29  ;;  %vm24584_vm9 = vmmov %vm24583_vm1 }
 0x689   : > { %17212 = vmatmul.mubr.msk.f32.gmra.mrb[30].mxu1 %vm24583_vm1, %v22839_v5  ;;  %11791 = vmatprep.mubr.f32.mxu0 %v24316_v41  ;;  %vm24585_vm13 = vmmov %vm24583_vm1  ;;  %v22946_v5 = vpop.permute.xlu1 %19525 }
 0x68a   : > { %11714 = vmatprep.mubr.f32.mxu1 %v24316_v41  ;;  %vm24587_vm11 = vmmov %vm24583_vm1  ;;  %v19527_v59 = vunpack.i.l.bf16 %v22946_v5 }
 0x68b   : > { %vm24589_vm10 = vmmov %vm24588_vm12 }
 0x68c   : > { %17231 = vmatmul.mubr.msk.f32.vlgmr.msra.gmra.mrb[28].mxu0 %vm24584_vm9, %v17213_v14  ;;  %v12303_v34 = vsel %vm24589_vm10, %v19512_v57, %v19513_v42  ;;  %vm24590_vm5 = vmmov %vm24583_vm1 }
 0x68d   : > { %18097 = vmatpush1.bf16.msra.mxu0 %v22207_v6  ;;  %17225 = vmatmul.mubr.msk.f32.vlgmr.msra.gmra.mrb[24].mxu1 %vm24585_vm13, %v17213_v14  ;;  %v12311_v6 = vsel %vm24588_vm12, %v19517_v56, %v19518_v20  ;;  %v22971_v54 = vpop.permute.xlu1 %19530  ;;  %vm24591_vm8 = vmmov %vm24583_vm1 }
 0x68e   : > { %18093 = vmatpush1.bf16.msk.msra.mxu1 %vm24586_vm15, %v18091_v35  ;;  %18103 = vmatprep.subr.bf16.mxu0 %v22250_v58  ;;  %v22968_v58 = vpop.permute.xlu0 %19540  ;;  %v18110_v62 = vpack.c.bf16 %v12311_v6, %v12303_v34  ;;  %vm24592_vm7 = vmmov %vm24583_vm1  ;;  %v19533_v16 = vunpack.i.h.bf16 %v22971_v54  ;;  %v19532_v47 = vunpack.i.l.bf16 %v22971_v54  ;;  %v17250_v35 = vld [vmem:[%s24435_s23 + $0x88] sm:$0xff] }
 0x68f   : > { %18099 = vmatprep.subr.bf16.mxu1 %v22217_v43  ;;  %11797 = vmatprep.mubr.f32.mxu0 %v24316_v41  ;;  %v17239_v43 = vld [vmem:[%s24435_s23 + $0x70] sm:$0xff]  ;;  %v19543_v60 = vunpack.i.h.bf16 %v22968_v58  ;;  %v19542_v38 = vunpack.i.l.bf16 %v22968_v58  ;;  %vm24594_vm1 = vmmov %vm24589_vm10 }
 0x690   : > { %11720 = vmatprep.mubr.f32.mxu1 %v24316_v41  ;;  %17232 = vmatmul.mubr.msk.f32.gmra.mrb[30].mxu0 %vm24587_vm11, %v22914_v13  ;;  %v12310_v48 = vsel %vm24594_vm1, %v19523_v15, %v19517_v56  ;;  %vm24595_vm9 = vmmov %vm24594_vm1 }
 0x691   : > { %17226 = vmatmul.mubr.msk.f32.gmra.mrb[26].mxu1 %vm24590_vm5, %v22914_v13  ;;  %11970 = vmatprep.mubr.f32.mxu0 %v24316_v41  ;;  %v12302_v51 = vsel %vm24595_vm9, %v19522_v18, %v19512_v57  ;;  %vm24596_vm13 = vmmov %vm24590_vm5  ;;  %v19546_v4 = vpop.permute.xlu1 %19545  ;;  %v12314_v36 = vsel %vm24594_vm1, %v19538_v63, %v19542_v38 }
 0x692   : > { %11868 = vmatprep.mubr.f32.mxu1 %v24316_v41  ;;  %vm24597_vm15 = vmmov %vm24594_vm1  ;;  %v18113_v28 = vpack.c.bf16 %v12310_v48, %v12302_v51  ;;  %v19551_v2 = vpop.permute.xlu0 %19550  ;;  %v19548_v11 = vunpack.i.h.bf16 %v19546_v4  ;;  %v19547_v22 = vunpack.i.l.bf16 %v19546_v4 }
 0x693   : > { %vm24598_vm11 = vmmov %vm24590_vm5  ;;  %v19552_v52 = vunpack.i.l.bf16 %v19551_v2 }
 0x694   : > { %17241 = vmatmul.mubr.msk.f32.vlgmr.msra.gmra.mrb[24].mxu0 %vm24591_vm8, %v17239_v43  ;;  %vm24599_vm12 = vmmov %vm24594_vm1 }
 0x695   : > { %18105 = vmatpush1.bf16.msra.mxu0 %v22254_v3  ;;  %17237 = vmatmul.mubr.msk.f32.vlgmr.msra.gmra.mrb[28].mxu1 %vm24592_vm7, %v17213_v14  ;;  %v19528_v3 = vunpack.i.h.bf16 %v22946_v5  ;;  %v12313_v17 = vsel %vm24599_vm12, %v19537_v49, %v19538_v63  ;;  %vm24600_vm10 = vmmov %vm24594_vm1  ;;  %v19553_v14 = vunpack.i.h.bf16 %v19551_v2 }
 0x696   : > { %18101 = vmatpush1.bf16.msra.mxu1 %v22236_v53  ;;  %18112 = vmatprep.subr.msk.bf16.mxu0 %vm24593_vm2, %v18110_v62  ;;  %v12315_v53 = vsel %vm24597_vm15, %v19542_v38, %v19543_v60  ;;  %v12307_v10 = vsel %vm24600_vm10, %v19532_v47, %v19533_v16  ;;  %vm24601_vm5 = vmmov %vm24594_vm1 }
 0x697   : > { %18107 = vmatprep.subr.bf16.mxu1 %v22298_v19  ;;  %11976 = vmatprep.mubr.f32.mxu0 %v24316_v41  ;;  %v12305_v24 = vsel %vm24601_vm5, %v19527_v59, %v19528_v3  ;;  %v18122_v45 = vpack.c.bf16 %v12315_v53, %v12307_v10  ;;  %vm24602_vm8 = vmmov %vm24592_vm7 }
 0x698   : > { %11874 = vmatprep.mubr.f32.mxu1 %v24316_v41  ;;  %17242 = vmatmul.mubr.msk.f32.gmra.mrb[26].mxu0 %vm24596_vm13, %v17240_v27  ;;  %v18116_v30 = vpack.c.bf16 %v12313_v17, %v12305_v24  ;;  %vm24603_vm2 = vmmov %vm24594_vm1  ;;  %v23090_v54 = vpop.permute.xlu0 %12692 }
 0x699   : > { %17238 = vmatmul.mubr.msk.f32.gmra.mrb[30].mxu1 %vm24598_vm11, %v22914_v13  ;;  %12124 = vmatprep.mubr.f32.mxu0 %v24316_v41  ;;  %v12309_v31 = vsel %vm24603_vm2, %v19547_v22, %v19548_v11  ;;  %vm24604_vm9 = vmmov %vm24594_vm1  ;;  %vm24616_vm2 = vnez %v24501_v9  ;;  %v23072_v9 = vld [vmem:[#allocation9 + $0x18] sm:$0xff] }
 0x69a   : > { %12047 = vmatprep.mubr.f32.mxu1 %v24316_v41  ;;  %v12317_v46 = vsel %vm24604_vm9, %v19552_v52, %v19553_v14  ;;  %vm24606_vm13 = vmmov %vm24594_vm1 }
 0x69b   : > { %vm24610_vm11 = vmmov %vm24594_vm1  ;;  %v18128_v44 = vpack.c.bf16 %v12317_v46, %v12309_v31 }
 0x69c   : > { %17245 = vmatmul.mubr.msk.f32.vlgmr.msra.gmra.mrb[28].mxu0 %vm24602_vm8, %v17239_v43  ;;  %v12304_v13 = vsel %vm24610_vm11, %v19513_v42, %v19527_v59  ;;  %vm24612_vm10 = vmmov %vm24594_vm1  ;;  %vm24614_vm8 = vnez %v24487_v23  ;;  %v23070_v23 = vld [vmem:[#allocation9 + $0x10] sm:$0xff]  ;;  %v23083_v42 = vpop.permute.xlu1 %12687 }
 0x69d   : > { %18115 = vmatpush1.bf16.msk.msra.mxu0 %vm24540_vm14, %v18113_v28  ;;  %17243 = vmatmul.mubr.msk.f32.vlgmr.msra.gmra.mrb[24].mxu1 %vm24592_vm7, %v17239_v43  ;;  %vm24605_vm14 = vmmov %vm24592_vm7  ;;  %v12316_v29 = vsel %vm24612_vm10, %v19543_v60, %v19552_v52 }
 0x69e   : > { %18109 = vmatpush3.bf16.msra.mxu1 %v22298_v19  ;;  %18124 = vmatprep.subr.msk.bf16.mxu0 %vm22541_vm3, %v18122_v45  ;;  %v12312_v19 = vsel %vm24606_vm13, %v19518_v20, %v19537_v49  ;;  %vm24607_vm3 = vmmov %vm24592_vm7 }
 0x69f   : > { %18118 = vmatprep.subr.msk.bf16.mxu1 %vm22573_vm4, %v18116_v30  ;;  %12130 = vmatprep.mubr.f32.mxu0 %v24316_v41  ;;  %vm24608_vm4 = vmmov %vm24594_vm1  ;;  %v18119_v33 = vpack.c.bf16 %v12312_v19, %v12304_v13 }
 0x6a0   : > { %12053 = vmatprep.mubr.f32.mxu1 %v24316_v41  ;;  %17246 = vmatmul.mubr.msk.f32.gmra.mrb[30].mxu0 %vm24605_vm14, %v17240_v27  ;;  %v12306_v32 = vsel %vm24608_vm4, %v19528_v3, %v19532_v47  ;;  %vm24609_vm15 = vmmov %vm24607_vm3 }
 0x6a1   : > { %17244 = vmatmul.mubr.msk.f32.gmra.mrb[26].mxu1 %vm24607_vm3, %v17240_v27  ;;  %12423 = vmatprep.mubr.f32.mxu0 %v24316_v41  ;;  %v18125_v25 = vpack.c.bf16 %v12314_v36, %v12306_v32  ;;  %vm24611_vm12 = vmmov %vm24607_vm3 }
 0x6a2   : > { %17466 = vmatprep.mubr.msk.f32.mxu1 %vm24609_vm15, %v17239_v43  ;;  %vm24613_vm5 = vmmov %vm24607_vm3 }
 0x6a3   : > { %vm24615_vm7 = vmmov %vm24594_vm1 }
 0x6a4   : > { %17255 = vmatmul.mubr.msk.f32.vlgmr.msra.gmra.mrb[24].mxu0 %vm24611_vm12, %v17249_v21  ;;  %v12308_v39 = vsel %vm24615_vm7, %v19533_v16, %v19547_v22 }
 0x6a5   : > { %18127 = vmatpush1.bf16.msk.msra.mxu0 %vm24553_vm0, %v18125_v25  ;;  %17467 = vmatmul.mubr.msk.f32.vlgmr.msra.gmra.mrb[32].mxu1 %vm24613_vm5, %v17240_v27  ;;  %v18131_v40 = vpack.c.bf16 %v12316_v29, %v12308_v39  ;;  %vm24617_vm0 = vmmov %vm24607_vm3 }
 0x6a6   : > { %18121 = vmatpush1.bf16.msk.msra.mxu1 %vm24614_vm8, %v18119_v33  ;;  %12429 = vmatprep.mubr.f32.mxu0 %v24316_v41  ;;  %vm24618_vm1 = vmmov %vm24617_vm0 }
 0x6a7   : > { %12500 = vmatprep.mubr.f32.mxu1 %v24316_v41  ;;  %18130 = vmatprep.subr.msk.bf16.mxu1 %vm24616_vm2, %v18128_v44  ;;  %vm24619_vm9 = vmmov %vm24617_vm0 }
 0x6a8   : > { %17256 = vmatmul.mubr.msk.f32.gmra.mrb[26].mxu0 %vm24617_vm0, %v17250_v35  ;;  %vm24620_vm14 = vmmov %vm24617_vm0 }
 0x6a9   : > { %17261 = vmatmul.mubr.msk.f32.vlgmr.msra.gmra.mrb[24].mxu1 %vm24618_vm1, %v17249_v21  ;;  %12577 = vmatprep.mubr.f32.mxu0 %v24316_v41  ;;  %vm24621_vm13 = vmmov %vm24617_vm0 }
 0x6aa   : > { %18133 = vmatpush1.bf16.msk.msra.mxu1 %vm24568_vm6, %v18131_v40  ;;  %12506 = vmatprep.mubr.f32.mxu1 %v24316_v41  ;;  %vm24622_vm3 = vmmov %vm24617_vm0 }
 0x6ab   : > { %17469 = vmatprep.subr.mxu1 %v24316_v41  ;;  %vm24623_vm6 = vmmov %vm24617_vm0 }
 0x6ac   : > { %17267 = vmatmul.mubr.msk.f32.vlgmr.msra.gmra.mrb[28].mxu0 %vm24619_vm9, %v17249_v21  ;;  %vm24624_vm4 = vmmov %vm24617_vm0 }
 0x6ad   : > { %17262 = vmatmul.mubr.msk.f32.gmra.mrb[26].mxu1 %vm24620_vm14, %v17250_v35  ;;  %12583 = vmatprep.mubr.f32.mxu0 %v24316_v41  ;;  %vm24625_vm15 = vmmov %vm24617_vm0 }
 0x6ae   : > { %12654 = vmatprep.mubr.f32.mxu1 %v24316_v41 }
 0x6b0   : > { %17268 = vmatmul.mubr.msk.f32.gmra.mrb[30].mxu0 %vm24621_vm13, %v17250_v35 }
 0x6b1   : > { %17273 = vmatmul.mubr.msk.f32.vlgmr.msra.gmra.mrb[34].mxu1 %vm24622_vm3, %v17249_v21  ;;  %13111 = vmatprep.mubr.f32.mxu0 %v24316_v41 }
 0x6b2   : > { %12660 = vmatprep.mubr.f32.mxu1 %v24316_v41  ;;  %17470 = vmatpush3.msra.mxu1 %v24316_v41 }
 0x6b5   : > { %17274 = vmatmul.mubr.msk.f32.gmra.mrb[36].mxu1 %vm24623_vm6, %v17250_v35 }
 0x6b6   : > { %17471 = vmatprep.mubr.msk.f32.mxu1 %vm24624_vm4, %v23070_v23 }
 0x6b9   : > { %17472 = vmatmul.mubr.msk.f32.vlgmr.msra.gmra.mrb[38].mxu1 %vm24625_vm15, %v23072_v9 }
 0x6ba   : > { %13188 = vmatprep.mubr.f32.mxu1 %v24316_v41 }
 0x768   : > { %v11870_v55 = vpop.f32.mrb[28].mxu1 }
 0x769   : > { %v23079_v50 = vpop.f32.mrb[29].mxu1 }
 0x76c   : > { %v11876_v20 = vpop.f32.mrb[30].mxu1 }
 0x76d   : > { %v23081_v56 = vpop.f32.mrb[31].mxu1 }
 0x777   : > { %v12425_v57 = vpop.f32.mrb[24].mxu0 }
 0x778   : > { %v12695_v5 = vadd.f32 %v23083_v42, %v12425_v57  ;;  %v17468_v6 = vpop.f32.mrb[32].mxu1  ;;  %v12427_v34 = vpop.f32.mrb[25].mxu0 }
 0x779   : > { %v23086_v43 = vadd.f32 %v17468_v6, %v11876_v20  ;;  %v12696_v58 = vadd.f32 %v23083_v42, %v12427_v34  ;;  %v12203_v62 = vpop.f32.mrb[33].mxu1 }
 0x77a   : > { %v12711_v15 = vmul.f32 %v12695_v5, %v20895_v61  ;;  %v12220_v18 = vadd.f32 %v12203_v62, %v11870_v55 }
 0x77b   : > { %v12712_v60 = vmul.f32 %v12696_v58, %v20895_v61  ;;  %v12431_v38 = vpop.f32.mrb[26].mxu0 }
 0x77c   : > { %v12727_v27 = vadd.f32 %v12711_v15, %v20902_v7  ;;  %v12703_v63 = vadd.f32 %v23090_v54, %v12431_v38  ;;  %v12433_v49 = vpop.f32.mrb[27].mxu0  ;;  %v12502_v16 = vpop.f32.mrb[24].mxu1 }
 0x77d   : > { %v12728_v47 = vadd.f32 %v12712_v60, %v20902_v7  ;;  %v12704_v3 = vadd.f32 %v23090_v54, %v12433_v49  ;;  %v12697_v59 = vadd.f32 %v23083_v42, %v12502_v16  ;;  %v12504_v48 = vpop.f32.mrb[25].mxu1 }
 0x77e   : > { %vm12743_vm11 = vcmp.ge.f32.partialorder %v12727_v27, 0.0  ;;  %v12759_v51 = vmul.f32 0.2, %v12727_v27  ;;  %v12719_v53 = vmul.f32 %v12703_v63, %v20904_v8  ;;  %v12698_v17 = vadd.f32 %v23083_v42, %v12504_v48 }
 0x77f   : > { %vm12744_vm12 = vcmp.ge.f32.partialorder %v12728_v47, 0.0  ;;  %v12760_v28 = vmul.f32 0.2, %v12728_v47  ;;  %v12720_v10 = vmul.f32 %v12704_v3, %v20904_v8  ;;  %v12713_v4 = vmul.f32 %v12697_v59, %v20895_v61  ;;  %v12579_v2 = vpop.f32.mrb[28].mxu0 }
 0x780   : > { %v23102_v24 = vsel %vm12743_vm11, %v12727_v27, %v12759_v51  ;;  %v12735_v11 = vadd.f32 %v12719_v53, %v20931_v37  ;;  %v12714_v45 = vmul.f32 %v12698_v17, %v20895_v61  ;;  %v12699_v14 = vadd.f32 %v23083_v42, %v12579_v2  ;;  %v12508_v30 = vpop.f32.mrb[26].mxu1  ;;  %v12581_v22 = vpop.f32.mrb[29].mxu0  ;;  %vm24626_vm11 = vmmov %vm24624_vm4 }
 0x781   : > { %v23107_v52 = vsel %vm12744_vm12, %v12728_v47, %v12760_v28  ;;  %v12736_v31 = vadd.f32 %v12720_v10, %v20931_v37  ;;  %v12729_v36 = vadd.f32 %v12713_v4, %v20902_v7  ;;  %v12705_v46 = vadd.f32 %v23090_v54, %v12508_v30  ;;  %v12510_v19 = vpop.f32.mrb[27].mxu1 }
 0x782   : > { %vm12751_vm10 = vcmp.ge.f32.partialorder %v12735_v11, 0.0  ;;  %v12767_v21 = vmul.f32 0.2, %v12735_v11  ;;  %v12730_v32 = vadd.f32 %v12714_v45, %v20902_v7  ;;  %v12715_v13 = vmul.f32 %v12699_v14, %v20895_v61 }
 0x783   : > { %vm12752_vm5 = vcmp.ge.f32.partialorder %v12736_v31, 0.0  ;;  %v12768_v25 = vmul.f32 0.2, %v12736_v31  ;;  %vm12745_vm8 = vcmp.ge.f32.partialorder %v12729_v36, 0.0  ;;  %v12761_v44 = vmul.f32 0.2, %v12729_v36 }
 0x784   : > { %v23114_v33 = vsel %vm12751_vm10, %v12735_v11, %v12767_v21  ;;  %vm12746_vm7 = vcmp.ge.f32.partialorder %v12730_v32, 0.0  ;;  %v12762_v29 = vmul.f32 0.2, %v12730_v32  ;;  %v12731_v35 = vadd.f32 %v12715_v13, %v20902_v7  ;;  %v12585_v39 = vpop.f32.mrb[30].mxu0  ;;  %v12656_v40 = vpop.f32.mrb[34].mxu1  ;;  %vm24627_vm10 = vmmov %vm24624_vm4 }
 0x785   : > { %v23117_v55 = vsel %vm12752_vm5, %v12736_v31, %v12768_v25  ;;  %v23119_v20 = vsel %vm12745_vm8, %v12729_v36, %v12761_v44  ;;  %v12721_v57 = vmul.f32 %v12705_v46, %v20904_v8  ;;  %v12700_v5 = vadd.f32 %v23083_v42, %v12581_v22  ;;  %v12587_v6 = vpop.f32.mrb[31].mxu0  ;;  %v12658_v34 = vpop.f32.mrb[35].mxu1  ;;  %vm24628_vm5 = vmmov %vm24624_vm4 }
 0x786   : > { %v23123_v58 = vsel %vm12746_vm7, %v12730_v32, %v12762_v29  ;;  %vm12747_vm2 = vcmp.ge.f32.partialorder %v12731_v35, 0.0  ;;  %v12763_v62 = vmul.f32 0.2, %v12731_v35  ;;  %v12706_v15 = vadd.f32 %v23090_v54, %v12510_v19 }
 0x787   : > { %v12737_v60 = vadd.f32 %v12721_v57, %v20931_v37  ;;  %v12716_v38 = vmul.f32 %v12700_v5, %v20895_v61  ;;  %v12707_v27 = vadd.f32 %v23090_v54, %v12585_v39  ;;  %v12708_v63 = vadd.f32 %v23090_v54, %v12587_v6 }
 0x788   : > { %v23130_v49 = vsel %vm12747_vm2, %v12731_v35, %v12763_v62  ;;  %v12722_v16 = vmul.f32 %v12706_v15, %v20904_v8  ;;  %v12673_v47 = vadd.f32 %v12656_v40, %v12220_v18  ;;  %v12674_v3 = vadd.f32 %v12658_v34, %v23079_v50  ;;  %v12662_v59 = vpop.f32.mrb[36].mxu1 }
 0x789   : > { %vm12753_vm0 = vcmp.ge.f32.partialorder %v12737_v60, 0.0  ;;  %v12769_v48 = vmul.f32 0.2, %v12737_v60  ;;  %v12732_v51 = vadd.f32 %v12716_v38, %v20902_v7  ;;  %v12723_v53 = vmul.f32 %v12707_v27, %v20904_v8  ;;  %v12664_v17 = vpop.f32.mrb[37].mxu1 }
 0x78a   : > { %v12738_v28 = vadd.f32 %v12722_v16, %v20931_v37  ;;  %v12724_v10 = vmul.f32 %v12708_v63, %v20904_v8  ;;  %v12701_v4 = vadd.f32 %v23083_v42, %v12673_v47  ;;  %v12702_v2 = vadd.f32 %v23083_v42, %v12674_v3  ;;  %v23203_v63 = vpop.permute.xlu1 %19555 }
 0x78b   : > { %v23140_v11 = vsel %vm12753_vm0, %v12737_v60, %v12769_v48  ;;  %vm12748_vm1 = vcmp.ge.f32.partialorder %v12732_v51, 0.0  ;;  %v12764_v50 = vmul.f32 0.2, %v12732_v51  ;;  %v12739_v18 = vadd.f32 %v12723_v53, %v20931_v37  ;;  %vm24630_vm0 = vmmov %vm24624_vm4 }
 0x78c   : > { %vm12754_vm9 = vcmp.ge.f32.partialorder %v12738_v28, 0.0  ;;  %v12770_v45 = vmul.f32 0.2, %v12738_v28  ;;  %v12740_v14 = vadd.f32 %v12724_v10, %v20931_v37  ;;  %v12717_v30 = vmul.f32 %v12701_v4, %v20895_v61 }
 0x78d   : > { %v12780_v22 = vsel %vm12748_vm1, %v12732_v51, %v12764_v50  ;;  %vm12755_vm14 = vcmp.ge.f32.partialorder %v12739_v18, 0.0  ;;  %v12771_v31 = vmul.f32 0.2, %v12739_v18  ;;  %v12718_v36 = vmul.f32 %v12702_v2, %v20895_v61 }
 0x78e   : > { %v23146_v46 = vsel %vm12754_vm9, %v12738_v28, %v12770_v45  ;;  %vm12756_vm13 = vcmp.ge.f32.partialorder %v12740_v14, 0.0  ;;  %v12772_v42 = vmul.f32 0.2, %v12740_v14  ;;  %v12733_v19 = vadd.f32 %v12717_v30, %v20902_v7 }
 0x78f   : > { %v23149_v21 = vsel %vm12755_vm14, %v12739_v18, %v12771_v31  ;;  %v12734_v32 = vadd.f32 %v12718_v36, %v20902_v7  ;;  %v12681_v13 = vadd.f32 %v12662_v59, %v23086_v43  ;;  %v23155_v25 = vpack.c.bf16 %v23117_v55, %v23107_v52 }
 0x790   : > { %v12788_v44 = vsel %vm12756_vm13, %v12740_v14, %v12772_v42  ;;  %vm12749_vm3 = vcmp.ge.f32.partialorder %v12733_v19, 0.0  ;;  %v12765_v29 = vmul.f32 0.2, %v12733_v19  ;;  %v23159_v61 = vpack.c.bf16 %v23114_v33, %v23102_v24  ;;  %v23278_v42 = vpop.permute.xlu0 %19560 }
 0x791   : > { %vm12750_vm6 = vcmp.ge.f32.partialorder %v12734_v32, 0.0  ;;  %v12766_v35 = vmul.f32 0.2, %v12734_v32  ;;  %v12709_v39 = vadd.f32 %v23090_v54, %v12681_v13  ;;  %18135 = vmatprep.subr.bf16.mxu0 %v23155_v25  ;;  %v23165_v7 = vpack.i.bf16 %v23123_v58, %v23119_v20 }
 0x792   : > { %v23167_v43 = vsel %vm12749_vm3, %v12733_v19, %v12765_v29  ;;  %18137 = vmatpush1.bf16.msra.mxu0 %v23159_v61  ;;  %v12682_v40 = vadd.f32 %v12664_v17, %v23081_v56  ;;  %v23173_v57 = vpack.i.bf16 %v23107_v52, %v23102_v24  ;;  %v23177_v5 = vpack.i.bf16 %v23146_v46, %v23140_v11  ;;  %v19566_v19 = vpop.permute.xlu1 %19565 }
 0x793   : > { %v23179_v6 = vsel %vm12750_vm6, %v12734_v32, %v12766_v35  ;;  %v12725_v34 = vmul.f32 %v12709_v39, %v20904_v8  ;;  %19570 = vrot.lane.b32.xlu0 %v23165_v7, %s20007_s21  ;;  %v23186_v62 = vpack.c.bf16 %v23146_v46, %v23123_v58  ;;  %v23190_v56 = vpack.c.bf16 %v23140_v11, %v23119_v20  ;;  %vm24638_vm6 = vmmov %vm24630_vm0 }
 0x794   : > { %v12710_v15 = vadd.f32 %v23090_v54, %v12682_v40  ;;  %19585 = vrot.lane.b32.xlu1 %v23177_v5, %s20007_s21  ;;  %v23195_v60 = vpack.c.bf16 %v12788_v44, %v12780_v22  ;;  %v23199_v38 = vpack.c.bf16 %v23149_v21, %v23130_v49  ;;  %v19579_v27 = vpack.i.bf16 %v23102_v24, %v24316_v41 }
 0x795   : > { %v12741_v16 = vadd.f32 %v12725_v34, %v20931_v37  ;;  %18139 = vmatprep.subr.bf16.mxu1 %v23186_v62  ;;  %17277 = vmatmul.mubr.msk.f32.vlgmr.msra.gmra.mrb[32].mxu0 %vm24624_vm4, %v23070_v23  ;;  %v23211_v54 = vpack.i.bf16 %v23117_v55, %v23114_v33  ;;  %v23214_v47 = vpack.i.bf16 %v12780_v22, %v23130_v49  ;;  %v19558_v3 = vunpack.i.h.bf16 %v23203_v63  ;;  %vm24639_vm4 = vmmov %vm24630_vm0 }
 0x796   : > { %v12726_v59 = vmul.f32 %v12710_v15, %v20904_v8  ;;  %18141 = vmatpush1.bf16.msra.mxu1 %v23190_v56  ;;  %18143 = vmatprep.subr.bf16.mxu0 %v23195_v60  ;;  %v19594_v48 = vpack.i.bf16 %v23114_v33, %v24316_v41  ;;  %v23223_v51 = vpack.i.bf16 %v12788_v44, %v23149_v21  ;;  %v19557_v53 = vunpack.i.l.bf16 %v23203_v63 }
 0x797   : > { %vm12757_vm15 = vcmp.ge.f32.partialorder %v12741_v16, 0.0  ;;  %v12773_v17 = vmul.f32 0.2, %v12741_v16  ;;  %19575 = vrot.lane.b32.xlu0 %v23173_v57, %s20007_s21  ;;  %18145 = vmatpush1.bf16.msra.mxu0 %v23199_v38  ;;  %v23231_v8 = vpack.i.bf16 %v23140_v11, %v23117_v55  ;;  %v23235_v28 = vpack.i.bf16 %v23119_v20, %v23107_v52 }
 0x798   : > { %v12742_v10 = vadd.f32 %v12726_v59, %v20931_v37  ;;  %19590 = vrot.lane.b32.xlu1 %v23211_v54, %s20007_s21  ;;  %v23242_v4 = vpack.i.bf16 %v23149_v21, %v23146_v46  ;;  %v23246_v2 = vpack.i.bf16 %v23130_v49, %v23123_v58  ;;  %v23249_v50 = vpack.i.bf16 %v23167_v43, %v12780_v22 }
 0x799   : > { %v12789_v18 = vsel %vm12757_vm15, %v12741_v16, %v12773_v17  ;;  %17279 = vmatmul.mubr.msk.f32.vlgmr.msra.gmra.mrb[40].mxu1 %vm24626_vm11, %v23070_v23  ;;  %13117 = vmatprep.mubr.f32.mxu0 %v24316_v41  ;;  %v23260_v14 = vpack.i.bf16 %v23179_v6, %v23167_v43  ;;  %v19699_v22 = vpack.i.bf16 %v23114_v33, %v23102_v24  ;;  %vm24629_vm8 = vcmask 64512   ;;  %vm24640_vm15 = vmmov %vm24630_vm0 }
 0x79a   : > { %vm12758_vm12 = vcmp.ge.f32.partialorder %v12742_v10, 0.0  ;;  %v12774_v37 = vmul.f32 0.2, %v12742_v10  ;;  %v23253_v45 = vpack.i.bf16 %v12789_v18, %v12788_v44  ;;  %13194 = vmatprep.mubr.f32.mxu1 %v24316_v41  ;;  %17278 = vmatmul.mubr.msk.f32.gmra.mrb[34].mxu0 %vm24628_vm5, %v23072_v9  ;;  %v19744_v36 = vpack.i.bf16 %v23117_v55, %v23107_v52  ;;  %vm24631_vm1 = vmmov %vm24629_vm8  ;;  %v16540_v52 = vld [vmem:[%s24641_s26] sm:$0xff]  ;;  %v16541_v55 = vld [vmem:[%s24641_s26 + $0x8] sm:$0xff] }
 0x79b   : > { %19580 = vrot.lane.b32.xlu0 %v19579_v27, %s20008_s10  ;;  %v19784_v24 = vpack.i.bf16 %v23149_v21, %v23130_v49  ;;  %v19799_v33 = vpack.i.bf16 %v23140_v11, %v23119_v20  ;;  %v19794_v32 = vpack.i.bf16 %v23146_v46, %v23123_v58  ;;  %v12912_v44 = vsel %vm24629_vm8, %v19557_v53, %v19558_v3  ;;  %vm24632_vm9 = vmmov %vm24631_vm1 }
 0x79c   : > { %v23262_v30 = vsel %vm12758_vm12, %v12742_v10, %v12774_v37  ;;  %19595 = vrot.lane.b32.xlu1 %v19594_v48, %s20008_s10  ;;  %v19563_v29 = vunpack.i.h.bf16 %v23278_v42  ;;  %v19562_v35 = vunpack.i.l.bf16 %v23278_v42  ;;  %v19568_v39 = vunpack.i.h.bf16 %v19566_v19  ;;  %13265 = vmatprep.mubr.f32.mxu0 %v24316_v41  ;;  %vm24633_vm14 = vmmov %vm24631_vm1  ;;  %v23346_v37 = vld [vmem:[#allocation9 + $0x8] sm:$0xff] }
 0x79d   : > { %v23268_v31 = vpack.i.bf16 %v23262_v30, %v12789_v18  ;;  %17280 = vmatmul.mubr.msk.f32.gmra.mrb[42].mxu1 %vm24627_vm10, %v23072_v9  ;;  %v19819_v13 = vpack.i.bf16 %v23262_v30, %v23179_v6  ;;  %v19567_v40 = vunpack.i.l.bf16 %v19566_v19  ;;  %vm12808_vm7 = vcmp.ge.s32.totalorder %v20462_v0, 8  ;;  %vm24642_vm12 = vmmov %vm24631_vm1  ;;  %v23474_v19 = vpop.f32.mrb[38].mxu1 }
 0x79e   : > { %13348 = vmatprep.mubr.f32.mxu1 %v24316_v41  ;;  %vm12807_vm2 = vcmp.ge.s32.totalorder %v20464_v1, 8  ;;  %17281 = vmatmul.mubr.msk.f32.vlgmr.msra.gmra.mrb[36].mxu0 %vm24630_vm0, %v23070_v23  ;;  %v12920_v34 = vsel %vm24631_vm1, %v19562_v35, %v19563_v29  ;;  %v12919_v27 = vsel %vm24633_vm14, %v19568_v39, %v19562_v35  ;;  %vm23310_vm13 = vmpackc.low %vm12808_vm7, %vm12808_vm7  ;;  %v23331_v17 = vpack.c.bf16 %v23262_v30, %v23179_v6 }
 0x79f   : > { %19600 = vrot.lane.b32.xlu0 %v23214_v47, %s20007_s21  ;;  %v12911_v15 = vsel %vm24632_vm9, %v19567_v40, %v19557_v53  ;;  %13271 = vmatprep.mubr.f32.mxu0 %v24316_v41  ;;  %v18146_v59 = vpack.c.bf16 %v12920_v34, %v12912_v44  ;;  %vm23315_vm3 = vmpackc.low %vm12807_vm2, %vm12807_vm2  ;;  %v23327_v53 = vld [vmem:[#allocation9] sm:$0xff]  ;;  %v23334_v10 = vpack.c.bf16 %v12789_v18, %v23167_v43  ;;  %vm12812_vm11 = vcmp.ge.s32.totalorder %v20513_v26, 8 }
 0x7a0   : > { %19610 = vrot.lane.b32.xlu1 %v23223_v51, %s20007_s21  ;;  %v18149_v48 = vpack.c.bf16 %v12919_v27, %v12911_v15  ;;  %v19729_v43 = vpack.i.bf16 %v24316_v41, %v23262_v30  ;;  %vm24643_vm10 = vmmov %vm24631_vm1  ;;  %vm12810_vm8 = vcmp.ge.s32.totalorder %v20483_v12, 8  ;;  %vm24210_vm9 = vcmask 982016  }
 0x7a1   : > { %18148 = vmatprep.subr.msk.bf16.mxu1 %vm23310_vm13, %v18146_v59  ;;  %vm23445_vm5 = vmpackc.low %vm12812_vm11, %vm12812_vm11 }
 0x7a2   : > { %18151 = vmatpush1.bf16.msk.msra.mxu1 %vm23315_vm3, %v18149_v48  ;;  %17282 = vmatmul.mubr.msk.f32.gmra.mrb[38].mxu0 %vm24638_vm6, %v23072_v9  ;;  %v19719_v9 = vpack.i.bf16 %v24316_v41, %v23179_v6  ;;  %vm24648_vm0 = vmmov %vm24631_vm1  ;;  %v15422_v6 = vld [vmem:[#allocation9 + $0x60] sm:$0xff] }
 0x7a3   : > { %19605 = vrot.lane.b32.xlu0 %v24316_v41, %s20008_s10  ;;  %13425 = vmatprep.mubr.f32.mxu0 %v24316_v41  ;;  %vm24649_vm1 = vmmov %vm24648_vm0 }
 0x7a4   : > { %19615 = vrot.lane.b32.xlu1 %v23235_v28, %s20008_s10  ;;  %vm23458_vm14 = vmpackc.low %vm12810_vm8, %vm12810_vm8  ;;  %vm12816_vm8 = vcmp.lt.s32.totalorder %v20462_v0, 24  ;;  %v24660_v0 = vmov 0 }
 0x7a5   : > { %17287 = vmatmul.mubr.msk.f32.vlgmr.msra.gmra.mrb[44].mxu1 %vm24639_vm4, %v23327_v53  ;;  %vm24652_vm6 = vmmov %vm24648_vm0 }
 0x7a6   : > { %13354 = vmatprep.mubr.f32.mxu1 %v24316_v41  ;;  %vm24653_vm4 = vmmov %vm24648_vm0 }
 0x7a7   : > { %19620 = vrot.lane.b32.xlu0 %v23231_v8, %s20008_s10  ;;  %vm24655_vm11 = vmmov %vm24648_vm0 }
 0x7a8   : > { %19625 = vrot.lane.b32.xlu1 %v23246_v2, %s20008_s10 }
 0x7a9   : > { %17288 = vmatmul.mubr.msk.f32.gmra.mrb[46].mxu1 %vm24640_vm15, %v23346_v37  ;;  %vm24654_vm15 = vmmov %vm24648_vm0 }
 0x7aa   : > { %13502 = vmatprep.mubr.f32.mxu1 %v24316_v41 }
 0x7ab   : > { %19630 = vrot.lane.b32.xlu0 %v23242_v4, %s20008_s10 }
 0x7ac   : > { %19635 = vrot.lane.b32.xlu1 %v23249_v50, %s20008_s10 }
 0x7af   : > { %19645 = vrot.lane.b32.xlu0 %v23253_v45, %s20008_s10 }
 0x7b0   : > { %19640 = vrot.lane.b32.xlu1 %v23173_v57, %s20007_s21 }
 0x7b3   : > { %19650 = vrot.lane.b32.xlu0 %v23211_v54, %s20007_s21 }
 0x7b4   : > { %19655 = vrot.lane.b32.xlu1 %v24316_v41, %s20007_s21 }
 0x7b7   : > { %19660 = vrot.lane.b32.xlu0 %v23165_v7, %s20007_s21 }
 0x7b8   : > { %19665 = vrot.lane.b32.xlu1 %v23177_v5, %s20007_s21 }
 0x7bb   : > { %19670 = vrot.lane.b32.xlu0 %v23214_v47, %s20007_s21 }
 0x7bc   : > { %19680 = vrot.lane.b32.xlu1 %v23223_v51, %s20007_s21 }
 0x7bf   : > { %19675 = vrot.lane.b32.xlu0 %v23260_v14, %s20007_s21 }
 0x7c0   : > { %19685 = vrot.lane.b32.xlu1 %v23268_v31, %s20007_s21 }
 0x7c3   : > { %19690 = vrot.lane.b32.xlu0 %v23235_v28, %s20008_s10  ;;  %v24646_v28 = vld [vmem:[#allocation17_spill] sm:$0xff] }
 0x7c4   : > { %19695 = vrot.lane.b32.xlu1 %v23231_v8, %s20008_s10  ;;  %vm12811_vm7 = vcmp.ge.s32.totalorder %v24646_v28, 8 }
 0x7c7   : > { %19700 = vrot.lane.b32.xlu0 %v19699_v22, %s20008_s10 }
 0x7c8   : > { %19705 = vrot.lane.b32.xlu1 %v23246_v2, %s20008_s10 }
 0x7cb   : > { %19710 = vrot.lane.b32.xlu0 %v23242_v4, %s20008_s10 }
 0x7cc   : > { %19715 = vrot.lane.b32.xlu1 %v23249_v50, %s20008_s10 }
 0x7cf   : > { %19725 = vrot.lane.b32.xlu0 %v23253_v45, %s20008_s10 }
 0x7d0   : > { %19720 = vrot.lane.b32.xlu1 %v19719_v9, %s20008_s10 }
 0x7d3   : > { %19730 = vrot.lane.b32.xlu0 %v19729_v43, %s20008_s10 }
 0x7d4   : > { %19735 = vrot.lane.b32.xlu1 %v23165_v7, %s20007_s21 }
 0x7d7   : > { %19740 = vrot.lane.b32.xlu0 %v23177_v5, %s20007_s21 }
 0x7d8   : > { %19745 = vrot.lane.b32.xlu1 %v19744_v36, %s20007_s21 }
 0x7db   : > { %19750 = vrot.lane.b32.xlu0 %v23214_v47, %s20007_s21 }
 0x7dc   : > { %19760 = vrot.lane.b32.xlu1 %v23223_v51, %s20007_s21 }
 0x7df   : > { %19755 = vrot.lane.b32.xlu0 %v23260_v14, %s20007_s21 }
 0x7e0   : > { %19765 = vrot.lane.b32.xlu1 %v23268_v31, %s20007_s21 }
 0x7e3   : > { %19770 = vrot.lane.b32.xlu0 %v24316_v41, %s20007_s21 }
 0x7e4   : > { %19775 = vrot.lane.b32.xlu1 %v24316_v41, %s20007_s21  ;;  %s17451_s21 = sshll.u32 %s20107_s17, 11 }
 0x7e5   : > { %s24062_s25 = scalar_lea.hbm %s24826_s22, %s17451_s21  ;;  %s19916_s21 = scalar_lea.vmem %s19915_s0, 4096 }
 0x7e7   : > { %19780 = vrot.lane.b32.xlu0 %v23249_v50, %s20008_s10  ;;  %v24647_v50 = vld [vmem:[#allocation16_spill] sm:$0xff] }
 0x7e8   : > { %19790 = vrot.lane.b32.xlu1 %v23253_v45, %s20008_s10  ;;  %vm12809_vm2 = vcmp.ge.s32.totalorder %v24647_v50, 8 }
 0x7eb   : > { %19785 = vrot.lane.b32.xlu0 %v19784_v24, %s20008_s10 }
 0x7ec   : > { %19795 = vrot.lane.b32.xlu1 %v19794_v32, %s20008_s10 }
 0x7ef   : > { %19800 = vrot.lane.b32.xlu0 %v19799_v33, %s20008_s10 }
 0x7f0   : > { %19805 = vrot.lane.b32.xlu1 %v24316_v41, %s20008_s10 }
 0x7f3   : > { %19810 = vrot.lane.b32.xlu0 %v24316_v41, %s20008_s10 }
 0x7f4   : > { %19815 = vrot.lane.b32.xlu1 %v24316_v41, %s20008_s10 }
 0x7f7   : > { %19820 = vrot.lane.b32.xlu0 %v19819_v13, %s20008_s10  ;;  %s16630_s10 = sshll.u32 %s24028_s24, 4  ;;  %s24065_s10 = int_to_ptr.vmem [resolvable:$true] %s16630_s10 }
 0x7f8   : > { %16544 = vperm.xlu1 %18923, %v16540_v52   ;;  %s19910_s11 = scalar_lea.vmem %s24065_s10, 2048  ;;  %p19917_p9 = scmp.lt.s32.totalorder %s24065_s10, %s19915_s0 }
 0x7f9   : > { %p19911_p0 = scmp.ne.s32.totalorder %s24065_s10, %s19910_s11  ;;  %p19918_p12 = scmp.lt.s32.totalorder %s19916_s21, %s19910_s11 }
 0x7fb   : > { %16549 = vperm.xlu0 %18922, %v16541_v55   ;;  %p19912_p3 = pnand %p19911_p0, %p24828_p1  ;;  %p19919_p2 = por %p19918_p12, %p19917_p9 }
 0x7fd   : > { %p19913_p5 = pneg %p19912_p3 }
 0x7ff   : > { %p19920_p13 = pnand %p19919_p2, %p19913_p5 }
 0x805   : > { %v19571_v20 = vpop.permute.xlu0 %19570 }
 0x806   : > { %v19573_v58 = vunpack.i.h.bf16 %v19571_v20  ;;  %v19572_v49 = vunpack.i.l.bf16 %v19571_v20  ;;  %v19586_v11 = vpop.permute.xlu1 %19585  ;;  %v24662_v20 = vld [vmem:[#allocation18_spill] sm:$0xff] }
 0x807   : > { %v19588_v46 = vunpack.i.h.bf16 %v19586_v11  ;;  %v19587_v21 = vunpack.i.l.bf16 %v19586_v11  ;;  %v24665_v11 = vld [vmem:[#allocation19_spill] sm:$0xff] }
 0x808   : > { %v12916_v7 = vsel %vm24642_vm12, %v19572_v49, %v19573_v58  ;;  %vm23470_vm12 = vmpackc.low %vm12811_vm7, %vm12811_vm7 }
 0x809   : > { %v19576_v57 = vpop.permute.xlu0 %19575  ;;  %v12924_v5 = vsel %vm24643_vm10, %v19587_v21, %v19588_v46  ;;  %vm23483_vm10 = vmpackc.low %vm12809_vm2, %vm12809_vm2  ;;  %vm12814_vm2 = vcmp.ge.s32.totalorder %v24662_v20, 8 }
 0x80a   : > { %v19578_v54 = vunpack.i.h.bf16 %v19576_v57  ;;  %v19577_v47 = vunpack.i.l.bf16 %v19576_v57  ;;  %v18158_v51 = vpack.c.bf16 %v12924_v5, %v12916_v7  ;;  %v19591_v8 = vpop.permute.xlu1 %19590  ;;  %vm23500_vm7 = vmpackc.low %vm12816_vm8, %vm12816_vm8 }
 0x80b   : > { %v19593_v4 = vunpack.i.h.bf16 %v19591_v8  ;;  %v19592_v2 = vunpack.i.l.bf16 %v19591_v8  ;;  %v24661_v0 = vsel %vm23500_vm7, 4294967295, %v24660_v0  ;;  %vm24668_vm8 = vmmov %vm24648_vm0 }
 0x80c   : > { %v12913_v18 = vsel %vm24648_vm0, %v19558_v3, %v19577_v47  ;;  %v12914_v45 = vsel %vm24649_vm1, %v19577_v47, %v19578_v54  ;;  %18160 = vmatprep.subr.msk.bf16.mxu1 %vm23445_vm5, %v18158_v51  ;;  %v12915_v30 = vsel %vm24652_vm6, %v19578_v54, %v19572_v49  ;;  %vm24663_vm1 = vcmask 130048  }
 0x80d   : > { %v23463_v22 = vpop.permute.xlu0 %19580  ;;  %v12921_v63 = vsel %vm24653_vm4, %v19563_v29, %v19592_v2  ;;  %v12922_v3 = vsel %vm24654_vm15, %v19592_v2, %v19593_v4  ;;  %v12923_v31 = vsel %vm24655_vm11, %v19593_v4, %v19587_v21  ;;  %v23487_v29 = vpop.f32.mrb[39].mxu1  ;;  %vm24664_vm6 = vmmov %vm24663_vm1  ;;  %vm12813_vm4 = vcmp.ge.s32.totalorder %v24665_v11, 8 }
 0x80e   : > { %v19583_v24 = vunpack.i.h.bf16 %v23463_v22  ;;  %v19582_v33 = vunpack.i.l.bf16 %v23463_v22  ;;  %v18152_v32 = vpack.c.bf16 %v12922_v3, %v12914_v45  ;;  %v18155_v13 = vpack.c.bf16 %v12921_v63, %v12913_v18  ;;  %v23478_v44 = vpop.permute.xlu1 %19595  ;;  %vm24666_vm15 = vmmov %vm24648_vm0 }
 0x80f   : > { %v18161_v35 = vpack.c.bf16 %v12923_v31, %v12915_v30  ;;  %v19598_v39 = vunpack.i.h.bf16 %v23478_v44  ;;  %v19597_v40 = vunpack.i.l.bf16 %v23478_v44  ;;  %vm24667_vm11 = vmmov %vm24648_vm0  ;;  %v24675_v30 = vmov 0 }
 0x810   : > { %18154 = vmatprep.subr.msk.bf16.mxu0 %vm23458_vm14, %v18152_v32  ;;  %v13682_v34 = vsel %vm24210_vm9, %v19582_v33, %v19583_v24 }
 0x811   : > { %v19601_v15 = vpop.permute.xlu0 %19600  ;;  %v13690_v27 = vsel %vm24210_vm9, %v19597_v40, %v19598_v39  ;;  %18163 = vmatpush1.bf16.msk.msra.mxu1 %vm23470_vm12, %v18161_v35  ;;  %18157 = vmatpush1.bf16.msk.msra.mxu0 %vm23483_vm10, %v18155_v13 }
 0x812   : > { %v19603_v59 = vunpack.i.h.bf16 %v19601_v15  ;;  %v19602_v48 = vunpack.i.l.bf16 %v19601_v15  ;;  %v18170_v9 = vpack.c.bf16 %v13690_v27, %v13682_v34  ;;  %v19611_v43 = vpop.permute.xlu1 %19610 }
 0x813   : > { %v19613_v52 = vunpack.i.h.bf16 %v19611_v43  ;;  %v19612_v55 = vunpack.i.l.bf16 %v19611_v43 }
 0x814   : > { %v12917_v49 = vsel %vm24648_vm0, %v19573_v58, %v19602_v48  ;;  %17299 = vmatmul.mubr.msk.f32.vlgmr.msra.gmra.mrb[40].mxu1 %vm24663_vm1, %v23327_v53  ;;  %17293 = vmatmul.mubr.msk.f32.vlgmr.msra.gmra.mrb[32].mxu0 %vm24664_vm6, %v23327_v53  ;;  %v12918_v21 = vsel %vm24666_vm15, %v19602_v48, %v19603_v59  ;;  %vm12815_vm0 = vcmp.lt.s32.totalorder %v20464_v1, 24  ;;  %vm23522_vm1 = vmpackc.low %vm12814_vm2, %vm12814_vm2  ;;  %v24671_v1 = vmov 0 }
 0x815   : > { %v19606_v7 = vpop.permute.xlu0 %19605  ;;  %v12925_v57 = vsel %vm24667_vm11, %v19588_v46, %v19612_v55  ;;  %v12926_v5 = vsel %vm24668_vm8, %v19612_v55, %v19613_v52  ;;  %18172 = vmatprep.subr.msk.bf16.mxu1 %vm23500_vm7, %v18170_v9  ;;  %13508 = vmatprep.mubr.f32.mxu1 %v24316_v41  ;;  %vm23529_vm6 = vmpackc.low %vm12813_vm4, %vm12813_vm4  ;;  %vm24673_vm15 = vcmask 130048   ;;  %vm12818_vm4 = vcmp.lt.s32.totalorder %v20483_v12, 24  ;;  %v23555_v12 = vld [vmem:[#allocation9 + $0x20] sm:$0xff] }
 0x816   : > { %v19608_v58 = vunpack.i.h.bf16 %v19606_v7  ;;  %v19607_v54 = vunpack.i.l.bf16 %v19606_v7  ;;  %v18164_v47 = vpack.c.bf16 %v12926_v5, %v12918_v21  ;;  %v18167_v51 = vpack.c.bf16 %v12925_v57, %v12917_v49  ;;  %v19616_v8 = vpop.permute.xlu1 %19615  ;;  %13431 = vmatprep.mubr.f32.mxu0 %v24316_v41  ;;  %vm24674_vm2 = vmmov %vm24673_vm15  ;;  %v23582_v49 = vld [vmem:[#allocation9 + $0x28] sm:$0xff] }
 0x817   : > { %v19618_v4 = vunpack.i.h.bf16 %v19616_v8  ;;  %v19617_v2 = vunpack.i.l.bf16 %v19616_v8  ;;  %v24672_v1 = vsel %vm23529_vm6, 4294967295, %v24671_v1  ;;  %vm23539_vm11 = vmpackc.low %vm12815_vm0, %vm12815_vm0  ;;  %vm12817_vm8 = vcmp.lt.s32.totalorder %v24647_v50, 24 }
 0x818   : > { %v13681_v18 = vsel %vm24210_vm9, %v19607_v54, %v19582_v33  ;;  %v13689_v45 = vsel %vm24210_vm9, %v19608_v58, %v19597_v40  ;;  %17300 = vmatmul.mubr.msk.f32.gmra.mrb[42].mxu1 %vm24673_vm15, %v23346_v37  ;;  %17294 = vmatmul.mubr.msk.f32.gmra.mrb[34].mxu0 %vm24674_vm2, %v23346_v37  ;;  %v24676_v30 = vsel %vm23539_vm11, 4294967295, %v24675_v30  ;;  %vm23559_vm0 = vmpackc.low %vm12818_vm4, %vm12818_vm4  ;;  %v24680_v48 = vmov 0 }
 0x819   : > { %v18173_v22 = vpack.c.bf16 %v13689_v45, %v13681_v18  ;;  %v19621_v63 = vpop.permute.xlu0 %19620  ;;  %18166 = vmatprep.subr.msk.bf16.mxu0 %vm23522_vm1, %v18164_v47  ;;  %13802 = vmatprep.mubr.f32.mxu1 %v24316_v41  ;;  %v13683_v33 = vsel %vm24210_vm9, %v19583_v24, %v19617_v2  ;;  %v13684_v32 = vsel %vm24210_vm9, %v19617_v2, %v19618_v4  ;;  %v24677_v24 = vmov 0  ;;  %vm24679_vm15 = vmmov %vm24674_vm2 }
 0x81a   : > { %v19623_v3 = vunpack.i.h.bf16 %v19621_v63  ;;  %v19622_v31 = vunpack.i.l.bf16 %v19621_v63  ;;  %18169 = vmatpush1.bf16.msk.msra.mxu0 %vm23529_vm6, %v18167_v51  ;;  %v19626_v13 = vpop.permute.xlu1 %19625  ;;  %13579 = vmatprep.mubr.f32.mxu0 %v24316_v41  ;;  %v24678_v24 = vsel %vm23559_vm0, 4294967295, %v24677_v24  ;;  %vm23568_vm2 = vmpackc.low %vm12817_vm8, %vm12817_vm8  ;;  %vm12819_vm4 = vcmp.lt.s32.totalorder %v24646_v28, 24 }
 0x81b   : > { %18175 = vmatpush1.bf16.msk.msra.mxu1 %vm23539_vm11, %v18173_v22  ;;  %v19628_v44 = vunpack.i.h.bf16 %v19626_v13  ;;  %v19627_v35 = vunpack.i.l.bf16 %v19626_v13  ;;  %v24681_v48 = vsel %vm23568_vm2, 4294967295, %v24680_v48  ;;  %vm12820_vm11 = vcmp.lt.s32.totalorder %v20513_v26, 24  ;;  %vm24682_vm7 = vmmov %vm24679_vm15 }
 0x81c   : > { %v13691_v40 = vsel %vm24210_vm9, %v19598_v39, %v19622_v31  ;;  %v13692_v34 = vsel %vm24210_vm9, %v19622_v31, %v19623_v3  ;;  %vm24685_vm8 = vmmov %vm24679_vm15  ;;  %v24693_v22 = vmov 0 }
 0x81d   : > { %v18176_v15 = vpack.c.bf16 %v13692_v34, %v13684_v32  ;;  %v18179_v27 = vpack.c.bf16 %v13691_v40, %v13683_v33  ;;  %v19631_v59 = vpop.permute.xlu0 %19630  ;;  %17305 = vmatmul.mubr.msk.f32.vlgmr.msra.gmra.mrb[36].mxu0 %vm24679_vm15, %v23327_v53  ;;  %v13685_v43 = vsel %vm24210_vm9, %v19618_v4, %v19627_v35  ;;  %v13686_v52 = vsel %vm24210_vm9, %v19627_v35, %v19628_v44  ;;  %vm23600_vm15 = vmpackc.low %vm12819_vm4, %vm12819_vm4 }
 0x81e   : > { %v19633_v39 = vunpack.i.h.bf16 %v19631_v59  ;;  %v19632_v9 = vunpack.i.l.bf16 %v19631_v59  ;;  %17311 = vmatmul.mubr.msk.f32.vlgmr.msra.gmra.mrb[48].mxu1 %vm24682_vm7, %v23555_v12  ;;  %v19636_v53 = vpop.permute.xlu1 %19635  ;;  %13585 = vmatprep.mubr.f32.mxu0 %v24316_v41  ;;  %vm23591_vm7 = vmpackc.low %vm12820_vm11, %vm12820_vm11  ;;  %vm12821_vm11 = vcmp.lt.s32.totalorder %v24665_v11, 24  ;;  %v24696_v33 = vmov 0 }
 0x81f   : > { %18178 = vmatprep.subr.msk.bf16.mxu0 %vm23559_vm0, %v18176_v15  ;;  %13808 = vmatprep.mubr.f32.mxu1 %v24316_v41  ;;  %v19638_v50 = vunpack.i.h.bf16 %v19636_v53  ;;  %v19637_v55 = vunpack.i.l.bf16 %v19636_v53  ;;  %vm24690_vm6 = vmmov %vm24685_vm8 }
 0x820   : > { %v13693_v21 = vsel %vm24210_vm9, %v19623_v3, %v19632_v9  ;;  %v13694_v7 = vsel %vm24210_vm9, %v19632_v9, %v19633_v39  ;;  %18181 = vmatpush1.bf16.msk.msra.mxu0 %vm23568_vm2, %v18179_v27  ;;  %vm12822_vm9 = vcmp.lt.s32.totalorder %v24662_v20, 24  ;;  %vm24688_vm2 = vcmask 982016  }
 0x821   : > { %v18182_v5 = vpack.c.bf16 %v13694_v7, %v13686_v52  ;;  %v18185_v58 = vpack.c.bf16 %v13693_v21, %v13685_v43  ;;  %v19646_v54 = vpop.permute.xlu0 %19645  ;;  %17306 = vmatmul.mubr.msk.f32.gmra.mrb[38].mxu0 %vm24685_vm8, %v23346_v37  ;;  %v13687_v8 = vsel %vm24688_vm2, %v19628_v44, %v19637_v55  ;;  %vm24689_vm0 = vmmov %vm24688_vm2 }
 0x822   : > { %v19648_v26 = vunpack.i.h.bf16 %v19646_v54  ;;  %v19647_v51 = vunpack.i.l.bf16 %v19646_v54  ;;  %v13688_v4 = vsel %vm24689_vm0, %v19637_v55, %v19638_v50  ;;  %17312 = vmatmul.mubr.msk.f32.gmra.mrb[50].mxu1 %vm24690_vm6, %v23582_v49  ;;  %v19641_v37 = vpop.permute.xlu1 %19640  ;;  %13879 = vmatprep.mubr.f32.mxu0 %v24316_v41  ;;  %vm24691_vm4 = vmmov %vm24689_vm0  ;;  %v23656_v55 = vld [vmem:[#allocation9 + $0x30] sm:$0xff] }
 0x823   : > { %18184 = vmatprep.subr.msk.bf16.mxu1 %vm23591_vm7, %v18182_v5  ;;  %v19643_v28 = vunpack.i.h.bf16 %v19641_v37  ;;  %v19642_v2 = vunpack.i.l.bf16 %v19641_v37  ;;  %13956 = vmatprep.mubr.f32.mxu1 %v24316_v41  ;;  %vm24692_vm8 = vmmov %vm24689_vm0  ;;  %vm24695_vm0 = vcmask 130048  }
 0x824   : > { %v13695_v18 = vsel %vm24691_vm4, %v19633_v39, %v19647_v51  ;;  %v13696_v45 = vsel %vm24692_vm8, %v19647_v51, %v19648_v26  ;;  %18187 = vmatpush1.bf16.msk.msra.mxu1 %vm23600_vm15, %v18185_v58  ;;  %vm23621_vm6 = vmpackc.low %vm12822_vm9, %vm12822_vm9  ;;  %vm24698_vm4 = vcmask 64512  }
 0x825   : > { %v24694_v22 = vsel %vm23621_vm6, 4294967295, %v24693_v22  ;;  %v18188_v63 = vpack.c.bf16 %v13696_v45, %v13688_v4  ;;  %v18191_v3 = vpack.c.bf16 %v13695_v18, %v13687_v8  ;;  %v19651_v31 = vpop.permute.xlu0 %19650  ;;  %17317 = vmatmul.mubr.msk.f32.vlgmr.msra.gmra.mrb[32].mxu0 %vm24695_vm0, %v23555_v12  ;;  %vm23630_vm2 = vmpackc.low %vm12821_vm11, %vm12821_vm11  ;;  %v14135_v13 = vsel %vm24698_vm4, %v19642_v2, %v19643_v28 }
 0x826   : > { %v24697_v33 = vsel %vm23630_vm2, 4294967295, %v24696_v33  ;;  %v19653_v32 = vunpack.i.h.bf16 %v19651_v31  ;;  %v19652_v20 = vunpack.i.l.bf16 %v19651_v31  ;;  %v19656_v44 = vpop.permute.xlu1 %19655  ;;  %13885 = vmatprep.mubr.f32.mxu0 %v24316_v41  ;;  %vm24699_vm9 = vmmov %vm24695_vm0 }
 0x827   : > { %18190 = vmatprep.subr.msk.bf16.mxu0 %vm23621_vm6, %v18188_v63  ;;  %v19658_v35 = vunpack.i.h.bf16 %v19656_v44  ;;  %v19657_v40 = vunpack.i.l.bf16 %v19656_v44  ;;  %17323 = vmatmul.mubr.msk.f32.vlgmr.msra.gmra.mrb[40].mxu1 %vm24699_vm9, %v23555_v12  ;;  %vm24700_vm8 = vmmov %vm24698_vm4 }
 0x828   : > { %v14143_v11 = vsel %vm24700_vm8, %v19652_v20, %v19653_v32  ;;  %18193 = vmatpush1.bf16.msk.msra.mxu0 %vm23630_vm2, %v18191_v3  ;;  %13962 = vmatprep.mubr.f32.mxu1 %v24316_v41  ;;  %vm24701_vm11 = vmmov %vm24698_vm4 }
 0x829   : > { %v18194_v34 = vpack.c.bf16 %v14143_v11, %v14135_v13  ;;  %v19661_v15 = vpop.permute.xlu0 %19660  ;;  %v14142_v27 = vsel %vm24701_vm11, %v19658_v35, %v19652_v20  ;;  %vm24702_vm0 = vmmov %vm24698_vm4 }
 0x82a   : > { %v14134_v59 = vsel %vm24702_vm0, %v19657_v40, %v19642_v2  ;;  %vm24703_vm4 = vmmov %vm24699_vm9  ;;  %v19663_v39 = vunpack.i.h.bf16 %v19661_v15  ;;  %v19662_v9 = vunpack.i.l.bf16 %v19661_v15  ;;  %v19666_v52 = vpop.permute.xlu1 %19665 }
 0x82b   : > { %17318 = vmatmul.mubr.msk.f32.gmra.mrb[34].mxu0 %vm24703_vm4, %v23582_v49  ;;  %v18197_v43 = vpack.c.bf16 %v14142_v27, %v14134_v59  ;;  %18196 = vmatprep.subr.msk.bf16.mxu1 %vm23310_vm13, %v18194_v34  ;;  %v19668_v53 = vunpack.i.h.bf16 %v19666_v52  ;;  %v19667_v50 = vunpack.i.l.bf16 %v19666_v52  ;;  %vm24704_vm9 = vmmov %vm24703_vm4 }
 0x82c   : > { %14033 = vmatprep.mubr.f32.mxu0 %v24316_v41  ;;  %17324 = vmatmul.mubr.msk.f32.gmra.mrb[42].mxu1 %vm24704_vm9, %v23582_v49  ;;  %vm24705_vm8 = vmmov %vm24702_vm0 }
 0x82d   : > { %18199 = vmatpush1.bf16.msk.msra.mxu1 %vm23315_vm3, %v18197_v43  ;;  %14255 = vmatprep.mubr.f32.mxu1 %v24316_v41  ;;  %v14136_v21 = vsel %vm24705_vm8, %v19643_v28, %v19662_v9  ;;  %vm24706_vm11 = vmmov %vm24702_vm0  ;;  %v19671_v5 = vpop.permute.xlu0 %19670  ;;  %v14144_v58 = vsel %vm24702_vm0, %v19653_v32, %v19667_v50  ;;  %v23670_v28 = vld [vmem:[#allocation9 + $0x38] sm:$0xff] }
 0x82e   : > { %v14137_v7 = vsel %vm24706_vm11, %v19662_v9, %v19663_v39  ;;  %vm24707_vm4 = vmmov %vm24702_vm0  ;;  %v19673_v26 = vunpack.i.h.bf16 %v19671_v5  ;;  %v19672_v51 = vunpack.i.l.bf16 %v19671_v5  ;;  %v18203_v4 = vpack.c.bf16 %v14144_v58, %v14136_v21  ;;  %v19681_v37 = vpop.permute.xlu1 %19680  ;;  %v23729_v58 = vld [vmem:[#allocation9 + $0x40] sm:$0xff] }
 0x82f   : > { %v14145_v54 = vsel %vm24707_vm4, %v19667_v50, %v19668_v53  ;;  %vm24708_vm2 = vmmov %vm24704_vm9  ;;  %v19683_v2 = vunpack.i.h.bf16 %v19681_v37  ;;  %v19682_v18 = vunpack.i.l.bf16 %v19681_v37 }
 0x830   : > { %17329 = vmatmul.mubr.msk.f32.vlgmr.msra.gmra.mrb[36].mxu0 %vm24708_vm2, %v23555_v12  ;;  %v18200_v8 = vpack.c.bf16 %v14145_v54, %v14137_v7  ;;  %vm24709_vm9 = vmmov %vm24708_vm2 }
 0x831   : > { %14039 = vmatprep.mubr.f32.mxu0 %v24316_v41  ;;  %17335 = vmatmul.mubr.msk.f32.vlgmr.msra.gmra.mrb[52].mxu1 %vm24709_vm9, %v23656_v55  ;;  %vm24710_vm2 = vmmov %vm24702_vm0  ;;  %v19676_v63 = vpop.permute.xlu0 %19675  ;;  %v14147_v31 = vsel %vm24702_vm0, %v19682_v18, %v19683_v2 }
 0x832   : > { %18202 = vmatprep.subr.msk.bf16.mxu0 %vm23458_vm14, %v18200_v8  ;;  %14261 = vmatprep.mubr.f32.mxu1 %v24316_v41  ;;  %v14138_v12 = vsel %vm24710_vm2, %v19663_v39, %v19672_v51  ;;  %vm24711_vm8 = vmmov %vm24702_vm0  ;;  %v19678_v32 = vunpack.i.h.bf16 %v19676_v63  ;;  %v19677_v20 = vunpack.i.l.bf16 %v19676_v63  ;;  %v19686_v35 = vpop.permute.xlu1 %19685 }
 0x833   : > { %v14139_v45 = vsel %vm24711_vm8, %v19672_v51, %v19673_v26  ;;  %vm24712_vm11 = vmmov %vm24702_vm0  ;;  %18205 = vmatpush1.bf16.msk.msra.mxu0 %vm23483_vm10, %v18203_v4  ;;  %v19688_v40 = vunpack.i.h.bf16 %v19686_v35  ;;  %v19687_v11 = vunpack.i.l.bf16 %v19686_v35 }
 0x834   : > { %v14146_v3 = vsel %vm24712_vm11, %v19668_v53, %v19682_v18  ;;  %vm24713_vm4 = vmmov %vm24709_vm9  ;;  %v18206_v13 = vpack.c.bf16 %v14147_v31, %v14139_v45 }
 0x835   : > { %17330 = vmatmul.mubr.msk.f32.gmra.mrb[38].mxu0 %vm24713_vm4, %v23582_v49  ;;  %v18209_v44 = vpack.c.bf16 %v14146_v3, %v14138_v12  ;;  %vm24714_vm9 = vmmov %vm24713_vm4  ;;  %v23688_v15 = vpop.permute.xlu0 %19690  ;;  %v14149_v59 = vsel %vm24702_vm0, %v19687_v11, %v19688_v40  ;;  %v23749_v3 = vld [vmem:[#allocation9 + $0x48] sm:$0xff] }
 0x836   : > { %14332 = vmatprep.mubr.f32.mxu0 %v24316_v41  ;;  %17336 = vmatmul.mubr.msk.f32.gmra.mrb[54].mxu1 %vm24714_vm9, %v23670_v28  ;;  %vm24715_vm2 = vmmov %vm24702_vm0  ;;  %v23696_v43 = vpop.permute.xlu1 %19695  ;;  %v19693_v21 = vunpack.i.h.bf16 %v23688_v15  ;;  %v19692_v7 = vunpack.i.l.bf16 %v23688_v15 }
 0x837   : > { %v14140_v34 = vsel %vm24715_vm2, %v19673_v26, %v19677_v20  ;;  %18208 = vmatprep.subr.msk.bf16.mxu1 %vm23445_vm5, %v18206_v13  ;;  %14409 = vmatprep.mubr.f32.mxu1 %v24316_v41  ;;  %vm24716_vm8 = vmmov %vm24702_vm0  ;;  %v19698_v53 = vunpack.i.h.bf16 %v23696_v43  ;;  %v19697_v50 = vunpack.i.l.bf16 %v23696_v43 }
 0x838   : > { %v14141_v49 = vsel %vm24716_vm8, %v19677_v20, %v19678_v32  ;;  %vm24717_vm11 = vmmov %vm24702_vm0  ;;  %18211 = vmatpush1.bf16.msk.msra.mxu1 %vm23470_vm12, %v18209_v44  ;;  %vm24720_vm8 = vnez %v24672_v1  ;;  %vm24722_vm0 = vcmask 982016  }
 0x839   : > { %v14148_v27 = vsel %vm24717_vm11, %v19683_v2, %v19687_v11  ;;  %17341 = vmatmul.mubr.msk.f32.vlgmr.msra.gmra.mrb[32].mxu0 %vm24713_vm4, %v23656_v55  ;;  %v18212_v39 = vpack.c.bf16 %v14149_v59, %v14141_v49  ;;  %18219 = vmatprep.subr.bf16.mxu1 %v23155_v25  ;;  %vm24718_vm9 = vmmov %vm24713_vm4  ;;  %v19701_v52 = vpop.permute.xlu0 %19700 }
 0x83a   : > { %v18215_v9 = vpack.c.bf16 %v14148_v27, %v14140_v34  ;;  %14338 = vmatprep.mubr.f32.mxu0 %v24316_v41  ;;  %vm24719_vm2 = vmmov %vm24713_vm4  ;;  %v23711_v25 = vpop.permute.xlu1 %19705  ;;  %v19703_v37 = vunpack.i.h.bf16 %v19701_v52  ;;  %v19702_v2 = vunpack.i.l.bf16 %v19701_v52 }
 0x83b   : > { %17347 = vmatmul.mubr.msk.f32.vlgmr.msra.gmra.mrb[40].mxu1 %vm24718_vm9, %v23656_v55  ;;  %18214 = vmatprep.subr.msk.bf16.mxu0 %vm23522_vm1, %v18212_v39  ;;  %vm24721_vm11 = vmmov %vm24719_vm2  ;;  %v19708_v51 = vunpack.i.h.bf16 %v23711_v25  ;;  %v19707_v8 = vunpack.i.l.bf16 %v23711_v25  ;;  %v23828_v25 = vld [vmem:[#allocation9 + $0x50] sm:$0xff] }
 0x83c   : > { %18221 = vmatpush1.bf16.msra.mxu1 %v23159_v61  ;;  %18217 = vmatpush1.bf16.msk.msra.mxu0 %vm24720_vm8, %v18215_v9  ;;  %v14929_v61 = vsel %vm24722_vm0, %v19697_v50, %v19698_v53  ;;  %vm24723_vm4 = vmmov %vm24719_vm2 }
 0x83d   : > { %17342 = vmatmul.mubr.msk.f32.gmra.mrb[34].mxu0 %vm24719_vm2, %v23670_v28  ;;  %18227 = vmatprep.subr.bf16.mxu1 %v23195_v60  ;;  %v23724_v5 = vpop.permute.xlu0 %19710  ;;  %vm24724_vm9 = vmmov %vm24722_vm0 }
 0x83e   : > { %18223 = vmatprep.subr.bf16.mxu0 %v23186_v62  ;;  %14415 = vmatprep.mubr.f32.mxu1 %v24316_v41  ;;  %v19713_v54 = vunpack.i.h.bf16 %v23724_v5  ;;  %v19712_v26 = vunpack.i.l.bf16 %v23724_v5  ;;  %v23736_v4 = vpop.permute.xlu1 %19715 }
 0x83f   : > { %14486 = vmatprep.mubr.f32.mxu0 %v24316_v41  ;;  %17348 = vmatmul.mubr.msk.f32.gmra.mrb[42].mxu1 %vm24721_vm11, %v23670_v28  ;;  %v19718_v45 = vunpack.i.h.bf16 %v23736_v4  ;;  %v19717_v63 = vunpack.i.l.bf16 %v23736_v4  ;;  %vm24725_vm11 = vmmov %vm24719_vm2 }
 0x840   : > { %14588 = vmatprep.mubr.f32.mxu1 %v24316_v41  ;;  %v14931_v31 = vsel %vm24722_vm0, %v19712_v26, %v19713_v54 }
 0x841   : > { %17353 = vmatmul.mubr.msk.f32.vlgmr.msra.gmra.mrb[36].mxu0 %vm24723_vm4, %v23656_v55  ;;  %v14921_v55 = vsel %vm24724_vm9, %v19692_v7, %v19693_v21  ;;  %v23743_v12 = vpop.permute.xlu0 %19725  ;;  %vm24726_vm4 = vmmov %vm24722_vm0  ;;  %vm24727_vm9 = vnez %v24661_v0 }
 0x842   : > { %18225 = vmatpush1.bf16.msra.mxu0 %v23190_v56  ;;  %14492 = vmatprep.mubr.f32.mxu0 %v24316_v41  ;;  %v18234_v18 = vpack.c.bf16 %v14929_v61, %v14921_v55  ;;  %v14923_v32 = vsel %vm24726_vm4, %v19707_v8, %v19708_v51  ;;  %v19728_v20 = vunpack.i.h.bf16 %v23743_v12  ;;  %v19727_v13 = vunpack.i.l.bf16 %v23743_v12  ;;  %v23760_v44 = vpop.permute.xlu1 %19720 }
 0x843   : > { %18231 = vmatprep.subr.bf16.mxu0 %v23331_v17  ;;  %17355 = vmatmul.mubr.msk.f32.vlgmr.msra.gmra.mrb[56].mxu1 %vm24719_vm2, %v23729_v58  ;;  %vm24728_vm2 = vmmov %vm24722_vm0  ;;  %v18240_v40 = vpack.c.bf16 %v14931_v31, %v14923_v32  ;;  %v19723_v59 = vunpack.i.h.bf16 %v23760_v44  ;;  %v19722_v39 = vunpack.i.l.bf16 %v23760_v44 }
 0x844   : > { %18229 = vmatpush1.bf16.msra.mxu1 %v23199_v38  ;;  %14594 = vmatprep.mubr.f32.mxu1 %v24316_v41  ;;  %vm24731_vm4 = vmmov %vm24728_vm2 }
 0x845   : > { %17354 = vmatmul.mubr.msk.f32.gmra.mrb[38].mxu0 %vm24725_vm11, %v23670_v28  ;;  %18236 = vmatprep.subr.msk.bf16.mxu1 %vm24727_vm9, %v18234_v18  ;;  %v14920_v28 = vsel %vm24728_vm2, %v19702_v2, %v19692_v7  ;;  %vm24729_vm11 = vmmov %vm24722_vm0  ;;  %vm24730_vm0 = vcmask 130048   ;;  %v14933_v11 = vsel %vm24731_vm4, %v19727_v13, %v19728_v20  ;;  %v19731_v49 = vpop.permute.xlu0 %19730 }
 0x846   : > { %14665 = vmatprep.mubr.f32.mxu0 %v24316_v41  ;;  %v14928_v35 = vsel %vm24729_vm11, %v19703_v37, %v19697_v50  ;;  %vm24732_vm8 = vmmov %vm24728_vm2  ;;  %v19733_v15 = vunpack.i.h.bf16 %v19731_v49  ;;  %v19732_v27 = vunpack.i.l.bf16 %v19731_v49  ;;  %v23781_v9 = vpop.permute.xlu1 %19735  ;;  %vm24734_vm2 = vnez %v24678_v24 }
 0x847   : > { %17356 = vmatmul.mubr.msk.f32.gmra.mrb[58].mxu1 %vm24730_vm0, %v23749_v3  ;;  %v14925_v34 = vsel %vm24732_vm8, %v19717_v63, %v19718_v45  ;;  %vm24733_vm9 = vmmov %vm24730_vm0  ;;  %v18237_v52 = vpack.c.bf16 %v14928_v35, %v14920_v28  ;;  %v19738_v37 = vunpack.i.h.bf16 %v23781_v9  ;;  %v19737_v2 = vunpack.i.l.bf16 %v23781_v9 }
 0x848   : > { %14742 = vmatprep.mubr.f32.mxu1 %v24316_v41  ;;  %v18246_v50 = vpack.c.bf16 %v14933_v11, %v14925_v34  ;;  %vm24735_vm8 = vmmov %vm24730_vm0 }
 0x849   : > { %17357 = vmatmul.mubr.msk.f32.vlgmr.msra.gmra.mrb[32].mxu0 %vm24733_vm9, %v23729_v58  ;;  %vm24736_vm9 = vmmov %vm24731_vm4  ;;  %v23793_v55 = vpop.permute.xlu0 %19740 }
 0x84a   : > { %18233 = vmatpush1.bf16.msra.mxu0 %v23334_v10  ;;  %14671 = vmatprep.mubr.f32.mxu0 %v24316_v41  ;;  %v14930_v7 = vsel %vm24736_vm9, %v19698_v53, %v19712_v26  ;;  %vm24737_vm11 = vmmov %vm24731_vm4  ;;  %vm24738_vm4 = vnez %v24676_v30  ;;  %v19743_v53 = vunpack.i.h.bf16 %v23793_v55  ;;  %v19746_v26 = vpop.permute.xlu1 %19745  ;;  %v16208_v30 = vld [vmem:[#allocation9 + $0x80] sm:$0xff] }
 0x84b   : > { %18242 = vmatprep.subr.msk.bf16.mxu0 %vm24734_vm2, %v18240_v40  ;;  %17359 = vmatmul.mubr.msk.f32.vlgmr.msra.gmra.mrb[40].mxu1 %vm24735_vm8, %v23729_v58  ;;  %v14922_v61 = vsel %vm24737_vm11, %v19693_v21, %v19707_v8  ;;  %vm24739_vm2 = vmmov %vm24736_vm9  ;;  %v19742_v21 = vunpack.i.l.bf16 %v23793_v55  ;;  %v19748_v34 = vunpack.i.h.bf16 %v19746_v26  ;;  %v19747_v49 = vunpack.i.l.bf16 %v19746_v26 }
 0x84c   : > { %18239 = vmatpush1.bf16.msk.msra.mxu1 %vm24738_vm4, %v18237_v52  ;;  %v14935_v18 = vsel %vm24739_vm2, %v19732_v27, %v19733_v15  ;;  %vm24740_vm8 = vmmov %vm24739_vm2  ;;  %14748 = vmatprep.mubr.f32.mxu1 %v24316_v41  ;;  %v18243_v8 = vpack.c.bf16 %v14930_v7, %v14922_v61  ;;  %v14924_v32 = vsel %vm24739_vm2, %v19708_v51, %v19717_v63  ;;  %v14970_v7 = vld [vmem:[#allocation9 + $0x58] sm:$0xff] }
 0x84d   : > { %17358 = vmatmul.mubr.msk.f32.gmra.mrb[34].mxu0 %vm24730_vm0, %v23749_v3  ;;  %v14927_v43 = vsel %vm24740_vm8, %v19722_v39, %v19723_v59  ;;  %18248 = vmatprep.subr.msk.bf16.mxu1 %vm23591_vm7, %v18246_v50  ;;  %vm24741_vm9 = vmmov %vm24739_vm2  ;;  %v23823_v40 = vpop.permute.xlu0 %19750  ;;  %vm24746_vm2 = vnez %v24681_v48  ;;  %v16209_v48 = vld [vmem:[#allocation9 + $0x88] sm:$0xff] }
 0x84e   : > { %14819 = vmatprep.mubr.f32.mxu0 %v24316_v41  ;;  %v14932_v31 = vsel %vm24741_vm9, %v19713_v54, %v19727_v13  ;;  %vm24742_vm11 = vmmov %vm24730_vm0  ;;  %v18252_v44 = vpack.c.bf16 %v14935_v18, %v14927_v43  ;;  %vm24743_vm0 = vcmask 64512   ;;  %v19753_v5 = vunpack.i.h.bf16 %v23823_v40  ;;  %v19761_v51 = vpop.permute.xlu1 %19760 }
 0x84f   : > { %17360 = vmatmul.mubr.msk.f32.gmra.mrb[42].mxu1 %vm24742_vm11, %v23749_v3  ;;  %v15382_v28 = vsel %vm24743_vm0, %v19742_v21, %v19743_v53  ;;  %vm24744_vm8 = vmmov %vm24743_vm0  ;;  %v19752_v54 = vunpack.i.l.bf16 %v23823_v40  ;;  %v18249_v63 = vpack.c.bf16 %v14932_v31, %v14924_v32  ;;  %v19763_v13 = vunpack.i.h.bf16 %v19761_v51  ;;  %v15423_v40 = vld [vmem:[#allocation9 + $0x68] sm:$0xff] }
 0x850   : > { %v15374_v35 = vsel %vm24744_vm8, %v19737_v2, %v19738_v37  ;;  %vm24745_vm9 = vmmov %vm24742_vm11  ;;  %15041 = vmatprep.mubr.f32.mxu1 %v24316_v41  ;;  %vm24748_vm0 = vcmask 982016  }
 0x851   : > { %17361 = vmatmul.mubr.msk.f32.vlgmr.msra.gmra.mrb[36].mxu0 %vm24745_vm9, %v23729_v58  ;;  %v19762_v58 = vunpack.i.l.bf16 %v19761_v51  ;;  %v18258_v11 = vpack.c.bf16 %v15382_v28, %v15374_v35  ;;  %vm24747_vm11 = vmmov %vm24745_vm9  ;;  %v14934_v15 = vsel %vm24748_vm0, %v19728_v20, %v19732_v27  ;;  %v23845_v52 = vpop.permute.xlu0 %19755  ;;  %vm24750_vm9 = vcmask 64512  }
 0x852   : > { %18245 = vmatpush1.bf16.msk.msra.mxu0 %vm24746_vm2, %v18243_v8  ;;  %14825 = vmatprep.mubr.f32.mxu0 %v24316_v41  ;;  %vm24749_vm8 = vmmov %vm24748_vm0  ;;  %v19758_v20 = vunpack.i.h.bf16 %v23845_v52  ;;  %v19757_v4 = vunpack.i.l.bf16 %v23845_v52 }
 0x853   : > { %18254 = vmatprep.subr.msk.bf16.mxu0 %vm23621_vm6, %v18252_v44  ;;  %17367 = vmatmul.mubr.msk.f32.vlgmr.msra.gmra.mrb[60].mxu1 %vm24747_vm11, %v23828_v25  ;;  %v14926_v59 = vsel %vm24749_vm8, %v19718_v45, %v19722_v39  ;;  %v15384_v50 = vsel %vm24750_vm9, %v19762_v58, %v19763_v13  ;;  %vm24751_vm6 = vmmov %vm24747_vm11  ;;  %v19766_v45 = vpop.permute.xlu1 %19765  ;;  %vm24755_vm8 = vcmask 130048  }
 0x854   : > { %18251 = vmatpush1.bf16.msk.msra.mxu1 %vm23600_vm15, %v18249_v63  ;;  %vm24752_vm11 = vmmov %vm24750_vm9  ;;  %15047 = vmatprep.mubr.f32.mxu1 %v24316_v41  ;;  %v19767_v39 = vunpack.i.l.bf16 %v19766_v45  ;;  %v18255_v61 = vpack.c.bf16 %v14934_v15, %v14926_v59 }
 0x855   : > { %17362 = vmatmul.mubr.msk.f32.gmra.mrb[38].mxu0 %vm24751_vm6, %v23749_v3  ;;  %v15376_v12 = vsel %vm24752_vm11, %v19752_v54, %v19753_v5  ;;  %18260 = vmatprep.subr.msk.bf16.mxu1 %vm23310_vm13, %v18258_v11  ;;  %v19768_v3 = vunpack.i.h.bf16 %v19766_v45  ;;  %vm24753_vm6 = vmmov %vm24750_vm9  ;;  %v19771_v26 = vpop.permute.xlu0 %19770 }
 0x856   : > { %v18264_v27 = vpack.c.bf16 %v15384_v50, %v15376_v12  ;;  %15118 = vmatprep.mubr.f32.mxu0 %v24316_v41  ;;  %v15381_v18 = vsel %vm24753_vm6, %v19748_v34, %v19742_v21  ;;  %vm24754_vm0 = vmmov %vm24753_vm6  ;;  %v19773_v31 = vunpack.i.h.bf16 %v19771_v26  ;;  %v19772_v32 = vunpack.i.l.bf16 %v19771_v26 }
 0x857   : > { %v15373_v43 = vsel %vm24754_vm0, %v19747_v49, %v19737_v2  ;;  %17368 = vmatmul.mubr.msk.f32.gmra.mrb[62].mxu1 %vm24755_vm8, %v14970_v7  ;;  %vm24756_vm9 = vmmov %vm24754_vm0  ;;  %vm24759_vm6 = vnez %v24697_v33  ;;  %v19776_v2 = vpop.permute.xlu1 %19775 }
 0x858   : > { %v15378_v16 = vsel %vm24756_vm9, %v19757_v4, %v19758_v20  ;;  %vm24757_vm13 = vmmov %vm24754_vm0  ;;  %15195 = vmatprep.mubr.f32.mxu1 %v24316_v41  ;;  %v18261_v21 = vpack.c.bf16 %v15381_v18, %v15373_v43  ;;  %v19778_v28 = vunpack.i.h.bf16 %v19776_v2  ;;  %v19777_v35 = vunpack.i.l.bf16 %v19776_v2 }
 0x859   : > { %v15386_v8 = vsel %vm24757_vm13, %v19767_v39, %v19768_v3  ;;  %vm24758_vm11 = vmmov %vm24755_vm8  ;;  %v15380_v51 = vsel %vm24754_vm0, %v19772_v32, %v19773_v31  ;;  %v23882_v11 = vpop.permute.xlu0 %19780 }
 0x85a   : > { %17373 = vmatmul.mubr.msk.f32.vlgmr.msra.gmra.mrb[32].mxu0 %vm24758_vm11, %v23828_v25  ;;  %v18270_v44 = vpack.c.bf16 %v15386_v8, %v15378_v16  ;;  %vm24760_vm9 = vmmov %vm24754_vm0 }
 0x85b   : > { %18257 = vmatpush1.bf16.msk.msra.mxu0 %vm24759_vm6, %v18255_v61  ;;  %15124 = vmatprep.mubr.f32.mxu0 %v24316_v41  ;;  %v15383_v63 = vsel %vm24760_vm9, %v19743_v53, %v19762_v58  ;;  %vm24761_vm13 = vmmov %vm24754_vm0  ;;  %v15385_v58 = vsel %vm24754_vm0, %v19763_v13, %v19767_v39  ;;  %v23896_v49 = vpop.permute.xlu1 %19790 }
 0x85c   : > { %18266 = vmatprep.subr.msk.bf16.mxu0 %vm23458_vm14, %v18264_v27  ;;  %17379 = vmatmul.mubr.msk.f32.vlgmr.msra.gmra.mrb[40].mxu1 %vm24755_vm8, %v23828_v25  ;;  %v15388_v34 = vsel %vm24761_vm13, %v19777_v35, %v19778_v28  ;;  %vm24762_vm11 = vmmov %vm24755_vm8  ;;  %v19792_v50 = vunpack.i.l.bf16 %v23896_v49 }
 0x85d   : > { %18263 = vmatpush1.bf16.msk.msra.mxu1 %vm23315_vm3, %v18261_v21  ;;  %15201 = vmatprep.mubr.f32.mxu1 %v24316_v41  ;;  %vm24763_vm14 = vmmov %vm24754_vm0  ;;  %v18276_v55 = vpack.c.bf16 %v15388_v34, %v15380_v51  ;;  %v23899_v23 = vpop.permute.xlu0 %19785 }
 0x85e   : > { %17374 = vmatmul.mubr.msk.f32.gmra.mrb[34].mxu0 %vm24762_vm11, %v14970_v7  ;;  %18272 = vmatprep.subr.msk.bf16.mxu1 %vm23445_vm5, %v18270_v44  ;;  %v15375_v14 = vsel %vm24763_vm14, %v19738_v37, %v19752_v54  ;;  %vm24764_vm3 = vmmov %vm24755_vm8 }
 0x85f   : > { %15272 = vmatprep.mubr.f32.mxu0 %v24316_v41  ;;  %v18267_v53 = vpack.c.bf16 %v15383_v63, %v15375_v14  ;;  %vm24765_vm5 = vmmov %vm24754_vm0  ;;  %v19796_v54 = vpop.permute.xlu1 %19795 }
 0x860   : > { %17380 = vmatmul.mubr.msk.f32.gmra.mrb[42].mxu1 %vm24755_vm8, %v14970_v7  ;;  %v15377_v9 = vsel %vm24765_vm5, %v19753_v5, %v19757_v4  ;;  %vm24766_vm9 = vmmov %vm24764_vm3  ;;  %v19798_v13 = vunpack.i.h.bf16 %v19796_v54  ;;  %v19797_v15 = vunpack.i.l.bf16 %v19796_v54  ;;  %vm24776_vm5 = vcmask 982016  }
 0x861   : > { %15494 = vmatprep.mubr.f32.mxu1 %v24316_v41  ;;  %v18273_v37 = vpack.c.bf16 %v15385_v58, %v15377_v9  ;;  %vm24767_vm13 = vmmov %vm24754_vm0  ;;  %v19801_v5 = vpop.permute.xlu0 %19800  ;;  %v19782_v4 = vunpack.i.l.bf16 %v23882_v11 }
 0x862   : > { %17385 = vmatmul.mubr.msk.f32.vlgmr.msra.gmra.mrb[36].mxu0 %vm24764_vm3, %v23828_v25  ;;  %v15387_v25 = vsel %vm24767_vm13, %v19768_v3, %v19777_v35  ;;  %vm24768_vm11 = vmmov %vm24764_vm3  ;;  %v19803_v45 = vunpack.i.h.bf16 %v19801_v5  ;;  %v19802_v27 = vunpack.i.l.bf16 %v19801_v5 }
 0x863   : > { %18269 = vmatpush1.bf16.msk.msra.mxu0 %vm23483_vm10, %v18267_v53  ;;  %15278 = vmatprep.mubr.f32.mxu0 %v24316_v41  ;;  %vm24769_vm10 = vmmov %vm24754_vm0  ;;  %v23932_v36 = vpop.permute.xlu1 %19805 }
 0x864   : > { %18278 = vmatprep.subr.msk.bf16.mxu0 %vm23522_vm1, %v18276_v55  ;;  %17391 = vmatmul.mubr.msk.f32.vlgmr.msra.gmra.mrb[64].mxu1 %vm24766_vm9, %v15422_v6  ;;  %v15379_v42 = vsel %vm24769_vm10, %v19758_v20, %v19772_v32  ;;  %vm24770_vm1 = vmmov %vm24764_vm3  ;;  %v19783_v20 = vunpack.i.h.bf16 %v23882_v11  ;;  %v19808_v8 = vunpack.i.h.bf16 %v23932_v36  ;;  %v19807_v31 = vunpack.i.l.bf16 %v23932_v36 }
 0x865   : > { %18275 = vmatpush1.bf16.msk.msra.mxu1 %vm23470_vm12, %v18273_v37  ;;  %15500 = vmatprep.mubr.f32.mxu1 %v24316_v41  ;;  %v18279_v46 = vpack.c.bf16 %v15387_v25, %v15379_v42  ;;  %vm24771_vm14 = vmmov %vm24770_vm1  ;;  %vm24772_vm12 = vnez %v24672_v1  ;;  %v19788_v1 = vunpack.i.h.bf16 %v23899_v23 }
 0x866   : > { %17386 = vmatmul.mubr.msk.f32.gmra.mrb[38].mxu0 %vm24768_vm11, %v14970_v7  ;;  %18283 = vmatprep.subr.bf16.mxu1 %v23186_v62  ;;  %v23930_v62 = vpop.permute.xlu0 %19810  ;;  %vm24773_vm0 = vmmov %vm24770_vm1 }
 0x867   : > { %15571 = vmatprep.mubr.f32.mxu0 %v24316_v41  ;;  %vm24774_vm8 = vmmov %vm24773_vm0  ;;  %v16168_v59 = vsel %vm24776_vm5, %v19798_v13, %v19788_v1  ;;  %v19816_v12 = vpop.permute.xlu1 %19815  ;;  %v19813_v44 = vunpack.i.h.bf16 %v23930_v62  ;;  %v19812_v2 = vunpack.i.l.bf16 %v23930_v62 }
 0x868   : > { %17392 = vmatmul.mubr.msk.f32.gmra.mrb[66].mxu1 %vm24770_vm1, %v15423_v40  ;;  %vm24775_vm3 = vmmov %vm24773_vm0  ;;  %v19818_v18 = vunpack.i.h.bf16 %v19816_v12  ;;  %v19817_v43 = vunpack.i.l.bf16 %v19816_v12 }
 0x869   : > { %15648 = vmatprep.mubr.f32.mxu1 %v24316_v41  ;;  %vm24777_vm9 = vmmov %vm24776_vm5 }
 0x86a   : > { %17397 = vmatmul.mubr.msk.f32.vlgmr.msra.gmra.mrb[32].mxu0 %vm24771_vm14, %v15422_v6  ;;  %vm24778_vm13 = vmmov %vm24773_vm0  ;;  %v19821_v7 = vpop.permute.xlu0 %19820  ;;  %vm24782_vm14 = vnez %v24661_v0 }
 0x86b   : > { %18281 = vmatpush1.bf16.msk.msra.mxu0 %vm24772_vm12, %v18279_v46  ;;  %15577 = vmatprep.mubr.f32.mxu0 %v24316_v41  ;;  %vm24779_vm11 = vmmov %vm24773_vm0  ;;  %v19823_v39 = vunpack.i.h.bf16 %v19821_v7  ;;  %v19822_v61 = vunpack.i.l.bf16 %v19821_v7 }
 0x86c   : > { %18287 = vmatprep.subr.bf16.mxu0 %v23195_v60  ;;  %17403 = vmatmul.mubr.msk.f32.vlgmr.msra.gmra.mrb[40].mxu1 %vm24773_vm0, %v15422_v6  ;;  %v19787_v60 = vunpack.i.l.bf16 %v23899_v23  ;;  %vm24780_vm10 = vmmov %vm24773_vm0 }
 0x86d   : > { %18285 = vmatpush1.bf16.msra.mxu1 %v23190_v56  ;;  %15654 = vmatprep.mubr.f32.mxu1 %v24316_v41  ;;  %v15755_v56 = vld [vmem:[#allocation9 + $0x70] sm:$0xff]  ;;  %vm24781_vm1 = vmmov %vm24776_vm5 }
 0x86e   : > { %17398 = vmatmul.mubr.msk.f32.gmra.mrb[34].mxu0 %vm24774_vm8, %v15423_v40  ;;  %18291 = vmatprep.subr.bf16.mxu1 %v23331_v17  ;;  %v16160_v52 = vsel %vm24777_vm9, %v19797_v15, %v19787_v60  ;;  %v19793_v17 = vunpack.i.h.bf16 %v23896_v49  ;;  %vm24783_vm12 = vmmov %vm24781_vm1 }
 0x86f   : > { %15725 = vmatprep.mubr.f32.mxu0 %v24316_v41  ;;  %v18294_v3 = vpack.c.bf16 %v16168_v59, %v16160_v52  ;;  %v16162_v26 = vsel %vm24783_vm12, %v19782_v4, %v19783_v20  ;;  %vm24784_vm0 = vmmov %vm24781_vm1 }
 0x870   : > { %17404 = vmatmul.mubr.msk.f32.gmra.mrb[42].mxu1 %vm24775_vm3, %v15423_v40  ;;  %v16170_v16 = vsel %vm24781_vm1, %v19792_v50, %v19793_v17  ;;  %v16167_v32 = vsel %vm24784_vm0, %v19803_v45, %v19798_v13  ;;  %vm24785_vm8 = vmmov %vm24784_vm0 }
 0x871   : > { %15827 = vmatprep.mubr.f32.mxu1 %v24316_v41  ;;  %v18300_v0 = vpack.c.bf16 %v16170_v16, %v16162_v26  ;;  %vm24786_vm5 = vmmov %vm24784_vm0 }
 0x872   : > { %17409 = vmatmul.mubr.msk.f32.vlgmr.msra.gmra.mrb[36].mxu0 %vm24778_vm13, %v15422_v6  ;;  %v16172_v21 = vsel %vm24786_vm5, %v19823_v39, %v19818_v18  ;;  %vm24787_vm9 = vmmov %vm24784_vm0 }
 0x873   : > { %18289 = vmatpush1.bf16.msra.mxu0 %v23199_v38  ;;  %15731 = vmatprep.mubr.f32.mxu0 %v24316_v41  ;;  %v15756_v38 = vld [vmem:[#allocation9 + $0x78] sm:$0xff]  ;;  %v16164_v28 = vsel %vm24787_vm9, %v19822_v61, %v19817_v43  ;;  %vm24788_vm13 = vmmov %vm24775_vm3 }
 0x874   : > { %17474 = vmatprep.subr.mxu0 %v24316_v41  ;;  %17411 = vmatmul.mubr.msk.f32.vlgmr.msra.gmra.mrb[68].mxu1 %vm24779_vm11, %v15755_v56  ;;  %vm24789_vm11 = vmmov %vm24784_vm0  ;;  %v18306_v14 = vpack.c.bf16 %v16172_v21, %v16164_v28 }
 0x875   : > { %18293 = vmatpush1.bf16.msra.mxu1 %v23334_v10  ;;  %15833 = vmatprep.mubr.f32.mxu1 %v24316_v41  ;;  %v16159_v10 = vsel %vm24785_vm8, %v19802_v27, %v19797_v15  ;;  %v16161_v35 = vsel %vm24789_vm11, %v19787_v60, %v19782_v4  ;;  %vm24791_vm1 = vmmov %vm24784_vm0 }
 0x876   : > { %17410 = vmatmul.mubr.msk.f32.gmra.mrb[38].mxu0 %vm24780_vm10, %v15423_v40  ;;  %18296 = vmatprep.subr.msk.bf16.mxu1 %vm24782_vm14, %v18294_v3  ;;  %v18297_v51 = vpack.c.bf16 %v16167_v32, %v16159_v10  ;;  %vm24790_vm10 = vnez %v24678_v24  ;;  %v16169_v63 = vsel %vm24791_vm1, %v19788_v1, %v19792_v50  ;;  %vm24792_vm14 = vmmov %vm24784_vm0 }
 0x877   : > { %15904 = vmatprep.mubr.f32.mxu0 %v24316_v41  ;;  %v16174_v11 = vsel %vm24792_vm14, %v19812_v2, %v19813_v44  ;;  %vm24793_vm12 = vmmov %vm24784_vm0  ;;  %v18303_v24 = vpack.c.bf16 %v16169_v63, %v16161_v35 }
 0x878   : > { %17412 = vmatmul.mubr.msk.f32.gmra.mrb[70].mxu1 %vm24775_vm3, %v15756_v38  ;;  %v16166_v34 = vsel %vm24793_vm12, %v19807_v31, %v19808_v8  ;;  %vm24794_vm0 = vmmov %vm24775_vm3  ;;  %v13350_v57 = vpop.f32.mrb[44].mxu1 }
 0x879   : > { %15981 = vmatprep.mubr.f32.mxu1 %v24316_v41  ;;  %vm24795_vm8 = vmmov %vm24794_vm0  ;;  %v18312_v55 = vpack.c.bf16 %v16174_v11, %v16166_v34  ;;  %v13351_v37 = vadd.f32 %v13350_v57, %v23487_v29  ;;  %v13352_v25 = vpop.f32.mrb[45].mxu1 }
 0x87a   : > { %17413 = vmatmul.mubr.msk.f32.vlgmr.msra.gmra.mrb[32].mxu0 %vm24788_vm13, %v15755_v56  ;;  %vm24796_vm3 = vmmov %vm24794_vm0 }
 0x87b   : > { %17475 = vmatpush3.msra.mxu0 %v24316_v41  ;;  %15910 = vmatprep.mubr.f32.mxu0 %v24316_v41  ;;  %vm24797_vm5 = vmmov %vm24791_vm1 }
 0x87c   : > { %18302 = vmatprep.subr.msk.bf16.mxu0 %vm24790_vm10, %v18300_v0  ;;  %17415 = vmatmul.mubr.msk.f32.vlgmr.msra.gmra.mrb[40].mxu1 %vm24794_vm0, %v15755_v56  ;;  %v16163_v53 = vsel %vm24797_vm5, %v19783_v20, %v19822_v61  ;;  %vm24798_vm9 = vmmov %vm24791_vm1  ;;  %v13356_v40 = vpop.f32.mrb[46].mxu1 }
 0x87d   : > { %18299 = vmatpush1.bf16.msk.msra.mxu1 %vm24738_vm4, %v18297_v51  ;;  %15987 = vmatprep.mubr.f32.mxu1 %v24316_v41  ;;  %v16171_v58 = vsel %vm24798_vm9, %v19793_v17, %v19823_v39  ;;  %vm24799_vm13 = vmmov %vm24791_vm1  ;;  %v13358_v29 = vpop.f32.mrb[47].mxu1 }
 0x87e   : > { %17414 = vmatmul.mubr.msk.f32.gmra.mrb[34].mxu0 %vm24795_vm8, %v15756_v38  ;;  %18308 = vmatprep.subr.msk.bf16.mxu1 %vm23591_vm7, %v18306_v14  ;;  %v16173_v49 = vsel %vm24799_vm13, %v19818_v18, %v19812_v2  ;;  %vm24800_vm11 = vmmov %vm24791_vm1  ;;  %v18309_v6 = vpack.c.bf16 %v16171_v58, %v16163_v53  ;;  %vm24803_vm7 = vnez %v24694_v22  ;;  %v13357_v22 = vadd.f32 %v23474_v19, %v13356_v40 }
 0x87f   : > { %17476 = vmatprep.mubr.msk.f32.mxu0 %vm24796_vm3, %v15755_v56  ;;  %v16165_v23 = vsel %vm24800_vm11, %v19817_v43, %v19807_v31  ;;  %vm24801_vm10 = vmmov %vm24794_vm0 }
 0x880   : > { %17416 = vmatmul.mubr.msk.f32.gmra.mrb[42].mxu1 %vm24801_vm10, %v15756_v38  ;;  %vm24802_vm4 = vmmov %vm24794_vm0  ;;  %v18315_v9 = vpack.c.bf16 %v16173_v49, %v16165_v23 }
 0x881   : > { %16280 = vmatprep.mubr.f32.mxu1 %v24316_v41  ;;  %vm24804_vm1 = vmmov %vm24794_vm0 }
 0x882   : > { %17477 = vmatmul.mubr.msk.f32.vlgmr.msra.gmra.mrb[40].mxu0 %vm24802_vm4, %v15756_v38  ;;  %vm24805_vm14 = vmmov %vm24794_vm0 }
 0x883   : > { %18305 = vmatpush1.bf16.msk.msra.mxu0 %vm24746_vm2, %v18303_v24  ;;  %16357 = vmatprep.mubr.f32.mxu0 %v24316_v41  ;;  %vm24806_vm2 = vmmov %vm24794_vm0 }
 0x884   : > { %18314 = vmatprep.subr.msk.bf16.mxu0 %vm24803_vm7, %v18312_v55  ;;  %17423 = vmatmul.mubr.msk.f32.vlgmr.msra.gmra.mrb[72].mxu1 %vm24804_vm1, %v16208_v30  ;;  %vm24807_vm12 = vmmov %vm24794_vm0 }
 0x885   : > { %18311 = vmatpush1.bf16.msk.msra.mxu1 %vm23600_vm15, %v18309_v6  ;;  %16286 = vmatprep.mubr.f32.mxu1 %v24316_v41  ;;  %vm24808_vm15 = vmmov %vm24794_vm0  ;;  %v16545_v6 = vpop.permute.xlu1 %16544 }
 0x886   : > { %17429 = vmatmul.mubr.msk.f32.vlgmr.msra.gmra.mrb[32].mxu0 %vm24805_vm14, %v16208_v30  ;;  %vm24810_vm8 = vmmov %vm24794_vm0 }
 0x887   : > { %16363 = vmatprep.mubr.f32.mxu0 %v24316_v41  ;;  %18317 = vmatpush1.bf16.msk.msra.mxu0 %vm24759_vm6, %v18315_v9  ;;  %vm24809_vm6 = vmmov %vm24794_vm0 }
 0x888   : > { %17424 = vmatmul.mubr.msk.f32.gmra.mrb[74].mxu1 %vm24806_vm2, %v16209_v48 }
 0x889   : > { %16434 = vmatprep.mubr.f32.mxu1 %v24316_v41 }
 0x88a   : > { %17430 = vmatmul.mubr.msk.f32.gmra.mrb[34].mxu0 %vm24807_vm12, %v16209_v48 }
 0x88b   : > { %16511 = vmatprep.mubr.f32.mxu0 %v24316_v41 }
 0x88c   : > { %17435 = vmatmul.mubr.msk.f32.vlgmr.msra.gmra.mrb[40].mxu1 %vm24808_vm15, %v16208_v30 }
 0x88d   : > { %16440 = vmatprep.mubr.f32.mxu1 %v24316_v41 }
 0x88e   : > { %17441 = vmatmul.mubr.msk.f32.vlgmr.msra.gmra.mrb[42].mxu0 %vm24794_vm0, %v16208_v30 }
 0x88f   : > { %16517 = vmatprep.mubr.f32.mxu0 %v24316_v41 }
 0x890   : > { %17436 = vmatmul.mubr.msk.f32.gmra.mrb[42].mxu1 %vm24809_vm6, %v16209_v48 }
 0x892   : > { %17442 = vmatmul.mubr.msk.f32.gmra.mrb[44].mxu0 %vm24810_vm8, %v16209_v48 }
 0x8f1   : > { %v13804_v19 = vpop.f32.mrb[48].mxu1 }
 0x8f2   : > { %v14046_v47 = vadd.f32 %v13804_v19, %v13351_v37  ;;  %v13806_v33 = vpop.f32.mrb[49].mxu1 }
 0x8f3   : > { %v14047_v5 = vadd.f32 %v13806_v33, %v13352_v25  ;;  %v16550_v33 = vpop.permute.xlu0 %16549 }
 0x8f5   : > { %v13810_v54 = vpop.f32.mrb[50].mxu1 }
 0x8f6   : > { %v14054_v42 = vadd.f32 %v13810_v54, %v13357_v22  ;;  %v13812_v46 = vpop.f32.mrb[51].mxu1 }
 0x8f7   : > { %v14055_v62 = vadd.f32 %v13812_v46, %v13358_v29 }
 0x904   : > { %v14257_v36 = vpop.f32.mrb[52].mxu1 }
 0x905   : > { %v14499_v13 = vadd.f32 %v14257_v36, %v14046_v47  ;;  %v14259_v15 = vpop.f32.mrb[53].mxu1 }
 0x906   : > { %v14500_v1 = vadd.f32 %v14259_v15, %v14047_v5  ;;  %v24811_v5 = vld [vmem:[#allocation23_spill] sm:$0xff] }
 0x909   : > { %v14263_v60 = vpop.f32.mrb[54].mxu1 }
 0x90a   : > { %v14507_v59 = vadd.f32 %v14263_v60, %v14054_v42  ;;  %v14265_v52 = vpop.f32.mrb[55].mxu1 }
 0x90b   : > { %v14508_v41 = vadd.f32 %v14265_v52, %v14055_v62  ;;  %v24812_v62 = vld [vmem:[#allocation20_spill] sm:$0xff]  ;;  %v24814_v52 = vld [vmem:[#allocation21_spill] sm:$0xff] }
 0x916   : > { %v14590_v56 = vpop.f32.mrb[56].mxu1 }
 0x917   : > { %v14832_v17 = vadd.f32 %v14590_v56, %v14499_v13  ;;  %v14592_v50 = vpop.f32.mrb[57].mxu1  ;;  %v24813_v13 = vld [vmem:[#allocation25_spill] sm:$0xff] }
 0x918   : > { %v14833_v7 = vadd.f32 %v14592_v50, %v14500_v1 }
 0x91a   : > { %v14596_v12 = vpop.f32.mrb[58].mxu1 }
 0x91b   : > { %v14840_v20 = vadd.f32 %v14596_v12, %v14507_v59  ;;  %v14598_v4 = vpop.f32.mrb[59].mxu1 }
 0x91c   : > { %v14841_v45 = vadd.f32 %v14598_v4, %v14508_v41 }
 0x926   : > { %v15043_v27 = vpop.f32.mrb[60].mxu1 }
 0x927   : > { %v15285_v3 = vadd.f32 %v15043_v27, %v14832_v17  ;;  %v15045_v39 = vpop.f32.mrb[61].mxu1 }
 0x928   : > { %v15286_v61 = vadd.f32 %v15045_v39, %v14833_v7 }
 0x92a   : > { %v15049_v18 = vpop.f32.mrb[62].mxu1 }
 0x92b   : > { %v15293_v43 = vadd.f32 %v15049_v18, %v14840_v20  ;;  %v15051_v38 = vpop.f32.mrb[63].mxu1  ;;  %v24815_v20 = vld [vmem:[#allocation26_spill] sm:$0xff] }
 0x92c   : > { %v15294_v16 = vadd.f32 %v15051_v38, %v14841_v45 }
 0x937   : > { %v15496_v26 = vpop.f32.mrb[64].mxu1 }
 0x938   : > { %v15738_v8 = vadd.f32 %v15496_v26, %v15285_v3  ;;  %v15498_v31 = vpop.f32.mrb[65].mxu1  ;;  %v24816_v3 = vld [vmem:[#allocation22_spill] sm:$0xff]  ;;  %v24818_v26 = vld [vmem:[#allocation24_spill] sm:$0xff] }
 0x939   : > { %v15739_v32 = vadd.f32 %v15498_v31, %v15286_v61  ;;  %v24817_v61 = vld [vmem:[#allocation28_spill] sm:$0xff] }
 0x93b   : > { %v15502_v10 = vpop.f32.mrb[66].mxu1 }
 0x93c   : > { %v15746_v44 = vadd.f32 %v15502_v10, %v15293_v43  ;;  %v15504_v2 = vpop.f32.mrb[67].mxu1 }
 0x93d   : > { %v15747_v0 = vadd.f32 %v15504_v2, %v15294_v16 }
 0x945   : > { %v15727_v21 = vpop.f32.mrb[36].mxu0 }
 0x946   : > { %v15729_v28 = vpop.f32.mrb[37].mxu0 }
 0x947   : > { %v15829_v35 = vpop.f32.mrb[68].mxu1 }
 0x948   : > { %v16071_v63 = vadd.f32 %v15829_v35, %v15738_v8  ;;  %v15831_v11 = vpop.f32.mrb[69].mxu1  ;;  %v24820_v35 = vld [vmem:[#allocation29_spill] sm:$0xff] }
 0x949   : > { %v15733_v51 = vpop.f32.mrb[38].mxu0  ;;  %v16072_v14 = vadd.f32 %v15831_v11, %v15739_v32 }
 0x94a   : > { %v24022_v34 = vpop.f32.mrb[39].mxu0 }
 0x94b   : > { %v15835_v24 = vpop.f32.mrb[70].mxu1 }
 0x94c   : > { %v16079_v55 = vadd.f32 %v15835_v24, %v15746_v44  ;;  %v15837_v53 = vpop.f32.mrb[71].mxu1  ;;  %v24819_v44 = vld [vmem:[#allocation27_spill] sm:$0xff] }
 0x94d   : > { %v16080_v58 = vadd.f32 %v15837_v53, %v15747_v0  ;;  %v24821_v53 = vld [vmem:[#allocation31_spill] sm:$0xff] }
 0x955   : > { %v17478_v49 = vpop.f32.mrb[40].mxu0 }
 0x956   : > { %v16085_v23 = vadd.f32 %v17478_v49, %v15733_v51  ;;  %v16060_v30 = vpop.f32.mrb[41].mxu0 }
 0x957   : > { %v16077_v57 = vadd.f32 %v16060_v30, %v15727_v21  ;;  %v16282_v9 = vpop.f32.mrb[72].mxu1 }
 0x958   : > { %v16524_v37 = vadd.f32 %v16282_v9, %v16071_v63  ;;  %v16284_v48 = vpop.f32.mrb[73].mxu1 }
 0x959   : > { %v16359_v25 = vpop.f32.mrb[32].mxu0  ;;  %v16525_v22 = vadd.f32 %v16284_v48, %v16072_v14 }
 0x95a   : > { %v16554_v40 = vadd.f32 %v16545_v6, %v16359_v25  ;;  %v16361_v29 = vpop.f32.mrb[33].mxu0  ;;  %v16552_v19 = vadd.f32 %v16545_v6, %v16524_v37  ;;  %v24823_v37 = vld [vmem:[#allocation30_spill] sm:$0xff] }
 0x95b   : > { %v16555_v47 = vadd.f32 %v16545_v6, %v16361_v29  ;;  %v16553_v42 = vadd.f32 %v16545_v6, %v16525_v22  ;;  %v16288_v46 = vpop.f32.mrb[74].mxu1  ;;  %v24825_v29 = vld [vmem:[#allocation34_spill] sm:$0xff] }
 0x95c   : > { %v16586_v54 = vadd.f32 %v24811_v5, %v16554_v40  ;;  %v16584_v36 = vadd.f32 %v24812_v62, %v16552_v19  ;;  %v16532_v1 = vadd.f32 %v16288_v46, %v16079_v55  ;;  %v16290_v59 = vpop.f32.mrb[75].mxu1  ;;  %v24824_v40 = vld [vmem:[#allocation32_spill] sm:$0xff] }
 0x95d   : > { %v16587_v15 = vadd.f32 %v24813_v13, %v16555_v47  ;;  %v16365_v60 = vpop.f32.mrb[34].mxu0  ;;  %v16585_v41 = vadd.f32 %v24814_v52, %v16553_v42  ;;  %v16533_v17 = vadd.f32 %v16290_v59, %v16080_v58 }
 0x95e   : > { %16602 = vst [vmem:[%s24028_s24 + $0x10] sm:$0xff] %v16586_v54  ;;  %v16562_v56 = vadd.f32 %v16550_v33, %v16365_v60  ;;  %v16367_v50 = vpop.f32.mrb[35].mxu0  ;;  %16600 = vst [vmem:[%s24028_s24] sm:$0xff] %v16584_v36  ;;  %v16560_v7 = vadd.f32 %v16550_v33, %v16532_v1 }
 0x95f   : > { %16603 = vst [vmem:[%s24028_s24 + $0x18] sm:$0xff] %v16587_v15  ;;  %v16563_v12 = vadd.f32 %v16550_v33, %v16367_v50  ;;  %16601 = vst [vmem:[%s24028_s24 + $0x8] sm:$0xff] %v16585_v41  ;;  %v16561_v45 = vadd.f32 %v16550_v33, %v16533_v17  ;;  %v16436_v27 = vpop.f32.mrb[40].mxu1 }
 0x960   : > { %v16594_v4 = vadd.f32 %v24815_v20, %v16562_v56  ;;  %v16592_v39 = vadd.f32 %v24816_v3, %v16560_v7  ;;  %v16556_v43 = vadd.f32 %v16545_v6, %v16436_v27  ;;  %v16438_v16 = vpop.f32.mrb[41].mxu1 }
 0x961   : > { %v16595_v18 = vadd.f32 %v24817_v61, %v16563_v12  ;;  %v16513_v38 = vpop.f32.mrb[42].mxu0  ;;  %v16593_v8 = vadd.f32 %v24818_v26, %v16561_v45  ;;  %v16557_v32 = vadd.f32 %v16545_v6, %v16438_v16 }
 0x962   : > { %16610 = vst [vmem:[%s24028_s24 + $0x50] sm:$0xff] %v16594_v4  ;;  %v16530_v31 = vadd.f32 %v16513_v38, %v16077_v57  ;;  %v16515_v10 = vpop.f32.mrb[43].mxu0  ;;  %16608 = vst [vmem:[%s24028_s24 + $0x40] sm:$0xff] %v16592_v39  ;;  %v16588_v2 = vadd.f32 %v24819_v44, %v16556_v43  ;;  %v24822_v57 = vld [vmem:[#allocation33_spill] sm:$0xff] }
 0x963   : > { %16611 = vst [vmem:[%s24028_s24 + $0x58] sm:$0xff] %v16595_v18  ;;  %v16531_v0 = vadd.f32 %v16515_v10, %v15729_v28  ;;  %16609 = vst [vmem:[%s24028_s24 + $0x48] sm:$0xff] %v16593_v8  ;;  %v16589_v51 = vadd.f32 %v24820_v35, %v16557_v32  ;;  %v16442_v63 = vpop.f32.mrb[42].mxu1 }
 0x964   : > { %v16558_v21 = vadd.f32 %v16545_v6, %v16530_v31  ;;  %16604 = vst [vmem:[%s24028_s24 + $0x20] sm:$0xff] %v16588_v2  ;;  %v16564_v14 = vadd.f32 %v16550_v33, %v16442_v63  ;;  %v16444_v55 = vpop.f32.mrb[43].mxu1 }
 0x965   : > { %v16559_v11 = vadd.f32 %v16545_v6, %v16531_v0  ;;  %v16519_v24 = vpop.f32.mrb[44].mxu0  ;;  %16605 = vst [vmem:[%s24028_s24 + $0x28] sm:$0xff] %v16589_v51  ;;  %v16565_v49 = vadd.f32 %v16550_v33, %v16444_v55 }
 0x966   : > { %v16590_v58 = vadd.f32 %v24821_v53, %v16558_v21  ;;  %v16538_v28 = vadd.f32 %v16519_v24, %v16085_v23  ;;  %v16521_v30 = vpop.f32.mrb[45].mxu0  ;;  %v16596_v25 = vadd.f32 %v24823_v37, %v16564_v14 }
 0x967   : > { %v16591_v9 = vadd.f32 %v24822_v57, %v16559_v11  ;;  %v16539_v6 = vadd.f32 %v16521_v30, %v24022_v34  ;;  %v16597_v22 = vadd.f32 %v24824_v40, %v16565_v49  ;;  %v24827_v34 = vld [vmem:[#allocation35_spill] sm:$0xff] }
 0x968   : > { %16606 = vst [vmem:[%s24028_s24 + $0x30] sm:$0xff] %v16590_v58  ;;  %v16566_v48 = vadd.f32 %v16550_v33, %v16538_v28  ;;  %16612 = vst [vmem:[%s24028_s24 + $0x60] sm:$0xff] %v16596_v25 }
 0x969   : > { %16607 = vst [vmem:[%s24028_s24 + $0x38] sm:$0xff] %v16591_v9  ;;  %v16567_v23 = vadd.f32 %v16550_v33, %v16539_v6  ;;  %16613 = vst [vmem:[%s24028_s24 + $0x68] sm:$0xff] %v16597_v22 }
 0x96a   : > { %v16598_v19 = vadd.f32 %v24825_v29, %v16566_v48 }
 0x96b   : > { %v16599_v47 = vadd.f32 %v24827_v34, %v16567_v23 }
 0x96c   : > { %16614 = vst [vmem:[%s24028_s24 + $0x70] sm:$0xff] %v16598_v19 }
 0x96d   : > { %16615 = vst [vmem:[%s24028_s24 + $0x78] sm:$0xff] %v16599_v47 }
 0x96e   : > { %19923 = shalt.err (!%p19920_p13)
}
 0x96f   : > { %s19924_s24 = scalar_lea.hbm %s24062_s25, 2048  ;;  %s19928_s19 = scalar_lea.hbm %s24826_s22, 4096 }
 0x970   : > { %p19925_p6 = scmp.ne.s32.totalorder %s24062_s25, %s19924_s24  ;;  %p19929_p7 = scmp.lt.u32.totalorder %s24062_s25, %s24826_s22 }
 0x971   : > { %p19930_p8 = scmp.lt.u32.totalorder %s19928_s19, %s19924_s24  ;;  %p19932_p0 = scmp.lt.u32.totalorder %s19924_s24, %s24062_s25 }
 0x972   : > { %p19926_p10 = pnand %p19925_p6, %p24828_p1 }
 0x973   : > { %p19931_p11 = por %p19930_p8, %p19929_p7 }
 0x974   : > { %p19927_p4 = pneg %p19926_p10 }
 0x975   : > { %p19933_p3 = por %p19932_p0, %p19931_p11 }
 0x977   : > { %p19934_p5 = pnand %p19933_p3, %p19927_p4 }
 0x979   : > { %19937 = shalt.err (!%p19934_p5)
}
 0x97a   : > { %s20010_s11 = smov 1024   ;;  %s24829_s21 = smov 64  }
 0x97b   : > { %s24830_s1 = scalar_lea.sflag [#allocation6], %s20255_s27 }
 0x97c   : > { %18840 = dma.vmem_to_hbm [thread:$0]  (%p24828_p1), %s24065_s10, 2048, %s24062_s25, %s24830_s1, %s20010_s11, %s20010_s11, %s24829_s21  }
 0x97d PF: > { %s24831_s14 = sld [smem:[#allocation14_spill]]  ;;  %s24832_s20 = sld [smem:[#allocation15_spill]] }
 0x97e   : > { %p24834_p12 = scmp.ge.s32.totalorder %s19980_s16, 2 }
 0x983   : > { %s16645_s17 = sand.u32 1, %s24831_s14   ;;  %p24833_p9 = scmp.ne.s32.totalorder %s24832_s20, 0 }
 0x984   : > { %s16646_s24 = scalar_lea.sflag [#allocation6], %s16645_s17 }
 0x985   : > { %p18854_p2 = pnand %p24834_p12, %p24833_p9 }
 0x987   : > { %19963 = dma.done.wait (!%p18854_p2), %s16646_s24, 2048  }
 0x988   : > { %19965 = vsyncadd (!%p18854_p2), %s16646_s24, 4294965248  ;;  %s24835_s18 = smov %s20196_s29  ;;  %p28_p13 = scmp.ge.s32.totalorder %s20196_s29, 4  }
 0x989   : > { %s24836_s29 = smov %s19972_s30  ;;  %s24837_s30 = smov %s19976_s15 }
 0x98a   : > { %s24838_s15 = smov %s20205_s28  ;;  %s24839_s16 = smov %s24835_s18 }
 0x98b   :  { %30 = sbr.rel (!%p28_p13) target bundleno = 13 (0xd), region = 167 }
 0x992   :  { %16651 = vsyncpa [#allocation5], 1 }
 0x993   :  { %16653 = vsyncpa [#allocation5 + $0x1], 1 }
 0x994   :  { %16654 = vsyncpa [#allocation8], 1 }
 0x995   :  { %16655 = vsyncpa [#allocation6], 1 }
 0x996   :  { %16657 = vsyncpa [#allocation6 + $0x1], 1 }

</bundles_post_ra>
